<compile_context>
chip_gen: v7x
topology: tpu7x:2x2x1
jax: 0.10.0
libtpu: 0.0.40
codegen_flags: <defaults>
</compile_context>

<pallas_src>
import functools
import math

import jax
import jax.numpy as jnp
from jax.experimental import pallas as pl
from jax.experimental.pallas import tpu as pltpu

CONFIG = [[128, 32, 7, 1, 1, 1],
          [32, 64, 7, 2, 4, 2],
          [64, 128, 11, 2, 4, 2],
          [128, 192, 11, 1, 4, 1]]

LANE = 128      # output channels padded to a multiple of the TPU lane width
SUBLANE = 8
TL_MAX = 256    # max output rows per tile
TN_MAX = 256    # max output channels per tile


def _round_up(v, m):
    return ((v + m - 1) // m) * m


def _pick_tn(npad):
    """Largest channel tile <= TN_MAX that divides npad (npad % 128 == 0)."""
    if npad <= TN_MAX:
        return npad
    for cand in (256, 128):
        if cand <= TN_MAX and npad % cand == 0:
            return cand
    return LANE


# --------------------------------------------------------------------------
# Fused conv1d (+ folded-BN shift + SiLU + residual + ECA pooling) kernel
# --------------------------------------------------------------------------
def _conv_mm_kernel(*refs, taps, stride, tl, act, has_res, emit_colsum,
                    nM, L_valid, need_mask):
    """One (tl x tn) output tile of a 1-D convolution.

    refs (in order):
      xw_ref   : (1, stride, W, Cin)  bf16  haloed, stride-phase-split window
      w_ref    : (taps, Cin, tn)      bf16  weights (BN scale pre-folded)
      shift_ref: (1, tn)              f32   folded conv-bias / BN shift
      [res_ref]: (1, tl, tn)                fused residual (if has_res)
      o_ref    : (1, tl, tn)                output tile
      [csum_ref]: (1, 1, tn)          f32   per-channel column sums (ECA pool)
    """
    xw_ref, w_ref, shift_ref = refs[0], refs[1], refs[2]
    pos = 3
    res_ref = refs[pos] if has_res else None
    pos += int(has_res)
    o_ref = refs[pos]
    pos += 1
    csum_ref = refs[pos] if emit_colsum else None

    tn = o_ref.shape[-1]

    # Load each stride-phase once; all taps reuse them via static slices.
    phases = [xw_ref[0, p] for p in range(stride)]           # each (W, Cin) bf16

    acc = jnp.zeros((tl, tn), jnp.float32)
    for t in range(taps):                                    # unrolled, taps <= 11
        p, q = t % stride, t // stride
        acc = acc + jnp.dot(phases[p][q:q + tl, :], w_ref[t],
                            preferred_element_type=jnp.float32)

    y = acc + shift_ref[...]                                 # f32 epilogue
    if act == "silu":
        y = y * jax.nn.sigmoid(y)
    if has_res:
        y = y + res_ref[0].astype(jnp.float32)               # fused residual add
    o_ref[0] = y.astype(o_ref.dtype)

    if emit_colsum:
        # ECA adaptive-avg-pool numerator: sum over valid L rows, per channel.
        yv = y
        if need_mask:
            row0 = (pl.program_id(0) % nM) * tl
            rows = row0 + jax.lax.broadcasted_iota(jnp.int32, (tl, 1), 0)
            yv = jnp.where(rows < L_valid, yv, 0.0)
        csum_ref[0] = jnp.sum(yv, axis=0, keepdims=True)


def conv1d_block(x, w_oik, shift, *, stride, pad, act,
                 gate=None, residual=None, out_dtype=jnp.bfloat16,
                 emit_colsum=False):
    """Fused Conv1d + shift (+SiLU) (+per-batch gate) (+residual) (+ECA pool).

    x        : (B, L, Cx) channels-last activations; Cx may exceed the weight's
               Cin (zero lane padding carried between layers).
    w_oik    : (Cout, Cin, K) torch-layout weights (BN scale already folded in).
    shift    : (Cout,) folded bias / BN shift.
    gate     : optional (B,) ECA gate, folded into the conv input windows.
    residual : optional (B, L_out, Npad) tensor fused into the epilogue.
    Returns (B, L_out, Npad) [, (B, Npad) column sums if emit_colsum];
    Npad = round_up(Cout, 128); lanes >= Cout are 0.
    """
    B, L, Cx = x.shape
    Cout, Cin, Kt = w_oik.shape
    if Cx > Cin:                       # input lanes zero-padded by previous layer
        w_oik = jnp.pad(w_oik, ((0, 0), (0, Cx - Cin), (0, 0)))
        Cin = Cx

    L_out = (L + 2 * pad - Kt) // stride + 1
    Npad = _round_up(Cout, LANE)
    tn = _pick_tn(Npad)
    nN = Npad // tn
    tl = min(TL_MAX, _round_up(L_out, SUBLANE))
    nM = pl.cdiv(L_out, tl)
    Lp = nM * tl

    halo = (Kt - 1) // stride
    W = tl + halo                      # window rows per tile (per phase)
    Lreq = Lp + halo                   # rows needed per phase
    rpad = stride * Lreq - (L + 2 * pad)
    assert rpad >= 0

    if Kt == 1 and stride == 1 and pad == 0:
        # 1x1 conv fast path: no halo / phase split — a free row-major reshape.
        xp = x if Lp == L else jnp.pad(x, ((0, 0), (0, Lp - L), (0, 0)))
        if gate is not None:
            xp = xp * gate.astype(jnp.float32)[:, None, None]
        win = xp.reshape(B * nM, 1, W, Cin).astype(jnp.bfloat16)
    else:
        # Phase split (stride de-interleave) + halo windows:
        #   x_pad[s*l + t] == phases[t % s, l + t // s]
        xp = jnp.pad(x, ((0, 0), (pad, pad + rpad), (0, 0)))
        phases = xp.reshape(B, Lreq, stride, Cin).transpose(0, 2, 1, 3)  # (B,s,Lreq,Cin)
        if nM == 1:
            win = phases[:, None, :, :W, :]
        else:
            win = jnp.stack([phases[:, :, i * tl:i * tl + W, :] for i in range(nM)],
                            axis=1)                                      # (B,nM,s,W,Cin)
        if gate is not None:
            # ECA fold: conv(g*y) == g*conv(y); fuses into the same XLA
            # gather/cast pass — no extra HBM round trip, bias stays un-gated.
            win = win * gate.astype(jnp.float32)[:, None, None, None, None]
        win = win.reshape(B * nM, stride, W, Cin).astype(jnp.bfloat16)

    w_mat = jnp.transpose(w_oik, (2, 1, 0))                              # (K,Cin,Cout)
    w_mat = jnp.pad(w_mat, ((0, 0), (0, 0), (0, Npad - Cout))).astype(jnp.bfloat16)
    shift_row = jnp.pad(shift.astype(jnp.float32), (0, Npad - Cout)).reshape(1, Npad)

    has_res = residual is not None
    inputs = [win, w_mat, shift_row]
    in_specs = [
        pl.BlockSpec((1, stride, W, Cin), lambda m, j: (m, 0, 0, 0)),
        pl.BlockSpec((Kt, Cin, tn), lambda m, j: (0, 0, j)),
        pl.BlockSpec((1, tn), lambda m, j: (0, j)),
    ]
    if has_res:
        assert residual.shape == (B, L_out, Npad)
        res = residual if Lp == L_out else jnp.pad(
            residual, ((0, 0), (0, Lp - L_out), (0, 0)))
        inputs.append(res.reshape(B * nM, tl, Npad))
        in_specs.append(pl.BlockSpec((1, tl, tn), lambda m, j: (m, 0, j)))

    out_shape = jax.ShapeDtypeStruct((B * nM, tl, Npad), out_dtype)
    out_specs = pl.BlockSpec((1, tl, tn), lambda m, j: (m, 0, j))
    if emit_colsum:
        out_shape = (out_shape,
                     jax.ShapeDtypeStruct((B * nM, 1, Npad), jnp.float32))
        out_specs = (out_specs, pl.BlockSpec((1, 1, tn), lambda m, j: (m, 0, j)))

    kern = functools.partial(
        _conv_mm_kernel, taps=Kt, stride=stride, tl=tl, act=act,
        has_res=has_res, emit_colsum=emit_colsum, nM=nM, L_valid=L_out,
        need_mask=(Lp != L_out))

    result = pl.pallas_call(
        kern,
        out_shape=out_shape,
        grid=(B * nM, nN),
        in_specs=in_specs,
        out_specs=out_specs,
        compiler_params=pltpu.CompilerParams(
            dimension_semantics=("parallel", "parallel"),
            vmem_limit_bytes=32 * 1024 * 1024),
    )(*inputs)

    if emit_colsum:
        out, csum = result
        out = out.reshape(B, Lp, Npad)[:, :L_out, :]
        csum = csum.reshape(B, nM, Npad).sum(axis=1)          # (B, Npad) f32
        return out, csum
    return result.reshape(B, Lp, Npad)[:, :L_out, :]


# --------------------------------------------------------------------------
# Parameters (deterministic synthetic init) and BN folding
# --------------------------------------------------------------------------
def _fold_bn(w, b, bn):
    """Fold eval-mode BatchNorm into the conv weight columns + an additive shift."""
    s = bn["gamma"] / jnp.sqrt(bn["var"] + bn["eps"])
    return w * s[:, None, None], (b - bn["mean"]) * s + bn["beta"]


def block_configs():
    cfgs = []
    for in_c, out_c, k, s, r, reps in CONFIG:
        cfgs.append((in_c, out_c, r, k, s))
        for _ in range(reps - 1):
            cfgs.append((out_c, out_c, r, k, 1))
    return cfgs


def _conv_init(key, cout, cin, k):
    std = 1.0 / math.sqrt(cin * k)
    kw, kb = jax.random.split(key)
    w = jax.random.normal(kw, (cout, cin, k), jnp.float32) * std
    b = jax.random.normal(kb, (cout,), jnp.float32) * std
    return w, b


def _bn_init(c):
    return dict(gamma=jnp.ones((c,), jnp.float32),
                beta=jnp.zeros((c,), jnp.float32),
                mean=jnp.zeros((c,), jnp.float32),
                var=jnp.ones((c,), jnp.float32),
                eps=1e-5)


def init_params(key, input_size, hidden_dim):
    cfgs = block_configs()
    keys = jax.random.split(key, 2 + 3 * len(cfgs))
    ki = iter(keys)

    params = {}
    w, b = _conv_init(next(ki), CONFIG[0][0], input_size, 5)
    params["conv1"] = dict(w=w, b=b)

    blocks = []
    for in_c, out_c, ratio, k, s in cfgs:
        hidden = int(in_c * ratio)
        ew, eb = _conv_init(next(ki), hidden, in_c, 1)
        eca_w = jax.random.normal(next(ki), (1, hidden, 3), jnp.float32) / math.sqrt(hidden * 3)
        pw, pb = _conv_init(next(ki), out_c, hidden, k)
        blocks.append(dict(
            expand_w=ew, expand_b=eb, bn1=_bn_init(hidden),
            eca_w_mid=eca_w[0, :, 1],   # only the middle tap touches the length-1 pooled input
            proj_w=pw, proj_b=pb, bn2=_bn_init(out_c),
        ))
    params["blocks"] = blocks

    w, b = _conv_init(next(ki), hidden_dim, CONFIG[-1][1], 1)
    params["conv_out"] = dict(w=w, b=b)
    return params


# --------------------------------------------------------------------------
# Forward pass
# --------------------------------------------------------------------------
def efficientnet1d_forward(x, params):
    # x: (B, L, input_size) channels-last (== torch input before its permute)
    hidden_dim = params["conv_out"]["w"].shape[0]

    x = conv1d_block(x, params["conv1"]["w"], params["conv1"]["b"],
                     stride=1, pad=2, act="silu")
    for (in_c, out_c, ratio, k, s), bp in zip(block_configs(), params["blocks"]):
        # 1x1 expand conv + BN + SiLU (BN scale folded into the weights);
        # its kernel also emits the per-channel column sums for the ECA pool,
        # so the expanded tensor is read from HBM exactly once.
        ew, eshift = _fold_bn(bp["expand_w"], bp["expand_b"], bp["bn1"])
        y, ysum = conv1d_block(x, ew, eshift, stride=1, pad=0, act="silu",
                               emit_colsum=True)

        # ECA: adaptive avg-pool over L, Conv1d(hidden, 1, 3) on the length-1
        # pooled signal (only its middle tap contributes), sigmoid -> one
        # scalar per batch, folded into the projection conv's input scale.
        w_mid = bp["eca_w_mid"]
        w_mid = jnp.pad(w_mid, (0, ysum.shape[-1] - w_mid.shape[0]))
        gate = jax.nn.sigmoid((ysum @ w_mid) / y.shape[1])

        # Projection conv + BN (+ fused ECA gate and residual add).
        pw, pshift = _fold_bn(bp["proj_w"], bp["proj_b"], bp["bn2"])
        res = x if in_c == out_c else None
        x = conv1d_block(y, pw, pshift, stride=s, pad=k // 2, act="none",
                         gate=gate, residual=res)
        # nn.Dropout inside the projection: identity in inference mode.

    x = conv1d_block(x, params["conv_out"]["w"], params["conv_out"]["b"],
                     stride=1, pad=0, act="silu", out_dtype=jnp.float32)
    # final nn.Dropout: identity in inference mode.
    return x[..., :hidden_dim]   # drop lane padding -> (B, L_out, hidden_dim)


# --------------------------------------------------------------------------
if __name__ == "__main__":
    B, L, input_size, hidden_dim = 2, 16, 8, 32
    key = jax.random.PRNGKey(0)
    kx, kp = jax.random.split(key)
    x = jax.random.normal(kx, (B, L, input_size), jnp.float32)
    params = init_params(kp, input_size, hidden_dim)

    fwd = jax.jit(efficientnet1d_forward)
    out = jax.block_until_ready(fwd(x, params))

    # two stride-2 projection convs: L 16 -> 8 -> 4
    assert out.shape == (B, 4, hidden_dim), out.shape
    assert out.dtype == jnp.float32
    assert bool(jnp.all(jnp.isfinite(out)))
    print("KERNEL_OK")
</pallas_src>

<mosaic_0001>
module attributes {stable_mosaic.version = 11 : i64} {
  func.func @_conv_mm_kernel(%arg0: i32, %arg1: i32, %arg2: memref<1x1x16x128xbf16, #tpu.memory_space<vmem>>, %arg3: memref<1x128x128xbf16, #tpu.memory_space<vmem>>, %arg4: memref<1x128xf32, #tpu.memory_space<vmem>>, %arg5: memref<1x16x128xbf16, #tpu.memory_space<vmem>>, %arg6: memref<1x1x128xf32, #tpu.memory_space<vmem>>) attributes {dimension_semantics = [#tpu.dimension_semantics<parallel>, #tpu.dimension_semantics<parallel>], iteration_bounds = array<i64: 2, 1>, scalar_prefetch = 0 : i64, scratch_operands = 0 : i64, tpu.core_type = #tpu.core_type<tc>, window_params = [{transform_indices = @transform_0, window_bounds = array<i64: 1, 1, 16, 128>}, {transform_indices = @transform_1, window_bounds = array<i64: 1, 128, 128>}, {transform_indices = @transform_2, window_bounds = array<i64: 1, 128>}, {transform_indices = @transform_3, window_bounds = array<i64: 1, 16, 128>}, {transform_indices = @transform_4, window_bounds = array<i64: 1, 1, 128>}]} {
    %c0 = arith.constant 0 : index
    %c0_0 = arith.constant 0 : index
    %c0_1 = arith.constant 0 : index
    %c0_2 = arith.constant 0 : index
    %0 = vector.load %arg2[%c0, %c0_0, %c0_1, %c0_2] : memref<1x1x16x128xbf16, #tpu.memory_space<vmem>>, vector<1x1x16x128xbf16>
    %1 = vector.shape_cast %0 : vector<1x1x16x128xbf16> to vector<16x128xbf16>
    %cst = arith.constant 0.000000e+00 : f32
    %2 = vector.broadcast %cst : f32 to vector<16x128xf32>
    %c0_3 = arith.constant 0 : index
    %c0_4 = arith.constant 0 : index
    %c0_5 = arith.constant 0 : index
    %3 = vector.load %arg3[%c0_3, %c0_4, %c0_5] : memref<1x128x128xbf16, #tpu.memory_space<vmem>>, vector<1x128x128xbf16>
    %4 = vector.shape_cast %3 : vector<1x128x128xbf16> to vector<128x128xbf16>
    %cst_6 = arith.constant dense<0.000000e+00> : vector<16x128xf32>
    %5 = tpu.matmul %1, %4, %cst_6 {dimension_numbers = #tpu.dot_dimension_numbers<[1], [0], [0], [1], [0, 0, 1, 1], [], []>} : vector<16x128xbf16>, vector<128x128xbf16>, vector<16x128xf32> -> vector<16x128xf32>
    %6 = arith.addf %2, %5 : vector<16x128xf32>
    %c0_7 = arith.constant 0 : index
    %c0_8 = arith.constant 0 : index
    %7 = vector.load %arg4[%c0_7, %c0_8] : memref<1x128xf32, #tpu.memory_space<vmem>>, vector<1x128xf32>
    %8 = vector.broadcast %7 : vector<1x128xf32> to vector<16x128xf32>
    %9 = arith.addf %6, %8 : vector<16x128xf32>
    %10 = arith.negf %9 : vector<16x128xf32>
    %11 = math.exp %10 : vector<16x128xf32>
    %cst_9 = arith.constant 1.000000e+00 : f32
    %12 = vector.broadcast %cst_9 : f32 to vector<16x128xf32>
    %13 = arith.addf %12, %11 : vector<16x128xf32>
    %14 = arith.divf %12, %13 : vector<16x128xf32>
    %15 = arith.mulf %9, %14 : vector<16x128xf32>
    %16 = arith.truncf %15 : vector<16x128xf32> to vector<16x128xbf16>
    %c0_10 = arith.constant 0 : index
    %c0_11 = arith.constant 0 : index
    %c0_12 = arith.constant 0 : index
    %17 = vector.load %arg5[%c0_10, %c0_11, %c0_12] : memref<1x16x128xbf16, #tpu.memory_space<vmem>>, vector<1x16x128xbf16>
    %18 = vector.shape_cast %17 : vector<1x16x128xbf16> to vector<16x128xbf16>
    %19 = vector.shape_cast %16 : vector<16x128xbf16> to vector<1x16x128xbf16>
    tpu.vector_store %arg5[%c0_10, %c0_11, %c0_12], %19 {strides = array<i32>} : memref<1x16x128xbf16, #tpu.memory_space<vmem>>, vector<1x16x128xbf16>,
    %cst_13 = arith.constant dense<0.000000e+00> : vector<128xf32>
    %20 = vector.multi_reduction <add>, %15, %cst_13 [0] : vector<16x128xf32> to vector<128xf32>
    %21 = vector.shape_cast %20 : vector<128xf32> to vector<1x128xf32>
    %c0_14 = arith.constant 0 : index
    %c0_15 = arith.constant 0 : index
    %c0_16 = arith.constant 0 : index
    %22 = vector.load %arg6[%c0_14, %c0_15, %c0_16] : memref<1x1x128xf32, #tpu.memory_space<vmem>>, vector<1x1x128xf32>
    %23 = vector.shape_cast %22 : vector<1x1x128xf32> to vector<1x128xf32>
    %24 = vector.shape_cast %21 : vector<1x128xf32> to vector<1x1x128xf32>
    tpu.vector_store %arg6[%c0_14, %c0_15, %c0_16], %24 {strides = array<i32>} : memref<1x1x128xf32, #tpu.memory_space<vmem>>, vector<1x1x128xf32>,
    return
  }
  func.func @transform_0(%arg0: i32, %arg1: i32) -> (i32, i32, i32, i32) {
    %c0_i32 = arith.constant 0 : i32
    %c0_i32_0 = arith.constant 0 : i32
    %c0_i32_1 = arith.constant 0 : i32
    %c0_i32_2 = arith.constant 0 : i32
    return %arg0, %c0_i32, %c0_i32_0, %c0_i32_1 : i32, i32, i32, i32
  }
  func.func @transform_1(%arg0: i32, %arg1: i32) -> (i32, i32, i32) {
    %c0_i32 = arith.constant 0 : i32
    %c0_i32_0 = arith.constant 0 : i32
    %c0_i32_1 = arith.constant 0 : i32
    return %c0_i32, %c0_i32_0, %arg1 : i32, i32, i32
  }
  func.func @transform_2(%arg0: i32, %arg1: i32) -> (i32, i32) {
    %c0_i32 = arith.constant 0 : i32
    %c0_i32_0 = arith.constant 0 : i32
    return %c0_i32, %arg1 : i32, i32
  }
  func.func @transform_3(%arg0: i32, %arg1: i32) -> (i32, i32, i32) {
    %c0_i32 = arith.constant 0 : i32
    %c0_i32_0 = arith.constant 0 : i32
    return %arg0, %c0_i32, %arg1 : i32, i32, i32
  }
  func.func @transform_4(%arg0: i32, %arg1: i32) -> (i32, i32, i32) {
    %c0_i32 = arith.constant 0 : i32
    %c0_i32_0 = arith.constant 0 : i32
    return %arg0, %c0_i32, %arg1 : i32, i32, i32
  }
}

module attributes {stable_mosaic.version = 11 : i64} {
  func.func @_conv_mm_kernel(%arg0: i32, %arg1: i32, %arg2: memref<1x1x20x8xbf16, #tpu.memory_space<vmem>>, %arg3: memref<5x8x128xbf16, #tpu.memory_space<vmem>>, %arg4: memref<1x128xf32, #tpu.memory_space<vmem>>, %arg5: memref<1x16x128xbf16, #tpu.memory_space<vmem>>) attributes {dimension_semantics = [#tpu.dimension_semantics<parallel>, #tpu.dimension_semantics<parallel>], iteration_bounds = array<i64: 2, 1>, scalar_prefetch = 0 : i64, scratch_operands = 0 : i64, tpu.core_type = #tpu.core_type<tc>, window_params = [{transform_indices = @transform_0, window_bounds = array<i64: 1, 1, 20, 8>}, {transform_indices = @transform_1, window_bounds = array<i64: 5, 8, 128>}, {transform_indices = @transform_2, window_bounds = array<i64: 1, 128>}, {transform_indices = @transform_3, window_bounds = array<i64: 1, 16, 128>}]} {
    %c0 = arith.constant 0 : index
    %c0_0 = arith.constant 0 : index
    %c0_1 = arith.constant 0 : index
    %c0_2 = arith.constant 0 : index
    %0 = vector.load %arg2[%c0, %c0_0, %c0_1, %c0_2] : memref<1x1x20x8xbf16, #tpu.memory_space<vmem>>, vector<1x1x20x8xbf16>
    %1 = vector.shape_cast %0 : vector<1x1x20x8xbf16> to vector<20x8xbf16>
    %cst = arith.constant 0.000000e+00 : f32
    %2 = vector.broadcast %cst : f32 to vector<16x128xf32>
    %3 = vector.extract_strided_slice %1 {offsets = [0, 0], sizes = [16, 8], strides = [1, 1]} : vector<20x8xbf16> to vector<16x8xbf16>
    %c0_3 = arith.constant 0 : index
    %c0_4 = arith.constant 0 : index
    %c0_5 = arith.constant 0 : index
    %4 = vector.load %arg3[%c0_3, %c0_4, %c0_5] : memref<5x8x128xbf16, #tpu.memory_space<vmem>>, vector<1x8x128xbf16>
    %5 = vector.shape_cast %4 : vector<1x8x128xbf16> to vector<8x128xbf16>
    %cst_6 = arith.constant dense<0.000000e+00> : vector<16x128xf32>
    %6 = tpu.matmul %3, %5, %cst_6 {dimension_numbers = #tpu.dot_dimension_numbers<[1], [0], [0], [1], [0, 0, 1, 1], [], []>} : vector<16x8xbf16>, vector<8x128xbf16>, vector<16x128xf32> -> vector<16x128xf32>
    %7 = arith.addf %2, %6 : vector<16x128xf32>
    %8 = vector.extract_strided_slice %1 {offsets = [1, 0], sizes = [16, 8], strides = [1, 1]} : vector<20x8xbf16> to vector<16x8xbf16>
    %c1 = arith.constant 1 : index
    %c0_7 = arith.constant 0 : index
    %c0_8 = arith.constant 0 : index
    %9 = vector.load %arg3[%c1, %c0_7, %c0_8] : memref<5x8x128xbf16, #tpu.memory_space<vmem>>, vector<1x8x128xbf16>
    %10 = vector.shape_cast %9 : vector<1x8x128xbf16> to vector<8x128xbf16>
    %cst_9 = arith.constant dense<0.000000e+00> : vector<16x128xf32>
    %11 = tpu.matmul %8, %10, %cst_9 {dimension_numbers = #tpu.dot_dimension_numbers<[1], [0], [0], [1], [0, 0, 1, 1], [], []>} : vector<16x8xbf16>, vector<8x128xbf16>, vector<16x128xf32> -> vector<16x128xf32>
    %12 = arith.addf %7, %11 : vector<16x128xf32>
    %13 = vector.extract_strided_slice %1 {offsets = [2, 0], sizes = [16, 8], strides = [1, 1]} : vector<20x8xbf16> to vector<16x8xbf16>
    %c2 = arith.constant 2 : index
    %c0_10 = arith.constant 0 : index
    %c0_11 = arith.constant 0 : index
    %14 = vector.load %arg3[%c2, %c0_10, %c0_11] : memref<5x8x128xbf16, #tpu.memory_space<vmem>>, vector<1x8x128xbf16>
    %15 = vector.shape_cast %14 : vector<1x8x128xbf16> to vector<8x128xbf16>
    %cst_12 = arith.constant dense<0.000000e+00> : vector<16x128xf32>
    %16 = tpu.matmul %13, %15, %cst_12 {dimension_numbers = #tpu.dot_dimension_numbers<[1], [0], [0], [1], [0, 0, 1, 1], [], []>} : vector<16x8xbf16>, vector<8x128xbf16>, vector<16x128xf32> -> vector<16x128xf32>
    %17 = arith.addf %12, %16 : vector<16x128xf32>
    %18 = vector.extract_strided_slice %1 {offsets = [3, 0], sizes = [16, 8], strides = [1, 1]} : vector<20x8xbf16> to vector<16x8xbf16>
    %c3 = arith.constant 3 : index
    %c0_13 = arith.constant 0 : index
    %c0_14 = arith.constant 0 : index
    %19 = vector.load %arg3[%c3, %c0_13, %c0_14] : memref<5x8x128xbf16, #tpu.memory_space<vmem>>, vector<1x8x128xbf16>
    %20 = vector.shape_cast %19 : vector<1x8x128xbf16> to vector<8x128xbf16>
    %cst_15 = arith.constant dense<0.000000e+00> : vector<16x128xf32>
    %21 = tpu.matmul %18, %20, %cst_15 {dimension_numbers = #tpu.dot_dimension_numbers<[1], [0], [0], [1], [0, 0, 1, 1], [], []>} : vector<16x8xbf16>, vector<8x128xbf16>, vector<16x128xf32> -> vector<16x128xf32>
    %22 = arith.addf %17, %21 : vector<16x128xf32>
    %23 = vector.extract_strided_slice %1 {offsets = [4, 0], sizes = [16, 8], strides = [1, 1]} : vector<20x8xbf16> to vector<16x8xbf16>
    %c4 = arith.constant 4 : index
    %c0_16 = arith.constant 0 : index
    %c0_17 = arith.constant 0 : index
    %24 = vector.load %arg3[%c4, %c0_16, %c0_17] : memref<5x8x128xbf16, #tpu.memory_space<vmem>>, vector<1x8x128xbf16>
    %25 = vector.shape_cast %24 : vector<1x8x128xbf16> to vector<8x128xbf16>
    %cst_18 = arith.constant dense<0.000000e+00> : vector<16x128xf32>
    %26 = tpu.matmul %23, %25, %cst_18 {dimension_numbers = #tpu.dot_dimension_numbers<[1], [0], [0], [1], [0, 0, 1, 1], [], []>} : vector<16x8xbf16>, vector<8x128xbf16>, vector<16x128xf32> -> vector<16x128xf32>
    %27 = arith.addf %22, %26 : vector<16x128xf32>
    %c0_19 = arith.constant 0 : index
    %c0_20 = arith.constant 0 : index
    %28 = vector.load %arg4[%c0_19, %c0_20] : memref<1x128xf32, #tpu.memory_space<vmem>>, vector<1x128xf32>
    %29 = vector.broadcast %28 : vector<1x128xf32> to vector<16x128xf32>
    %30 = arith.addf %27, %29 : vector<16x128xf32>
    %31 = arith.negf %30 : vector<16x128xf32>
    %32 = math.exp %31 : vector<16x128xf32>
    %cst_21 = arith.constant 1.000000e+00 : f32
    %33 = vector.broadcast %cst_21 : f32 to vector<16x128xf32>
    %34 = arith.addf %33, %32 : vector<16x128xf32>
    %35 = arith.divf %33, %34 : vector<16x128xf32>
    %36 = arith.mulf %30, %35 : vector<16x128xf32>
    %37 = arith.truncf %36 : vector<16x128xf32> to vector<16x128xbf16>
    %c0_22 = arith.constant 0 : index
    %c0_23 = arith.constant 0 : index
    %c0_24 = arith.constant 0 : index
    %38 = vector.load %arg5[%c0_22, %c0_23, %c0_24] : memref<1x16x128xbf16, #tpu.memory_space<vmem>>, vector<1x16x128xbf16>
    %39 = vector.shape_cast %38 : vector<1x16x128xbf16> to vector<16x128xbf16>
    %40 = vector.shape_cast %37 : vector<16x128xbf16> to vector<1x16x128xbf16>
    tpu.vector_store %arg5[%c0_22, %c0_23, %c0_24], %40 {strides = array<i32>} : memref<1x16x128xbf16, #tpu.memory_space<vmem>>, vector<1x16x128xbf16>,
    return
  }
  func.func @transform_0(%arg0: i32, %arg1: i32) -> (i32, i32, i32, i32) {
    %c0_i32 = arith.constant 0 : i32
    %c0_i32_0 = arith.constant 0 : i32
    %c0_i32_1 = arith.constant 0 : i32
    %c0_i32_2 = arith.constant 0 : i32
    return %arg0, %c0_i32, %c0_i32_0, %c0_i32_1 : i32, i32, i32, i32
  }
  func.func @transform_1(%arg0: i32, %arg1: i32) -> (i32, i32, i32) {
    %c0_i32 = arith.constant 0 : i32
    %c0_i32_0 = arith.constant 0 : i32
    %c0_i32_1 = arith.constant 0 : i32
    return %c0_i32, %c0_i32_0, %arg1 : i32, i32, i32
  }
  func.func @transform_2(%arg0: i32, %arg1: i32) -> (i32, i32) {
    %c0_i32 = arith.constant 0 : i32
    %c0_i32_0 = arith.constant 0 : i32
    return %c0_i32, %arg1 : i32, i32
  }
  func.func @transform_3(%arg0: i32, %arg1: i32) -> (i32, i32, i32) {
    %c0_i32 = arith.constant 0 : i32
    %c0_i32_0 = arith.constant 0 : i32
    return %arg0, %c0_i32, %arg1 : i32, i32, i32
  }
}

module attributes {stable_mosaic.version = 11 : i64} {
  func.func @_conv_mm_kernel(%arg0: i32, %arg1: i32, %arg2: memref<1x1x22x128xbf16, #tpu.memory_space<vmem>>, %arg3: memref<7x128x128xbf16, #tpu.memory_space<vmem>>, %arg4: memref<1x128xf32, #tpu.memory_space<vmem>>, %arg5: memref<1x16x128xbf16, #tpu.memory_space<vmem>>) attributes {dimension_semantics = [#tpu.dimension_semantics<parallel>, #tpu.dimension_semantics<parallel>], iteration_bounds = array<i64: 2, 1>, scalar_prefetch = 0 : i64, scratch_operands = 0 : i64, tpu.core_type = #tpu.core_type<tc>, window_params = [{transform_indices = @transform_0, window_bounds = array<i64: 1, 1, 22, 128>}, {transform_indices = @transform_1, window_bounds = array<i64: 7, 128, 128>}, {transform_indices = @transform_2, window_bounds = array<i64: 1, 128>}, {transform_indices = @transform_3, window_bounds = array<i64: 1, 16, 128>}]} {
    %c0 = arith.constant 0 : index
    %c0_0 = arith.constant 0 : index
    %c0_1 = arith.constant 0 : index
    %c0_2 = arith.constant 0 : index
    %0 = vector.load %arg2[%c0, %c0_0, %c0_1, %c0_2] : memref<1x1x22x128xbf16, #tpu.memory_space<vmem>>, vector<1x1x22x128xbf16>
    %1 = vector.shape_cast %0 : vector<1x1x22x128xbf16> to vector<22x128xbf16>
    %cst = arith.constant 0.000000e+00 : f32
    %2 = vector.broadcast %cst : f32 to vector<16x128xf32>
    %3 = vector.extract_strided_slice %1 {offsets = [0, 0], sizes = [16, 128], strides = [1, 1]} : vector<22x128xbf16> to vector<16x128xbf16>
    %c0_3 = arith.constant 0 : index
    %c0_4 = arith.constant 0 : index
    %c0_5 = arith.constant 0 : index
    %4 = vector.load %arg3[%c0_3, %c0_4, %c0_5] : memref<7x128x128xbf16, #tpu.memory_space<vmem>>, vector<1x128x128xbf16>
    %5 = vector.shape_cast %4 : vector<1x128x128xbf16> to vector<128x128xbf16>
    %cst_6 = arith.constant dense<0.000000e+00> : vector<16x128xf32>
    %6 = tpu.matmul %3, %5, %cst_6 {dimension_numbers = #tpu.dot_dimension_numbers<[1], [0], [0], [1], [0, 0, 1, 1], [], []>} : vector<16x128xbf16>, vector<128x128xbf16>, vector<16x128xf32> -> vector<16x128xf32>
    %7 = arith.addf %2, %6 : vector<16x128xf32>
    %8 = vector.extract_strided_slice %1 {offsets = [1, 0], sizes = [16, 128], strides = [1, 1]} : vector<22x128xbf16> to vector<16x128xbf16>
    %c1 = arith.constant 1 : index
    %c0_7 = arith.constant 0 : index
    %c0_8 = arith.constant 0 : index
    %9 = vector.load %arg3[%c1, %c0_7, %c0_8] : memref<7x128x128xbf16, #tpu.memory_space<vmem>>, vector<1x128x128xbf16>
    %10 = vector.shape_cast %9 : vector<1x128x128xbf16> to vector<128x128xbf16>
    %cst_9 = arith.constant dense<0.000000e+00> : vector<16x128xf32>
    %11 = tpu.matmul %8, %10, %cst_9 {dimension_numbers = #tpu.dot_dimension_numbers<[1], [0], [0], [1], [0, 0, 1, 1], [], []>} : vector<16x128xbf16>, vector<128x128xbf16>, vector<16x128xf32> -> vector<16x128xf32>
    %12 = arith.addf %7, %11 : vector<16x128xf32>
    %13 = vector.extract_strided_slice %1 {offsets = [2, 0], sizes = [16, 128], strides = [1, 1]} : vector<22x128xbf16> to vector<16x128xbf16>
    %c2 = arith.constant 2 : index
    %c0_10 = arith.constant 0 : index
    %c0_11 = arith.constant 0 : index
    %14 = vector.load %arg3[%c2, %c0_10, %c0_11] : memref<7x128x128xbf16, #tpu.memory_space<vmem>>, vector<1x128x128xbf16>
    %15 = vector.shape_cast %14 : vector<1x128x128xbf16> to vector<128x128xbf16>
    %cst_12 = arith.constant dense<0.000000e+00> : vector<16x128xf32>
    %16 = tpu.matmul %13, %15, %cst_12 {dimension_numbers = #tpu.dot_dimension_numbers<[1], [0], [0], [1], [0, 0, 1, 1], [], []>} : vector<16x128xbf16>, vector<128x128xbf16>, vector<16x128xf32> -> vector<16x128xf32>
    %17 = arith.addf %12, %16 : vector<16x128xf32>
    %18 = vector.extract_strided_slice %1 {offsets = [3, 0], sizes = [16, 128], strides = [1, 1]} : vector<22x128xbf16> to vector<16x128xbf16>
    %c3 = arith.constant 3 : index
    %c0_13 = arith.constant 0 : index
    %c0_14 = arith.constant 0 : index
    %19 = vector.load %arg3[%c3, %c0_13, %c0_14] : memref<7x128x128xbf16, #tpu.memory_space<vmem>>, vector<1x128x128xbf16>
    %20 = vector.shape_cast %19 : vector<1x128x128xbf16> to vector<128x128xbf16>
    %cst_15 = arith.constant dense<0.000000e+00> : vector<16x128xf32>
    %21 = tpu.matmul %18, %20, %cst_15 {dimension_numbers = #tpu.dot_dimension_numbers<[1], [0], [0], [1], [0, 0, 1, 1], [], []>} : vector<16x128xbf16>, vector<128x128xbf16>, vector<16x128xf32> -> vector<16x128xf32>
    %22 = arith.addf %17, %21 : vector<16x128xf32>
    %23 = vector.extract_strided_slice %1 {offsets = [4, 0], sizes = [16, 128], strides = [1, 1]} : vector<22x128xbf16> to vector<16x128xbf16>
    %c4 = arith.constant 4 : index
    %c0_16 = arith.constant 0 : index
    %c0_17 = arith.constant 0 : index
    %24 = vector.load %arg3[%c4, %c0_16, %c0_17] : memref<7x128x128xbf16, #tpu.memory_space<vmem>>, vector<1x128x128xbf16>
    %25 = vector.shape_cast %24 : vector<1x128x128xbf16> to vector<128x128xbf16>
    %cst_18 = arith.constant dense<0.000000e+00> : vector<16x128xf32>
    %26 = tpu.matmul %23, %25, %cst_18 {dimension_numbers = #tpu.dot_dimension_numbers<[1], [0], [0], [1], [0, 0, 1, 1], [], []>} : vector<16x128xbf16>, vector<128x128xbf16>, vector<16x128xf32> -> vector<16x128xf32>
    %27 = arith.addf %22, %26 : vector<16x128xf32>
    %28 = vector.extract_strided_slice %1 {offsets = [5, 0], sizes = [16, 128], strides = [1, 1]} : vector<22x128xbf16> to vector<16x128xbf16>
    %c5 = arith.constant 5 : index
    %c0_19 = arith.constant 0 : index
    %c0_20 = arith.constant 0 : index
    %29 = vector.load %arg3[%c5, %c0_19, %c0_20] : memref<7x128x128xbf16, #tpu.memory_space<vmem>>, vector<1x128x128xbf16>
    %30 = vector.shape_cast %29 : vector<1x128x128xbf16> to vector<128x128xbf16>
    %cst_21 = arith.constant dense<0.000000e+00> : vector<16x128xf32>
    %31 = tpu.matmul %28, %30, %cst_21 {dimension_numbers = #tpu.dot_dimension_numbers<[1], [0], [0], [1], [0, 0, 1, 1], [], []>} : vector<16x128xbf16>, vector<128x128xbf16>, vector<16x128xf32> -> vector<16x128xf32>
    %32 = arith.addf %27, %31 : vector<16x128xf32>
    %33 = vector.extract_strided_slice %1 {offsets = [6, 0], sizes = [16, 128], strides = [1, 1]} : vector<22x128xbf16> to vector<16x128xbf16>
    %c6 = arith.constant 6 : index
    %c0_22 = arith.constant 0 : index
    %c0_23 = arith.constant 0 : index
    %34 = vector.load %arg3[%c6, %c0_22, %c0_23] : memref<7x128x128xbf16, #tpu.memory_space<vmem>>, vector<1x128x128xbf16>
    %35 = vector.shape_cast %34 : vector<1x128x128xbf16> to vector<128x128xbf16>
    %cst_24 = arith.constant dense<0.000000e+00> : vector<16x128xf32>
    %36 = tpu.matmul %33, %35, %cst_24 {dimension_numbers = #tpu.dot_dimension_numbers<[1], [0], [0], [1], [0, 0, 1, 1], [], []>} : vector<16x128xbf16>, vector<128x128xbf16>, vector<16x128xf32> -> vector<16x128xf32>
    %37 = arith.addf %32, %36 : vector<16x128xf32>
    %c0_25 = arith.constant 0 : index
    %c0_26 = arith.constant 0 : index
    %38 = vector.load %arg4[%c0_25, %c0_26] : memref<1x128xf32, #tpu.memory_space<vmem>>, vector<1x128xf32>
    %39 = vector.broadcast %38 : vector<1x128xf32> to vector<16x128xf32>
    %40 = arith.addf %37, %39 : vector<16x128xf32>
    %41 = arith.truncf %40 : vector<16x128xf32> to vector<16x128xbf16>
    %c0_27 = arith.constant 0 : index
    %c0_28 = arith.constant 0 : index
    %c0_29 = arith.constant 0 : index
    %42 = vector.load %arg5[%c0_27, %c0_28, %c0_29] : memref<1x16x128xbf16, #tpu.memory_space<vmem>>, vector<1x16x128xbf16>
    %43 = vector.shape_cast %42 : vector<1x16x128xbf16> to vector<16x128xbf16>
    %44 = vector.shape_cast %41 : vector<16x128xbf16> to vector<1x16x128xbf16>
    tpu.vector_store %arg5[%c0_27, %c0_28, %c0_29], %44 {strides = array<i32>} : memref<1x16x128xbf16, #tpu.memory_space<vmem>>, vector<1x16x128xbf16>,
    return
  }
  func.func @transform_0(%arg0: i32, %arg1: i32) -> (i32, i32, i32, i32) {
    %c0_i32 = arith.constant 0 : i32
    %c0_i32_0 = arith.constant 0 : i32
    %c0_i32_1 = arith.constant 0 : i32
    %c0_i32_2 = arith.constant 0 : i32
    return %arg0, %c0_i32, %c0_i32_0, %c0_i32_1 : i32, i32, i32, i32
  }
  func.func @transform_1(%arg0: i32, %arg1: i32) -> (i32, i32, i32) {
    %c0_i32 = arith.constant 0 : i32
    %c0_i32_0 = arith.constant 0 : i32
    %c0_i32_1 = arith.constant 0 : i32
    return %c0_i32, %c0_i32_0, %arg1 : i32, i32, i32
  }
  func.func @transform_2(%arg0: i32, %arg1: i32) -> (i32, i32) {
    %c0_i32 = arith.constant 0 : i32
    %c0_i32_0 = arith.constant 0 : i32
    return %c0_i32, %arg1 : i32, i32
  }
  func.func @transform_3(%arg0: i32, %arg1: i32) -> (i32, i32, i32) {
    %c0_i32 = arith.constant 0 : i32
    %c0_i32_0 = arith.constant 0 : i32
    return %arg0, %c0_i32, %arg1 : i32, i32, i32
  }
}

module attributes {stable_mosaic.version = 11 : i64} {
  func.func @_conv_mm_kernel(%arg0: i32, %arg1: i32, %arg2: memref<1x2x11x128xbf16, #tpu.memory_space<vmem>>, %arg3: memref<7x128x128xbf16, #tpu.memory_space<vmem>>, %arg4: memref<1x128xf32, #tpu.memory_space<vmem>>, %arg5: memref<1x8x128xbf16, #tpu.memory_space<vmem>>) attributes {dimension_semantics = [#tpu.dimension_semantics<parallel>, #tpu.dimension_semantics<parallel>], iteration_bounds = array<i64: 2, 1>, scalar_prefetch = 0 : i64, scratch_operands = 0 : i64, tpu.core_type = #tpu.core_type<tc>, window_params = [{transform_indices = @transform_0, window_bounds = array<i64: 1, 2, 11, 128>}, {transform_indices = @transform_1, window_bounds = array<i64: 7, 128, 128>}, {transform_indices = @transform_2, window_bounds = array<i64: 1, 128>}, {transform_indices = @transform_3, window_bounds = array<i64: 1, 8, 128>}]} {
    %c0 = arith.constant 0 : index
    %c0_0 = arith.constant 0 : index
    %c0_1 = arith.constant 0 : index
    %c0_2 = arith.constant 0 : index
    %0 = vector.load %arg2[%c0, %c0_0, %c0_1, %c0_2] : memref<1x2x11x128xbf16, #tpu.memory_space<vmem>>, vector<1x1x11x128xbf16>
    %1 = vector.shape_cast %0 : vector<1x1x11x128xbf16> to vector<11x128xbf16>
    %c0_3 = arith.constant 0 : index
    %c1 = arith.constant 1 : index
    %c0_4 = arith.constant 0 : index
    %c0_5 = arith.constant 0 : index
    %2 = vector.load %arg2[%c0_3, %c1, %c0_4, %c0_5] : memref<1x2x11x128xbf16, #tpu.memory_space<vmem>>, vector<1x1x11x128xbf16>
    %3 = vector.shape_cast %2 : vector<1x1x11x128xbf16> to vector<11x128xbf16>
    %cst = arith.constant 0.000000e+00 : f32
    %4 = vector.broadcast %cst : f32 to vector<8x128xf32>
    %5 = vector.extract_strided_slice %1 {offsets = [0, 0], sizes = [8, 128], strides = [1, 1]} : vector<11x128xbf16> to vector<8x128xbf16>
    %c0_6 = arith.constant 0 : index
    %c0_7 = arith.constant 0 : index
    %c0_8 = arith.constant 0 : index
    %6 = vector.load %arg3[%c0_6, %c0_7, %c0_8] : memref<7x128x128xbf16, #tpu.memory_space<vmem>>, vector<1x128x128xbf16>
    %7 = vector.shape_cast %6 : vector<1x128x128xbf16> to vector<128x128xbf16>
    %cst_9 = arith.constant dense<0.000000e+00> : vector<8x128xf32>
    %8 = tpu.matmul %5, %7, %cst_9 {dimension_numbers = #tpu.dot_dimension_numbers<[1], [0], [0], [1], [0, 0, 1, 1], [], []>} : vector<8x128xbf16>, vector<128x128xbf16>, vector<8x128xf32> -> vector<8x128xf32>
    %9 = arith.addf %4, %8 : vector<8x128xf32>
    %10 = vector.extract_strided_slice %3 {offsets = [0, 0], sizes = [8, 128], strides = [1, 1]} : vector<11x128xbf16> to vector<8x128xbf16>
    %c1_10 = arith.constant 1 : index
    %c0_11 = arith.constant 0 : index
    %c0_12 = arith.constant 0 : index
    %11 = vector.load %arg3[%c1_10, %c0_11, %c0_12] : memref<7x128x128xbf16, #tpu.memory_space<vmem>>, vector<1x128x128xbf16>
    %12 = vector.shape_cast %11 : vector<1x128x128xbf16> to vector<128x128xbf16>
    %cst_13 = arith.constant dense<0.000000e+00> : vector<8x128xf32>
    %13 = tpu.matmul %10, %12, %cst_13 {dimension_numbers = #tpu.dot_dimension_numbers<[1], [0], [0], [1], [0, 0, 1, 1], [], []>} : vector<8x128xbf16>, vector<128x128xbf16>, vector<8x128xf32> -> vector<8x128xf32>
    %14 = arith.addf %9, %13 : vector<8x128xf32>
    %15 = vector.extract_strided_slice %1 {offsets = [1, 0], sizes = [8, 128], strides = [1, 1]} : vector<11x128xbf16> to vector<8x128xbf16>
    %c2 = arith.constant 2 : index
    %c0_14 = arith.constant 0 : index
    %c0_15 = arith.constant 0 : index
    %16 = vector.load %arg3[%c2, %c0_14, %c0_15] : memref<7x128x128xbf16, #tpu.memory_space<vmem>>, vector<1x128x128xbf16>
    %17 = vector.shape_cast %16 : vector<1x128x128xbf16> to vector<128x128xbf16>
    %cst_16 = arith.constant dense<0.000000e+00> : vector<8x128xf32>
    %18 = tpu.matmul %15, %17, %cst_16 {dimension_numbers = #tpu.dot_dimension_numbers<[1], [0], [0], [1], [0, 0, 1, 1], [], []>} : vector<8x128xbf16>, vector<128x128xbf16>, vector<8x128xf32> -> vector<8x128xf32>
    %19 = arith.addf %14, %18 : vector<8x128xf32>
    %20 = vector.extract_strided_slice %3 {offsets = [1, 0], sizes = [8, 128], strides = [1, 1]} : vector<11x128xbf16> to vector<8x128xbf16>
    %c3 = arith.constant 3 : index
    %c0_17 = arith.constant 0 : index
    %c0_18 = arith.constant 0 : index
    %21 = vector.load %arg3[%c3, %c0_17, %c0_18] : memref<7x128x128xbf16, #tpu.memory_space<vmem>>, vector<1x128x128xbf16>
    %22 = vector.shape_cast %21 : vector<1x128x128xbf16> to vector<128x128xbf16>
    %cst_19 = arith.constant dense<0.000000e+00> : vector<8x128xf32>
    %23 = tpu.matmul %20, %22, %cst_19 {dimension_numbers = #tpu.dot_dimension_numbers<[1], [0], [0], [1], [0, 0, 1, 1], [], []>} : vector<8x128xbf16>, vector<128x128xbf16>, vector<8x128xf32> -> vector<8x128xf32>
    %24 = arith.addf %19, %23 : vector<8x128xf32>
    %25 = vector.extract_strided_slice %1 {offsets = [2, 0], sizes = [8, 128], strides = [1, 1]} : vector<11x128xbf16> to vector<8x128xbf16>
    %c4 = arith.constant 4 : index
    %c0_20 = arith.constant 0 : index
    %c0_21 = arith.constant 0 : index
    %26 = vector.load %arg3[%c4, %c0_20, %c0_21] : memref<7x128x128xbf16, #tpu.memory_space<vmem>>, vector<1x128x128xbf16>
    %27 = vector.shape_cast %26 : vector<1x128x128xbf16> to vector<128x128xbf16>
    %cst_22 = arith.constant dense<0.000000e+00> : vector<8x128xf32>
    %28 = tpu.matmul %25, %27, %cst_22 {dimension_numbers = #tpu.dot_dimension_numbers<[1], [0], [0], [1], [0, 0, 1, 1], [], []>} : vector<8x128xbf16>, vector<128x128xbf16>, vector<8x128xf32> -> vector<8x128xf32>
    %29 = arith.addf %24, %28 : vector<8x128xf32>
    %30 = vector.extract_strided_slice %3 {offsets = [2, 0], sizes = [8, 128], strides = [1, 1]} : vector<11x128xbf16> to vector<8x128xbf16>
    %c5 = arith.constant 5 : index
    %c0_23 = arith.constant 0 : index
    %c0_24 = arith.constant 0 : index
    %31 = vector.load %arg3[%c5, %c0_23, %c0_24] : memref<7x128x128xbf16, #tpu.memory_space<vmem>>, vector<1x128x128xbf16>
    %32 = vector.shape_cast %31 : vector<1x128x128xbf16> to vector<128x128xbf16>
    %cst_25 = arith.constant dense<0.000000e+00> : vector<8x128xf32>
    %33 = tpu.matmul %30, %32, %cst_25 {dimension_numbers = #tpu.dot_dimension_numbers<[1], [0], [0], [1], [0, 0, 1, 1], [], []>} : vector<8x128xbf16>, vector<128x128xbf16>, vector<8x128xf32> -> vector<8x128xf32>
    %34 = arith.addf %29, %33 : vector<8x128xf32>
    %35 = vector.extract_strided_slice %1 {offsets = [3, 0], sizes = [8, 128], strides = [1, 1]} : vector<11x128xbf16> to vector<8x128xbf16>
    %c6 = arith.constant 6 : index
    %c0_26 = arith.constant 0 : index
    %c0_27 = arith.constant 0 : index
    %36 = vector.load %arg3[%c6, %c0_26, %c0_27] : memref<7x128x128xbf16, #tpu.memory_space<vmem>>, vector<1x128x128xbf16>
    %37 = vector.shape_cast %36 : vector<1x128x128xbf16> to vector<128x128xbf16>
    %cst_28 = arith.constant dense<0.000000e+00> : vector<8x128xf32>
    %38 = tpu.matmul %35, %37, %cst_28 {dimension_numbers = #tpu.dot_dimension_numbers<[1], [0], [0], [1], [0, 0, 1, 1], [], []>} : vector<8x128xbf16>, vector<128x128xbf16>, vector<8x128xf32> -> vector<8x128xf32>
    %39 = arith.addf %34, %38 : vector<8x128xf32>
    %c0_29 = arith.constant 0 : index
    %c0_30 = arith.constant 0 : index
    %40 = vector.load %arg4[%c0_29, %c0_30] : memref<1x128xf32, #tpu.memory_space<vmem>>, vector<1x128xf32>
    %41 = vector.broadcast %40 : vector<1x128xf32> to vector<8x128xf32>
    %42 = arith.addf %39, %41 : vector<8x128xf32>
    %43 = arith.truncf %42 : vector<8x128xf32> to vector<8x128xbf16>
    %c0_31 = arith.constant 0 : index
    %c0_32 = arith.constant 0 : index
    %c0_33 = arith.constant 0 : index
    %44 = vector.load %arg5[%c0_31, %c0_32, %c0_33] : memref<1x8x128xbf16, #tpu.memory_space<vmem>>, vector<1x8x128xbf16>
    %45 = vector.shape_cast %44 : vector<1x8x128xbf16> to vector<8x128xbf16>
    %46 = vector.shape_cast %43 : vector<8x128xbf16> to vector<1x8x128xbf16>
    tpu.vector_store %arg5[%c0_31, %c0_32, %c0_33], %46 {strides = array<i32>} : memref<1x8x128xbf16, #tpu.memory_space<vmem>>, vector<1x8x128xbf16>,
    return
  }
  func.func @transform_0(%arg0: i32, %arg1: i32) -> (i32, i32, i32, i32) {
    %c0_i32 = arith.constant 0 : i32
    %c0_i32_0 = arith.constant 0 : i32
    %c0_i32_1 = arith.constant 0 : i32
    %c0_i32_2 = arith.constant 0 : i32
    return %arg0, %c0_i32, %c0_i32_0, %c0_i32_1 : i32, i32, i32, i32
  }
  func.func @transform_1(%arg0: i32, %arg1: i32) -> (i32, i32, i32) {
    %c0_i32 = arith.constant 0 : i32
    %c0_i32_0 = arith.constant 0 : i32
    %c0_i32_1 = arith.constant 0 : i32
    return %c0_i32, %c0_i32_0, %arg1 : i32, i32, i32
  }
  func.func @transform_2(%arg0: i32, %arg1: i32) -> (i32, i32) {
    %c0_i32 = arith.constant 0 : i32
    %c0_i32_0 = arith.constant 0 : i32
    return %c0_i32, %arg1 : i32, i32
  }
  func.func @transform_3(%arg0: i32, %arg1: i32) -> (i32, i32, i32) {
    %c0_i32 = arith.constant 0 : i32
    %c0_i32_0 = arith.constant 0 : i32
    return %arg0, %c0_i32, %arg1 : i32, i32, i32
  }
}

module attributes {stable_mosaic.version = 11 : i64} {
  func.func @_conv_mm_kernel(%arg0: i32, %arg1: i32, %arg2: memref<1x1x8x128xbf16, #tpu.memory_space<vmem>>, %arg3: memref<1x128x256xbf16, #tpu.memory_space<vmem>>, %arg4: memref<1x256xf32, #tpu.memory_space<vmem>>, %arg5: memref<1x8x256xbf16, #tpu.memory_space<vmem>>, %arg6: memref<1x1x256xf32, #tpu.memory_space<vmem>>) attributes {dimension_semantics = [#tpu.dimension_semantics<parallel>, #tpu.dimension_semantics<parallel>], iteration_bounds = array<i64: 2, 1>, scalar_prefetch = 0 : i64, scratch_operands = 0 : i64, tpu.core_type = #tpu.core_type<tc>, window_params = [{transform_indices = @transform_0, window_bounds = array<i64: 1, 1, 8, 128>}, {transform_indices = @transform_1, window_bounds = array<i64: 1, 128, 256>}, {transform_indices = @transform_2, window_bounds = array<i64: 1, 256>}, {transform_indices = @transform_3, window_bounds = array<i64: 1, 8, 256>}, {transform_indices = @transform_4, window_bounds = array<i64: 1, 1, 256>}]} {
    %c0 = arith.constant 0 : index
    %c0_0 = arith.constant 0 : index
    %c0_1 = arith.constant 0 : index
    %c0_2 = arith.constant 0 : index
    %0 = vector.load %arg2[%c0, %c0_0, %c0_1, %c0_2] : memref<1x1x8x128xbf16, #tpu.memory_space<vmem>>, vector<1x1x8x128xbf16>
    %1 = vector.shape_cast %0 : vector<1x1x8x128xbf16> to vector<8x128xbf16>
    %cst = arith.constant 0.000000e+00 : f32
    %2 = vector.broadcast %cst : f32 to vector<8x256xf32>
    %c0_3 = arith.constant 0 : index
    %c0_4 = arith.constant 0 : index
    %c0_5 = arith.constant 0 : index
    %3 = vector.load %arg3[%c0_3, %c0_4, %c0_5] : memref<1x128x256xbf16, #tpu.memory_space<vmem>>, vector<1x128x256xbf16>
    %4 = vector.shape_cast %3 : vector<1x128x256xbf16> to vector<128x256xbf16>
    %cst_6 = arith.constant dense<0.000000e+00> : vector<8x256xf32>
    %5 = tpu.matmul %1, %4, %cst_6 {dimension_numbers = #tpu.dot_dimension_numbers<[1], [0], [0], [1], [0, 0, 1, 1], [], []>} : vector<8x128xbf16>, vector<128x256xbf16>, vector<8x256xf32> -> vector<8x256xf32>
    %6 = arith.addf %2, %5 : vector<8x256xf32>
    %c0_7 = arith.constant 0 : index
    %c0_8 = arith.constant 0 : index
    %7 = vector.load %arg4[%c0_7, %c0_8] : memref<1x256xf32, #tpu.memory_space<vmem>>, vector<1x256xf32>
    %8 = vector.broadcast %7 : vector<1x256xf32> to vector<8x256xf32>
    %9 = arith.addf %6, %8 : vector<8x256xf32>
    %10 = arith.negf %9 : vector<8x256xf32>
    %11 = math.exp %10 : vector<8x256xf32>
    %cst_9 = arith.constant 1.000000e+00 : f32
    %12 = vector.broadcast %cst_9 : f32 to vector<8x256xf32>
    %13 = arith.addf %12, %11 : vector<8x256xf32>
    %14 = arith.divf %12, %13 : vector<8x256xf32>
    %15 = arith.mulf %9, %14 : vector<8x256xf32>
    %16 = arith.truncf %15 : vector<8x256xf32> to vector<8x256xbf16>
    %c0_10 = arith.constant 0 : index
    %c0_11 = arith.constant 0 : index
    %c0_12 = arith.constant 0 : index
    %17 = vector.load %arg5[%c0_10, %c0_11, %c0_12] : memref<1x8x256xbf16, #tpu.memory_space<vmem>>, vector<1x8x256xbf16>
    %18 = vector.shape_cast %17 : vector<1x8x256xbf16> to vector<8x256xbf16>
    %19 = vector.shape_cast %16 : vector<8x256xbf16> to vector<1x8x256xbf16>
    tpu.vector_store %arg5[%c0_10, %c0_11, %c0_12], %19 {strides = array<i32>} : memref<1x8x256xbf16, #tpu.memory_space<vmem>>, vector<1x8x256xbf16>,
    %cst_13 = arith.constant dense<0.000000e+00> : vector<256xf32>
    %20 = vector.multi_reduction <add>, %15, %cst_13 [0] : vector<8x256xf32> to vector<256xf32>
    %21 = vector.shape_cast %20 : vector<256xf32> to vector<1x256xf32>
    %c0_14 = arith.constant 0 : index
    %c0_15 = arith.constant 0 : index
    %c0_16 = arith.constant 0 : index
    %22 = vector.load %arg6[%c0_14, %c0_15, %c0_16] : memref<1x1x256xf32, #tpu.memory_space<vmem>>, vector<1x1x256xf32>
    %23 = vector.shape_cast %22 : vector<1x1x256xf32> to vector<1x256xf32>
    %24 = vector.shape_cast %21 : vector<1x256xf32> to vector<1x1x256xf32>
    tpu.vector_store %arg6[%c0_14, %c0_15, %c0_16], %24 {strides = array<i32>} : memref<1x1x256xf32, #tpu.memory_space<vmem>>, vector<1x1x256xf32>,
    return
  }
  func.func @transform_0(%arg0: i32, %arg1: i32) -> (i32, i32, i32, i32) {
    %c0_i32 = arith.constant 0 : i32
    %c0_i32_0 = arith.constant 0 : i32
    %c0_i32_1 = arith.constant 0 : i32
    %c0_i32_2 = arith.constant 0 : i32
    return %arg0, %c0_i32, %c0_i32_0, %c0_i32_1 : i32, i32, i32, i32
  }
  func.func @transform_1(%arg0: i32, %arg1: i32) -> (i32, i32, i32) {
    %c0_i32 = arith.constant 0 : i32
    %c0_i32_0 = arith.constant 0 : i32
    %c0_i32_1 = arith.constant 0 : i32
    return %c0_i32, %c0_i32_0, %arg1 : i32, i32, i32
  }
  func.func @transform_2(%arg0: i32, %arg1: i32) -> (i32, i32) {
    %c0_i32 = arith.constant 0 : i32
    %c0_i32_0 = arith.constant 0 : i32
    return %c0_i32, %arg1 : i32, i32
  }
  func.func @transform_3(%arg0: i32, %arg1: i32) -> (i32, i32, i32) {
    %c0_i32 = arith.constant 0 : i32
    %c0_i32_0 = arith.constant 0 : i32
    return %arg0, %c0_i32, %arg1 : i32, i32, i32
  }
  func.func @transform_4(%arg0: i32, %arg1: i32) -> (i32, i32, i32) {
    %c0_i32 = arith.constant 0 : i32
    %c0_i32_0 = arith.constant 0 : i32
    return %arg0, %c0_i32, %arg1 : i32, i32, i32
  }
}

module attributes {stable_mosaic.version = 11 : i64} {
  func.func @_conv_mm_kernel(%arg0: i32, %arg1: i32, %arg2: memref<1x1x14x256xbf16, #tpu.memory_space<vmem>>, %arg3: memref<7x256x128xbf16, #tpu.memory_space<vmem>>, %arg4: memref<1x128xf32, #tpu.memory_space<vmem>>, %arg5: memref<1x8x128xbf16, #tpu.memory_space<vmem>>, %arg6: memref<1x8x128xbf16, #tpu.memory_space<vmem>>) attributes {dimension_semantics = [#tpu.dimension_semantics<parallel>, #tpu.dimension_semantics<parallel>], iteration_bounds = array<i64: 2, 1>, scalar_prefetch = 0 : i64, scratch_operands = 0 : i64, tpu.core_type = #tpu.core_type<tc>, window_params = [{transform_indices = @transform_0, window_bounds = array<i64: 1, 1, 14, 256>}, {transform_indices = @transform_1, window_bounds = array<i64: 7, 256, 128>}, {transform_indices = @transform_2, window_bounds = array<i64: 1, 128>}, {transform_indices = @transform_3, window_bounds = array<i64: 1, 8, 128>}, {transform_indices = @transform_4, window_bounds = array<i64: 1, 8, 128>}]} {
    %c0 = arith.constant 0 : index
    %c0_0 = arith.constant 0 : index
    %c0_1 = arith.constant 0 : index
    %c0_2 = arith.constant 0 : index
    %0 = vector.load %arg2[%c0, %c0_0, %c0_1, %c0_2] : memref<1x1x14x256xbf16, #tpu.memory_space<vmem>>, vector<1x1x14x256xbf16>
    %1 = vector.shape_cast %0 : vector<1x1x14x256xbf16> to vector<14x256xbf16>
    %cst = arith.constant 0.000000e+00 : f32
    %2 = vector.broadcast %cst : f32 to vector<8x128xf32>
    %3 = vector.extract_strided_slice %1 {offsets = [0, 0], sizes = [8, 256], strides = [1, 1]} : vector<14x256xbf16> to vector<8x256xbf16>
    %c0_3 = arith.constant 0 : index
    %c0_4 = arith.constant 0 : index
    %c0_5 = arith.constant 0 : index
    %4 = vector.load %arg3[%c0_3, %c0_4, %c0_5] : memref<7x256x128xbf16, #tpu.memory_space<vmem>>, vector<1x256x128xbf16>
    %5 = vector.shape_cast %4 : vector<1x256x128xbf16> to vector<256x128xbf16>
    %cst_6 = arith.constant dense<0.000000e+00> : vector<8x128xf32>
    %6 = tpu.matmul %3, %5, %cst_6 {dimension_numbers = #tpu.dot_dimension_numbers<[1], [0], [0], [1], [0, 0, 1, 1], [], []>} : vector<8x256xbf16>, vector<256x128xbf16>, vector<8x128xf32> -> vector<8x128xf32>
    %7 = arith.addf %2, %6 : vector<8x128xf32>
    %8 = vector.extract_strided_slice %1 {offsets = [1, 0], sizes = [8, 256], strides = [1, 1]} : vector<14x256xbf16> to vector<8x256xbf16>
    %c1 = arith.constant 1 : index
    %c0_7 = arith.constant 0 : index
    %c0_8 = arith.constant 0 : index
    %9 = vector.load %arg3[%c1, %c0_7, %c0_8] : memref<7x256x128xbf16, #tpu.memory_space<vmem>>, vector<1x256x128xbf16>
    %10 = vector.shape_cast %9 : vector<1x256x128xbf16> to vector<256x128xbf16>
    %cst_9 = arith.constant dense<0.000000e+00> : vector<8x128xf32>
    %11 = tpu.matmul %8, %10, %cst_9 {dimension_numbers = #tpu.dot_dimension_numbers<[1], [0], [0], [1], [0, 0, 1, 1], [], []>} : vector<8x256xbf16>, vector<256x128xbf16>, vector<8x128xf32> -> vector<8x128xf32>
    %12 = arith.addf %7, %11 : vector<8x128xf32>
    %13 = vector.extract_strided_slice %1 {offsets = [2, 0], sizes = [8, 256], strides = [1, 1]} : vector<14x256xbf16> to vector<8x256xbf16>
    %c2 = arith.constant 2 : index
    %c0_10 = arith.constant 0 : index
    %c0_11 = arith.constant 0 : index
    %14 = vector.load %arg3[%c2, %c0_10, %c0_11] : memref<7x256x128xbf16, #tpu.memory_space<vmem>>, vector<1x256x128xbf16>
    %15 = vector.shape_cast %14 : vector<1x256x128xbf16> to vector<256x128xbf16>
    %cst_12 = arith.constant dense<0.000000e+00> : vector<8x128xf32>
    %16 = tpu.matmul %13, %15, %cst_12 {dimension_numbers = #tpu.dot_dimension_numbers<[1], [0], [0], [1], [0, 0, 1, 1], [], []>} : vector<8x256xbf16>, vector<256x128xbf16>, vector<8x128xf32> -> vector<8x128xf32>
    %17 = arith.addf %12, %16 : vector<8x128xf32>
    %18 = vector.extract_strided_slice %1 {offsets = [3, 0], sizes = [8, 256], strides = [1, 1]} : vector<14x256xbf16> to vector<8x256xbf16>
    %c3 = arith.constant 3 : index
    %c0_13 = arith.constant 0 : index
    %c0_14 = arith.constant 0 : index
    %19 = vector.load %arg3[%c3, %c0_13, %c0_14] : memref<7x256x128xbf16, #tpu.memory_space<vmem>>, vector<1x256x128xbf16>
    %20 = vector.shape_cast %19 : vector<1x256x128xbf16> to vector<256x128xbf16>
    %cst_15 = arith.constant dense<0.000000e+00> : vector<8x128xf32>
    %21 = tpu.matmul %18, %20, %cst_15 {dimension_numbers = #tpu.dot_dimension_numbers<[1], [0], [0], [1], [0, 0, 1, 1], [], []>} : vector<8x256xbf16>, vector<256x128xbf16>, vector<8x128xf32> -> vector<8x128xf32>
    %22 = arith.addf %17, %21 : vector<8x128xf32>
    %23 = vector.extract_strided_slice %1 {offsets = [4, 0], sizes = [8, 256], strides = [1, 1]} : vector<14x256xbf16> to vector<8x256xbf16>
    %c4 = arith.constant 4 : index
    %c0_16 = arith.constant 0 : index
    %c0_17 = arith.constant 0 : index
    %24 = vector.load %arg3[%c4, %c0_16, %c0_17] : memref<7x256x128xbf16, #tpu.memory_space<vmem>>, vector<1x256x128xbf16>
    %25 = vector.shape_cast %24 : vector<1x256x128xbf16> to vector<256x128xbf16>
    %cst_18 = arith.constant dense<0.000000e+00> : vector<8x128xf32>
    %26 = tpu.matmul %23, %25, %cst_18 {dimension_numbers = #tpu.dot_dimension_numbers<[1], [0], [0], [1], [0, 0, 1, 1], [], []>} : vector<8x256xbf16>, vector<256x128xbf16>, vector<8x128xf32> -> vector<8x128xf32>
    %27 = arith.addf %22, %26 : vector<8x128xf32>
    %28 = vector.extract_strided_slice %1 {offsets = [5, 0], sizes = [8, 256], strides = [1, 1]} : vector<14x256xbf16> to vector<8x256xbf16>
    %c5 = arith.constant 5 : index
    %c0_19 = arith.constant 0 : index
    %c0_20 = arith.constant 0 : index
    %29 = vector.load %arg3[%c5, %c0_19, %c0_20] : memref<7x256x128xbf16, #tpu.memory_space<vmem>>, vector<1x256x128xbf16>
    %30 = vector.shape_cast %29 : vector<1x256x128xbf16> to vector<256x128xbf16>
    %cst_21 = arith.constant dense<0.000000e+00> : vector<8x128xf32>
    %31 = tpu.matmul %28, %30, %cst_21 {dimension_numbers = #tpu.dot_dimension_numbers<[1], [0], [0], [1], [0, 0, 1, 1], [], []>} : vector<8x256xbf16>, vector<256x128xbf16>, vector<8x128xf32> -> vector<8x128xf32>
    %32 = arith.addf %27, %31 : vector<8x128xf32>
    %33 = vector.extract_strided_slice %1 {offsets = [6, 0], sizes = [8, 256], strides = [1, 1]} : vector<14x256xbf16> to vector<8x256xbf16>
    %c6 = arith.constant 6 : index
    %c0_22 = arith.constant 0 : index
    %c0_23 = arith.constant 0 : index
    %34 = vector.load %arg3[%c6, %c0_22, %c0_23] : memref<7x256x128xbf16, #tpu.memory_space<vmem>>, vector<1x256x128xbf16>
    %35 = vector.shape_cast %34 : vector<1x256x128xbf16> to vector<256x128xbf16>
    %cst_24 = arith.constant dense<0.000000e+00> : vector<8x128xf32>
    %36 = tpu.matmul %33, %35, %cst_24 {dimension_numbers = #tpu.dot_dimension_numbers<[1], [0], [0], [1], [0, 0, 1, 1], [], []>} : vector<8x256xbf16>, vector<256x128xbf16>, vector<8x128xf32> -> vector<8x128xf32>
    %37 = arith.addf %32, %36 : vector<8x128xf32>
    %c0_25 = arith.constant 0 : index
    %c0_26 = arith.constant 0 : index
    %38 = vector.load %arg4[%c0_25, %c0_26] : memref<1x128xf32, #tpu.memory_space<vmem>>, vector<1x128xf32>
    %39 = vector.broadcast %38 : vector<1x128xf32> to vector<8x128xf32>
    %40 = arith.addf %37, %39 : vector<8x128xf32>
    %c0_27 = arith.constant 0 : index
    %c0_28 = arith.constant 0 : index
    %c0_29 = arith.constant 0 : index
    %41 = vector.load %arg5[%c0_27, %c0_28, %c0_29] : memref<1x8x128xbf16, #tpu.memory_space<vmem>>, vector<1x8x128xbf16>
    %42 = vector.shape_cast %41 : vector<1x8x128xbf16> to vector<8x128xbf16>
    %43 = arith.extf %42 : vector<8x128xbf16> to vector<8x128xf32>
    %44 = arith.addf %40, %43 : vector<8x128xf32>
    %45 = arith.truncf %44 : vector<8x128xf32> to vector<8x128xbf16>
    %c0_30 = arith.constant 0 : index
    %c0_31 = arith.constant 0 : index
    %c0_32 = arith.constant 0 : index
    %46 = vector.load %arg6[%c0_30, %c0_31, %c0_32] : memref<1x8x128xbf16, #tpu.memory_space<vmem>>, vector<1x8x128xbf16>
    %47 = vector.shape_cast %46 : vector<1x8x128xbf16> to vector<8x128xbf16>
    %48 = vector.shape_cast %45 : vector<8x128xbf16> to vector<1x8x128xbf16>
    tpu.vector_store %arg6[%c0_30, %c0_31, %c0_32], %48 {strides = array<i32>} : memref<1x8x128xbf16, #tpu.memory_space<vmem>>, vector<1x8x128xbf16>,
    return
  }
  func.func @transform_0(%arg0: i32, %arg1: i32) -> (i32, i32, i32, i32) {
    %c0_i32 = arith.constant 0 : i32
    %c0_i32_0 = arith.constant 0 : i32
    %c0_i32_1 = arith.constant 0 : i32
    %c0_i32_2 = arith.constant 0 : i32
    return %arg0, %c0_i32, %c0_i32_0, %c0_i32_1 : i32, i32, i32, i32
  }
  func.func @transform_1(%arg0: i32, %arg1: i32) -> (i32, i32, i32) {
    %c0_i32 = arith.constant 0 : i32
    %c0_i32_0 = arith.constant 0 : i32
    %c0_i32_1 = arith.constant 0 : i32
    return %c0_i32, %c0_i32_0, %arg1 : i32, i32, i32
  }
  func.func @transform_2(%arg0: i32, %arg1: i32) -> (i32, i32) {
    %c0_i32 = arith.constant 0 : i32
    %c0_i32_0 = arith.constant 0 : i32
    return %c0_i32, %arg1 : i32, i32
  }
  func.func @transform_3(%arg0: i32, %arg1: i32) -> (i32, i32, i32) {
    %c0_i32 = arith.constant 0 : i32
    %c0_i32_0 = arith.constant 0 : i32
    return %arg0, %c0_i32, %arg1 : i32, i32, i32
  }
  func.func @transform_4(%arg0: i32, %arg1: i32) -> (i32, i32, i32) {
    %c0_i32 = arith.constant 0 : i32
    %c0_i32_0 = arith.constant 0 : i32
    return %arg0, %c0_i32, %arg1 : i32, i32, i32
  }
}

module attributes {stable_mosaic.version = 11 : i64} {
  func.func @_conv_mm_kernel(%arg0: i32, %arg1: i32, %arg2: memref<1x2x13x256xbf16, #tpu.memory_space<vmem>>, %arg3: memref<11x256x128xbf16, #tpu.memory_space<vmem>>, %arg4: memref<1x128xf32, #tpu.memory_space<vmem>>, %arg5: memref<1x8x128xbf16, #tpu.memory_space<vmem>>) attributes {dimension_semantics = [#tpu.dimension_semantics<parallel>, #tpu.dimension_semantics<parallel>], iteration_bounds = array<i64: 2, 1>, scalar_prefetch = 0 : i64, scratch_operands = 0 : i64, tpu.core_type = #tpu.core_type<tc>, window_params = [{transform_indices = @transform_0, window_bounds = array<i64: 1, 2, 13, 256>}, {transform_indices = @transform_1, window_bounds = array<i64: 11, 256, 128>}, {transform_indices = @transform_2, window_bounds = array<i64: 1, 128>}, {transform_indices = @transform_3, window_bounds = array<i64: 1, 8, 128>}]} {
    %c0 = arith.constant 0 : index
    %c0_0 = arith.constant 0 : index
    %c0_1 = arith.constant 0 : index
    %c0_2 = arith.constant 0 : index
    %0 = vector.load %arg2[%c0, %c0_0, %c0_1, %c0_2] : memref<1x2x13x256xbf16, #tpu.memory_space<vmem>>, vector<1x1x13x256xbf16>
    %1 = vector.shape_cast %0 : vector<1x1x13x256xbf16> to vector<13x256xbf16>
    %c0_3 = arith.constant 0 : index
    %c1 = arith.constant 1 : index
    %c0_4 = arith.constant 0 : index
    %c0_5 = arith.constant 0 : index
    %2 = vector.load %arg2[%c0_3, %c1, %c0_4, %c0_5] : memref<1x2x13x256xbf16, #tpu.memory_space<vmem>>, vector<1x1x13x256xbf16>
    %3 = vector.shape_cast %2 : vector<1x1x13x256xbf16> to vector<13x256xbf16>
    %cst = arith.constant 0.000000e+00 : f32
    %4 = vector.broadcast %cst : f32 to vector<8x128xf32>
    %5 = vector.extract_strided_slice %1 {offsets = [0, 0], sizes = [8, 256], strides = [1, 1]} : vector<13x256xbf16> to vector<8x256xbf16>
    %c0_6 = arith.constant 0 : index
    %c0_7 = arith.constant 0 : index
    %c0_8 = arith.constant 0 : index
    %6 = vector.load %arg3[%c0_6, %c0_7, %c0_8] : memref<11x256x128xbf16, #tpu.memory_space<vmem>>, vector<1x256x128xbf16>
    %7 = vector.shape_cast %6 : vector<1x256x128xbf16> to vector<256x128xbf16>
    %cst_9 = arith.constant dense<0.000000e+00> : vector<8x128xf32>
    %8 = tpu.matmul %5, %7, %cst_9 {dimension_numbers = #tpu.dot_dimension_numbers<[1], [0], [0], [1], [0, 0, 1, 1], [], []>} : vector<8x256xbf16>, vector<256x128xbf16>, vector<8x128xf32> -> vector<8x128xf32>
    %9 = arith.addf %4, %8 : vector<8x128xf32>
    %10 = vector.extract_strided_slice %3 {offsets = [0, 0], sizes = [8, 256], strides = [1, 1]} : vector<13x256xbf16> to vector<8x256xbf16>
    %c1_10 = arith.constant 1 : index
    %c0_11 = arith.constant 0 : index
    %c0_12 = arith.constant 0 : index
    %11 = vector.load %arg3[%c1_10, %c0_11, %c0_12] : memref<11x256x128xbf16, #tpu.memory_space<vmem>>, vector<1x256x128xbf16>
    %12 = vector.shape_cast %11 : vector<1x256x128xbf16> to vector<256x128xbf16>
    %cst_13 = arith.constant dense<0.000000e+00> : vector<8x128xf32>
    %13 = tpu.matmul %10, %12, %cst_13 {dimension_numbers = #tpu.dot_dimension_numbers<[1], [0], [0], [1], [0, 0, 1, 1], [], []>} : vector<8x256xbf16>, vector<256x128xbf16>, vector<8x128xf32> -> vector<8x128xf32>
    %14 = arith.addf %9, %13 : vector<8x128xf32>
    %15 = vector.extract_strided_slice %1 {offsets = [1, 0], sizes = [8, 256], strides = [1, 1]} : vector<13x256xbf16> to vector<8x256xbf16>
    %c2 = arith.constant 2 : index
    %c0_14 = arith.constant 0 : index
    %c0_15 = arith.constant 0 : index
    %16 = vector.load %arg3[%c2, %c0_14, %c0_15] : memref<11x256x128xbf16, #tpu.memory_space<vmem>>, vector<1x256x128xbf16>
    %17 = vector.shape_cast %16 : vector<1x256x128xbf16> to vector<256x128xbf16>
    %cst_16 = arith.constant dense<0.000000e+00> : vector<8x128xf32>
    %18 = tpu.matmul %15, %17, %cst_16 {dimension_numbers = #tpu.dot_dimension_numbers<[1], [0], [0], [1], [0, 0, 1, 1], [], []>} : vector<8x256xbf16>, vector<256x128xbf16>, vector<8x128xf32> -> vector<8x128xf32>
    %19 = arith.addf %14, %18 : vector<8x128xf32>
    %20 = vector.extract_strided_slice %3 {offsets = [1, 0], sizes = [8, 256], strides = [1, 1]} : vector<13x256xbf16> to vector<8x256xbf16>
    %c3 = arith.constant 3 : index
    %c0_17 = arith.constant 0 : index
    %c0_18 = arith.constant 0 : index
    %21 = vector.load %arg3[%c3, %c0_17, %c0_18] : memref<11x256x128xbf16, #tpu.memory_space<vmem>>, vector<1x256x128xbf16>
    %22 = vector.shape_cast %21 : vector<1x256x128xbf16> to vector<256x128xbf16>
    %cst_19 = arith.constant dense<0.000000e+00> : vector<8x128xf32>
    %23 = tpu.matmul %20, %22, %cst_19 {dimension_numbers = #tpu.dot_dimension_numbers<[1], [0], [0], [1], [0, 0, 1, 1], [], []>} : vector<8x256xbf16>, vector<256x128xbf16>, vector<8x128xf32> -> vector<8x128xf32>
    %24 = arith.addf %19, %23 : vector<8x128xf32>
    %25 = vector.extract_strided_slice %1 {offsets = [2, 0], sizes = [8, 256], strides = [1, 1]} : vector<13x256xbf16> to vector<8x256xbf16>
    %c4 = arith.constant 4 : index
    %c0_20 = arith.constant 0 : index
    %c0_21 = arith.constant 0 : index
    %26 = vector.load %arg3[%c4, %c0_20, %c0_21] : memref<11x256x128xbf16, #tpu.memory_space<vmem>>, vector<1x256x128xbf16>
    %27 = vector.shape_cast %26 : vector<1x256x128xbf16> to vector<256x128xbf16>
    %cst_22 = arith.constant dense<0.000000e+00> : vector<8x128xf32>
    %28 = tpu.matmul %25, %27, %cst_22 {dimension_numbers = #tpu.dot_dimension_numbers<[1], [0], [0], [1], [0, 0, 1, 1], [], []>} : vector<8x256xbf16>, vector<256x128xbf16>, vector<8x128xf32> -> vector<8x128xf32>
    %29 = arith.addf %24, %28 : vector<8x128xf32>
    %30 = vector.extract_strided_slice %3 {offsets = [2, 0], sizes = [8, 256], strides = [1, 1]} : vector<13x256xbf16> to vector<8x256xbf16>
    %c5 = arith.constant 5 : index
    %c0_23 = arith.constant 0 : index
    %c0_24 = arith.constant 0 : index
    %31 = vector.load %arg3[%c5, %c0_23, %c0_24] : memref<11x256x128xbf16, #tpu.memory_space<vmem>>, vector<1x256x128xbf16>
    %32 = vector.shape_cast %31 : vector<1x256x128xbf16> to vector<256x128xbf16>
    %cst_25 = arith.constant dense<0.000000e+00> : vector<8x128xf32>
    %33 = tpu.matmul %30, %32, %cst_25 {dimension_numbers = #tpu.dot_dimension_numbers<[1], [0], [0], [1], [0, 0, 1, 1], [], []>} : vector<8x256xbf16>, vector<256x128xbf16>, vector<8x128xf32> -> vector<8x128xf32>
    %34 = arith.addf %29, %33 : vector<8x128xf32>
    %35 = vector.extract_strided_slice %1 {offsets = [3, 0], sizes = [8, 256], strides = [1, 1]} : vector<13x256xbf16> to vector<8x256xbf16>
    %c6 = arith.constant 6 : index
    %c0_26 = arith.constant 0 : index
    %c0_27 = arith.constant 0 : index
    %36 = vector.load %arg3[%c6, %c0_26, %c0_27] : memref<11x256x128xbf16, #tpu.memory_space<vmem>>, vector<1x256x128xbf16>
    %37 = vector.shape_cast %36 : vector<1x256x128xbf16> to vector<256x128xbf16>
    %cst_28 = arith.constant dense<0.000000e+00> : vector<8x128xf32>
    %38 = tpu.matmul %35, %37, %cst_28 {dimension_numbers = #tpu.dot_dimension_numbers<[1], [0], [0], [1], [0, 0, 1, 1], [], []>} : vector<8x256xbf16>, vector<256x128xbf16>, vector<8x128xf32> -> vector<8x128xf32>
    %39 = arith.addf %34, %38 : vector<8x128xf32>
    %40 = vector.extract_strided_slice %3 {offsets = [3, 0], sizes = [8, 256], strides = [1, 1]} : vector<13x256xbf16> to vector<8x256xbf16>
    %c7 = arith.constant 7 : index
    %c0_29 = arith.constant 0 : index
    %c0_30 = arith.constant 0 : index
    %41 = vector.load %arg3[%c7, %c0_29, %c0_30] : memref<11x256x128xbf16, #tpu.memory_space<vmem>>, vector<1x256x128xbf16>
    %42 = vector.shape_cast %41 : vector<1x256x128xbf16> to vector<256x128xbf16>
    %cst_31 = arith.constant dense<0.000000e+00> : vector<8x128xf32>
    %43 = tpu.matmul %40, %42, %cst_31 {dimension_numbers = #tpu.dot_dimension_numbers<[1], [0], [0], [1], [0, 0, 1, 1], [], []>} : vector<8x256xbf16>, vector<256x128xbf16>, vector<8x128xf32> -> vector<8x128xf32>
    %44 = arith.addf %39, %43 : vector<8x128xf32>
    %45 = vector.extract_strided_slice %1 {offsets = [4, 0], sizes = [8, 256], strides = [1, 1]} : vector<13x256xbf16> to vector<8x256xbf16>
    %c8 = arith.constant 8 : index
    %c0_32 = arith.constant 0 : index
    %c0_33 = arith.constant 0 : index
    %46 = vector.load %arg3[%c8, %c0_32, %c0_33] : memref<11x256x128xbf16, #tpu.memory_space<vmem>>, vector<1x256x128xbf16>
    %47 = vector.shape_cast %46 : vector<1x256x128xbf16> to vector<256x128xbf16>
    %cst_34 = arith.constant dense<0.000000e+00> : vector<8x128xf32>
    %48 = tpu.matmul %45, %47, %cst_34 {dimension_numbers = #tpu.dot_dimension_numbers<[1], [0], [0], [1], [0, 0, 1, 1], [], []>} : vector<8x256xbf16>, vector<256x128xbf16>, vector<8x128xf32> -> vector<8x128xf32>
    %49 = arith.addf %44, %48 : vector<8x128xf32>
    %50 = vector.extract_strided_slice %3 {offsets = [4, 0], sizes = [8, 256], strides = [1, 1]} : vector<13x256xbf16> to vector<8x256xbf16>
    %c9 = arith.constant 9 : index
    %c0_35 = arith.constant 0 : index
    %c0_36 = arith.constant 0 : index
    %51 = vector.load %arg3[%c9, %c0_35, %c0_36] : memref<11x256x128xbf16, #tpu.memory_space<vmem>>, vector<1x256x128xbf16>
    %52 = vector.shape_cast %51 : vector<1x256x128xbf16> to vector<256x128xbf16>
    %cst_37 = arith.constant dense<0.000000e+00> : vector<8x128xf32>
    %53 = tpu.matmul %50, %52, %cst_37 {dimension_numbers = #tpu.dot_dimension_numbers<[1], [0], [0], [1], [0, 0, 1, 1], [], []>} : vector<8x256xbf16>, vector<256x128xbf16>, vector<8x128xf32> -> vector<8x128xf32>
    %54 = arith.addf %49, %53 : vector<8x128xf32>
    %55 = vector.extract_strided_slice %1 {offsets = [5, 0], sizes = [8, 256], strides = [1, 1]} : vector<13x256xbf16> to vector<8x256xbf16>
    %c10 = arith.constant 10 : index
    %c0_38 = arith.constant 0 : index
    %c0_39 = arith.constant 0 : index
    %56 = vector.load %arg3[%c10, %c0_38, %c0_39] : memref<11x256x128xbf16, #tpu.memory_space<vmem>>, vector<1x256x128xbf16>
    %57 = vector.shape_cast %56 : vector<1x256x128xbf16> to vector<256x128xbf16>
    %cst_40 = arith.constant dense<0.000000e+00> : vector<8x128xf32>
    %58 = tpu.matmul %55, %57, %cst_40 {dimension_numbers = #tpu.dot_dimension_numbers<[1], [0], [0], [1], [0, 0, 1, 1], [], []>} : vector<8x256xbf16>, vector<256x128xbf16>, vector<8x128xf32> -> vector<8x128xf32>
    %59 = arith.addf %54, %58 : vector<8x128xf32>
    %c0_41 = arith.constant 0 : index
    %c0_42 = arith.constant 0 : index
    %60 = vector.load %arg4[%c0_41, %c0_42] : memref<1x128xf32, #tpu.memory_space<vmem>>, vector<1x128xf32>
    %61 = vector.broadcast %60 : vector<1x128xf32> to vector<8x128xf32>
    %62 = arith.addf %59, %61 : vector<8x128xf32>
    %63 = arith.truncf %62 : vector<8x128xf32> to vector<8x128xbf16>
    %c0_43 = arith.constant 0 : index
    %c0_44 = arith.constant 0 : index
    %c0_45 = arith.constant 0 : index
    %64 = vector.load %arg5[%c0_43, %c0_44, %c0_45] : memref<1x8x128xbf16, #tpu.memory_space<vmem>>, vector<1x8x128xbf16>
    %65 = vector.shape_cast %64 : vector<1x8x128xbf16> to vector<8x128xbf16>
    %66 = vector.shape_cast %63 : vector<8x128xbf16> to vector<1x8x128xbf16>
    tpu.vector_store %arg5[%c0_43, %c0_44, %c0_45], %66 {strides = array<i32>} : memref<1x8x128xbf16, #tpu.memory_space<vmem>>, vector<1x8x128xbf16>,
    return
  }
  func.func @transform_0(%arg0: i32, %arg1: i32) -> (i32, i32, i32, i32) {
    %c0_i32 = arith.constant 0 : i32
    %c0_i32_0 = arith.constant 0 : i32
    %c0_i32_1 = arith.constant 0 : i32
    %c0_i32_2 = arith.constant 0 : i32
    return %arg0, %c0_i32, %c0_i32_0, %c0_i32_1 : i32, i32, i32, i32
  }
  func.func @transform_1(%arg0: i32, %arg1: i32) -> (i32, i32, i32) {
    %c0_i32 = arith.constant 0 : i32
    %c0_i32_0 = arith.constant 0 : i32
    %c0_i32_1 = arith.constant 0 : i32
    return %c0_i32, %c0_i32_0, %arg1 : i32, i32, i32
  }
  func.func @transform_2(%arg0: i32, %arg1: i32) -> (i32, i32) {
    %c0_i32 = arith.constant 0 : i32
    %c0_i32_0 = arith.constant 0 : i32
    return %c0_i32, %arg1 : i32, i32
  }
  func.func @transform_3(%arg0: i32, %arg1: i32) -> (i32, i32, i32) {
    %c0_i32 = arith.constant 0 : i32
    %c0_i32_0 = arith.constant 0 : i32
    return %arg0, %c0_i32, %arg1 : i32, i32, i32
  }
}

module attributes {stable_mosaic.version = 11 : i64} {
  func.func @_conv_mm_kernel(%arg0: i32, %arg1: i32, %arg2: memref<1x1x8x128xbf16, #tpu.memory_space<vmem>>, %arg3: memref<1x128x256xbf16, #tpu.memory_space<vmem>>, %arg4: memref<1x256xf32, #tpu.memory_space<vmem>>, %arg5: memref<1x8x256xbf16, #tpu.memory_space<vmem>>, %arg6: memref<1x1x256xf32, #tpu.memory_space<vmem>>) attributes {dimension_semantics = [#tpu.dimension_semantics<parallel>, #tpu.dimension_semantics<parallel>], iteration_bounds = array<i64: 2, 2>, scalar_prefetch = 0 : i64, scratch_operands = 0 : i64, tpu.core_type = #tpu.core_type<tc>, window_params = [{transform_indices = @transform_0, window_bounds = array<i64: 1, 1, 8, 128>}, {transform_indices = @transform_1, window_bounds = array<i64: 1, 128, 256>}, {transform_indices = @transform_2, window_bounds = array<i64: 1, 256>}, {transform_indices = @transform_3, window_bounds = array<i64: 1, 8, 256>}, {transform_indices = @transform_4, window_bounds = array<i64: 1, 1, 256>}]} {
    %c0 = arith.constant 0 : index
    %c0_0 = arith.constant 0 : index
    %c0_1 = arith.constant 0 : index
    %c0_2 = arith.constant 0 : index
    %0 = vector.load %arg2[%c0, %c0_0, %c0_1, %c0_2] : memref<1x1x8x128xbf16, #tpu.memory_space<vmem>>, vector<1x1x8x128xbf16>
    %1 = vector.shape_cast %0 : vector<1x1x8x128xbf16> to vector<8x128xbf16>
    %cst = arith.constant 0.000000e+00 : f32
    %2 = vector.broadcast %cst : f32 to vector<8x256xf32>
    %c0_3 = arith.constant 0 : index
    %c0_4 = arith.constant 0 : index
    %c0_5 = arith.constant 0 : index
    %3 = vector.load %arg3[%c0_3, %c0_4, %c0_5] : memref<1x128x256xbf16, #tpu.memory_space<vmem>>, vector<1x128x256xbf16>
    %4 = vector.shape_cast %3 : vector<1x128x256xbf16> to vector<128x256xbf16>
    %cst_6 = arith.constant dense<0.000000e+00> : vector<8x256xf32>
    %5 = tpu.matmul %1, %4, %cst_6 {dimension_numbers = #tpu.dot_dimension_numbers<[1], [0], [0], [1], [0, 0, 1, 1], [], []>} : vector<8x128xbf16>, vector<128x256xbf16>, vector<8x256xf32> -> vector<8x256xf32>
    %6 = arith.addf %2, %5 : vector<8x256xf32>
    %c0_7 = arith.constant 0 : index
    %c0_8 = arith.constant 0 : index
    %7 = vector.load %arg4[%c0_7, %c0_8] : memref<1x256xf32, #tpu.memory_space<vmem>>, vector<1x256xf32>
    %8 = vector.broadcast %7 : vector<1x256xf32> to vector<8x256xf32>
    %9 = arith.addf %6, %8 : vector<8x256xf32>
    %10 = arith.negf %9 : vector<8x256xf32>
    %11 = math.exp %10 : vector<8x256xf32>
    %cst_9 = arith.constant 1.000000e+00 : f32
    %12 = vector.broadcast %cst_9 : f32 to vector<8x256xf32>
    %13 = arith.addf %12, %11 : vector<8x256xf32>
    %14 = arith.divf %12, %13 : vector<8x256xf32>
    %15 = arith.mulf %9, %14 : vector<8x256xf32>
    %16 = arith.truncf %15 : vector<8x256xf32> to vector<8x256xbf16>
    %c0_10 = arith.constant 0 : index
    %c0_11 = arith.constant 0 : index
    %c0_12 = arith.constant 0 : index
    %17 = vector.load %arg5[%c0_10, %c0_11, %c0_12] : memref<1x8x256xbf16, #tpu.memory_space<vmem>>, vector<1x8x256xbf16>
    %18 = vector.shape_cast %17 : vector<1x8x256xbf16> to vector<8x256xbf16>
    %19 = vector.shape_cast %16 : vector<8x256xbf16> to vector<1x8x256xbf16>
    tpu.vector_store %arg5[%c0_10, %c0_11, %c0_12], %19 {strides = array<i32>} : memref<1x8x256xbf16, #tpu.memory_space<vmem>>, vector<1x8x256xbf16>,
    %c1_i32 = arith.constant 1 : i32
    %c0_i32 = arith.constant 0 : i32
    %20 = arith.cmpi eq, %c1_i32, %c0_i32 : i32
    %c1_i32_13 = arith.constant 1 : i32
    %21 = arith.select %20, %c1_i32_13, %c1_i32 : i32
    %22 = arith.remsi %arg0, %21 : i32
    %c0_i32_14 = arith.constant 0 : i32
    %23 = arith.cmpi ne, %22, %c0_i32_14 : i32
    %c0_i32_15 = arith.constant 0 : i32
    %24 = arith.cmpi slt, %22, %c0_i32_15 : i32
    %c0_i32_16 = arith.constant 0 : i32
    %25 = arith.cmpi slt, %21, %c0_i32_16 : i32
    %26 = arith.xori %24, %25 : i1
    %27 = arith.andi %26, %23 : i1
    %28 = arith.addi %22, %21 : i32
    %29 = arith.select %27, %28, %22 : i32
    %c8_i32 = arith.constant 8 : i32
    %30 = arith.muli %29, %c8_i32 : i32
    %31 = tpu.iota {dimensions = array<i32: 0>} : vector<8x1xi32>
    %32 = vector.broadcast %30 : i32 to vector<8x1xi32>
    %33 = arith.addi %32, %31 : vector<8x1xi32>
    %c4_i32 = arith.constant 4 : i32
    %34 = vector.broadcast %c4_i32 : i32 to vector<8x1xi32>
    %35 = arith.cmpi slt, %33, %34 : vector<8x1xi32>
    %cst_17 = arith.constant 0.000000e+00 : f32
    %36 = vector.shape_cast %35 : vector<8x1xi1> to vector<8x1xi1>
    %37 = vector.broadcast %36 : vector<8x1xi1> to vector<8x256xi1>
    %38 = vector.broadcast %cst_17 : f32 to vector<8x256xf32>
    %39 = arith.select %37, %15, %38 : vector<8x256xi1>, vector<8x256xf32>
    %cst_18 = arith.constant dense<0.000000e+00> : vector<256xf32>
    %40 = vector.multi_reduction <add>, %39, %cst_18 [0] : vector<8x256xf32> to vector<256xf32>
    %41 = vector.shape_cast %40 : vector<256xf32> to vector<1x256xf32>
    %c0_19 = arith.constant 0 : index
    %c0_20 = arith.constant 0 : index
    %c0_21 = arith.constant 0 : index
    %42 = vector.load %arg6[%c0_19, %c0_20, %c0_21] : memref<1x1x256xf32, #tpu.memory_space<vmem>>, vector<1x1x256xf32>
    %43 = vector.shape_cast %42 : vector<1x1x256xf32> to vector<1x256xf32>
    %44 = vector.shape_cast %41 : vector<1x256xf32> to vector<1x1x256xf32>
    tpu.vector_store %arg6[%c0_19, %c0_20, %c0_21], %44 {strides = array<i32>} : memref<1x1x256xf32, #tpu.memory_space<vmem>>, vector<1x1x256xf32>,
    return
  }
  func.func @transform_0(%arg0: i32, %arg1: i32) -> (i32, i32, i32, i32) {
    %c0_i32 = arith.constant 0 : i32
    %c0_i32_0 = arith.constant 0 : i32
    %c0_i32_1 = arith.constant 0 : i32
    %c0_i32_2 = arith.constant 0 : i32
    return %arg0, %c0_i32, %c0_i32_0, %c0_i32_1 : i32, i32, i32, i32
  }
  func.func @transform_1(%arg0: i32, %arg1: i32) -> (i32, i32, i32) {
    %c0_i32 = arith.constant 0 : i32
    %c0_i32_0 = arith.constant 0 : i32
    %c0_i32_1 = arith.constant 0 : i32
    return %c0_i32, %c0_i32_0, %arg1 : i32, i32, i32
  }
  func.func @transform_2(%arg0: i32, %arg1: i32) -> (i32, i32) {
    %c0_i32 = arith.constant 0 : i32
    %c0_i32_0 = arith.constant 0 : i32
    return %c0_i32, %arg1 : i32, i32
  }
  func.func @transform_3(%arg0: i32, %arg1: i32) -> (i32, i32, i32) {
    %c0_i32 = arith.constant 0 : i32
    %c0_i32_0 = arith.constant 0 : i32
    return %arg0, %c0_i32, %arg1 : i32, i32, i32
  }
  func.func @transform_4(%arg0: i32, %arg1: i32) -> (i32, i32, i32) {
    %c0_i32 = arith.constant 0 : i32
    %c0_i32_0 = arith.constant 0 : i32
    return %arg0, %c0_i32, %arg1 : i32, i32, i32
  }
}

module attributes {stable_mosaic.version = 11 : i64} {
  func.func @_conv_mm_kernel(%arg0: i32, %arg1: i32, %arg2: memref<1x1x18x512xbf16, #tpu.memory_space<vmem>>, %arg3: memref<11x512x128xbf16, #tpu.memory_space<vmem>>, %arg4: memref<1x128xf32, #tpu.memory_space<vmem>>, %arg5: memref<1x8x128xbf16, #tpu.memory_space<vmem>>, %arg6: memref<1x8x128xbf16, #tpu.memory_space<vmem>>) attributes {dimension_semantics = [#tpu.dimension_semantics<parallel>, #tpu.dimension_semantics<parallel>], iteration_bounds = array<i64: 2, 1>, scalar_prefetch = 0 : i64, scratch_operands = 0 : i64, tpu.core_type = #tpu.core_type<tc>, window_params = [{transform_indices = @transform_0, window_bounds = array<i64: 1, 1, 18, 512>}, {transform_indices = @transform_1, window_bounds = array<i64: 11, 512, 128>}, {transform_indices = @transform_2, window_bounds = array<i64: 1, 128>}, {transform_indices = @transform_3, window_bounds = array<i64: 1, 8, 128>}, {transform_indices = @transform_4, window_bounds = array<i64: 1, 8, 128>}]} {
    %c0 = arith.constant 0 : index
    %c0_0 = arith.constant 0 : index
    %c0_1 = arith.constant 0 : index
    %c0_2 = arith.constant 0 : index
    %0 = vector.load %arg2[%c0, %c0_0, %c0_1, %c0_2] : memref<1x1x18x512xbf16, #tpu.memory_space<vmem>>, vector<1x1x18x512xbf16>
    %1 = vector.shape_cast %0 : vector<1x1x18x512xbf16> to vector<18x512xbf16>
    %cst = arith.constant 0.000000e+00 : f32
    %2 = vector.broadcast %cst : f32 to vector<8x128xf32>
    %3 = vector.extract_strided_slice %1 {offsets = [0, 0], sizes = [8, 512], strides = [1, 1]} : vector<18x512xbf16> to vector<8x512xbf16>
    %c0_3 = arith.constant 0 : index
    %c0_4 = arith.constant 0 : index
    %c0_5 = arith.constant 0 : index
    %4 = vector.load %arg3[%c0_3, %c0_4, %c0_5] : memref<11x512x128xbf16, #tpu.memory_space<vmem>>, vector<1x512x128xbf16>
    %5 = vector.shape_cast %4 : vector<1x512x128xbf16> to vector<512x128xbf16>
    %cst_6 = arith.constant dense<0.000000e+00> : vector<8x128xf32>
    %6 = tpu.matmul %3, %5, %cst_6 {dimension_numbers = #tpu.dot_dimension_numbers<[1], [0], [0], [1], [0, 0, 1, 1], [], []>} : vector<8x512xbf16>, vector<512x128xbf16>, vector<8x128xf32> -> vector<8x128xf32>
    %7 = arith.addf %2, %6 : vector<8x128xf32>
    %8 = vector.extract_strided_slice %1 {offsets = [1, 0], sizes = [8, 512], strides = [1, 1]} : vector<18x512xbf16> to vector<8x512xbf16>
    %c1 = arith.constant 1 : index
    %c0_7 = arith.constant 0 : index
    %c0_8 = arith.constant 0 : index
    %9 = vector.load %arg3[%c1, %c0_7, %c0_8] : memref<11x512x128xbf16, #tpu.memory_space<vmem>>, vector<1x512x128xbf16>
    %10 = vector.shape_cast %9 : vector<1x512x128xbf16> to vector<512x128xbf16>
    %cst_9 = arith.constant dense<0.000000e+00> : vector<8x128xf32>
    %11 = tpu.matmul %8, %10, %cst_9 {dimension_numbers = #tpu.dot_dimension_numbers<[1], [0], [0], [1], [0, 0, 1, 1], [], []>} : vector<8x512xbf16>, vector<512x128xbf16>, vector<8x128xf32> -> vector<8x128xf32>
    %12 = arith.addf %7, %11 : vector<8x128xf32>
    %13 = vector.extract_strided_slice %1 {offsets = [2, 0], sizes = [8, 512], strides = [1, 1]} : vector<18x512xbf16> to vector<8x512xbf16>
    %c2 = arith.constant 2 : index
    %c0_10 = arith.constant 0 : index
    %c0_11 = arith.constant 0 : index
    %14 = vector.load %arg3[%c2, %c0_10, %c0_11] : memref<11x512x128xbf16, #tpu.memory_space<vmem>>, vector<1x512x128xbf16>
    %15 = vector.shape_cast %14 : vector<1x512x128xbf16> to vector<512x128xbf16>
    %cst_12 = arith.constant dense<0.000000e+00> : vector<8x128xf32>
    %16 = tpu.matmul %13, %15, %cst_12 {dimension_numbers = #tpu.dot_dimension_numbers<[1], [0], [0], [1], [0, 0, 1, 1], [], []>} : vector<8x512xbf16>, vector<512x128xbf16>, vector<8x128xf32> -> vector<8x128xf32>
    %17 = arith.addf %12, %16 : vector<8x128xf32>
    %18 = vector.extract_strided_slice %1 {offsets = [3, 0], sizes = [8, 512], strides = [1, 1]} : vector<18x512xbf16> to vector<8x512xbf16>
    %c3 = arith.constant 3 : index
    %c0_13 = arith.constant 0 : index
    %c0_14 = arith.constant 0 : index
    %19 = vector.load %arg3[%c3, %c0_13, %c0_14] : memref<11x512x128xbf16, #tpu.memory_space<vmem>>, vector<1x512x128xbf16>
    %20 = vector.shape_cast %19 : vector<1x512x128xbf16> to vector<512x128xbf16>
    %cst_15 = arith.constant dense<0.000000e+00> : vector<8x128xf32>
    %21 = tpu.matmul %18, %20, %cst_15 {dimension_numbers = #tpu.dot_dimension_numbers<[1], [0], [0], [1], [0, 0, 1, 1], [], []>} : vector<8x512xbf16>, vector<512x128xbf16>, vector<8x128xf32> -> vector<8x128xf32>
    %22 = arith.addf %17, %21 : vector<8x128xf32>
    %23 = vector.extract_strided_slice %1 {offsets = [4, 0], sizes = [8, 512], strides = [1, 1]} : vector<18x512xbf16> to vector<8x512xbf16>
    %c4 = arith.constant 4 : index
    %c0_16 = arith.constant 0 : index
    %c0_17 = arith.constant 0 : index
    %24 = vector.load %arg3[%c4, %c0_16, %c0_17] : memref<11x512x128xbf16, #tpu.memory_space<vmem>>, vector<1x512x128xbf16>
    %25 = vector.shape_cast %24 : vector<1x512x128xbf16> to vector<512x128xbf16>
    %cst_18 = arith.constant dense<0.000000e+00> : vector<8x128xf32>
    %26 = tpu.matmul %23, %25, %cst_18 {dimension_numbers = #tpu.dot_dimension_numbers<[1], [0], [0], [1], [0, 0, 1, 1], [], []>} : vector<8x512xbf16>, vector<512x128xbf16>, vector<8x128xf32> -> vector<8x128xf32>
    %27 = arith.addf %22, %26 : vector<8x128xf32>
    %28 = vector.extract_strided_slice %1 {offsets = [5, 0], sizes = [8, 512], strides = [1, 1]} : vector<18x512xbf16> to vector<8x512xbf16>
    %c5 = arith.constant 5 : index
    %c0_19 = arith.constant 0 : index
    %c0_20 = arith.constant 0 : index
    %29 = vector.load %arg3[%c5, %c0_19, %c0_20] : memref<11x512x128xbf16, #tpu.memory_space<vmem>>, vector<1x512x128xbf16>
    %30 = vector.shape_cast %29 : vector<1x512x128xbf16> to vector<512x128xbf16>
    %cst_21 = arith.constant dense<0.000000e+00> : vector<8x128xf32>
    %31 = tpu.matmul %28, %30, %cst_21 {dimension_numbers = #tpu.dot_dimension_numbers<[1], [0], [0], [1], [0, 0, 1, 1], [], []>} : vector<8x512xbf16>, vector<512x128xbf16>, vector<8x128xf32> -> vector<8x128xf32>
    %32 = arith.addf %27, %31 : vector<8x128xf32>
    %33 = vector.extract_strided_slice %1 {offsets = [6, 0], sizes = [8, 512], strides = [1, 1]} : vector<18x512xbf16> to vector<8x512xbf16>
    %c6 = arith.constant 6 : index
    %c0_22 = arith.constant 0 : index
    %c0_23 = arith.constant 0 : index
    %34 = vector.load %arg3[%c6, %c0_22, %c0_23] : memref<11x512x128xbf16, #tpu.memory_space<vmem>>, vector<1x512x128xbf16>
    %35 = vector.shape_cast %34 : vector<1x512x128xbf16> to vector<512x128xbf16>
    %cst_24 = arith.constant dense<0.000000e+00> : vector<8x128xf32>
    %36 = tpu.matmul %33, %35, %cst_24 {dimension_numbers = #tpu.dot_dimension_numbers<[1], [0], [0], [1], [0, 0, 1, 1], [], []>} : vector<8x512xbf16>, vector<512x128xbf16>, vector<8x128xf32> -> vector<8x128xf32>
    %37 = arith.addf %32, %36 : vector<8x128xf32>
    %38 = vector.extract_strided_slice %1 {offsets = [7, 0], sizes = [8, 512], strides = [1, 1]} : vector<18x512xbf16> to vector<8x512xbf16>
    %c7 = arith.constant 7 : index
    %c0_25 = arith.constant 0 : index
    %c0_26 = arith.constant 0 : index
    %39 = vector.load %arg3[%c7, %c0_25, %c0_26] : memref<11x512x128xbf16, #tpu.memory_space<vmem>>, vector<1x512x128xbf16>
    %40 = vector.shape_cast %39 : vector<1x512x128xbf16> to vector<512x128xbf16>
    %cst_27 = arith.constant dense<0.000000e+00> : vector<8x128xf32>
    %41 = tpu.matmul %38, %40, %cst_27 {dimension_numbers = #tpu.dot_dimension_numbers<[1], [0], [0], [1], [0, 0, 1, 1], [], []>} : vector<8x512xbf16>, vector<512x128xbf16>, vector<8x128xf32> -> vector<8x128xf32>
    %42 = arith.addf %37, %41 : vector<8x128xf32>
    %43 = vector.extract_strided_slice %1 {offsets = [8, 0], sizes = [8, 512], strides = [1, 1]} : vector<18x512xbf16> to vector<8x512xbf16>
    %c8 = arith.constant 8 : index
    %c0_28 = arith.constant 0 : index
    %c0_29 = arith.constant 0 : index
    %44 = vector.load %arg3[%c8, %c0_28, %c0_29] : memref<11x512x128xbf16, #tpu.memory_space<vmem>>, vector<1x512x128xbf16>
    %45 = vector.shape_cast %44 : vector<1x512x128xbf16> to vector<512x128xbf16>
    %cst_30 = arith.constant dense<0.000000e+00> : vector<8x128xf32>
    %46 = tpu.matmul %43, %45, %cst_30 {dimension_numbers = #tpu.dot_dimension_numbers<[1], [0], [0], [1], [0, 0, 1, 1], [], []>} : vector<8x512xbf16>, vector<512x128xbf16>, vector<8x128xf32> -> vector<8x128xf32>
    %47 = arith.addf %42, %46 : vector<8x128xf32>
    %48 = vector.extract_strided_slice %1 {offsets = [9, 0], sizes = [8, 512], strides = [1, 1]} : vector<18x512xbf16> to vector<8x512xbf16>
    %c9 = arith.constant 9 : index
    %c0_31 = arith.constant 0 : index
    %c0_32 = arith.constant 0 : index
    %49 = vector.load %arg3[%c9, %c0_31, %c0_32] : memref<11x512x128xbf16, #tpu.memory_space<vmem>>, vector<1x512x128xbf16>
    %50 = vector.shape_cast %49 : vector<1x512x128xbf16> to vector<512x128xbf16>
    %cst_33 = arith.constant dense<0.000000e+00> : vector<8x128xf32>
    %51 = tpu.matmul %48, %50, %cst_33 {dimension_numbers = #tpu.dot_dimension_numbers<[1], [0], [0], [1], [0, 0, 1, 1], [], []>} : vector<8x512xbf16>, vector<512x128xbf16>, vector<8x128xf32> -> vector<8x128xf32>
    %52 = arith.addf %47, %51 : vector<8x128xf32>
    %53 = vector.extract_strided_slice %1 {offsets = [10, 0], sizes = [8, 512], strides = [1, 1]} : vector<18x512xbf16> to vector<8x512xbf16>
    %c10 = arith.constant 10 : index
    %c0_34 = arith.constant 0 : index
    %c0_35 = arith.constant 0 : index
    %54 = vector.load %arg3[%c10, %c0_34, %c0_35] : memref<11x512x128xbf16, #tpu.memory_space<vmem>>, vector<1x512x128xbf16>
    %55 = vector.shape_cast %54 : vector<1x512x128xbf16> to vector<512x128xbf16>
    %cst_36 = arith.constant dense<0.000000e+00> : vector<8x128xf32>
    %56 = tpu.matmul %53, %55, %cst_36 {dimension_numbers = #tpu.dot_dimension_numbers<[1], [0], [0], [1], [0, 0, 1, 1], [], []>} : vector<8x512xbf16>, vector<512x128xbf16>, vector<8x128xf32> -> vector<8x128xf32>
    %57 = arith.addf %52, %56 : vector<8x128xf32>
    %c0_37 = arith.constant 0 : index
    %c0_38 = arith.constant 0 : index
    %58 = vector.load %arg4[%c0_37, %c0_38] : memref<1x128xf32, #tpu.memory_space<vmem>>, vector<1x128xf32>
    %59 = vector.broadcast %58 : vector<1x128xf32> to vector<8x128xf32>
    %60 = arith.addf %57, %59 : vector<8x128xf32>
    %c0_39 = arith.constant 0 : index
    %c0_40 = arith.constant 0 : index
    %c0_41 = arith.constant 0 : index
    %61 = vector.load %arg5[%c0_39, %c0_40, %c0_41] : memref<1x8x128xbf16, #tpu.memory_space<vmem>>, vector<1x8x128xbf16>
    %62 = vector.shape_cast %61 : vector<1x8x128xbf16> to vector<8x128xbf16>
    %63 = arith.extf %62 : vector<8x128xbf16> to vector<8x128xf32>
    %64 = arith.addf %60, %63 : vector<8x128xf32>
    %65 = arith.truncf %64 : vector<8x128xf32> to vector<8x128xbf16>
    %c0_42 = arith.constant 0 : index
    %c0_43 = arith.constant 0 : index
    %c0_44 = arith.constant 0 : index
    %66 = vector.load %arg6[%c0_42, %c0_43, %c0_44] : memref<1x8x128xbf16, #tpu.memory_space<vmem>>, vector<1x8x128xbf16>
    %67 = vector.shape_cast %66 : vector<1x8x128xbf16> to vector<8x128xbf16>
    %68 = vector.shape_cast %65 : vector<8x128xbf16> to vector<1x8x128xbf16>
    tpu.vector_store %arg6[%c0_42, %c0_43, %c0_44], %68 {strides = array<i32>} : memref<1x8x128xbf16, #tpu.memory_space<vmem>>, vector<1x8x128xbf16>,
    return
  }
  func.func @transform_0(%arg0: i32, %arg1: i32) -> (i32, i32, i32, i32) {
    %c0_i32 = arith.constant 0 : i32
    %c0_i32_0 = arith.constant 0 : i32
    %c0_i32_1 = arith.constant 0 : i32
    %c0_i32_2 = arith.constant 0 : i32
    return %arg0, %c0_i32, %c0_i32_0, %c0_i32_1 : i32, i32, i32, i32
  }
  func.func @transform_1(%arg0: i32, %arg1: i32) -> (i32, i32, i32) {
    %c0_i32 = arith.constant 0 : i32
    %c0_i32_0 = arith.constant 0 : i32
    %c0_i32_1 = arith.constant 0 : i32
    return %c0_i32, %c0_i32_0, %arg1 : i32, i32, i32
  }
  func.func @transform_2(%arg0: i32, %arg1: i32) -> (i32, i32) {
    %c0_i32 = arith.constant 0 : i32
    %c0_i32_0 = arith.constant 0 : i32
    return %c0_i32, %arg1 : i32, i32
  }
  func.func @transform_3(%arg0: i32, %arg1: i32) -> (i32, i32, i32) {
    %c0_i32 = arith.constant 0 : i32
    %c0_i32_0 = arith.constant 0 : i32
    return %arg0, %c0_i32, %arg1 : i32, i32, i32
  }
  func.func @transform_4(%arg0: i32, %arg1: i32) -> (i32, i32, i32) {
    %c0_i32 = arith.constant 0 : i32
    %c0_i32_0 = arith.constant 0 : i32
    return %arg0, %c0_i32, %arg1 : i32, i32, i32
  }
}

module attributes {stable_mosaic.version = 11 : i64} {
  func.func @_conv_mm_kernel(%arg0: i32, %arg1: i32, %arg2: memref<1x1x18x512xbf16, #tpu.memory_space<vmem>>, %arg3: memref<11x512x256xbf16, #tpu.memory_space<vmem>>, %arg4: memref<1x256xf32, #tpu.memory_space<vmem>>, %arg5: memref<1x8x256xbf16, #tpu.memory_space<vmem>>) attributes {dimension_semantics = [#tpu.dimension_semantics<parallel>, #tpu.dimension_semantics<parallel>], iteration_bounds = array<i64: 2, 1>, scalar_prefetch = 0 : i64, scratch_operands = 0 : i64, tpu.core_type = #tpu.core_type<tc>, window_params = [{transform_indices = @transform_0, window_bounds = array<i64: 1, 1, 18, 512>}, {transform_indices = @transform_1, window_bounds = array<i64: 11, 512, 256>}, {transform_indices = @transform_2, window_bounds = array<i64: 1, 256>}, {transform_indices = @transform_3, window_bounds = array<i64: 1, 8, 256>}]} {
    %c0 = arith.constant 0 : index
    %c0_0 = arith.constant 0 : index
    %c0_1 = arith.constant 0 : index
    %c0_2 = arith.constant 0 : index
    %0 = vector.load %arg2[%c0, %c0_0, %c0_1, %c0_2] : memref<1x1x18x512xbf16, #tpu.memory_space<vmem>>, vector<1x1x18x512xbf16>
    %1 = vector.shape_cast %0 : vector<1x1x18x512xbf16> to vector<18x512xbf16>
    %cst = arith.constant 0.000000e+00 : f32
    %2 = vector.broadcast %cst : f32 to vector<8x256xf32>
    %3 = vector.extract_strided_slice %1 {offsets = [0, 0], sizes = [8, 512], strides = [1, 1]} : vector<18x512xbf16> to vector<8x512xbf16>
    %c0_3 = arith.constant 0 : index
    %c0_4 = arith.constant 0 : index
    %c0_5 = arith.constant 0 : index
    %4 = vector.load %arg3[%c0_3, %c0_4, %c0_5] : memref<11x512x256xbf16, #tpu.memory_space<vmem>>, vector<1x512x256xbf16>
    %5 = vector.shape_cast %4 : vector<1x512x256xbf16> to vector<512x256xbf16>
    %cst_6 = arith.constant dense<0.000000e+00> : vector<8x256xf32>
    %6 = tpu.matmul %3, %5, %cst_6 {dimension_numbers = #tpu.dot_dimension_numbers<[1], [0], [0], [1], [0, 0, 1, 1], [], []>} : vector<8x512xbf16>, vector<512x256xbf16>, vector<8x256xf32> -> vector<8x256xf32>
    %7 = arith.addf %2, %6 : vector<8x256xf32>
    %8 = vector.extract_strided_slice %1 {offsets = [1, 0], sizes = [8, 512], strides = [1, 1]} : vector<18x512xbf16> to vector<8x512xbf16>
    %c1 = arith.constant 1 : index
    %c0_7 = arith.constant 0 : index
    %c0_8 = arith.constant 0 : index
    %9 = vector.load %arg3[%c1, %c0_7, %c0_8] : memref<11x512x256xbf16, #tpu.memory_space<vmem>>, vector<1x512x256xbf16>
    %10 = vector.shape_cast %9 : vector<1x512x256xbf16> to vector<512x256xbf16>
    %cst_9 = arith.constant dense<0.000000e+00> : vector<8x256xf32>
    %11 = tpu.matmul %8, %10, %cst_9 {dimension_numbers = #tpu.dot_dimension_numbers<[1], [0], [0], [1], [0, 0, 1, 1], [], []>} : vector<8x512xbf16>, vector<512x256xbf16>, vector<8x256xf32> -> vector<8x256xf32>
    %12 = arith.addf %7, %11 : vector<8x256xf32>
    %13 = vector.extract_strided_slice %1 {offsets = [2, 0], sizes = [8, 512], strides = [1, 1]} : vector<18x512xbf16> to vector<8x512xbf16>
    %c2 = arith.constant 2 : index
    %c0_10 = arith.constant 0 : index
    %c0_11 = arith.constant 0 : index
    %14 = vector.load %arg3[%c2, %c0_10, %c0_11] : memref<11x512x256xbf16, #tpu.memory_space<vmem>>, vector<1x512x256xbf16>
    %15 = vector.shape_cast %14 : vector<1x512x256xbf16> to vector<512x256xbf16>
    %cst_12 = arith.constant dense<0.000000e+00> : vector<8x256xf32>
    %16 = tpu.matmul %13, %15, %cst_12 {dimension_numbers = #tpu.dot_dimension_numbers<[1], [0], [0], [1], [0, 0, 1, 1], [], []>} : vector<8x512xbf16>, vector<512x256xbf16>, vector<8x256xf32> -> vector<8x256xf32>
    %17 = arith.addf %12, %16 : vector<8x256xf32>
    %18 = vector.extract_strided_slice %1 {offsets = [3, 0], sizes = [8, 512], strides = [1, 1]} : vector<18x512xbf16> to vector<8x512xbf16>
    %c3 = arith.constant 3 : index
    %c0_13 = arith.constant 0 : index
    %c0_14 = arith.constant 0 : index
    %19 = vector.load %arg3[%c3, %c0_13, %c0_14] : memref<11x512x256xbf16, #tpu.memory_space<vmem>>, vector<1x512x256xbf16>
    %20 = vector.shape_cast %19 : vector<1x512x256xbf16> to vector<512x256xbf16>
    %cst_15 = arith.constant dense<0.000000e+00> : vector<8x256xf32>
    %21 = tpu.matmul %18, %20, %cst_15 {dimension_numbers = #tpu.dot_dimension_numbers<[1], [0], [0], [1], [0, 0, 1, 1], [], []>} : vector<8x512xbf16>, vector<512x256xbf16>, vector<8x256xf32> -> vector<8x256xf32>
    %22 = arith.addf %17, %21 : vector<8x256xf32>
    %23 = vector.extract_strided_slice %1 {offsets = [4, 0], sizes = [8, 512], strides = [1, 1]} : vector<18x512xbf16> to vector<8x512xbf16>
    %c4 = arith.constant 4 : index
    %c0_16 = arith.constant 0 : index
    %c0_17 = arith.constant 0 : index
    %24 = vector.load %arg3[%c4, %c0_16, %c0_17] : memref<11x512x256xbf16, #tpu.memory_space<vmem>>, vector<1x512x256xbf16>
    %25 = vector.shape_cast %24 : vector<1x512x256xbf16> to vector<512x256xbf16>
    %cst_18 = arith.constant dense<0.000000e+00> : vector<8x256xf32>
    %26 = tpu.matmul %23, %25, %cst_18 {dimension_numbers = #tpu.dot_dimension_numbers<[1], [0], [0], [1], [0, 0, 1, 1], [], []>} : vector<8x512xbf16>, vector<512x256xbf16>, vector<8x256xf32> -> vector<8x256xf32>
    %27 = arith.addf %22, %26 : vector<8x256xf32>
    %28 = vector.extract_strided_slice %1 {offsets = [5, 0], sizes = [8, 512], strides = [1, 1]} : vector<18x512xbf16> to vector<8x512xbf16>
    %c5 = arith.constant 5 : index
    %c0_19 = arith.constant 0 : index
    %c0_20 = arith.constant 0 : index
    %29 = vector.load %arg3[%c5, %c0_19, %c0_20] : memref<11x512x256xbf16, #tpu.memory_space<vmem>>, vector<1x512x256xbf16>
    %30 = vector.shape_cast %29 : vector<1x512x256xbf16> to vector<512x256xbf16>
    %cst_21 = arith.constant dense<0.000000e+00> : vector<8x256xf32>
    %31 = tpu.matmul %28, %30, %cst_21 {dimension_numbers = #tpu.dot_dimension_numbers<[1], [0], [0], [1], [0, 0, 1, 1], [], []>} : vector<8x512xbf16>, vector<512x256xbf16>, vector<8x256xf32> -> vector<8x256xf32>
    %32 = arith.addf %27, %31 : vector<8x256xf32>
    %33 = vector.extract_strided_slice %1 {offsets = [6, 0], sizes = [8, 512], strides = [1, 1]} : vector<18x512xbf16> to vector<8x512xbf16>
    %c6 = arith.constant 6 : index
    %c0_22 = arith.constant 0 : index
    %c0_23 = arith.constant 0 : index
    %34 = vector.load %arg3[%c6, %c0_22, %c0_23] : memref<11x512x256xbf16, #tpu.memory_space<vmem>>, vector<1x512x256xbf16>
    %35 = vector.shape_cast %34 : vector<1x512x256xbf16> to vector<512x256xbf16>
    %cst_24 = arith.constant dense<0.000000e+00> : vector<8x256xf32>
    %36 = tpu.matmul %33, %35, %cst_24 {dimension_numbers = #tpu.dot_dimension_numbers<[1], [0], [0], [1], [0, 0, 1, 1], [], []>} : vector<8x512xbf16>, vector<512x256xbf16>, vector<8x256xf32> -> vector<8x256xf32>
    %37 = arith.addf %32, %36 : vector<8x256xf32>
    %38 = vector.extract_strided_slice %1 {offsets = [7, 0], sizes = [8, 512], strides = [1, 1]} : vector<18x512xbf16> to vector<8x512xbf16>
    %c7 = arith.constant 7 : index
    %c0_25 = arith.constant 0 : index
    %c0_26 = arith.constant 0 : index
    %39 = vector.load %arg3[%c7, %c0_25, %c0_26] : memref<11x512x256xbf16, #tpu.memory_space<vmem>>, vector<1x512x256xbf16>
    %40 = vector.shape_cast %39 : vector<1x512x256xbf16> to vector<512x256xbf16>
    %cst_27 = arith.constant dense<0.000000e+00> : vector<8x256xf32>
    %41 = tpu.matmul %38, %40, %cst_27 {dimension_numbers = #tpu.dot_dimension_numbers<[1], [0], [0], [1], [0, 0, 1, 1], [], []>} : vector<8x512xbf16>, vector<512x256xbf16>, vector<8x256xf32> -> vector<8x256xf32>
    %42 = arith.addf %37, %41 : vector<8x256xf32>
    %43 = vector.extract_strided_slice %1 {offsets = [8, 0], sizes = [8, 512], strides = [1, 1]} : vector<18x512xbf16> to vector<8x512xbf16>
    %c8 = arith.constant 8 : index
    %c0_28 = arith.constant 0 : index
    %c0_29 = arith.constant 0 : index
    %44 = vector.load %arg3[%c8, %c0_28, %c0_29] : memref<11x512x256xbf16, #tpu.memory_space<vmem>>, vector<1x512x256xbf16>
    %45 = vector.shape_cast %44 : vector<1x512x256xbf16> to vector<512x256xbf16>
    %cst_30 = arith.constant dense<0.000000e+00> : vector<8x256xf32>
    %46 = tpu.matmul %43, %45, %cst_30 {dimension_numbers = #tpu.dot_dimension_numbers<[1], [0], [0], [1], [0, 0, 1, 1], [], []>} : vector<8x512xbf16>, vector<512x256xbf16>, vector<8x256xf32> -> vector<8x256xf32>
    %47 = arith.addf %42, %46 : vector<8x256xf32>
    %48 = vector.extract_strided_slice %1 {offsets = [9, 0], sizes = [8, 512], strides = [1, 1]} : vector<18x512xbf16> to vector<8x512xbf16>
    %c9 = arith.constant 9 : index
    %c0_31 = arith.constant 0 : index
    %c0_32 = arith.constant 0 : index
    %49 = vector.load %arg3[%c9, %c0_31, %c0_32] : memref<11x512x256xbf16, #tpu.memory_space<vmem>>, vector<1x512x256xbf16>
    %50 = vector.shape_cast %49 : vector<1x512x256xbf16> to vector<512x256xbf16>
    %cst_33 = arith.constant dense<0.000000e+00> : vector<8x256xf32>
    %51 = tpu.matmul %48, %50, %cst_33 {dimension_numbers = #tpu.dot_dimension_numbers<[1], [0], [0], [1], [0, 0, 1, 1], [], []>} : vector<8x512xbf16>, vector<512x256xbf16>, vector<8x256xf32> -> vector<8x256xf32>
    %52 = arith.addf %47, %51 : vector<8x256xf32>
    %53 = vector.extract_strided_slice %1 {offsets = [10, 0], sizes = [8, 512], strides = [1, 1]} : vector<18x512xbf16> to vector<8x512xbf16>
    %c10 = arith.constant 10 : index
    %c0_34 = arith.constant 0 : index
    %c0_35 = arith.constant 0 : index
    %54 = vector.load %arg3[%c10, %c0_34, %c0_35] : memref<11x512x256xbf16, #tpu.memory_space<vmem>>, vector<1x512x256xbf16>
    %55 = vector.shape_cast %54 : vector<1x512x256xbf16> to vector<512x256xbf16>
    %cst_36 = arith.constant dense<0.000000e+00> : vector<8x256xf32>
    %56 = tpu.matmul %53, %55, %cst_36 {dimension_numbers = #tpu.dot_dimension_numbers<[1], [0], [0], [1], [0, 0, 1, 1], [], []>} : vector<8x512xbf16>, vector<512x256xbf16>, vector<8x256xf32> -> vector<8x256xf32>
    %57 = arith.addf %52, %56 : vector<8x256xf32>
    %c0_37 = arith.constant 0 : index
    %c0_38 = arith.constant 0 : index
    %58 = vector.load %arg4[%c0_37, %c0_38] : memref<1x256xf32, #tpu.memory_space<vmem>>, vector<1x256xf32>
    %59 = vector.broadcast %58 : vector<1x256xf32> to vector<8x256xf32>
    %60 = arith.addf %57, %59 : vector<8x256xf32>
    %61 = arith.truncf %60 : vector<8x256xf32> to vector<8x256xbf16>
    %c0_39 = arith.constant 0 : index
    %c0_40 = arith.constant 0 : index
    %c0_41 = arith.constant 0 : index
    %62 = vector.load %arg5[%c0_39, %c0_40, %c0_41] : memref<1x8x256xbf16, #tpu.memory_space<vmem>>, vector<1x8x256xbf16>
    %63 = vector.shape_cast %62 : vector<1x8x256xbf16> to vector<8x256xbf16>
    %64 = vector.shape_cast %61 : vector<8x256xbf16> to vector<1x8x256xbf16>
    tpu.vector_store %arg5[%c0_39, %c0_40, %c0_41], %64 {strides = array<i32>} : memref<1x8x256xbf16, #tpu.memory_space<vmem>>, vector<1x8x256xbf16>,
    return
  }
  func.func @transform_0(%arg0: i32, %arg1: i32) -> (i32, i32, i32, i32) {
    %c0_i32 = arith.constant 0 : i32
    %c0_i32_0 = arith.constant 0 : i32
    %c0_i32_1 = arith.constant 0 : i32
    %c0_i32_2 = arith.constant 0 : i32
    return %arg0, %c0_i32, %c0_i32_0, %c0_i32_1 : i32, i32, i32, i32
  }
  func.func @transform_1(%arg0: i32, %arg1: i32) -> (i32, i32, i32) {
    %c0_i32 = arith.constant 0 : i32
    %c0_i32_0 = arith.constant 0 : i32
    %c0_i32_1 = arith.constant 0 : i32
    return %c0_i32, %c0_i32_0, %arg1 : i32, i32, i32
  }
  func.func @transform_2(%arg0: i32, %arg1: i32) -> (i32, i32) {
    %c0_i32 = arith.constant 0 : i32
    %c0_i32_0 = arith.constant 0 : i32
    return %c0_i32, %arg1 : i32, i32
  }
  func.func @transform_3(%arg0: i32, %arg1: i32) -> (i32, i32, i32) {
    %c0_i32 = arith.constant 0 : i32
    %c0_i32_0 = arith.constant 0 : i32
    return %arg0, %c0_i32, %arg1 : i32, i32, i32
  }
}

module attributes {stable_mosaic.version = 11 : i64} {
  func.func @_conv_mm_kernel(%arg0: i32, %arg1: i32, %arg2: memref<1x1x8x256xbf16, #tpu.memory_space<vmem>>, %arg3: memref<1x256x128xbf16, #tpu.memory_space<vmem>>, %arg4: memref<1x128xf32, #tpu.memory_space<vmem>>, %arg5: memref<1x8x128xf32, #tpu.memory_space<vmem>>) attributes {dimension_semantics = [#tpu.dimension_semantics<parallel>, #tpu.dimension_semantics<parallel>], iteration_bounds = array<i64: 2, 1>, scalar_prefetch = 0 : i64, scratch_operands = 0 : i64, tpu.core_type = #tpu.core_type<tc>, window_params = [{transform_indices = @transform_0, window_bounds = array<i64: 1, 1, 8, 256>}, {transform_indices = @transform_1, window_bounds = array<i64: 1, 256, 128>}, {transform_indices = @transform_2, window_bounds = array<i64: 1, 128>}, {transform_indices = @transform_3, window_bounds = array<i64: 1, 8, 128>}]} {
    %c0 = arith.constant 0 : index
    %c0_0 = arith.constant 0 : index
    %c0_1 = arith.constant 0 : index
    %c0_2 = arith.constant 0 : index
    %0 = vector.load %arg2[%c0, %c0_0, %c0_1, %c0_2] : memref<1x1x8x256xbf16, #tpu.memory_space<vmem>>, vector<1x1x8x256xbf16>
    %1 = vector.shape_cast %0 : vector<1x1x8x256xbf16> to vector<8x256xbf16>
    %cst = arith.constant 0.000000e+00 : f32
    %2 = vector.broadcast %cst : f32 to vector<8x128xf32>
    %c0_3 = arith.constant 0 : index
    %c0_4 = arith.constant 0 : index
    %c0_5 = arith.constant 0 : index
    %3 = vector.load %arg3[%c0_3, %c0_4, %c0_5] : memref<1x256x128xbf16, #tpu.memory_space<vmem>>, vector<1x256x128xbf16>
    %4 = vector.shape_cast %3 : vector<1x256x128xbf16> to vector<256x128xbf16>
    %cst_6 = arith.constant dense<0.000000e+00> : vector<8x128xf32>
    %5 = tpu.matmul %1, %4, %cst_6 {dimension_numbers = #tpu.dot_dimension_numbers<[1], [0], [0], [1], [0, 0, 1, 1], [], []>} : vector<8x256xbf16>, vector<256x128xbf16>, vector<8x128xf32> -> vector<8x128xf32>
    %6 = arith.addf %2, %5 : vector<8x128xf32>
    %c0_7 = arith.constant 0 : index
    %c0_8 = arith.constant 0 : index
    %7 = vector.load %arg4[%c0_7, %c0_8] : memref<1x128xf32, #tpu.memory_space<vmem>>, vector<1x128xf32>
    %8 = vector.broadcast %7 : vector<1x128xf32> to vector<8x128xf32>
    %9 = arith.addf %6, %8 : vector<8x128xf32>
    %10 = arith.negf %9 : vector<8x128xf32>
    %11 = math.exp %10 : vector<8x128xf32>
    %cst_9 = arith.constant 1.000000e+00 : f32
    %12 = vector.broadcast %cst_9 : f32 to vector<8x128xf32>
    %13 = arith.addf %12, %11 : vector<8x128xf32>
    %14 = arith.divf %12, %13 : vector<8x128xf32>
    %15 = arith.mulf %9, %14 : vector<8x128xf32>
    %c0_10 = arith.constant 0 : index
    %c0_11 = arith.constant 0 : index
    %c0_12 = arith.constant 0 : index
    %16 = vector.load %arg5[%c0_10, %c0_11, %c0_12] : memref<1x8x128xf32, #tpu.memory_space<vmem>>, vector<1x8x128xf32>
    %17 = vector.shape_cast %16 : vector<1x8x128xf32> to vector<8x128xf32>
    %18 = vector.shape_cast %15 : vector<8x128xf32> to vector<1x8x128xf32>
    tpu.vector_store %arg5[%c0_10, %c0_11, %c0_12], %18 {strides = array<i32>} : memref<1x8x128xf32, #tpu.memory_space<vmem>>, vector<1x8x128xf32>,
    return
  }
  func.func @transform_0(%arg0: i32, %arg1: i32) -> (i32, i32, i32, i32) {
    %c0_i32 = arith.constant 0 : i32
    %c0_i32_0 = arith.constant 0 : i32
    %c0_i32_1 = arith.constant 0 : i32
    %c0_i32_2 = arith.constant 0 : i32
    return %arg0, %c0_i32, %c0_i32_0, %c0_i32_1 : i32, i32, i32, i32
  }
  func.func @transform_1(%arg0: i32, %arg1: i32) -> (i32, i32, i32) {
    %c0_i32 = arith.constant 0 : i32
    %c0_i32_0 = arith.constant 0 : i32
    %c0_i32_1 = arith.constant 0 : i32
    return %c0_i32, %c0_i32_0, %arg1 : i32, i32, i32
  }
  func.func @transform_2(%arg0: i32, %arg1: i32) -> (i32, i32) {
    %c0_i32 = arith.constant 0 : i32
    %c0_i32_0 = arith.constant 0 : i32
    return %c0_i32, %arg1 : i32, i32
  }
  func.func @transform_3(%arg0: i32, %arg1: i32) -> (i32, i32, i32) {
    %c0_i32 = arith.constant 0 : i32
    %c0_i32_0 = arith.constant 0 : i32
    return %arg0, %c0_i32, %arg1 : i32, i32, i32
  }
}

</mosaic_0001>

<bundles_post_ra>
// kernel: efficientnet1d_forward.14
= control target key start
LH: loop header
LB: loop body
LE: loop exit
PB: predicated region body
PF: predicated region fallthrough
CT: control target
= control target key end

     0   :  { %8 = vsyncpa [#allocation3], 0  ;;  %s866_s12 = smov 0   ;;  %s868_s13 = smov 0   ;;  %s976_s0 = inlined_call_operand.vmem [shape: bf16[2,1,20,8], index: 0, kind: input, shape index: {}]   ;;  %s977_s1 = inlined_call_operand.vmem [shape: bf16[5,8,128], index: 1, kind: input, shape index: {}]   ;;  %s978_s2 = inlined_call_operand.hbm [shape: f32[1,128], index: 2, kind: input, shape index: {}]   ;;  %s979_s3 = inlined_call_operand.vmem [shape: bf16[2,16,128], index: 3, kind: output, shape index: {}]  }
   0x1   :  { %s870_s14 = smov 0  }
   0x2 LB: > { %s662_s15 = sadd.s32 4294967295, %s841_s14   ;;  %s26_s16 = sadd.s32 1, %s837_s13  ;;  %s841_s14 = sphi %s870_s14, %s14_s14   ;;  %s837_s13 = sphi %s868_s13, %s989_s13   ;;  %s833_s12 = sphi %s866_s12, %s988_s12  }
   0x3   : > { %p28_p0 = scmp.ge.s32.totalorder %s26_s16, 2  ;;  %p664_p1 = scmp.ge.s32.totalorder %s841_s14, 1 }
   0x4   : > { %p137_p2 = scmp.lt.s32.totalorder %s841_s14, 3  ;;  %p891_p4 = scmp.eq.s32.totalorder %s662_s15, 0 }
   0x5   : > { %s991_s16 = smov (%p28_p0, %s26_s16), 0  ;;  %s843_s19 = smov [#allocation2]  }
   0x6   : > { %p887_p3 = pnand %p664_p1, %p137_p2  ;;  %s159_s20 = sshll.u32 %s843_s19, 4  ;;  %s160_s20 = int_to_ptr.vmem [resolvable:$true] %s159_s20 }
   0x7   : > { %s984_s18 = scalar_select %p891_p4, 1, 0 }
   0x8   : > { %s983_s17 = scalar_select %p887_p3, 1, 0 }
   0x9   : > { %p744_p5 = pneg %p887_p3  ;;  %s787_s24 = scalar_lea.hbm %s978_s2, 16 }
   0xa   : > { %p788_p7 = scmp.ne.s32.totalorder %s978_s2, %s787_s24  ;;  %p794_p11 = scmp.lt.u32.totalorder %s787_s24, %s978_s2 }
   0xb   : > { %p899_p6 = pnand %p891_p4, %p744_p5 }
   0xd   : > { %p789_p8 = pneg %p899_p6 }
   0xf   : > { %p790_p9 = pnand %p789_p8, %p788_p7 }
  0x11   : > { %p791_p10 = pneg %p790_p9 }
  0x13   : > { %p796_p12 = pnand %p794_p11, %p791_p10 }
  0x15   : > { %799 = shalt.err (!%p796_p12)
}
  0x16   : > { %s800_s29 = scalar_lea.vmem %s160_s20, 16  ;;  %s807_s30 = scalar_lea.vmem %s160_s20, 32 }
  0x17   : > { %p801_p13 = scmp.ne.s32.totalorder %s160_s20, %s800_s29  ;;  %p808_p2 = scmp.lt.s32.totalorder %s160_s20, %s160_s20 }
  0x18   : > { %p809_p5 = scmp.lt.s32.totalorder %s807_s30, %s800_s29 }
  0x19   : > { %p803_p0 = pnand %p801_p13, %p789_p8 }
  0x1a   : > { %p810_p4 = por %p809_p5, %p808_p2 }
  0x1b   : > { %p804_p1 = pneg %p803_p0 }
  0x1d   : > { %p811_p3 = pnand %p810_p4, %p804_p1 }
  0x1f   : > { %814 = shalt.err (!%p811_p3)
}
  0x20   : > { %747 = dma.hbm_to_vmem [thread:$0]  (!%p899_p6), %s978_s2, 16, %s160_s20, [#allocation3]  }
  0x21   : > { %p986_p7 = scmp.ne.s32.totalorder %s983_s17, 0 }
  0x22   : > { %p987_p9 = scmp.ne.s32.totalorder (!%p986_p7), %s984_s18, 0 }
  0x23   : > { %180 = sbr.rel (%p986_p7) target bundleno = 322 (0x142), region = 32 }
  0x2a   : > { %828 = dma.done.wait (%p987_p9), [#allocation3], 16  }
  0x2b   : > { %830 = vsyncadd (%p987_p9), [#allocation3], 4294967280  ;;  %p211_p8 = scmp.lt.s32.totalorder %s833_s12, 1  ;;  %v844_v0 = vmov 0.0   ;;  %vm845_vm0 = vmmov 0   ;;  %vm260_vm1 = vcmask 1043456  }
  0x2c   : > { %709 = vmatprep.subr.bf16.mxu0 %v844_v0  ;;  %715 = vmatprep.subr.bf16.mxu1 %v844_v0  ;;  %v673_v1 = vld [vmem:[%s977_s1 + $0x4] sm:$0xf]  ;;  %v232_v2 = vld [vmem:[%s977_s1] sm:$0xf]  ;;  %vm256_vm2 = vcmask 64512   ;;  %vm353_vm5 = vcmask 1046528  }
  0x2d   : > { %711 = vmatprep.mubr.msk.bf16.mxu0 %vm845_vm0, %v844_v0  ;;  %717 = vmatprep.mubr.msk.bf16.mxu1 %vm845_vm0, %v844_v0  ;;  %s993_s12 = smov (!%p211_p8, %s833_s12), 1  ;;  %v262_v3 = vsel %vm260_vm1, %v673_v1, 0  ;;  %v308_v4 = vsel %vm260_vm1, %v232_v2, 0  ;;  %v680_v7 = vld [vmem:[%s977_s1 + $0xc] sm:$0xf]  ;;  %vm469_vm6 = vcmask 1045504  }
  0x2e   : > { %s739_s6 = smul.u32 12, %s993_s12  ;;  %710 = vmatpush3.bf16.msra.mxu0 %v262_v3  ;;  %716 = vmatpush3.bf16.msra.mxu1 %v308_v4  ;;  %v422_v11 = vsel %vm260_vm1, %v680_v7, 0  ;;  %v678_v17 = vld [vmem:[%s977_s1 + $0x8] sm:$0xf]  ;;  %vm243_vm3 = vsmask.f32 7424 }
  0x2f   : > { %721 = vmatprep.subr.bf16.mxu0 %v844_v0  ;;  %727 = vmatprep.subr.bf16.mxu1 %v844_v0  ;;  %vm408_vm4 = vsmask.f32 6400  ;;  %v361_v21 = vsel %vm260_vm1, %v678_v17, 0  ;;  %v682_v28 = vld [vmem:[%s977_s1 + $0x10] sm:$0xf]  ;;  %s691_s24 = sshll.u32 %s993_s12, 3 }
  0x30   : > { %s215_s9 = scalar_lea.vmem %s976_s0, %s739_s6  ;;  %v477_v30 = vsel %vm260_vm1, %v682_v28, 0  ;;  %v684_v57 = vld [vmem:[#allocation2] ss:$0 sm:$0xff]  ;;  %s227_s27 = scalar_lea.vmem %s979_s3, %s691_s24 }
  0x31   : > { %v777_v5 = vld [vmem:[%s215_s9] sm:$0xff]   ;;  %v778_v6 = vld [vmem:[%s215_s9 + $0x8] ss:$0 sps:$4 sm:$0x33]  }
  0x32   : > { %v245_v8 = vshrl.u32 %v777_v5, 16  ;;  %v247_v9 = vshll.u32 %v777_v5, 16  ;;  %v252_v10 = vshll.u32 %v778_v6, 16  ;;  %718 = vmatmul.mubr.msk.bf16.vlgmr.msra.gmra.mrb[0].mxu1 %vm256_vm2, %v777_v5  ;;  %v412_v12 = vshrl.u32 %v778_v6, 16 }
  0x33   : > { %728 = vmatpush3.bf16.msra.mxu1 %v422_v11  ;;  %729 = vmatprep.mubr.msk.bf16.mxu1 %vm845_vm0, %v844_v0  ;;  %v354_v26 = vrot.slane %v777_v5, 1  ;;  %v355_v27 = vrot.slane %v778_v6, 1  ;;  %v470_v31 = vrot.slane %v777_v5, 2  ;;  %v471_v32 = vrot.slane %v778_v6, 2 }
  0x34   : > { %v249_v13 = vrot.slane %v247_v9, 1  ;;  %v254_v14 = vrot.slane %v252_v10, 1  ;;  %v409_v15 = vrot.slane %v245_v8, 1  ;;  %v415_v16 = vrot.slane %v252_v10, 2 }
  0x35   : > { %v410_v18 = vrot.slane %v247_v9, 2  ;;  %v414_v19 = vrot.slane %v412_v12, 1  ;;  %v356_v29 = vsel %vm353_vm5, %v354_v26, %v355_v27  ;;  %v472_v33 = vsel %vm469_vm6, %v470_v31, %v471_v32 }
  0x36   : > { %v250_v20 = vor.u32 %v249_v13, %v245_v8 }
  0x37   : > { %v411_v22 = vor.u32 %v410_v18, %v409_v15  ;;  %v416_v23 = vor.u32 %v415_v16, %v414_v19 }
  0x38   : > { %v255_v24 = vsel %vm243_vm3, %v250_v20, %v254_v14 }
  0x39   : > { %712 = vmatmul.mubr.msk.bf16.vlgmr.msra.gmra.mrb[0].mxu0 %vm256_vm2, %v255_v24  ;;  %v417_v25 = vsel %vm408_vm4, %v411_v22, %v416_v23 }
  0x3a   : > { %722 = vmatpush3.bf16.msra.mxu0 %v361_v21  ;;  %723 = vmatprep.mubr.msk.bf16.mxu0 %vm845_vm0, %v844_v0 }
  0x3b   : > { %733 = vmatprep.subr.bf16.mxu0 %v844_v0  ;;  %730 = vmatmul.mubr.msk.bf16.vlgmr.msra.gmra.mrb[4].mxu1 %vm256_vm2, %v417_v25 }
  0x41   : > { %724 = vmatmul.mubr.msk.bf16.vlgmr.msra.gmra.mrb[4].mxu0 %vm256_vm2, %v356_v29 }
  0x42   : > { %734 = vmatpush3.bf16.msra.mxu0 %v477_v30  ;;  %735 = vmatprep.mubr.msk.bf16.mxu0 %vm845_vm0, %v844_v0 }
  0x49   : > { %736 = vmatmul.mubr.msk.bf16.vlgmr.msra.gmra.mrb[8].mxu0 %vm256_vm2, %v472_v33 }
 0x105   : > { %v344_v34 = vpop.f32.mrb[0].mxu1 }
 0x106   : > { %v719_v35 = vpop.f32.mrb[1].mxu1 }
 0x107   : > { %v347_v36 = vpop.f32.mrb[2].mxu1 }
 0x108   : > { %v720_v37 = vpop.f32.mrb[3].mxu1 }
 0x10c   : > { %v298_v38 = vpop.f32.mrb[0].mxu0 }
 0x10d   : > { %v345_v39 = vadd.f32 %v344_v34, %v298_v38  ;;  %v713_v40 = vpop.f32.mrb[1].mxu0 }
 0x10e   : > { %v301_v41 = vpop.f32.mrb[2].mxu0  ;;  %v458_v42 = vpop.f32.mrb[4].mxu1 }
 0x10f   : > { %v348_v43 = vadd.f32 %v347_v36, %v301_v41  ;;  %v714_v44 = vpop.f32.mrb[3].mxu0  ;;  %v731_v45 = vpop.f32.mrb[5].mxu1 }
 0x110   : > { %v461_v46 = vpop.f32.mrb[6].mxu1 }
 0x111   : > { %v732_v47 = vpop.f32.mrb[7].mxu1 }
 0x114   : > { %v397_v48 = vpop.f32.mrb[4].mxu0 }
 0x115   : > { %v404_v49 = vadd.f32 %v397_v48, %v345_v39  ;;  %v725_v50 = vpop.f32.mrb[5].mxu0 }
 0x116   : > { %v400_v51 = vpop.f32.mrb[6].mxu0 }
 0x117   : > { %v405_v52 = vadd.f32 %v400_v51, %v348_v43  ;;  %v465_v53 = vadd.f32 %v458_v42, %v404_v49  ;;  %v726_v54 = vpop.f32.mrb[7].mxu0 }
 0x119   : > { %v466_v55 = vadd.f32 %v461_v46, %v405_v52 }
 0x11c   : > { %v513_v56 = vpop.f32.mrb[8].mxu0 }
 0x11d   : > { %v520_v58 = vadd.f32 %v513_v56, %v465_v53  ;;  %v737_v59 = vpop.f32.mrb[9].mxu0 }
 0x11e   : > { %v516_v60 = vpop.f32.mrb[10].mxu0 }
 0x11f   : > { %v529_v61 = vadd.f32 %v684_v57, %v520_v58  ;;  %v521_v62 = vadd.f32 %v516_v60, %v466_v55  ;;  %v738_v63 = vpop.f32.mrb[11].mxu0 }
 0x121   : > { %v685_v0 = vmul.f32 -1.442695, %v529_v61  ;;  %v530_v1 = vadd.f32 %v684_v57, %v521_v62 }
 0x123   : > { %779 = vpow2.f32 %v685_v0  ;;  %v686_v2 = vmul.f32 -1.442695, %v530_v1 }
 0x125   : > { %781 = vpow2.f32 %v686_v2 }
 0x12d   : > { %v780_v3 = vpop.eup %779 }
 0x12e   : > { %v537_v4 = vadd.f32 1.0, %v780_v3 }
 0x12f   : > { %v782_v5 = vpop.eup %781 }
 0x130   : > { %783 = vrcp.f32 %v537_v4  ;;  %v538_v6 = vadd.f32 1.0, %v782_v5 }
 0x132   : > { %785 = vrcp.f32 %v538_v6 }
 0x13a   : > { %v784_v7 = vpop.eup %783 }
 0x13b   : > { %v543_v9 = vmul.f32 %v784_v7, %v529_v61 }
 0x13c   : > { %v786_v8 = vpop.eup %785 }
 0x13d   : > { %v544_v10 = vmul.f32 %v786_v8, %v530_v1 }
 0x13f   : > { %v697_v11 = vpack.c.bf16 %v544_v10, %v543_v9 }
 0x141   : > { %698 = vst [vmem:[%s227_s27] sm:$0xff] %v697_v11  }
 0x142 PF: > { %s14_s14 = sadd.s32 1, %s841_s14   ;;  %s988_s12 = smov %s837_s13 }
 0x143   : > { %p11_p3 = scmp.ge.s32.totalorder %s14_s14, 4   ;;  %s989_s13 = smov %s991_s16 }
 0x145   :  { %13 = sbr.rel (!%p11_p3) target bundleno = 2 (0x2), region = 75 }
 0x14c   :  { %582 = vsyncpa [#allocation3], 1 }
 0x14d   :  { %584 = vsyncpa [#allocation3 + $0x1], 1 }

// kernel: efficientnet1d_forward.15
= control target key start
LH: loop header
LB: loop body
LE: loop exit
PB: predicated region body
PF: predicated region fallthrough
CT: control target
= control target key end

     0   :  { %s718_s15 = smov 0   ;;  %s720_s16 = smov 0   ;;  %s789_s0 = inlined_call_operand.vmem [shape: bf16[2,1,16,128], index: 0, kind: input, shape index: {}]   ;;  %s790_s1 = inlined_call_operand.vmem [shape: bf16[1,128,128], index: 1, kind: input, shape index: {}]   ;;  %s791_s2 = inlined_call_operand.vmem [shape: f32[1,128], index: 2, kind: input, shape index: {}]   ;;  %s792_s3 = inlined_call_operand.vmem [shape: bf16[2,16,128], index: 3, kind: output, shape index: {0}]   ;;  %s793_s4 = inlined_call_operand.vmem [shape: f32[2,1,128], index: 4, kind: output, shape index: {1}]  }
   0x1   :  { %s722_s17 = smov 0  }
   0x2 LB: > { %s27_s18 = sadd.s32 1, %s685_s16  ;;  %p565_p0 = scmp.ge.s32.totalorder %s689_s17, 1  ;;  %s689_s17 = sphi %s722_s17, %s15_s17   ;;  %s685_s16 = sphi %s720_s16, %s795_s16   ;;  %s681_s15 = sphi %s718_s15, %s794_s15  }
   0x3   : > { %p29_p1 = scmp.ge.s32.totalorder %s27_s18, 2  ;;  %p198_p2 = scmp.lt.s32.totalorder %s689_s17, 3 }
   0x5   : > { %s797_s18 = smov (%p29_p1, %s27_s18), 0  ;;  %p199_p3 = pnand %p565_p0, %p198_p2 }
   0x6   : > { %v650_v0 = vld [vmem:[%s790_s1] sm:$0xff] (!%p199_p3)   ;;  %v691_v1 = vmov (!%p199_p3), 0.0   ;;  %v651_v2 = vld [vmem:[%s790_s1 + $0x8] sm:$0xff] (!%p199_p3)   ;;  %vm692_vm0 = vmmov (!%p199_p3), 0   ;;  %p240_p4 = scmp.lt.s32.totalorder (!%p199_p3), %s681_s15, 1  ;;  %v652_v3 = vld [vmem:[%s790_s1 + $0x10] sm:$0xff] (!%p199_p3)  }
   0x7   : > { %202 = sbr.rel (%p199_p3) target bundleno = 298 (0x12a), region = 32  ;;  %604 = vmatprep.subr.bf16.mxu0 (!%p199_p3), %v691_v1  ;;  %620 = vmatprep.mubr.msk.bf16.mxu0 (!%p199_p3), %vm692_vm0, %v691_v1  ;;  %v653_v4 = vld [vmem:[%s790_s1 + $0x18] sm:$0xff] (!%p199_p3)   ;;  %v654_v5 = vld [vmem:[%s790_s1 + $0x20] sm:$0xff] (!%p199_p3)   ;;  %v655_v6 = vld [vmem:[%s790_s1 + $0x28] sm:$0xff] (!%p199_p3)  }
   0x8   : > { %605 = vmatpush3.bf16.msra.mxu0 (!%p199_p3), %v650_v0  ;;  %v656_v7 = vld [vmem:[%s790_s1 + $0x30] sm:$0xff] (!%p199_p3)   ;;  %v657_v8 = vld [vmem:[%s790_s1 + $0x38] sm:$0xff] (!%p199_p3)   ;;  %v570_v10 = vld [vmem:[%s791_s2] ss:$0 sm:$0xff] (!%p199_p3) }
   0x9   : > { %606 = vmatprep.subr.bf16.mxu0 (!%p199_p3), %v691_v1 }
   0xc   : > { %607 = vmatpush3.bf16.msra.mxu0 (!%p199_p3), %v651_v2 }
   0xd   : > { %608 = vmatprep.subr.bf16.mxu0 (!%p199_p3), %v691_v1 }
   0xe   : > { %s799_s15 = smov (!%p240_p4, %s681_s15), 1 }
   0xf   : > { %s586_s25 = sshll.u32 %s799_s15, 3  ;;  %s265_s24 = scalar_lea.vmem %s793_s4, %s799_s15 }
  0x10   : > { %s244_s28 = scalar_lea.vmem %s789_s0, %s586_s25  ;;  %609 = vmatpush3.bf16.msra.mxu0 %v652_v3  ;;  %s259_s21 = scalar_lea.vmem %s792_s3, %s586_s25 }
  0x11   : > { %610 = vmatprep.subr.bf16.mxu0 %v691_v1  ;;  %v658_v9 = vld [vmem:[%s244_s28] sm:$0xff]  }
  0x14   : > { %611 = vmatpush3.bf16.msra.mxu0 %v653_v4 }
  0x15   : > { %612 = vmatprep.subr.bf16.mxu0 %v691_v1 }
  0x18   : > { %613 = vmatpush3.bf16.msra.mxu0 %v654_v5 }
  0x19   : > { %614 = vmatprep.subr.bf16.mxu0 %v691_v1 }
  0x1c   : > { %615 = vmatpush3.bf16.msra.mxu0 %v655_v6 }
  0x1d   : > { %616 = vmatprep.subr.bf16.mxu0 %v691_v1 }
  0x20   : > { %617 = vmatpush3.bf16.msra.mxu0 %v656_v7 }
  0x21   : > { %618 = vmatprep.subr.bf16.mxu0 %v691_v1 }
  0x24   : > { %619 = vmatpush3.bf16.msra.mxu0 %v657_v8 }
  0x27   : > { %621 = vmatmul.mubr.bf16.vlgmr.msra.gmra.mrb[0].mxu0 %v658_v9 }
  0xfa   : > { %v380_v11 = vpop.f32.mrb[0].mxu0 }
  0xfb   : > { %v381_v12 = vadd.f32 %v570_v10, %v380_v11  ;;  %v622_v13 = vpop.f32.mrb[1].mxu0 }
  0xfc   : > { %v383_v14 = vpop.f32.mrb[2].mxu0 }
  0xfd   : > { %v580_v15 = vmul.f32 -1.442695, %v381_v12  ;;  %v384_v16 = vadd.f32 %v570_v10, %v383_v14  ;;  %v623_v17 = vpop.f32.mrb[3].mxu0 }
  0xff   : > { %659 = vpow2.f32 %v580_v15  ;;  %v581_v18 = vmul.f32 -1.442695, %v384_v16 }
 0x101   : > { %661 = vpow2.f32 %v581_v18 }
 0x109   : > { %v660_v19 = vpop.eup %659 }
 0x10a   : > { %v393_v20 = vadd.f32 1.0, %v660_v19 }
 0x10b   : > { %v662_v21 = vpop.eup %661 }
 0x10c   : > { %663 = vrcp.f32 %v393_v20  ;;  %v394_v22 = vadd.f32 1.0, %v662_v21 }
 0x10e   : > { %665 = vrcp.f32 %v394_v22 }
 0x116   : > { %v664_v23 = vpop.eup %663 }
 0x117   : > { %v399_v25 = vmul.f32 %v664_v23, %v381_v12 }
 0x118   : > { %v666_v24 = vpop.eup %665 }
 0x119   : > { %v400_v26 = vmul.f32 %v666_v24, %v384_v16 }
 0x11b   : > { %v593_v27 = vpack.c.bf16 %v400_v26, %v399_v25  ;;  %v411_v28 = vadd.f32 %v400_v26, %v399_v25 }
 0x11d   : > { %594 = vst [vmem:[%s259_s21] sm:$0xff] %v593_v27   ;;  %v412_v29 = vrot.slane %v411_v28, 4 }
 0x11f   : > { %v413_v30 = vadd.f32 %v412_v29, %v411_v28 }
 0x121   : > { %v414_v31 = vrot.slane %v413_v30, 2 }
 0x123   : > { %v415_v32 = vadd.f32 %v414_v31, %v413_v30 }
 0x125   : > { %v416_v33 = vrot.slane %v415_v32, 1 }
 0x127   : > { %v417_v34 = vadd.f32 %v416_v33, %v415_v32 }
 0x129   : > { %418 = vst [vmem:[%s265_s24] sm:$0x1] %v417_v34 }
 0x12a PF: > { %s15_s17 = sadd.s32 1, %s689_s17   ;;  %s794_s15 = smov %s685_s16 }
 0x12b   : > { %p12_p5 = scmp.ge.s32.totalorder %s15_s17, 4   ;;  %s795_s16 = smov %s797_s18 }
 0x12d   :  { %14 = sbr.rel (!%p12_p5) target bundleno = 2 (0x2), region = 80 }

// kernel: efficientnet1d_forward.16
= control target key start
LH: loop header
LB: loop body
LE: loop exit
PB: predicated region body
PF: predicated region fallthrough
CT: control target
= control target key end

     0   :  { %s1670_s12 = smov 0   ;;  %s1672_s13 = smov 0   ;;  %s1987_s0 = inlined_call_operand.vmem [shape: bf16[2,1,22,128], index: 0, kind: input, shape index: {}]   ;;  %s1988_s1 = inlined_call_operand.vmem [shape: bf16[7,128,128], index: 1, kind: input, shape index: {}]   ;;  %s1989_s2 = inlined_call_operand.vmem [shape: f32[1,128], index: 2, kind: input, shape index: {}]   ;;  %s1990_s3 = inlined_call_operand.vmem [shape: bf16[2,16,128], index: 3, kind: output, shape index: {}]  }
   0x1   :  { %s1674_s14 = smov 0  }
   0x2 LB: > { %s25_s15 = sadd.s32 1, %s1642_s13  ;;  %p1165_p0 = scmp.ge.s32.totalorder %s1646_s14, 1  ;;  %s1646_s14 = sphi %s1674_s14, %s13_s14   ;;  %s1642_s13 = sphi %s1672_s13, %s1992_s13   ;;  %s1638_s12 = sphi %s1670_s12, %s1991_s12  }
   0x3   : > { %p27_p1 = scmp.ge.s32.totalorder %s25_s15, 2  ;;  %p168_p2 = scmp.lt.s32.totalorder %s1646_s14, 3 }
   0x5   : > { %s1994_s15 = smov (%p27_p1, %s25_s15), 0  ;;  %p169_p3 = pnand %p1165_p0, %p168_p2 }
   0x6   : > { %v1566_v0 = vld [vmem:[%s1988_s1 + $0x40] sm:$0xff] (!%p169_p3)   ;;  %v1648_v1 = vmov (!%p169_p3), 0.0   ;;  %v1568_v3 = vld [vmem:[%s1988_s1 + $0x48] sm:$0xff] (!%p169_p3)   ;;  %vm1649_vm0 = vmmov (!%p169_p3), 0   ;;  %p202_p4 = scmp.lt.s32.totalorder (!%p169_p3), %s1638_s12, 1  ;;  %v1570_v5 = vld [vmem:[%s1988_s1 + $0x50] sm:$0xff] (!%p169_p3)  }
   0x7   : > { %172 = sbr.rel (%p169_p3) target bundleno = 356 (0x164), region = 32  ;;  %1399 = vmatprep.subr.bf16.mxu0 (!%p169_p3), %v1648_v1  ;;  %1419 = vmatprep.subr.bf16.mxu1 (!%p169_p3), %v1648_v1  ;;  %v1567_v2 = vld [vmem:[%s1988_s1] sm:$0xff] (!%p169_p3)   ;;  %v1569_v4 = vld [vmem:[%s1988_s1 + $0x8] sm:$0xff] (!%p169_p3)   ;;  %v1571_v6 = vld [vmem:[%s1988_s1 + $0x10] sm:$0xff] (!%p169_p3)   ;;  %vm267_vm1 = vsmask.f32 (!%p169_p3), 7424 }
   0x8   : > { %1400 = vmatpush3.bf16.msra.mxu0 (!%p169_p3), %v1566_v0  ;;  %1415 = vmatprep.mubr.msk.bf16.mxu0 (!%p169_p3), %vm1649_vm0, %v1648_v1  ;;  %v1572_v7 = vld [vmem:[%s1988_s1 + $0x58] sm:$0xff] (!%p169_p3)   ;;  %v1574_v9 = vld [vmem:[%s1988_s1 + $0x60] sm:$0xff] (!%p169_p3)   ;;  %v1576_v13 = vld [vmem:[%s1988_s1 + $0x68] sm:$0xff] (!%p169_p3)   ;;  %vm709_vm2 = vcmask (!%p169_p3), 1045504   ;;  %vm939_vm3 = vcmask (!%p169_p3), 1044480   ;;  %vm477_vm5 = vcmask (!%p169_p3), 1046528  }
   0x9   : > { %1420 = vmatpush3.bf16.msra.mxu1 (!%p169_p3), %v1567_v2  ;;  %1401 = vmatprep.subr.bf16.mxu0 (!%p169_p3), %v1648_v1  ;;  %v1573_v8 = vld [vmem:[%s1988_s1 + $0x18] sm:$0xff] (!%p169_p3)   ;;  %v1575_v10 = vld [vmem:[%s1988_s1 + $0x20] sm:$0xff] (!%p169_p3)   ;;  %v1577_v14 = vld [vmem:[%s1988_s1 + $0x28] sm:$0xff] (!%p169_p3)   ;;  %vm822_vm4 = vsmask.f32 (!%p169_p3), 5376 }
   0xa   : > { %1421 = vmatprep.subr.bf16.mxu1 (!%p169_p3), %v1648_v1  ;;  %1435 = vmatprep.mubr.msk.bf16.mxu1 (!%p169_p3), %vm1649_vm0, %v1648_v1  ;;  %v1578_v16 = vld [vmem:[%s1988_s1 + $0x70] sm:$0xff] (!%p169_p3)   ;;  %v1580_v21 = vld [vmem:[%s1988_s1 + $0x78] sm:$0xff] (!%p169_p3)   ;;  %v1584_v26 = vld [vmem:[%s1988_s1 + $0x80] sm:$0xff] (!%p169_p3)   ;;  %vm590_vm6 = vsmask.f32 (!%p169_p3), 6400 }
   0xb   : > { %v1579_v20 = vld [vmem:[%s1988_s1 + $0x30] sm:$0xff] (!%p169_p3)   ;;  %v1581_v22 = vld [vmem:[%s1988_s1 + $0x38] sm:$0xff] (!%p169_p3)   ;;  %v1585_v28 = vld [vmem:[%s1988_s1 + $0xc0] sm:$0xff] (!%p169_p3)  }
   0xc   : > { %1402 = vmatpush3.bf16.msra.mxu0 (!%p169_p3), %v1568_v3  ;;  %v1586_v33 = vld [vmem:[%s1988_s1 + $0x88] sm:$0xff] (!%p169_p3)   ;;  %v1588_v36 = vld [vmem:[%s1988_s1 + $0x90] sm:$0xff] (!%p169_p3)   ;;  %v1590_v41 = vld [vmem:[%s1988_s1 + $0x98] sm:$0xff] (!%p169_p3)  }
   0xd   : > { %1422 = vmatpush3.bf16.msra.mxu1 (!%p169_p3), %v1569_v4  ;;  %1403 = vmatprep.subr.bf16.mxu0 (!%p169_p3), %v1648_v1  ;;  %v1587_v34 = vld [vmem:[%s1988_s1 + $0xc8] sm:$0xff] (!%p169_p3)   ;;  %v1589_v38 = vld [vmem:[%s1988_s1 + $0xd0] sm:$0xff] (!%p169_p3)   ;;  %v1591_v43 = vld [vmem:[%s1988_s1 + $0xd8] sm:$0xff] (!%p169_p3)  }
   0xe   : > { %s1996_s12 = smov (!%p202_p4, %s1638_s12), 1  ;;  %1423 = vmatprep.subr.bf16.mxu1 %v1648_v1  ;;  %v1592_v46 = vld [vmem:[%s1988_s1 + $0xa0] sm:$0xff]   ;;  %v1594_v49 = vld [vmem:[%s1988_s1 + $0xa8] sm:$0xff]   ;;  %v1596_v54 = vld [vmem:[%s1988_s1 + $0xb0] sm:$0xff]  }
   0xf   : > { %s1539_s30 = smul.u32 12, %s1996_s12  ;;  %v1593_v47 = vld [vmem:[%s1988_s1 + $0xe0] sm:$0xff]   ;;  %v1595_v50 = vld [vmem:[%s1988_s1 + $0xe8] sm:$0xff]   ;;  %v1597_v56 = vld [vmem:[%s1988_s1 + $0xf0] sm:$0xff]   ;;  %s1328_s19 = sshll.u32 %s1996_s12, 3 }
  0x10   : > { %1404 = vmatpush3.bf16.msra.mxu0 %v1570_v5  ;;  %v1598_v58 = vld [vmem:[%s1988_s1 + $0xb8] sm:$0xff]   ;;  %v1600_v2 = vld [vmem:[%s1988_s1 + $0x100] sm:$0xff]   ;;  %v1602_v5 = vld [vmem:[%s1988_s1 + $0x108] sm:$0xff]   ;;  %s221_s22 = scalar_lea.vmem %s1990_s3, %s1328_s19 }
  0x11   : > { %1424 = vmatpush3.bf16.msra.mxu1 %v1571_v6  ;;  %1405 = vmatprep.subr.bf16.mxu0 %v1648_v1  ;;  %s206_s10 = scalar_lea.vmem %s1987_s0, %s1539_s30  ;;  %v1599_v61 = vld [vmem:[%s1988_s1 + $0xf8] sm:$0xff]   ;;  %v1601_v4 = vld [vmem:[%s1988_s1 + $0x140] sm:$0xff]   ;;  %v1603_v6 = vld [vmem:[%s1988_s1 + $0x148] sm:$0xff]  }
  0x12   : > { %1425 = vmatprep.subr.bf16.mxu1 %v1648_v1  ;;  %v1738_v11 = vld [vmem:[%s206_s10] sm:$0xff]   ;;  %v1740_v12 = vld [vmem:[%s206_s10 + $0x8] ss:$0 sps:$4 sm:$0x77]  }
  0x13   : > { %v1750_v15 = vshll.u32 %v1738_v11, 16  ;;  %v1757_v17 = vshrl.u32 %v1738_v11, 16  ;;  %v1761_v19 = vshll.u32 %v1740_v12, 16  ;;  %v710_v27 = vrot.slane %v1738_v11, 2 }
  0x14   : > { %1406 = vmatpush3.bf16.msra.mxu0 %v1572_v7  ;;  %v711_v29 = vrot.slane %v1740_v12, 2  ;;  %v940_v37 = vrot.slane %v1738_v11, 3  ;;  %v941_v39 = vrot.slane %v1740_v12, 3  ;;  %v594_v42 = vshrl.u32 %v1740_v12, 16  ;;  %v1604_v7 = vld [vmem:[%s1988_s1 + $0x110] sm:$0xff]  }
  0x15   : > { %1426 = vmatpush3.bf16.msra.mxu1 %v1573_v8  ;;  %1407 = vmatprep.subr.bf16.mxu0 %v1648_v1  ;;  %v273_v18 = vrot.slane %v1750_v15, 1  ;;  %v278_v24 = vrot.slane %v1761_v19, 1  ;;  %v823_v30 = vrot.slane %v1757_v17, 2  ;;  %v824_v32 = vrot.slane %v1750_v15, 3  ;;  %v1605_v8 = vld [vmem:[%s1988_s1 + $0x150] sm:$0xff]  }
  0x16   : > { %1427 = vmatprep.subr.bf16.mxu1 %v1648_v1  ;;  %v1789_v31 = vsel %vm709_vm2, %v710_v27, %v711_v29  ;;  %v1815_v40 = vsel %vm939_vm3, %v940_v37, %v941_v39  ;;  %v826_v44 = vrot.slane %v594_v42, 2  ;;  %v827_v45 = vrot.slane %v1761_v19, 3 }
  0x17   : > { %v274_v23 = vor.u32 %v273_v18, %v1757_v17  ;;  %v825_v35 = vor.u32 %v824_v32, %v823_v30  ;;  %v591_v52 = vrot.slane %v1757_v17, 1  ;;  %v592_v53 = vrot.slane %v1750_v15, 2  ;;  %v1612_v15 = vld [vmem:[%s1988_s1 + $0x130] sm:$0xff]   ;;  %v1614_v17 = vld [vmem:[%s1988_s1 + $0x138] sm:$0xff]  }
  0x18   : > { %1408 = vmatpush3.bf16.msra.mxu0 %v1574_v9  ;;  %v828_v48 = vor.u32 %v827_v45, %v826_v44  ;;  %v597_v55 = vrot.slane %v1761_v19, 2  ;;  %v596_v57 = vrot.slane %v594_v42, 1  ;;  %v478_v59 = vrot.slane %v1738_v11, 1  ;;  %v1606_v9 = vld [vmem:[%s1988_s1 + $0x118] sm:$0xff]   ;;  %v1616_v19 = vld [vmem:[%s1988_s1 + $0x180] sm:$0xff]  }
  0x19   : > { %1428 = vmatpush3.bf16.msra.mxu1 %v1575_v10  ;;  %1409 = vmatprep.subr.bf16.mxu0 %v1648_v1  ;;  %v279_v25 = vsel %vm267_vm1, %v274_v23, %v278_v24  ;;  %v479_v60 = vrot.slane %v1740_v12, 1  ;;  %v593_v62 = vor.u32 %v592_v53, %v591_v52  ;;  %v1607_v10 = vld [vmem:[%s1988_s1 + $0x158] sm:$0xff]   ;;  %v1609_v12 = vld [vmem:[%s1988_s1 + $0x160] sm:$0xff]   ;;  %v1621_v24 = vld [vmem:[%s1988_s1 + $0x1a8] sm:$0xff]  }
  0x1a   : > { %1429 = vmatprep.subr.bf16.mxu1 %v1648_v1  ;;  %v1843_v51 = vsel %vm822_vm4, %v825_v35, %v828_v48  ;;  %v598_v63 = vor.u32 %v597_v55, %v596_v57  ;;  %v1615_v18 = vld [vmem:[%s1988_s1 + $0x178] sm:$0xff]   ;;  %v1620_v23 = vld [vmem:[%s1988_s1 + $0x1a0] sm:$0xff]  }
  0x1b   : > { %v480_v0 = vsel %vm477_vm5, %v478_v59, %v479_v60 }
  0x1c   : > { %1410 = vmatpush3.bf16.msra.mxu0 %v1576_v13  ;;  %v599_v3 = vsel %vm590_vm6, %v593_v62, %v598_v63  ;;  %v1610_v13 = vld [vmem:[%s1988_s1 + $0x128] sm:$0xff]   ;;  %v1323_v63 = vld [vmem:[%s1989_s2] ss:$0 sm:$0xff] }
  0x1d   : > { %1430 = vmatpush3.bf16.msra.mxu1 %v1577_v14  ;;  %1411 = vmatprep.subr.bf16.mxu0 %v1648_v1  ;;  %v1611_v14 = vld [vmem:[%s1988_s1 + $0x168] sm:$0xff]  }
  0x1e   : > { %1431 = vmatprep.subr.bf16.mxu1 %v1648_v1 }
  0x20   : > { %1412 = vmatpush3.bf16.msra.mxu0 %v1578_v16  ;;  %v1613_v16 = vld [vmem:[%s1988_s1 + $0x170] sm:$0xff]  }
  0x21   : > { %1432 = vmatpush3.bf16.msra.mxu1 %v1579_v20  ;;  %1413 = vmatprep.subr.bf16.mxu0 %v1648_v1  ;;  %v1617_v20 = vld [vmem:[%s1988_s1 + $0x188] sm:$0xff]  }
  0x22   : > { %1433 = vmatprep.subr.bf16.mxu1 %v1648_v1 }
  0x24   : > { %1414 = vmatpush3.bf16.msra.mxu0 %v1580_v21  ;;  %v1618_v21 = vld [vmem:[%s1988_s1 + $0x190] sm:$0xff]  }
  0x25   : > { %1434 = vmatpush3.bf16.msra.mxu1 %v1581_v22  ;;  %1439 = vmatprep.subr.bf16.mxu0 %v1648_v1  ;;  %v1619_v22 = vld [vmem:[%s1988_s1 + $0x198] sm:$0xff]  }
  0x26   : > { %1459 = vmatprep.subr.bf16.mxu1 %v1648_v1 }
  0x27   : > { %1416 = vmatmul.mubr.bf16.vlgmr.msra.gmra.mrb[0].mxu0 %v279_v25  ;;  %v1622_v25 = vld [vmem:[%s1988_s1 + $0x1b0] sm:$0xff]  }
  0x28   : > { %1436 = vmatmul.mubr.bf16.vlgmr.msra.gmra.mrb[0].mxu1 %v1738_v11  ;;  %1440 = vmatpush3.bf16.msra.mxu0 %v1584_v26  ;;  %v1608_v11 = vld [vmem:[%s1988_s1 + $0x120] sm:$0xff]   ;;  %v1623_v26 = vld [vmem:[%s1988_s1 + $0x1b8] sm:$0xff]  }
  0x29   : > { %1460 = vmatpush3.bf16.msra.mxu1 %v1585_v28  ;;  %1441 = vmatprep.subr.bf16.mxu0 %v1648_v1 }
  0x2a   : > { %1461 = vmatprep.subr.bf16.mxu1 %v1648_v1  ;;  %1455 = vmatprep.mubr.msk.bf16.mxu0 %vm1649_vm0, %v1648_v1 }
  0x2b   : > { %1475 = vmatprep.mubr.msk.bf16.mxu1 %vm1649_vm0, %v1648_v1 }
  0x2c   : > { %1442 = vmatpush3.bf16.msra.mxu0 %v1586_v33 }
  0x2d   : > { %1462 = vmatpush3.bf16.msra.mxu1 %v1587_v34  ;;  %1443 = vmatprep.subr.bf16.mxu0 %v1648_v1 }
  0x2e   : > { %1463 = vmatprep.subr.bf16.mxu1 %v1648_v1 }
  0x30   : > { %1444 = vmatpush3.bf16.msra.mxu0 %v1588_v36 }
  0x31   : > { %1464 = vmatpush3.bf16.msra.mxu1 %v1589_v38  ;;  %1445 = vmatprep.subr.bf16.mxu0 %v1648_v1 }
  0x32   : > { %1465 = vmatprep.subr.bf16.mxu1 %v1648_v1 }
  0x34   : > { %1446 = vmatpush3.bf16.msra.mxu0 %v1590_v41 }
  0x35   : > { %1466 = vmatpush3.bf16.msra.mxu1 %v1591_v43  ;;  %1447 = vmatprep.subr.bf16.mxu0 %v1648_v1 }
  0x36   : > { %1467 = vmatprep.subr.bf16.mxu1 %v1648_v1 }
  0x38   : > { %1448 = vmatpush3.bf16.msra.mxu0 %v1592_v46 }
  0x39   : > { %1468 = vmatpush3.bf16.msra.mxu1 %v1593_v47  ;;  %1449 = vmatprep.subr.bf16.mxu0 %v1648_v1 }
  0x3a   : > { %1469 = vmatprep.subr.bf16.mxu1 %v1648_v1 }
  0x3c   : > { %1450 = vmatpush3.bf16.msra.mxu0 %v1594_v49 }
  0x3d   : > { %1470 = vmatpush3.bf16.msra.mxu1 %v1595_v50  ;;  %1451 = vmatprep.subr.bf16.mxu0 %v1648_v1 }
  0x3e   : > { %1471 = vmatprep.subr.bf16.mxu1 %v1648_v1 }
  0x40   : > { %1452 = vmatpush3.bf16.msra.mxu0 %v1596_v54 }
  0x41   : > { %1472 = vmatpush3.bf16.msra.mxu1 %v1597_v56  ;;  %1453 = vmatprep.subr.bf16.mxu0 %v1648_v1 }
  0x42   : > { %1473 = vmatprep.subr.bf16.mxu1 %v1648_v1 }
  0x44   : > { %1454 = vmatpush3.bf16.msra.mxu0 %v1598_v58 }
  0x45   : > { %1474 = vmatpush3.bf16.msra.mxu1 %v1599_v61  ;;  %1479 = vmatprep.subr.bf16.mxu0 %v1648_v1 }
  0x46   : > { %1499 = vmatprep.subr.bf16.mxu1 %v1648_v1 }
  0x47   : > { %1456 = vmatmul.mubr.bf16.vlgmr.msra.gmra.mrb[4].mxu0 %v480_v0 }
  0x48   : > { %1480 = vmatpush3.bf16.msra.mxu0 %v1600_v2  ;;  %1476 = vmatmul.mubr.bf16.vlgmr.msra.gmra.mrb[4].mxu1 %v599_v3 }
  0x49   : > { %1500 = vmatpush3.bf16.msra.mxu1 %v1601_v4  ;;  %1481 = vmatprep.subr.bf16.mxu0 %v1648_v1 }
  0x4a   : > { %1501 = vmatprep.subr.bf16.mxu1 %v1648_v1  ;;  %1495 = vmatprep.mubr.msk.bf16.mxu0 %vm1649_vm0, %v1648_v1 }
  0x4b   : > { %1515 = vmatprep.mubr.msk.bf16.mxu1 %vm1649_vm0, %v1648_v1 }
  0x4c   : > { %1482 = vmatpush3.bf16.msra.mxu0 %v1602_v5 }
  0x4d   : > { %1502 = vmatpush3.bf16.msra.mxu1 %v1603_v6  ;;  %1483 = vmatprep.subr.bf16.mxu0 %v1648_v1 }
  0x4e   : > { %1503 = vmatprep.subr.bf16.mxu1 %v1648_v1 }
  0x50   : > { %1484 = vmatpush3.bf16.msra.mxu0 %v1604_v7 }
  0x51   : > { %1504 = vmatpush3.bf16.msra.mxu1 %v1605_v8  ;;  %1485 = vmatprep.subr.bf16.mxu0 %v1648_v1 }
  0x52   : > { %1505 = vmatprep.subr.bf16.mxu1 %v1648_v1 }
  0x54   : > { %1486 = vmatpush3.bf16.msra.mxu0 %v1606_v9 }
  0x55   : > { %1506 = vmatpush3.bf16.msra.mxu1 %v1607_v10  ;;  %1487 = vmatprep.subr.bf16.mxu0 %v1648_v1 }
  0x56   : > { %1507 = vmatprep.subr.bf16.mxu1 %v1648_v1 }
  0x58   : > { %1488 = vmatpush3.bf16.msra.mxu0 %v1608_v11 }
  0x59   : > { %1508 = vmatpush3.bf16.msra.mxu1 %v1609_v12  ;;  %1489 = vmatprep.subr.bf16.mxu0 %v1648_v1 }
  0x5a   : > { %1509 = vmatprep.subr.bf16.mxu1 %v1648_v1 }
  0x5c   : > { %1490 = vmatpush3.bf16.msra.mxu0 %v1610_v13 }
  0x5d   : > { %1510 = vmatpush3.bf16.msra.mxu1 %v1611_v14  ;;  %1491 = vmatprep.subr.bf16.mxu0 %v1648_v1 }
  0x5e   : > { %1511 = vmatprep.subr.bf16.mxu1 %v1648_v1 }
  0x60   : > { %1492 = vmatpush3.bf16.msra.mxu0 %v1612_v15 }
  0x61   : > { %1512 = vmatpush3.bf16.msra.mxu1 %v1613_v16  ;;  %1493 = vmatprep.subr.bf16.mxu0 %v1648_v1 }
  0x62   : > { %1513 = vmatprep.subr.bf16.mxu1 %v1648_v1 }
  0x64   : > { %1494 = vmatpush3.bf16.msra.mxu0 %v1614_v17 }
  0x65   : > { %1514 = vmatpush3.bf16.msra.mxu1 %v1615_v18  ;;  %1519 = vmatprep.subr.bf16.mxu0 %v1648_v1 }
  0x67   : > { %1496 = vmatmul.mubr.bf16.vlgmr.msra.gmra.mrb[8].mxu0 %v1789_v31 }
  0x68   : > { %1520 = vmatpush3.bf16.msra.mxu0 %v1616_v19  ;;  %1516 = vmatmul.mubr.bf16.vlgmr.msra.gmra.mrb[8].mxu1 %v1843_v51 }
  0x69   : > { %1521 = vmatprep.subr.bf16.mxu0 %v1648_v1  ;;  %1535 = vmatprep.mubr.msk.bf16.mxu0 %vm1649_vm0, %v1648_v1 }
  0x6c   : > { %1522 = vmatpush3.bf16.msra.mxu0 %v1617_v20 }
  0x6d   : > { %1523 = vmatprep.subr.bf16.mxu0 %v1648_v1 }
  0x70   : > { %1524 = vmatpush3.bf16.msra.mxu0 %v1618_v21 }
  0x71   : > { %1525 = vmatprep.subr.bf16.mxu0 %v1648_v1 }
  0x74   : > { %1526 = vmatpush3.bf16.msra.mxu0 %v1619_v22 }
  0x75   : > { %1527 = vmatprep.subr.bf16.mxu0 %v1648_v1 }
  0x78   : > { %1528 = vmatpush3.bf16.msra.mxu0 %v1620_v23 }
  0x79   : > { %1529 = vmatprep.subr.bf16.mxu0 %v1648_v1 }
  0x7c   : > { %1530 = vmatpush3.bf16.msra.mxu0 %v1621_v24 }
  0x7d   : > { %1531 = vmatprep.subr.bf16.mxu0 %v1648_v1 }
  0x80   : > { %1532 = vmatpush3.bf16.msra.mxu0 %v1622_v25 }
  0x81   : > { %1533 = vmatprep.subr.bf16.mxu0 %v1648_v1 }
  0x84   : > { %1534 = vmatpush3.bf16.msra.mxu0 %v1623_v26 }
  0x87   : > { %1536 = vmatmul.mubr.bf16.vlgmr.msra.gmra.mrb[12].mxu0 %v1815_v40 }
  0xfa   : > { %v363_v27 = vpop.f32.mrb[0].mxu0 }
  0xfb   : > { %v453_v28 = vpop.f32.mrb[0].mxu1  ;;  %v1417_v29 = vpop.f32.mrb[1].mxu0 }
  0xfc   : > { %v454_v30 = vadd.f32 %v453_v28, %v363_v27  ;;  %v1437_v31 = vpop.f32.mrb[1].mxu1  ;;  %v366_v32 = vpop.f32.mrb[2].mxu0 }
  0xfd   : > { %v456_v33 = vpop.f32.mrb[2].mxu1  ;;  %v1418_v34 = vpop.f32.mrb[3].mxu0 }
  0xfe   : > { %v457_v35 = vadd.f32 %v456_v33, %v366_v32  ;;  %v1438_v36 = vpop.f32.mrb[3].mxu1 }
 0x11a   : > { %v564_v37 = vpop.f32.mrb[4].mxu0 }
 0x11b   : > { %v571_v38 = vadd.f32 %v564_v37, %v454_v30  ;;  %v1457_v39 = vpop.f32.mrb[5].mxu0  ;;  %v683_v41 = vpop.f32.mrb[4].mxu1 }
 0x11c   : > { %v567_v42 = vpop.f32.mrb[6].mxu0  ;;  %v1477_v43 = vpop.f32.mrb[5].mxu1 }
 0x11d   : > { %v572_v1 = vadd.f32 %v567_v42, %v457_v35  ;;  %v690_v44 = vadd.f32 %v683_v41, %v571_v38  ;;  %v1458_v45 = vpop.f32.mrb[7].mxu0  ;;  %v686_v40 = vpop.f32.mrb[6].mxu1 }
 0x11e   : > { %v1478_v46 = vpop.f32.mrb[7].mxu1 }
 0x11f   : > { %v691_v47 = vadd.f32 %v686_v40, %v572_v1 }
 0x13a   : > { %v796_v48 = vpop.f32.mrb[8].mxu0 }
 0x13b   : > { %v803_v49 = vadd.f32 %v796_v48, %v690_v44  ;;  %v1497_v50 = vpop.f32.mrb[9].mxu0  ;;  %v913_v51 = vpop.f32.mrb[8].mxu1 }
 0x13c   : > { %v799_v52 = vpop.f32.mrb[10].mxu0  ;;  %v1517_v53 = vpop.f32.mrb[9].mxu1 }
 0x13d   : > { %v804_v54 = vadd.f32 %v799_v52, %v691_v47  ;;  %v920_v55 = vadd.f32 %v913_v51, %v803_v49  ;;  %v1498_v56 = vpop.f32.mrb[11].mxu0  ;;  %v916_v57 = vpop.f32.mrb[10].mxu1 }
 0x13e   : > { %v1518_v58 = vpop.f32.mrb[11].mxu1 }
 0x13f   : > { %v921_v59 = vadd.f32 %v916_v57, %v804_v54 }
 0x15a   : > { %v1026_v60 = vpop.f32.mrb[12].mxu0 }
 0x15b   : > { %v1033_v61 = vadd.f32 %v1026_v60, %v920_v55  ;;  %v1537_v62 = vpop.f32.mrb[13].mxu0 }
 0x15c   : > { %v1029_v0 = vpop.f32.mrb[14].mxu0 }
 0x15d   : > { %v1034_v2 = vadd.f32 %v1029_v0, %v921_v59  ;;  %v1538_v3 = vpop.f32.mrb[15].mxu0  ;;  %v1042_v4 = vadd.f32 %v1323_v63, %v1033_v61 }
 0x15f   : > { %v1043_v5 = vadd.f32 %v1323_v63, %v1034_v2 }
 0x161   : > { %v1334_v6 = vpack.c.bf16 %v1043_v5, %v1042_v4 }
 0x163   : > { %1335 = vst [vmem:[%s221_s22] sm:$0xff] %v1334_v6  }
 0x164 PF: > { %s13_s14 = sadd.s32 1, %s1646_s14   ;;  %s1991_s12 = smov %s1642_s13 }
 0x165   : > { %p10_p5 = scmp.ge.s32.totalorder %s13_s14, 4   ;;  %s1992_s13 = smov %s1994_s15 }
 0x167   :  { %12 = sbr.rel (!%p10_p5) target bundleno = 2 (0x2), region = 74 }

// kernel: efficientnet1d_forward.19
= control target key start
LH: loop header
LB: loop body
LE: loop exit
PB: predicated region body
PF: predicated region fallthrough
CT: control target
= control target key end

     0   :  { %s785_s15 = smov 0   ;;  %s787_s16 = smov 0   ;;  %s881_s0 = inlined_call_operand.vmem [shape: bf16[2,1,8,128], index: 0, kind: input, shape index: {}]   ;;  %s882_s1 = inlined_call_operand.vmem [shape: bf16[1,128,256], index: 1, kind: input, shape index: {}]   ;;  %s883_s2 = inlined_call_operand.vmem [shape: f32[1,256], index: 2, kind: input, shape index: {}]   ;;  %s884_s3 = inlined_call_operand.vmem [shape: bf16[2,8,256], index: 3, kind: output, shape index: {0}]   ;;  %s885_s4 = inlined_call_operand.vmem [shape: f32[2,1,256], index: 4, kind: output, shape index: {1}]  }
   0x1   :  { %s789_s17 = smov 0  }
   0x2 LB: > { %s27_s18 = sadd.s32 1, %s752_s16  ;;  %p648_p0 = scmp.ge.s32.totalorder %s756_s17, 1  ;;  %s756_s17 = sphi %s789_s17, %s15_s17   ;;  %s752_s16 = sphi %s787_s16, %s887_s16   ;;  %s748_s15 = sphi %s785_s15, %s886_s15  }
   0x3   : > { %p29_p1 = scmp.ge.s32.totalorder %s27_s18, 2  ;;  %p201_p2 = scmp.lt.s32.totalorder %s756_s17, 3 }
   0x5   : > { %s889_s18 = smov (%p29_p1, %s27_s18), 0  ;;  %p202_p3 = pnand %p648_p0, %p201_p2 }
   0x6   : > { %v702_v0 = vld [vmem:[%s882_s1 + $0x4] ss:$8 sps:$4 sm:$0xff] (!%p202_p3)   ;;  %v704_v1 = vld [vmem:[%s882_s1] ss:$8 sps:$4 sm:$0xff] (!%p202_p3)   ;;  %v758_v2 = vmov (!%p202_p3), 0   ;;  %p247_p4 = scmp.lt.s32.totalorder (!%p202_p3), %s748_s15, 1  ;;  %v301_v18 = vlaneseq (!%p202_p3) }
   0x7   : > { %205 = sbr.rel (%p202_p3) target bundleno = 301 (0x12d), region = 32  ;;  %423 = vmatprep.mubr.bf16.mxu0 (!%p202_p3), %v758_v2  ;;  %391 = vmatprep.subr.bf16.mxu0 (!%p202_p3), %v702_v0  ;;  %v705_v3 = vld [vmem:[%s882_s1 + $0x14] ss:$8 sps:$4 sm:$0xff] (!%p202_p3)   ;;  %v707_v4 = vld [vmem:[%s882_s1 + $0x10] ss:$8 sps:$4 sm:$0xff] (!%p202_p3)  }
   0x8   : > { %392 = vmatpush1.bf16.msra.mxu0 (!%p202_p3), %v704_v1  ;;  %v708_v5 = vld [vmem:[%s882_s1 + $0x24] ss:$8 sps:$4 sm:$0xff] (!%p202_p3)   ;;  %v710_v6 = vld [vmem:[%s882_s1 + $0x20] ss:$8 sps:$4 sm:$0xff] (!%p202_p3)   ;;  %v711_v7 = vld [vmem:[%s882_s1 + $0x34] ss:$8 sps:$4 sm:$0xff] (!%p202_p3)  }
   0x9   : > { %393 = vmatprep.subr.bf16.mxu0 (!%p202_p3), %v705_v3  ;;  %v713_v8 = vld [vmem:[%s882_s1 + $0x30] ss:$8 sps:$4 sm:$0xff] (!%p202_p3)   ;;  %v714_v9 = vld [vmem:[%s882_s1 + $0x44] ss:$8 sps:$4 sm:$0xff] (!%p202_p3)   ;;  %v716_v10 = vld [vmem:[%s882_s1 + $0x40] ss:$8 sps:$4 sm:$0xff] (!%p202_p3)  }
   0xa   : > { %v717_v11 = vld [vmem:[%s882_s1 + $0x54] ss:$8 sps:$4 sm:$0xff] (!%p202_p3)   ;;  %v719_v12 = vld [vmem:[%s882_s1 + $0x50] ss:$8 sps:$4 sm:$0xff] (!%p202_p3)   ;;  %v720_v13 = vld [vmem:[%s882_s1 + $0x64] ss:$8 sps:$4 sm:$0xff] (!%p202_p3)  }
   0xb   : > { %v722_v14 = vld [vmem:[%s882_s1 + $0x60] ss:$8 sps:$4 sm:$0xff] (!%p202_p3)   ;;  %v723_v15 = vld [vmem:[%s882_s1 + $0x74] ss:$8 sps:$4 sm:$0xff] (!%p202_p3)   ;;  %v725_v16 = vld [vmem:[%s882_s1 + $0x70] ss:$8 sps:$4 sm:$0xff] (!%p202_p3)  }
   0xc   : > { %394 = vmatpush1.bf16.msra.mxu0 (!%p202_p3), %v707_v4  ;;  %v302_v19 = vshrl.u32 (!%p202_p3), %v301_v18, 7  ;;  %v299_v21 = vld [vmem:[%s883_s2] sm:$0x3] (!%p202_p3)  ;;  %v759_v45 = vmov (!%p202_p3), 1966171168   ;;  %vm487_vm0 = vcmp.lt.s32.totalorder (!%p202_p3), %v301_v18, 256 }
   0xd   : > { %395 = vmatprep.subr.bf16.mxu0 (!%p202_p3), %v708_v5  ;;  %v471_v46 = vunpack.c.l.s4 (!%p202_p3), %v759_v45 }
   0xe   : > { %s891_s15 = smov (!%p247_p4, %s748_s15), 1  ;;  %v303_v20 = vsub.s32 0, %v302_v19  ;;  %v307_v22 = vsub.s32 1, %v302_v19 }
   0xf   : > { %s649_s27 = sshll.u32 %s891_s15, 2  ;;  %s674_s9 = sshll.u32 %s891_s15, 3  ;;  %v472_v51 = vunpack.c.0.s8 %v471_v46 }
  0x10   : > { %396 = vmatpush1.bf16.msra.mxu0 %v710_v6  ;;  %s250_s6 = scalar_lea.vmem %s881_s0, %s649_s27  ;;  %v304_v23 = vrot.slane %v299_v21, %v303_v20  ;;  %v308_v24 = vrot.slane %v299_v21, %v307_v22  ;;  %s270_s12 = scalar_lea.vmem %s884_s3, %s674_s9 }
  0x11   : > { %397 = vmatprep.subr.bf16.mxu0 %v711_v7  ;;  %v282_v17 = vld [vmem:[%s250_s6] sm:$0xf]  ;;  %v475_v56 = vsub.s32 %v472_v51, %v302_v19  ;;  %s652_s13 = sshll.u32 %s891_s15, 1 }
  0x12   : > { %s279_s20 = scalar_lea.vmem %s885_s4, %s652_s13 }
  0x14   : > { %398 = vmatpush1.bf16.msra.mxu0 %v713_v8 }
  0x15   : > { %399 = vmatprep.subr.bf16.mxu0 %v714_v9 }
  0x18   : > { %400 = vmatpush1.bf16.msra.mxu0 %v716_v10 }
  0x19   : > { %401 = vmatprep.subr.bf16.mxu0 %v717_v11 }
  0x1c   : > { %402 = vmatpush1.bf16.msra.mxu0 %v719_v12 }
  0x1d   : > { %403 = vmatprep.subr.bf16.mxu0 %v720_v13 }
  0x20   : > { %404 = vmatpush1.bf16.msra.mxu0 %v722_v14 }
  0x21   : > { %405 = vmatprep.subr.bf16.mxu0 %v723_v15 }
  0x24   : > { %406 = vmatpush1.bf16.msra.mxu0 %v725_v16 }
  0x27   : > { %424 = vmatmul.mubr.bf16.vlgmr.msra.gmra.mrb[0].mxu0 %v282_v17 }
  0xfa   : > { %v425_v25 = vpop.f32.mrb[0].mxu0 }
  0xfb   : > { %v426_v26 = vadd.f32 %v425_v25, %v304_v23  ;;  %v427_v27 = vpop.f32.mrb[1].mxu0 }
  0xfc   : > { %v428_v28 = vadd.f32 %v427_v27, %v308_v24  ;;  %v429_v29 = vpop.f32.mrb[2].mxu0 }
  0xfd   : > { %v669_v30 = vmul.f32 -1.442695, %v426_v26  ;;  %v430_v31 = vpop.f32.mrb[3].mxu0 }
  0xfe   : > { %v670_v32 = vmul.f32 -1.442695, %v428_v28 }
  0xff   : > { %726 = vpow2.f32 %v669_v30 }
 0x100   : > { %728 = vpow2.f32 %v670_v32 }
 0x109   : > { %v727_v33 = vpop.eup %726 }
 0x10a   : > { %v729_v34 = vpop.eup %728  ;;  %v438_v35 = vadd.f32 1.0, %v727_v33 }
 0x10b   : > { %v439_v36 = vadd.f32 1.0, %v729_v34 }
 0x10c   : > { %730 = vrcp.f32 %v438_v35 }
 0x10d   : > { %732 = vrcp.f32 %v439_v36 }
 0x116   : > { %v731_v37 = vpop.eup %730 }
 0x117   : > { %v733_v38 = vpop.eup %732  ;;  %v444_v39 = vmul.f32 %v731_v37, %v426_v26 }
 0x118   : > { %v445_v40 = vmul.f32 %v733_v38, %v428_v28 }
 0x119   : > { %v455_v41 = vrot.slane %v444_v39, 4 }
 0x11a   : > { %v675_v42 = vpack.c.bf16 %v445_v40, %v444_v39  ;;  %v461_v43 = vrot.slane %v445_v40, 4 }
 0x11b   : > { %v456_v44 = vadd.f32 %v455_v41, %v444_v39 }
 0x11c   : > { %454 = vst [vmem:[%s270_s12] sm:$0xff] %v675_v42  ;;  %v462_v47 = vadd.f32 %v461_v43, %v445_v40 }
 0x11d   : > { %v457_v48 = vrot.slane %v456_v44, 2 }
 0x11e   : > { %v463_v49 = vrot.slane %v462_v47, 2 }
 0x11f   : > { %v458_v50 = vadd.f32 %v457_v48, %v456_v44 }
 0x120   : > { %v464_v52 = vadd.f32 %v463_v49, %v462_v47 }
 0x121   : > { %v459_v53 = vrot.slane %v458_v50, 1 }
 0x122   : > { %v465_v54 = vrot.slane %v464_v52, 1 }
 0x123   : > { %v460_v55 = vadd.f32 %v459_v53, %v458_v50 }
 0x124   : > { %v466_v57 = vadd.f32 %v465_v54, %v464_v52 }
 0x126   : > { %v469_v58 = vcombine.low %v460_v55, %v466_v57 }
 0x128   : > { %v476_v59 = vrot.slane %v469_v58, %v475_v56 }
 0x12a   : > { %v483_v60 = vrot.slane %v476_v59, %v475_v56 }
 0x12c   : > { %489 = vst.msk [vmem:[%s279_s20] sm:$0x3] %vm487_vm0, %v483_v60 }
 0x12d PF: > { %s15_s17 = sadd.s32 1, %s756_s17   ;;  %s886_s15 = smov %s752_s16 }
 0x12e   : > { %p12_p5 = scmp.ge.s32.totalorder %s15_s17, 4   ;;  %s887_s16 = smov %s889_s18 }
 0x130   :  { %14 = sbr.rel (!%p12_p5) target bundleno = 2 (0x2), region = 80 }

// kernel: efficientnet1d_forward.18
= control target key start
LH: loop header
LB: loop body
LE: loop exit
PB: predicated region body
PF: predicated region fallthrough
CT: control target
= control target key end

     0   :  { %s1611_s12 = smov 0   ;;  %s1613_s13 = smov 0   ;;  %s1917_s0 = inlined_call_operand.vmem [shape: bf16[2,2,11,128], index: 0, kind: input, shape index: {}]   ;;  %s1918_s1 = inlined_call_operand.vmem [shape: bf16[7,128,128], index: 1, kind: input, shape index: {}]   ;;  %s1919_s2 = inlined_call_operand.vmem [shape: f32[1,128], index: 2, kind: input, shape index: {}]   ;;  %s1920_s3 = inlined_call_operand.vmem [shape: bf16[2,8,128], index: 3, kind: output, shape index: {}]  }
   0x1   :  { %s1615_s14 = smov 0  }
   0x2 LB: > { %s25_s15 = sadd.s32 1, %s1583_s13  ;;  %p1114_p0 = scmp.ge.s32.totalorder %s1587_s14, 1  ;;  %s1587_s14 = sphi %s1615_s14, %s13_s14   ;;  %s1583_s13 = sphi %s1613_s13, %s1922_s13   ;;  %s1579_s12 = sphi %s1611_s12, %s1921_s12  }
   0x3   : > { %p27_p1 = scmp.ge.s32.totalorder %s25_s15, 2  ;;  %p168_p2 = scmp.lt.s32.totalorder %s1587_s14, 3 }
   0x5   : > { %s1924_s15 = smov (%p27_p1, %s25_s15), 0  ;;  %p169_p3 = pnand %p1114_p0, %p168_p2 }
   0x6   : > { %v1507_v0 = vld [vmem:[%s1918_s1 + $0x40] sm:$0xff] (!%p169_p3)   ;;  %v1589_v1 = vmov (!%p169_p3), 0.0   ;;  %v1509_v3 = vld [vmem:[%s1918_s1 + $0x48] sm:$0xff] (!%p169_p3)   ;;  %vm1590_vm0 = vmmov (!%p169_p3), 0   ;;  %v1511_v5 = vld [vmem:[%s1918_s1 + $0x50] sm:$0xff] (!%p169_p3)   ;;  %p201_p4 = scmp.lt.s32.totalorder (!%p169_p3), %s1579_s12, 1 }
   0x7   : > { %172 = sbr.rel (%p169_p3) target bundleno = 354 (0x162), region = 32  ;;  %1341 = vmatprep.subr.bf16.mxu0 (!%p169_p3), %v1589_v1  ;;  %1361 = vmatprep.subr.bf16.mxu1 (!%p169_p3), %v1589_v1  ;;  %v1508_v2 = vld [vmem:[%s1918_s1] sm:$0xff] (!%p169_p3)   ;;  %v1510_v4 = vld [vmem:[%s1918_s1 + $0x8] sm:$0xff] (!%p169_p3)   ;;  %v1512_v6 = vld [vmem:[%s1918_s1 + $0x10] sm:$0xff] (!%p169_p3)  }
   0x8   : > { %1342 = vmatpush3.bf16.msra.mxu0 (!%p169_p3), %v1507_v0  ;;  %1357 = vmatprep.mubr.msk.bf16.mxu0 (!%p169_p3), %vm1590_vm0, %v1589_v1  ;;  %v1513_v7 = vld [vmem:[%s1918_s1 + $0x58] sm:$0xff] (!%p169_p3)   ;;  %v1515_v9 = vld [vmem:[%s1918_s1 + $0x60] sm:$0xff] (!%p169_p3)   ;;  %v1517_v11 = vld [vmem:[%s1918_s1 + $0x68] sm:$0xff] (!%p169_p3)  }
   0x9   : > { %1362 = vmatpush3.bf16.msra.mxu1 (!%p169_p3), %v1508_v2  ;;  %1343 = vmatprep.subr.bf16.mxu0 (!%p169_p3), %v1589_v1  ;;  %v1514_v8 = vld [vmem:[%s1918_s1 + $0x18] sm:$0xff] (!%p169_p3)   ;;  %v1516_v10 = vld [vmem:[%s1918_s1 + $0x20] sm:$0xff] (!%p169_p3)   ;;  %v1518_v12 = vld [vmem:[%s1918_s1 + $0x28] sm:$0xff] (!%p169_p3)  }
   0xa   : > { %1363 = vmatprep.subr.bf16.mxu1 (!%p169_p3), %v1589_v1  ;;  %1377 = vmatprep.mubr.msk.bf16.mxu1 (!%p169_p3), %vm1590_vm0, %v1589_v1  ;;  %v1519_v13 = vld [vmem:[%s1918_s1 + $0x70] sm:$0xff] (!%p169_p3)   ;;  %v1521_v15 = vld [vmem:[%s1918_s1 + $0x78] sm:$0xff] (!%p169_p3)   ;;  %v1525_v19 = vld [vmem:[%s1918_s1 + $0x80] sm:$0xff] (!%p169_p3)  }
   0xb   : > { %v1520_v14 = vld [vmem:[%s1918_s1 + $0x30] sm:$0xff] (!%p169_p3)   ;;  %v1522_v16 = vld [vmem:[%s1918_s1 + $0x38] sm:$0xff] (!%p169_p3)   ;;  %v1526_v20 = vld [vmem:[%s1918_s1 + $0xc0] sm:$0xff] (!%p169_p3)  }
   0xc   : > { %1344 = vmatpush3.bf16.msra.mxu0 (!%p169_p3), %v1509_v3  ;;  %v1527_v21 = vld [vmem:[%s1918_s1 + $0x88] sm:$0xff] (!%p169_p3)   ;;  %v1529_v23 = vld [vmem:[%s1918_s1 + $0x90] sm:$0xff] (!%p169_p3)   ;;  %v1531_v25 = vld [vmem:[%s1918_s1 + $0x98] sm:$0xff] (!%p169_p3)  }
   0xd   : > { %1364 = vmatpush3.bf16.msra.mxu1 (!%p169_p3), %v1510_v4  ;;  %1345 = vmatprep.subr.bf16.mxu0 (!%p169_p3), %v1589_v1  ;;  %v1528_v22 = vld [vmem:[%s1918_s1 + $0xc8] sm:$0xff] (!%p169_p3)   ;;  %v1530_v24 = vld [vmem:[%s1918_s1 + $0xd0] sm:$0xff] (!%p169_p3)   ;;  %v1532_v26 = vld [vmem:[%s1918_s1 + $0xd8] sm:$0xff] (!%p169_p3)  }
   0xe   : > { %1365 = vmatprep.subr.bf16.mxu1 %v1589_v1  ;;  %s1926_s12 = smov (!%p201_p4, %s1579_s12), 1  ;;  %v1533_v29 = vld [vmem:[%s1918_s1 + $0xa0] sm:$0xff]   ;;  %v1535_v33 = vld [vmem:[%s1918_s1 + $0xa8] sm:$0xff]   ;;  %v1537_v37 = vld [vmem:[%s1918_s1 + $0xb0] sm:$0xff]  }
   0xf   : > { %s1277_s21 = sshll.u32 %s1926_s12, 4  ;;  %v1534_v30 = vld [vmem:[%s1918_s1 + $0xe0] sm:$0xff]   ;;  %v1536_v34 = vld [vmem:[%s1918_s1 + $0xe8] sm:$0xff]   ;;  %v1538_v38 = vld [vmem:[%s1918_s1 + $0xf0] sm:$0xff]   ;;  %s1117_s19 = sshll.u32 %s1926_s12, 2 }
  0x10   : > { %1346 = vmatpush3.bf16.msra.mxu0 %v1511_v5  ;;  %s1699_s24 = scalar_lea.vmem %s1917_s0, %s1277_s21  ;;  %v1539_v43 = vld [vmem:[%s1918_s1 + $0xb8] sm:$0xff]   ;;  %v1541_v46 = vld [vmem:[%s1918_s1 + $0x100] sm:$0xff]   ;;  %v1543_v49 = vld [vmem:[%s1918_s1 + $0x108] sm:$0xff]   ;;  %s219_s22 = scalar_lea.vmem %s1920_s3, %s1117_s19 }
  0x11   : > { %1366 = vmatpush3.bf16.msra.mxu1 %v1512_v6  ;;  %1347 = vmatprep.subr.bf16.mxu0 %v1589_v1  ;;  %v1118_v17 = vld [vmem:[%s1699_s24 + $0x8] sm:$0xf]  ;;  %v221_v18 = vld [vmem:[%s1699_s24] sm:$0xf]  ;;  %v1119_v27 = vld [vmem:[%s1699_s24 + $0xc] sm:$0x3] }
  0x12   : > { %1367 = vmatprep.subr.bf16.mxu1 %v1589_v1  ;;  %v222_v28 = vld [vmem:[%s1699_s24 + $0x4] sm:$0x3]  ;;  %v1759_v32 = vcombine.low %v1118_v17, %v1119_v27  ;;  %v1540_v44 = vld [vmem:[%s1918_s1 + $0xf8] sm:$0xff]   ;;  %v1544_v50 = vld [vmem:[%s1918_s1 + $0x148] sm:$0xff]  }
  0x13   : > { %v1757_v31 = vcombine.low %v221_v18, %v222_v28  ;;  %v1542_v48 = vld [vmem:[%s1918_s1 + $0x140] sm:$0xff]   ;;  %v1545_v51 = vld [vmem:[%s1918_s1 + $0x110] sm:$0xff]   ;;  %v1547_v53 = vld [vmem:[%s1918_s1 + $0x118] sm:$0xff]  }
  0x14   : > { %1348 = vmatpush3.bf16.msra.mxu0 %v1513_v7  ;;  %v579_v36 = vshll.u32 %v1759_v32, 16  ;;  %v577_v41 = vshrl.u32 %v1759_v32, 16  ;;  %v1546_v52 = vld [vmem:[%s1918_s1 + $0x150] sm:$0xff]   ;;  %v1548_v54 = vld [vmem:[%s1918_s1 + $0x158] sm:$0xff]   ;;  %v1549_v55 = vld [vmem:[%s1918_s1 + $0x120] sm:$0xff]   ;;  %v798_v0 = vrot.slane %v1759_v32, 1 }
  0x15   : > { %1368 = vmatpush3.bf16.msra.mxu1 %v1514_v8  ;;  %1349 = vmatprep.subr.bf16.mxu0 %v1589_v1  ;;  %v460_v35 = vshll.u32 %v1757_v31, 16  ;;  %v458_v39 = vshrl.u32 %v1757_v31, 16  ;;  %v1550_v56 = vld [vmem:[%s1918_s1 + $0x160] sm:$0xff]   ;;  %v1551_v57 = vld [vmem:[%s1918_s1 + $0x128] sm:$0xff]   ;;  %v1553_v59 = vld [vmem:[%s1918_s1 + $0x130] sm:$0xff]   ;;  %v690_v63 = vrot.slane %v1757_v31, 1 }
  0x16   : > { %1369 = vmatprep.subr.bf16.mxu1 %v1589_v1  ;;  %v581_v42 = vrot.slane %v579_v36, 1  ;;  %v1552_v58 = vld [vmem:[%s1918_s1 + $0x168] sm:$0xff]   ;;  %v1554_v60 = vld [vmem:[%s1918_s1 + $0x170] sm:$0xff]   ;;  %v1555_v61 = vld [vmem:[%s1918_s1 + $0x138] sm:$0xff]  }
  0x17   : > { %v462_v40 = vrot.slane %v460_v35, 1  ;;  %v1556_v62 = vld [vmem:[%s1918_s1 + $0x178] sm:$0xff]   ;;  %v1557_v2 = vld [vmem:[%s1918_s1 + $0x180] sm:$0xff]   ;;  %v1558_v3 = vld [vmem:[%s1918_s1 + $0x188] sm:$0xff]  }
  0x18   : > { %1350 = vmatpush3.bf16.msra.mxu0 %v1515_v9  ;;  %v582_v47 = vor.u32 %v581_v42, %v577_v41  ;;  %v1559_v4 = vld [vmem:[%s1918_s1 + $0x190] sm:$0xff]   ;;  %v1560_v5 = vld [vmem:[%s1918_s1 + $0x198] sm:$0xff]   ;;  %v1561_v6 = vld [vmem:[%s1918_s1 + $0x1a0] sm:$0xff]   ;;  %v906_v9 = vrot.slane %v458_v39, 1 }
  0x19   : > { %1370 = vmatpush3.bf16.msra.mxu1 %v1516_v10  ;;  %1351 = vmatprep.subr.bf16.mxu0 %v1589_v1  ;;  %v463_v45 = vor.u32 %v462_v40, %v458_v39  ;;  %v1562_v7 = vld [vmem:[%s1918_s1 + $0x1a8] sm:$0xff]   ;;  %v1563_v8 = vld [vmem:[%s1918_s1 + $0x1b0] sm:$0xff]   ;;  %v907_v10 = vrot.slane %v460_v35, 2  ;;  %v1274_v42 = vld [vmem:[%s1919_s2] ss:$0 sm:$0xff] }
  0x1a   : > { %1371 = vmatprep.subr.bf16.mxu1 %v1589_v1 }
  0x1c   : > { %1352 = vmatpush3.bf16.msra.mxu0 %v1517_v11  ;;  %v1564_v11 = vld [vmem:[%s1918_s1 + $0x1b8] sm:$0xff]  }
  0x1d   : > { %1372 = vmatpush3.bf16.msra.mxu1 %v1518_v12  ;;  %1353 = vmatprep.subr.bf16.mxu0 %v1589_v1  ;;  %v908_v12 = vor.u32 %v907_v10, %v906_v9 }
  0x1e   : > { %1373 = vmatprep.subr.bf16.mxu1 %v1589_v1 }
  0x20   : > { %1354 = vmatpush3.bf16.msra.mxu0 %v1519_v13 }
  0x21   : > { %1374 = vmatpush3.bf16.msra.mxu1 %v1520_v14  ;;  %1355 = vmatprep.subr.bf16.mxu0 %v1589_v1 }
  0x22   : > { %1375 = vmatprep.subr.bf16.mxu1 %v1589_v1 }
  0x24   : > { %1356 = vmatpush3.bf16.msra.mxu0 %v1521_v15 }
  0x25   : > { %1376 = vmatpush3.bf16.msra.mxu1 %v1522_v16  ;;  %1381 = vmatprep.subr.bf16.mxu0 %v1589_v1 }
  0x26   : > { %1401 = vmatprep.subr.bf16.mxu1 %v1589_v1 }
  0x27   : > { %1358 = vmatmul.mubr.bf16.vlgmr.msra.gmra.mrb[0].mxu0 %v1118_v17 }
  0x28   : > { %1378 = vmatmul.mubr.bf16.vlgmr.msra.gmra.mrb[0].mxu1 %v221_v18  ;;  %1382 = vmatpush3.bf16.msra.mxu0 %v1525_v19 }
  0x29   : > { %1402 = vmatpush3.bf16.msra.mxu1 %v1526_v20  ;;  %1383 = vmatprep.subr.bf16.mxu0 %v1589_v1 }
  0x2a   : > { %1403 = vmatprep.subr.bf16.mxu1 %v1589_v1  ;;  %1397 = vmatprep.mubr.msk.bf16.mxu0 %vm1590_vm0, %v1589_v1 }
  0x2b   : > { %1417 = vmatprep.mubr.msk.bf16.mxu1 %vm1590_vm0, %v1589_v1 }
  0x2c   : > { %1384 = vmatpush3.bf16.msra.mxu0 %v1527_v21 }
  0x2d   : > { %1404 = vmatpush3.bf16.msra.mxu1 %v1528_v22  ;;  %1385 = vmatprep.subr.bf16.mxu0 %v1589_v1 }
  0x2e   : > { %1405 = vmatprep.subr.bf16.mxu1 %v1589_v1 }
  0x30   : > { %1386 = vmatpush3.bf16.msra.mxu0 %v1529_v23 }
  0x31   : > { %1406 = vmatpush3.bf16.msra.mxu1 %v1530_v24  ;;  %1387 = vmatprep.subr.bf16.mxu0 %v1589_v1 }
  0x32   : > { %1407 = vmatprep.subr.bf16.mxu1 %v1589_v1 }
  0x34   : > { %1388 = vmatpush3.bf16.msra.mxu0 %v1531_v25 }
  0x35   : > { %1408 = vmatpush3.bf16.msra.mxu1 %v1532_v26  ;;  %1389 = vmatprep.subr.bf16.mxu0 %v1589_v1 }
  0x36   : > { %1409 = vmatprep.subr.bf16.mxu1 %v1589_v1 }
  0x38   : > { %1390 = vmatpush3.bf16.msra.mxu0 %v1533_v29 }
  0x39   : > { %1410 = vmatpush3.bf16.msra.mxu1 %v1534_v30  ;;  %1391 = vmatprep.subr.bf16.mxu0 %v1589_v1 }
  0x3a   : > { %1411 = vmatprep.subr.bf16.mxu1 %v1589_v1 }
  0x3c   : > { %1392 = vmatpush3.bf16.msra.mxu0 %v1535_v33 }
  0x3d   : > { %1412 = vmatpush3.bf16.msra.mxu1 %v1536_v34  ;;  %1393 = vmatprep.subr.bf16.mxu0 %v1589_v1 }
  0x3e   : > { %1413 = vmatprep.subr.bf16.mxu1 %v1589_v1 }
  0x40   : > { %1394 = vmatpush3.bf16.msra.mxu0 %v1537_v37 }
  0x41   : > { %1414 = vmatpush3.bf16.msra.mxu1 %v1538_v38  ;;  %1395 = vmatprep.subr.bf16.mxu0 %v1589_v1 }
  0x42   : > { %1415 = vmatprep.subr.bf16.mxu1 %v1589_v1 }
  0x44   : > { %1396 = vmatpush3.bf16.msra.mxu0 %v1539_v43 }
  0x45   : > { %1416 = vmatpush3.bf16.msra.mxu1 %v1540_v44  ;;  %1421 = vmatprep.subr.bf16.mxu0 %v1589_v1 }
  0x46   : > { %1441 = vmatprep.subr.bf16.mxu1 %v1589_v1 }
  0x47   : > { %1398 = vmatmul.mubr.bf16.vlgmr.msra.gmra.mrb[4].mxu0 %v463_v45 }
  0x48   : > { %1422 = vmatpush3.bf16.msra.mxu0 %v1541_v46  ;;  %1418 = vmatmul.mubr.bf16.vlgmr.msra.gmra.mrb[4].mxu1 %v582_v47 }
  0x49   : > { %1442 = vmatpush3.bf16.msra.mxu1 %v1542_v48  ;;  %1423 = vmatprep.subr.bf16.mxu0 %v1589_v1 }
  0x4a   : > { %1443 = vmatprep.subr.bf16.mxu1 %v1589_v1  ;;  %1437 = vmatprep.mubr.msk.bf16.mxu0 %vm1590_vm0, %v1589_v1 }
  0x4b   : > { %1457 = vmatprep.mubr.msk.bf16.mxu1 %vm1590_vm0, %v1589_v1 }
  0x4c   : > { %1424 = vmatpush3.bf16.msra.mxu0 %v1543_v49 }
  0x4d   : > { %1444 = vmatpush3.bf16.msra.mxu1 %v1544_v50  ;;  %1425 = vmatprep.subr.bf16.mxu0 %v1589_v1 }
  0x4e   : > { %1445 = vmatprep.subr.bf16.mxu1 %v1589_v1 }
  0x50   : > { %1426 = vmatpush3.bf16.msra.mxu0 %v1545_v51 }
  0x51   : > { %1446 = vmatpush3.bf16.msra.mxu1 %v1546_v52  ;;  %1427 = vmatprep.subr.bf16.mxu0 %v1589_v1 }
  0x52   : > { %1447 = vmatprep.subr.bf16.mxu1 %v1589_v1 }
  0x54   : > { %1428 = vmatpush3.bf16.msra.mxu0 %v1547_v53 }
  0x55   : > { %1448 = vmatpush3.bf16.msra.mxu1 %v1548_v54  ;;  %1429 = vmatprep.subr.bf16.mxu0 %v1589_v1 }
  0x56   : > { %1449 = vmatprep.subr.bf16.mxu1 %v1589_v1 }
  0x58   : > { %1430 = vmatpush3.bf16.msra.mxu0 %v1549_v55 }
  0x59   : > { %1450 = vmatpush3.bf16.msra.mxu1 %v1550_v56  ;;  %1431 = vmatprep.subr.bf16.mxu0 %v1589_v1 }
  0x5a   : > { %1451 = vmatprep.subr.bf16.mxu1 %v1589_v1 }
  0x5c   : > { %1432 = vmatpush3.bf16.msra.mxu0 %v1551_v57 }
  0x5d   : > { %1452 = vmatpush3.bf16.msra.mxu1 %v1552_v58  ;;  %1433 = vmatprep.subr.bf16.mxu0 %v1589_v1 }
  0x5e   : > { %1453 = vmatprep.subr.bf16.mxu1 %v1589_v1 }
  0x60   : > { %1434 = vmatpush3.bf16.msra.mxu0 %v1553_v59 }
  0x61   : > { %1454 = vmatpush3.bf16.msra.mxu1 %v1554_v60  ;;  %1435 = vmatprep.subr.bf16.mxu0 %v1589_v1 }
  0x62   : > { %1455 = vmatprep.subr.bf16.mxu1 %v1589_v1 }
  0x64   : > { %1436 = vmatpush3.bf16.msra.mxu0 %v1555_v61 }
  0x65   : > { %1456 = vmatpush3.bf16.msra.mxu1 %v1556_v62  ;;  %1461 = vmatprep.subr.bf16.mxu0 %v1589_v1 }
  0x67   : > { %1438 = vmatmul.mubr.bf16.vlgmr.msra.gmra.mrb[8].mxu0 %v690_v63 }
  0x68   : > { %1462 = vmatpush3.bf16.msra.mxu0 %v1557_v2  ;;  %1458 = vmatmul.mubr.bf16.vlgmr.msra.gmra.mrb[8].mxu1 %v798_v0 }
  0x69   : > { %1463 = vmatprep.subr.bf16.mxu0 %v1589_v1  ;;  %1477 = vmatprep.mubr.msk.bf16.mxu0 %vm1590_vm0, %v1589_v1 }
  0x6c   : > { %1464 = vmatpush3.bf16.msra.mxu0 %v1558_v3 }
  0x6d   : > { %1465 = vmatprep.subr.bf16.mxu0 %v1589_v1 }
  0x70   : > { %1466 = vmatpush3.bf16.msra.mxu0 %v1559_v4 }
  0x71   : > { %1467 = vmatprep.subr.bf16.mxu0 %v1589_v1 }
  0x74   : > { %1468 = vmatpush3.bf16.msra.mxu0 %v1560_v5 }
  0x75   : > { %1469 = vmatprep.subr.bf16.mxu0 %v1589_v1 }
  0x78   : > { %1470 = vmatpush3.bf16.msra.mxu0 %v1561_v6 }
  0x79   : > { %1471 = vmatprep.subr.bf16.mxu0 %v1589_v1 }
  0x7c   : > { %1472 = vmatpush3.bf16.msra.mxu0 %v1562_v7 }
  0x7d   : > { %1473 = vmatprep.subr.bf16.mxu0 %v1589_v1 }
  0x80   : > { %1474 = vmatpush3.bf16.msra.mxu0 %v1563_v8 }
  0x81   : > { %1475 = vmatprep.subr.bf16.mxu0 %v1589_v1 }
  0x84   : > { %1476 = vmatpush3.bf16.msra.mxu0 %v1564_v11 }
  0x87   : > { %1478 = vmatmul.mubr.bf16.vlgmr.msra.gmra.mrb[12].mxu0 %v908_v12 }
  0xfa   : > { %v341_v13 = vpop.f32.mrb[0].mxu0 }
  0xfb   : > { %v1359_v14 = vpop.f32.mrb[1].mxu0  ;;  %v429_v15 = vpop.f32.mrb[0].mxu1 }
  0xfc   : > { %v430_v16 = vadd.f32 %v429_v15, %v341_v13  ;;  %v344_v17 = vpop.f32.mrb[2].mxu0  ;;  %v1379_v18 = vpop.f32.mrb[1].mxu1 }
  0xfd   : > { %v1360_v19 = vpop.f32.mrb[3].mxu0  ;;  %v432_v20 = vpop.f32.mrb[2].mxu1 }
  0xfe   : > { %v1380_v21 = vpop.f32.mrb[3].mxu1 }
 0x11a   : > { %v547_v22 = vpop.f32.mrb[4].mxu0 }
 0x11b   : > { %v553_v23 = vadd.f32 %v547_v22, %v430_v16  ;;  %v1399_v24 = vpop.f32.mrb[5].mxu0  ;;  %v666_v25 = vpop.f32.mrb[4].mxu1 }
 0x11c   : > { %v550_v26 = vpop.f32.mrb[6].mxu0  ;;  %v1419_v27 = vpop.f32.mrb[5].mxu1 }
 0x11d   : > { %v672_v28 = vadd.f32 %v666_v25, %v553_v23  ;;  %v1400_v1 = vpop.f32.mrb[7].mxu0  ;;  %v669_v29 = vpop.f32.mrb[6].mxu1 }
 0x11e   : > { %v1420_v30 = vpop.f32.mrb[7].mxu1 }
 0x13a   : > { %v774_v31 = vpop.f32.mrb[8].mxu0 }
 0x13b   : > { %v780_v32 = vadd.f32 %v774_v31, %v672_v28  ;;  %v1439_v33 = vpop.f32.mrb[9].mxu0  ;;  %v882_v34 = vpop.f32.mrb[8].mxu1 }
 0x13c   : > { %v777_v35 = vpop.f32.mrb[10].mxu0  ;;  %v1459_v36 = vpop.f32.mrb[9].mxu1 }
 0x13d   : > { %v888_v37 = vadd.f32 %v882_v34, %v780_v32  ;;  %v1440_v38 = vpop.f32.mrb[11].mxu0  ;;  %v885_v39 = vpop.f32.mrb[10].mxu1 }
 0x13e   : > { %v1460_v40 = vpop.f32.mrb[11].mxu1 }
 0x15a   : > { %v992_v41 = vpop.f32.mrb[12].mxu0 }
 0x15b   : > { %v998_v43 = vadd.f32 %v992_v41, %v888_v37  ;;  %v1479_v44 = vpop.f32.mrb[13].mxu0 }
 0x15c   : > { %v995_v45 = vpop.f32.mrb[14].mxu0 }
 0x15d   : > { %v1006_v46 = vadd.f32 %v1274_v42, %v998_v43  ;;  %v1480_v47 = vpop.f32.mrb[15].mxu0 }
 0x15f   : > { %v1007_v48 = vpack.c.bf16 %v1006_v46, %v1006_v46 }
 0x161   : > { %1008 = vst [vmem:[%s219_s22] sm:$0xf] %v1007_v48 }
 0x162 PF: > { %s13_s14 = sadd.s32 1, %s1587_s14   ;;  %s1921_s12 = smov %s1583_s13 }
 0x163   : > { %p10_p5 = scmp.ge.s32.totalorder %s13_s14, 4   ;;  %s1922_s13 = smov %s1924_s15 }
 0x165   :  { %12 = sbr.rel (!%p10_p5) target bundleno = 2 (0x2), region = 75 }

// kernel: efficientnet1d_forward.20
= control target key start
LH: loop header
LB: loop body
LE: loop exit
PB: predicated region body
PF: predicated region fallthrough
CT: control target
= control target key end

     0   :  { %s2314_s15 = smov 0   ;;  %s2316_s16 = smov 0   ;;  %s2731_s0 = inlined_call_operand.vmem [shape: bf16[2,1,14,256], index: 0, kind: input, shape index: {}]   ;;  %s2732_s1 = inlined_call_operand.vmem [shape: bf16[7,256,128], index: 1, kind: input, shape index: {}]   ;;  %s2733_s2 = inlined_call_operand.vmem [shape: f32[1,128], index: 2, kind: input, shape index: {}]   ;;  %s2734_s3 = inlined_call_operand.vmem [shape: bf16[2,8,128], index: 3, kind: input, shape index: {}]   ;;  %s2735_s4 = inlined_call_operand.vmem [shape: bf16[2,8,128], index: 4, kind: output, shape index: {}]  }
   0x1   :  { %s2318_s17 = smov 0  }
   0x2 LB: > { %s26_s18 = sadd.s32 1, %s2283_s16  ;;  %p1654_p0 = scmp.ge.s32.totalorder %s2287_s17, 1  ;;  %s2287_s17 = sphi %s2318_s17, %s14_s17   ;;  %s2283_s16 = sphi %s2316_s16, %s2737_s16   ;;  %s2279_s15 = sphi %s2314_s15, %s2736_s15  }
   0x3   : > { %p28_p1 = scmp.ge.s32.totalorder %s26_s18, 2  ;;  %p207_p2 = scmp.lt.s32.totalorder %s2287_s17, 3 }
   0x5   : > { %s2739_s18 = smov (%p28_p1, %s26_s18), 0  ;;  %p208_p3 = pnand %p1654_p0, %p207_p2 }
   0x6   : > { %v2149_v0 = vld [vmem:[%s2732_s1 + $0xc0] sm:$0xff] (!%p208_p3)   ;;  %v2153_v4 = vld [vmem:[%s2732_s1 + $0xc8] sm:$0xff] (!%p208_p3)   ;;  %v2157_v8 = vld [vmem:[%s2732_s1 + $0xd0] sm:$0xff] (!%p208_p3)   ;;  %p249_p4 = scmp.lt.s32.totalorder (!%p208_p3), %s2279_s15, 1 }
   0x7   : > { %211 = sbr.rel (%p208_p3) target bundleno = 360 (0x168), region = 36  ;;  %v2150_v1 = vld [vmem:[%s2732_s1 + $0x40] sm:$0xff] (!%p208_p3)   ;;  %1971 = vmatprep.subr.bf16.mxu0 (!%p208_p3), %v2149_v0  ;;  %v2154_v5 = vld [vmem:[%s2732_s1 + $0x48] sm:$0xff] (!%p208_p3)   ;;  %v2158_v9 = vld [vmem:[%s2732_s1 + $0x50] sm:$0xff] (!%p208_p3)  }
   0x8   : > { %v2151_v2 = vld [vmem:[%s2732_s1 + $0x80] sm:$0xff] (!%p208_p3)   ;;  %1993 = vmatprep.subr.bf16.mxu1 (!%p208_p3), %v2150_v1  ;;  %v2155_v6 = vld [vmem:[%s2732_s1 + $0x88] sm:$0xff] (!%p208_p3)   ;;  %v2159_v10 = vld [vmem:[%s2732_s1 + $0x90] sm:$0xff] (!%p208_p3)  }
   0x9   : > { %v2152_v3 = vld [vmem:[%s2732_s1] sm:$0xff] (!%p208_p3)   ;;  %1972 = vmatpush3.bf16.msra.mxu0 (!%p208_p3), %v2151_v2  ;;  %v2156_v7 = vld [vmem:[%s2732_s1 + $0x8] sm:$0xff] (!%p208_p3)   ;;  %v2160_v11 = vld [vmem:[%s2732_s1 + $0x10] sm:$0xff] (!%p208_p3)  }
   0xa   : > { %1994 = vmatpush3.bf16.msra.mxu1 (!%p208_p3), %v2152_v3  ;;  %1973 = vmatprep.subr.bf16.mxu0 (!%p208_p3), %v2153_v4  ;;  %v2161_v12 = vld [vmem:[%s2732_s1 + $0xd8] sm:$0xff] (!%p208_p3)   ;;  %v2165_v16 = vld [vmem:[%s2732_s1 + $0xe0] sm:$0xff] (!%p208_p3)   ;;  %v2169_v20 = vld [vmem:[%s2732_s1 + $0xe8] sm:$0xff] (!%p208_p3)  }
   0xb   : > { %1995 = vmatprep.subr.bf16.mxu1 (!%p208_p3), %v2154_v5  ;;  %v2162_v13 = vld [vmem:[%s2732_s1 + $0x58] sm:$0xff] (!%p208_p3)   ;;  %v2166_v17 = vld [vmem:[%s2732_s1 + $0x60] sm:$0xff] (!%p208_p3)   ;;  %v2170_v21 = vld [vmem:[%s2732_s1 + $0x68] sm:$0xff] (!%p208_p3)  }
   0xc   : > { %v2163_v14 = vld [vmem:[%s2732_s1 + $0x98] sm:$0xff] (!%p208_p3)   ;;  %v2167_v18 = vld [vmem:[%s2732_s1 + $0xa0] sm:$0xff] (!%p208_p3)   ;;  %v2171_v22 = vld [vmem:[%s2732_s1 + $0xa8] sm:$0xff] (!%p208_p3)  }
   0xd   : > { %1974 = vmatpush3.bf16.msra.mxu0 (!%p208_p3), %v2155_v6  ;;  %v2164_v15 = vld [vmem:[%s2732_s1 + $0x18] sm:$0xff] (!%p208_p3)   ;;  %v2168_v19 = vld [vmem:[%s2732_s1 + $0x20] sm:$0xff] (!%p208_p3)   ;;  %v2172_v23 = vld [vmem:[%s2732_s1 + $0x28] sm:$0xff] (!%p208_p3)  }
   0xe   : > { %1996 = vmatpush3.bf16.msra.mxu1 %v2156_v7  ;;  %1975 = vmatprep.subr.bf16.mxu0 %v2157_v8  ;;  %s2741_s15 = smov (!%p249_p4, %s2279_s15), 1  ;;  %v2173_v24 = vld [vmem:[%s2732_s1 + $0xf0] sm:$0xff]   ;;  %v2177_v28 = vld [vmem:[%s2732_s1 + $0xf8] sm:$0xff]   ;;  %v2185_v38 = vld [vmem:[%s2732_s1 + $0x140] sm:$0xff]  }
   0xf   : > { %1997 = vmatprep.subr.bf16.mxu1 %v2158_v9  ;;  %v2174_v25 = vld [vmem:[%s2732_s1 + $0x70] sm:$0xff]   ;;  %s1970_s29 = sshll.u32 %s2741_s15, 4  ;;  %v2178_v29 = vld [vmem:[%s2732_s1 + $0x78] sm:$0xff]   ;;  %v2187_v43 = vld [vmem:[%s2732_s1 + $0x1c0] sm:$0xff]   ;;  %s1657_s27 = sshll.u32 %s2741_s15, 2 }
  0x10   : > { %v2175_v26 = vld [vmem:[%s2732_s1 + $0xb0] sm:$0xff]   ;;  %s253_s12 = scalar_lea.vmem %s2731_s0, %s1970_s29  ;;  %v2179_v30 = vld [vmem:[%s2732_s1 + $0xb8] sm:$0xff]   ;;  %v2186_v46 = vld [vmem:[%s2732_s1 + $0x100] sm:$0xff]   ;;  %s267_s30 = scalar_lea.vmem %s2734_s3, %s1657_s27 }
  0x11   : > { %1976 = vmatpush3.bf16.msra.mxu0 %v2159_v10  ;;  %v2176_v27 = vld [vmem:[%s2732_s1 + $0x30] sm:$0xff]   ;;  %v2180_v31 = vld [vmem:[%s2732_s1 + $0x38] sm:$0xff]   ;;  %v276_v32 = vld [vmem:[%s253_s12] sm:$0xff]  ;;  %s274_s8 = scalar_lea.vmem %s2735_s4, %s1657_s27 }
  0x12   : > { %1998 = vmatpush3.bf16.msra.mxu1 %v2160_v11  ;;  %1977 = vmatprep.subr.bf16.mxu0 %v2161_v12  ;;  %v277_v33 = vld [vmem:[%s253_s12 + $0x8] sm:$0x77]  ;;  %v1710_v36 = vcombine.high %v276_v32, %v276_v32  ;;  %v1709_v37 = vcombine.low %v276_v32, %v276_v32  ;;  %v2188_v47 = vld [vmem:[%s2732_s1 + $0x180] sm:$0xff]   ;;  %v2193_v57 = vld [vmem:[%s2732_s1 + $0x150] sm:$0xff]  }
  0x13   : > { %1999 = vmatprep.subr.bf16.mxu1 %v2162_v13  ;;  %v2438_v34 = vcombine.low %v276_v32, %v277_v33  ;;  %v2440_v35 = vcombine.high %v276_v32, %v277_v33  ;;  %v2189_v50 = vld [vmem:[%s2732_s1 + $0x148] sm:$0xff]   ;;  %v2195_v59 = vld [vmem:[%s2732_s1 + $0x1d0] sm:$0xff]   ;;  %v2197_v62 = vld [vmem:[%s2732_s1 + $0x158] sm:$0xff]  }
  0x14   : > { %635 = vmatprep.mubr.bf16.mxu1 %v1710_v36  ;;  %v2191_v52 = vld [vmem:[%s2732_s1 + $0x1c8] sm:$0xff]   ;;  %v2196_v60 = vld [vmem:[%s2732_s1 + $0x190] sm:$0xff]   ;;  %v2199_v63 = vld [vmem:[%s2732_s1 + $0x1d8] sm:$0xff]  }
  0x15   : > { %1978 = vmatpush3.bf16.msra.mxu0 %v2163_v14  ;;  %v2446_v39 = vshrl.u32 %v2440_v35, 16  ;;  %v2449_v40 = vshll.u32 %v2440_v35, 16  ;;  %v2452_v41 = vshrl.u32 %v2438_v34, 16  ;;  %v2455_v42 = vshll.u32 %v2438_v34, 16  ;;  %v2192_v54 = vld [vmem:[%s2732_s1 + $0x188] sm:$0xff]   ;;  %v2194_v61 = vld [vmem:[%s2732_s1 + $0x110] sm:$0xff]  }
  0x16   : > { %2000 = vmatpush3.bf16.msra.mxu1 %v2164_v15  ;;  %1979 = vmatprep.subr.bf16.mxu0 %v2165_v16  ;;  %v677_v51 = vrot.slane %v2440_v35, 1  ;;  %v2190_v56 = vld [vmem:[%s2732_s1 + $0x108] sm:$0xff]   ;;  %v2200_v0 = vld [vmem:[%s2732_s1 + $0x198] sm:$0xff]   ;;  %v2201_v2 = vld [vmem:[%s2732_s1 + $0x160] sm:$0xff]  }
  0x17   : > { %2001 = vmatprep.subr.bf16.mxu1 %v2166_v17  ;;  %v363_v44 = vrot.slane %v2449_v40, 1  ;;  %v356_v45 = vrot.slane %v2455_v42, 1  ;;  %v853_v53 = vrot.slane %v2446_v39, 1  ;;  %v854_v55 = vrot.slane %v2449_v40, 2  ;;  %v2198_v1 = vld [vmem:[%s2732_s1 + $0x118] sm:$0xff]   ;;  %v2203_v3 = vld [vmem:[%s2732_s1 + $0x1e0] sm:$0xff]  }
  0x18   : > { %v2204_v4 = vld [vmem:[%s2732_s1 + $0x1a0] sm:$0xff]   ;;  %v2205_v6 = vld [vmem:[%s2732_s1 + $0x168] sm:$0xff]   ;;  %v2209_v10 = vld [vmem:[%s2732_s1 + $0x170] sm:$0xff]   ;;  %v850_v13 = vrot.slane %v2452_v41, 1  ;;  %v851_v15 = vrot.slane %v2455_v42, 2  ;;  %v1205_v17 = vrot.slane %v2446_v39, 2 }
  0x19   : > { %1980 = vmatpush3.bf16.msra.mxu0 %v2167_v18  ;;  %v364_v48 = vor.u32 %v363_v44, %v2446_v39  ;;  %v357_v49 = vor.u32 %v356_v45, %v2452_v41  ;;  %v855_v58 = vor.u32 %v854_v55, %v853_v53  ;;  %v2202_v5 = vld [vmem:[%s2732_s1 + $0x120] sm:$0xff]   ;;  %v2207_v7 = vld [vmem:[%s2732_s1 + $0x1e8] sm:$0xff]   ;;  %v2211_v11 = vld [vmem:[%s2732_s1 + $0x1f0] sm:$0xff]  }
  0x1a   : > { %2002 = vmatpush3.bf16.msra.mxu1 %v2168_v19  ;;  %1981 = vmatprep.subr.bf16.mxu0 %v2169_v20  ;;  %v2208_v8 = vld [vmem:[%s2732_s1 + $0x1a8] sm:$0xff]   ;;  %v2212_v12 = vld [vmem:[%s2732_s1 + $0x1b0] sm:$0xff]   ;;  %v2213_v16 = vld [vmem:[%s2732_s1 + $0x178] sm:$0xff]   ;;  %v1206_v19 = vrot.slane %v2449_v40, 3 }
  0x1b   : > { %2003 = vmatprep.subr.bf16.mxu1 %v2170_v21  ;;  %495 = vmatprep.mubr.bf16.mxu0 %v364_v48  ;;  %v2206_v9 = vld [vmem:[%s2732_s1 + $0x128] sm:$0xff]   ;;  %v2210_v14 = vld [vmem:[%s2732_s1 + $0x130] sm:$0xff]   ;;  %v2215_v18 = vld [vmem:[%s2732_s1 + $0x1f8] sm:$0xff]  }
  0x1c   : > { %v2216_v20 = vld [vmem:[%s2732_s1 + $0x1b8] sm:$0xff]   ;;  %v2224_v32 = vld [vmem:[%s2732_s1 + $0x288] sm:$0xff]   ;;  %v2225_v36 = vld [vmem:[%s2732_s1 + $0x250] sm:$0xff]  }
  0x1d   : > { %1982 = vmatpush3.bf16.msra.mxu0 %v2171_v22  ;;  %v2214_v21 = vld [vmem:[%s2732_s1 + $0x138] sm:$0xff]   ;;  %v852_v22 = vor.u32 %v851_v15, %v850_v13  ;;  %v2222_v33 = vld [vmem:[%s2732_s1 + $0x208] sm:$0xff]   ;;  %v2226_v39 = vld [vmem:[%s2732_s1 + $0x210] sm:$0xff]  }
  0x1e   : > { %2004 = vmatpush3.bf16.msra.mxu1 %v2172_v23  ;;  %1983 = vmatprep.subr.bf16.mxu0 %v2173_v24  ;;  %v2217_v23 = vld [vmem:[%s2732_s1 + $0x240] sm:$0xff]   ;;  %v2229_v40 = vld [vmem:[%s2732_s1 + $0x258] sm:$0xff]   ;;  %v2238_v53 = vld [vmem:[%s2732_s1 + $0x228] sm:$0xff]  }
  0x1f   : > { %2005 = vmatprep.subr.bf16.mxu1 %v2174_v25  ;;  %v2219_v24 = vld [vmem:[%s2732_s1 + $0x2c0] sm:$0xff]   ;;  %v1207_v25 = vor.u32 %v1206_v19, %v1205_v17  ;;  %v2232_v44 = vld [vmem:[%s2732_s1 + $0x298] sm:$0xff]   ;;  %v2243_v55 = vld [vmem:[%s2732_s1 + $0x2f0] sm:$0xff]  }
  0x20   : > { %v2230_v45 = vld [vmem:[%s2732_s1 + $0x218] sm:$0xff]   ;;  %v2236_v48 = vld [vmem:[%s2732_s1 + $0x2a0] sm:$0xff]   ;;  %v2262_v13 = vld [vmem:[%s2732_s1 + $0x330] sm:$0xff]  }
  0x21   : > { %1984 = vmatpush3.bf16.msra.mxu0 %v2175_v26  ;;  %v2220_v26 = vld [vmem:[%s2732_s1 + $0x280] sm:$0xff]   ;;  %v2264_v15 = vld [vmem:[%s2732_s1 + $0x338] sm:$0xff]  }
  0x22   : > { %2006 = vmatpush3.bf16.msra.mxu1 %v2176_v27  ;;  %1985 = vmatprep.subr.bf16.mxu0 %v2177_v28  ;;  %v676_v27 = vrot.slane %v2438_v34, 1  ;;  %v2218_v28 = vld [vmem:[%s2732_s1 + $0x200] sm:$0xff]  }
  0x23   : > { %2007 = vmatprep.subr.bf16.mxu1 %v2178_v29  ;;  %v2221_v29 = vld [vmem:[%s2732_s1 + $0x248] sm:$0xff]  }
  0x25   : > { %1986 = vmatpush3.bf16.msra.mxu0 %v2179_v30  ;;  %v2223_v30 = vld [vmem:[%s2732_s1 + $0x2c8] sm:$0xff]  }
  0x26   : > { %2008 = vmatpush3.bf16.msra.mxu1 %v2180_v31  ;;  %2015 = vmatprep.subr.bf16.mxu0 %v2185_v38  ;;  %v1029_v31 = vrot.slane %v2440_v35, 2  ;;  %v2228_v38 = vld [vmem:[%s2732_s1 + $0x290] sm:$0xff]  }
  0x27   : > { %2037 = vmatprep.subr.bf16.mxu1 %v2187_v43  ;;  %v2231_v43 = vld [vmem:[%s2732_s1 + $0x2d8] sm:$0xff]  }
  0x28   : > { %496 = vmatmul.mubr.bf16.vlgmr.msra.gmra.mrb[0].mxu0 %v357_v49  ;;  %v2234_v49 = vld [vmem:[%s2732_s1 + $0x220] sm:$0xff]  }
  0x29   : > { %636 = vmatmul.mubr.bf16.vlgmr.msra.gmra.mrb[0].mxu1 %v1709_v37  ;;  %2016 = vmatpush3.bf16.msra.mxu0 %v2186_v46  ;;  %v2227_v37 = vld [vmem:[%s2732_s1 + $0x2d0] sm:$0xff]   ;;  %v2233_v46 = vld [vmem:[%s2732_s1 + $0x260] sm:$0xff]  }
  0x2a   : > { %2038 = vmatpush3.bf16.msra.mxu1 %v2188_v47  ;;  %2017 = vmatprep.subr.bf16.mxu0 %v2189_v50  ;;  %v2235_v47 = vld [vmem:[%s2732_s1 + $0x2e0] sm:$0xff]   ;;  %v2237_v50 = vld [vmem:[%s2732_s1 + $0x268] sm:$0xff]  }
  0x2b   : > { %2039 = vmatprep.subr.bf16.mxu1 %v2191_v52  ;;  %808 = vmatprep.mubr.bf16.mxu0 %v677_v51  ;;  %v2239_v51 = vld [vmem:[%s2732_s1 + $0x2e8] sm:$0xff]  }
  0x2c   : > { %986 = vmatprep.mubr.bf16.mxu1 %v855_v58  ;;  %v2240_v52 = vld [vmem:[%s2732_s1 + $0x2a8] sm:$0xff]   ;;  %v2242_v58 = vld [vmem:[%s2732_s1 + $0x230] sm:$0xff]  }
  0x2d   : > { %2018 = vmatpush3.bf16.msra.mxu0 %v2190_v56  ;;  %v2244_v56 = vld [vmem:[%s2732_s1 + $0x2b0] sm:$0xff]  }
  0x2e   : > { %2040 = vmatpush3.bf16.msra.mxu1 %v2192_v54  ;;  %2019 = vmatprep.subr.bf16.mxu0 %v2193_v57  ;;  %v2241_v54 = vld [vmem:[%s2732_s1 + $0x270] sm:$0xff]   ;;  %v1202_v57 = vrot.slane %v2452_v41, 2  ;;  %v2248_v41 = vld [vmem:[%s2732_s1 + $0x2b8] sm:$0xff]  }
  0x2f   : > { %2041 = vmatprep.subr.bf16.mxu1 %v2195_v59  ;;  %v1203_v59 = vrot.slane %v2455_v42, 3  ;;  %v2246_v42 = vld [vmem:[%s2732_s1 + $0x238] sm:$0xff]  }
  0x31   : > { %2020 = vmatpush3.bf16.msra.mxu0 %v2194_v61  ;;  %v2247_v61 = vld [vmem:[%s2732_s1 + $0x2f8] sm:$0xff]  }
  0x32   : > { %2042 = vmatpush3.bf16.msra.mxu1 %v2196_v60  ;;  %2021 = vmatprep.subr.bf16.mxu0 %v2197_v62  ;;  %v2245_v60 = vld [vmem:[%s2732_s1 + $0x278] sm:$0xff]   ;;  %v1204_v62 = vor.u32 %v1203_v59, %v1202_v57  ;;  %v1529_v57 = vld [vmem:[%s267_s30] sm:$0xf] }
  0x33   : > { %2043 = vmatprep.subr.bf16.mxu1 %v2199_v63  ;;  %v2249_v63 = vld [vmem:[%s2732_s1 + $0x340] sm:$0xff]  }
  0x35   : > { %2022 = vmatpush3.bf16.msra.mxu0 %v2198_v1  ;;  %v2250_v1 = vld [vmem:[%s2732_s1 + $0x300] sm:$0xff]  }
  0x36   : > { %2044 = vmatpush3.bf16.msra.mxu1 %v2200_v0  ;;  %2023 = vmatprep.subr.bf16.mxu0 %v2201_v2  ;;  %v1028_v0 = vrot.slane %v2438_v34, 2  ;;  %v1381_v2 = vrot.slane %v2440_v35, 3  ;;  %v2254_v35 = vld [vmem:[%s2732_s1 + $0x310] sm:$0xff]  }
  0x37   : > { %2045 = vmatprep.subr.bf16.mxu1 %v2203_v3  ;;  %v2251_v3 = vld [vmem:[%s2732_s1 + $0x348] sm:$0xff]  }
  0x39   : > { %2024 = vmatpush3.bf16.msra.mxu0 %v2202_v5  ;;  %v2253_v5 = vld [vmem:[%s2732_s1 + $0x350] sm:$0xff]  }
  0x3a   : > { %2046 = vmatpush3.bf16.msra.mxu1 %v2204_v4  ;;  %2025 = vmatprep.subr.bf16.mxu0 %v2205_v6  ;;  %v2252_v4 = vld [vmem:[%s2732_s1 + $0x308] sm:$0xff]   ;;  %v2255_v6 = vld [vmem:[%s2732_s1 + $0x358] sm:$0xff]  }
  0x3b   : > { %2047 = vmatprep.subr.bf16.mxu1 %v2207_v7  ;;  %v2256_v7 = vld [vmem:[%s2732_s1 + $0x318] sm:$0xff]  }
  0x3d   : > { %2026 = vmatpush3.bf16.msra.mxu0 %v2206_v9  ;;  %v2258_v9 = vld [vmem:[%s2732_s1 + $0x320] sm:$0xff]  }
  0x3e   : > { %2048 = vmatpush3.bf16.msra.mxu1 %v2208_v8  ;;  %2027 = vmatprep.subr.bf16.mxu0 %v2209_v10  ;;  %v2257_v8 = vld [vmem:[%s2732_s1 + $0x360] sm:$0xff]   ;;  %v2259_v10 = vld [vmem:[%s2732_s1 + $0x368] sm:$0xff]  }
  0x3f   : > { %2049 = vmatprep.subr.bf16.mxu1 %v2211_v11  ;;  %v2260_v11 = vld [vmem:[%s2732_s1 + $0x328] sm:$0xff]  }
  0x41   : > { %2028 = vmatpush3.bf16.msra.mxu0 %v2210_v14  ;;  %v2263_v14 = vld [vmem:[%s2732_s1 + $0x378] sm:$0xff]  }
  0x42   : > { %2050 = vmatpush3.bf16.msra.mxu1 %v2212_v12  ;;  %2029 = vmatprep.subr.bf16.mxu0 %v2213_v16  ;;  %v2261_v12 = vld [vmem:[%s2732_s1 + $0x370] sm:$0xff]   ;;  %v1380_v16 = vrot.slane %v2438_v34, 3 }
  0x43   : > { %2051 = vmatprep.subr.bf16.mxu1 %v2215_v18 }
  0x45   : > { %2030 = vmatpush3.bf16.msra.mxu0 %v2214_v21 }
  0x46   : > { %2052 = vmatpush3.bf16.msra.mxu1 %v2216_v20  ;;  %2059 = vmatprep.subr.bf16.mxu0 %v2217_v23 }
  0x47   : > { %2081 = vmatprep.subr.bf16.mxu1 %v2219_v24 }
  0x48   : > { %809 = vmatmul.mubr.bf16.vlgmr.msra.gmra.mrb[4].mxu0 %v676_v27 }
  0x49   : > { %987 = vmatmul.mubr.bf16.vlgmr.msra.gmra.mrb[4].mxu1 %v852_v22  ;;  %2060 = vmatpush3.bf16.msra.mxu0 %v2218_v28 }
  0x4a   : > { %2082 = vmatpush3.bf16.msra.mxu1 %v2220_v26  ;;  %1338 = vmatprep.mubr.bf16.mxu1 %v1207_v25 }
  0x4b   : > { %2083 = vmatprep.subr.bf16.mxu1 %v2223_v30  ;;  %2061 = vmatprep.subr.bf16.mxu0 %v2221_v29 }
  0x4c   : > { %1160 = vmatprep.mubr.bf16.mxu0 %v1029_v31 }
  0x4d   : > { %2062 = vmatpush3.bf16.msra.mxu0 %v2222_v33 }
  0x4e   : > { %2084 = vmatpush3.bf16.msra.mxu1 %v2224_v32  ;;  %2063 = vmatprep.subr.bf16.mxu0 %v2225_v36 }
  0x4f   : > { %2085 = vmatprep.subr.bf16.mxu1 %v2227_v37 }
  0x51   : > { %2064 = vmatpush3.bf16.msra.mxu0 %v2226_v39 }
  0x52   : > { %2086 = vmatpush3.bf16.msra.mxu1 %v2228_v38  ;;  %2065 = vmatprep.subr.bf16.mxu0 %v2229_v40 }
  0x53   : > { %2087 = vmatprep.subr.bf16.mxu1 %v2231_v43 }
  0x55   : > { %2066 = vmatpush3.bf16.msra.mxu0 %v2230_v45 }
  0x56   : > { %2088 = vmatpush3.bf16.msra.mxu1 %v2232_v44  ;;  %2067 = vmatprep.subr.bf16.mxu0 %v2233_v46 }
  0x57   : > { %2089 = vmatprep.subr.bf16.mxu1 %v2235_v47 }
  0x59   : > { %2068 = vmatpush3.bf16.msra.mxu0 %v2234_v49 }
  0x5a   : > { %2090 = vmatpush3.bf16.msra.mxu1 %v2236_v48  ;;  %2069 = vmatprep.subr.bf16.mxu0 %v2237_v50 }
  0x5b   : > { %2091 = vmatprep.subr.bf16.mxu1 %v2239_v51 }
  0x5d   : > { %2070 = vmatpush3.bf16.msra.mxu0 %v2238_v53 }
  0x5e   : > { %2092 = vmatpush3.bf16.msra.mxu1 %v2240_v52  ;;  %2071 = vmatprep.subr.bf16.mxu0 %v2241_v54 }
  0x5f   : > { %2093 = vmatprep.subr.bf16.mxu1 %v2243_v55 }
  0x61   : > { %2072 = vmatpush3.bf16.msra.mxu0 %v2242_v58 }
  0x62   : > { %2094 = vmatpush3.bf16.msra.mxu1 %v2244_v56  ;;  %2073 = vmatprep.subr.bf16.mxu0 %v2245_v60  ;;  %v1967_v60 = vld [vmem:[%s2733_s2] ss:$0 sm:$0xff] }
  0x63   : > { %2095 = vmatprep.subr.bf16.mxu1 %v2247_v61 }
  0x65   : > { %2074 = vmatpush3.bf16.msra.mxu0 %v2246_v42 }
  0x66   : > { %2096 = vmatpush3.bf16.msra.mxu1 %v2248_v41  ;;  %2103 = vmatprep.subr.bf16.mxu0 %v2249_v63 }
  0x68   : > { %1161 = vmatmul.mubr.bf16.vlgmr.msra.gmra.mrb[8].mxu0 %v1028_v0 }
  0x69   : > { %1339 = vmatmul.mubr.bf16.vlgmr.msra.gmra.mrb[8].mxu1 %v1204_v62  ;;  %2104 = vmatpush3.bf16.msra.mxu0 %v2250_v1  ;;  %v1530_v62 = vunpack.c.l.bf16 %v1529_v57 }
  0x6a   : > { %1512 = vmatprep.mubr.bf16.mxu0 %v1381_v2  ;;  %2105 = vmatprep.subr.bf16.mxu0 %v2251_v3 }
  0x6d   : > { %2106 = vmatpush3.bf16.msra.mxu0 %v2252_v4 }
  0x6e   : > { %2107 = vmatprep.subr.bf16.mxu0 %v2253_v5 }
  0x71   : > { %2108 = vmatpush3.bf16.msra.mxu0 %v2254_v35 }
  0x72   : > { %2109 = vmatprep.subr.bf16.mxu0 %v2255_v6 }
  0x75   : > { %2110 = vmatpush3.bf16.msra.mxu0 %v2256_v7 }
  0x76   : > { %2111 = vmatprep.subr.bf16.mxu0 %v2257_v8 }
  0x79   : > { %2112 = vmatpush3.bf16.msra.mxu0 %v2258_v9 }
  0x7a   : > { %2113 = vmatprep.subr.bf16.mxu0 %v2259_v10 }
  0x7d   : > { %2114 = vmatpush3.bf16.msra.mxu0 %v2260_v11 }
  0x7e   : > { %2115 = vmatprep.subr.bf16.mxu0 %v2261_v12 }
  0x81   : > { %2116 = vmatpush3.bf16.msra.mxu0 %v2262_v13 }
  0x82   : > { %2117 = vmatprep.subr.bf16.mxu0 %v2263_v14 }
  0x85   : > { %2118 = vmatpush3.bf16.msra.mxu0 %v2264_v15 }
  0x88   : > { %1513 = vmatmul.mubr.bf16.vlgmr.msra.gmra.mrb[12].mxu0 %v1380_v16 }
  0xfb   : > { %v1987_v22 = vpop.f32.mrb[0].mxu0 }
  0xfc   : > { %v2009_v17 = vpop.f32.mrb[0].mxu1  ;;  %v1988_v23 = vpop.f32.mrb[1].mxu0 }
  0xfd   : > { %v2010_v18 = vpop.f32.mrb[1].mxu1  ;;  %v1989_v24 = vadd.f32 %v1988_v23, %v1987_v22  ;;  %v1990_v25 = vpop.f32.mrb[2].mxu0 }
  0xfe   : > { %v2011_v19 = vadd.f32 %v2010_v18, %v2009_v17  ;;  %v2012_v20 = vpop.f32.mrb[2].mxu1  ;;  %v1991_v26 = vpop.f32.mrb[3].mxu0 }
  0xff   : > { %v2013_v21 = vpop.f32.mrb[3].mxu1 }
 0x100   : > { %v638_v27 = vadd.f32 %v2011_v19, %v1989_v24 }
 0x11b   : > { %v2031_v33 = vpop.f32.mrb[4].mxu0 }
 0x11c   : > { %v2053_v28 = vpop.f32.mrb[4].mxu1  ;;  %v2032_v34 = vpop.f32.mrb[5].mxu0 }
 0x11d   : > { %v2054_v29 = vpop.f32.mrb[5].mxu1  ;;  %v2033_v36 = vadd.f32 %v2032_v34, %v2031_v33  ;;  %v2034_v37 = vpop.f32.mrb[6].mxu0 }
 0x11e   : > { %v2055_v30 = vadd.f32 %v2054_v29, %v2053_v28  ;;  %v2056_v31 = vpop.f32.mrb[6].mxu1  ;;  %v2035_v38 = vpop.f32.mrb[7].mxu0 }
 0x11f   : > { %v2057_v32 = vpop.f32.mrb[7].mxu1  ;;  %v816_v39 = vadd.f32 %v2033_v36, %v638_v27 }
 0x121   : > { %v994_v40 = vadd.f32 %v2055_v30, %v816_v39 }
 0x13b   : > { %v2075_v48 = vpop.f32.mrb[8].mxu0 }
 0x13c   : > { %v2097_v43 = vpop.f32.mrb[8].mxu1  ;;  %v2076_v49 = vpop.f32.mrb[9].mxu0 }
 0x13d   : > { %v2098_v44 = vpop.f32.mrb[9].mxu1  ;;  %v2077_v50 = vadd.f32 %v2076_v49, %v2075_v48  ;;  %v2078_v51 = vpop.f32.mrb[10].mxu0 }
 0x13e   : > { %v2099_v45 = vadd.f32 %v2098_v44, %v2097_v43  ;;  %v2100_v46 = vpop.f32.mrb[10].mxu1  ;;  %v2079_v52 = vpop.f32.mrb[11].mxu0 }
 0x13f   : > { %v2101_v47 = vpop.f32.mrb[11].mxu1  ;;  %v1168_v53 = vadd.f32 %v2077_v50, %v994_v40 }
 0x141   : > { %v1346_v54 = vadd.f32 %v2099_v45, %v1168_v53 }
 0x15b   : > { %v2119_v55 = vpop.f32.mrb[12].mxu0 }
 0x15c   : > { %v2120_v56 = vpop.f32.mrb[13].mxu0 }
 0x15d   : > { %v2121_v58 = vadd.f32 %v2120_v56, %v2119_v55  ;;  %v2122_v59 = vpop.f32.mrb[14].mxu0 }
 0x15e   : > { %v2123_v61 = vpop.f32.mrb[15].mxu0 }
 0x15f   : > { %v1520_v41 = vadd.f32 %v2121_v58, %v1346_v54 }
 0x161   : > { %v1528_v42 = vadd.f32 %v1967_v60, %v1520_v41 }
 0x163   : > { %v1531_v63 = vadd.f32 %v1530_v62, %v1528_v42 }
 0x165   : > { %v1532_v0 = vpack.c.bf16 %v1531_v63, %v1531_v63 }
 0x167   : > { %1533 = vst [vmem:[%s274_s8] sm:$0xf] %v1532_v0 }
 0x168 PF: > { %s14_s17 = sadd.s32 1, %s2287_s17   ;;  %s2736_s15 = smov %s2283_s16 }
 0x169   : > { %p11_p5 = scmp.ge.s32.totalorder %s14_s17, 4   ;;  %s2737_s16 = smov %s2739_s18 }
 0x16b   :  { %13 = sbr.rel (!%p11_p5) target bundleno = 2 (0x2), region = 81 }

// kernel: efficientnet1d_forward.23
= control target key start
LH: loop header
LB: loop body
LE: loop exit
PB: predicated region body
PF: predicated region fallthrough
CT: control target
= control target key end

     0   :  { %s958_s15 = smov 0   ;;  %s960_s16 = smov 0   ;;  %s1101_s0 = inlined_call_operand.vmem [shape: bf16[2,1,8,128], index: 0, kind: input, shape index: {}]   ;;  %s1102_s1 = inlined_call_operand.vmem [shape: bf16[1,128,512], index: 1, kind: input, shape index: {}]   ;;  %s1103_s2 = inlined_call_operand.vmem [shape: f32[1,512], index: 2, kind: input, shape index: {}]   ;;  %s1104_s3 = inlined_call_operand.vmem [shape: bf16[2,8,512], index: 3, kind: output, shape index: {0}]   ;;  %s1105_s4 = inlined_call_operand.vmem [shape: f32[2,1,512], index: 4, kind: output, shape index: {1}]  }
   0x1   :  { %s962_s17 = smov 0   ;;  %s964_s18 = smov 0  }
   0x2   :  { %s966_s19 = smov 0   ;;  %s968_s20 = smov 0  }
   0x3   :  { %s970_s21 = smov 0  }
   0x4 LB: > { %s24_s22 = sadd.s32 1, %s921_s19  ;;  %s27_s23 = sadd.s32 1, %s925_s20  ;;  %s929_s21 = sphi %s970_s21, %s15_s21   ;;  %s925_s20 = sphi %s968_s20, %s1111_s20   ;;  %s921_s19 = sphi %s966_s19, %s1110_s19   ;;  %s917_s18 = sphi %s964_s18, %s1109_s18   ;;  %s913_s17 = sphi %s962_s17, %s1108_s17   ;;  %s909_s16 = sphi %s960_s16, %s1107_s16   ;;  %s905_s15 = sphi %s958_s15, %s1106_s15  }
   0x5   : > { %p25_p0 = scmp.ge.s32.totalorder %s24_s22, 2  ;;  %s60_s24 = sadd.s32 1, %s909_s16 }
   0x6   : > { %p67_p1 = scmp.ne.s32.totalorder %s909_s16, %s905_s15  ;;  %p68_p2 = scmp.eq.s32.totalorder %s929_s21, 0 }
   0x7   : > { %s1113_s22 = smov (%p25_p0, %s24_s22), 0  ;;  %s1115_s23 = smov (!%p25_p0, %s27_s23), %s925_s20 }
   0x8   : > { %s57_s25 = ssub.s32 %s921_s19, %s1113_s22  ;;  %p69_p3 = por %p68_p2, %p67_p1 }
   0x9   : > { %p29_p4 = scmp.ge.s32.totalorder %s1115_s23, 2  ;;  %p58_p5 = scmp.eq.s32.totalorder %s57_s25, 0 }
   0xa   : > { %p749_p6 = scmp.ge.s32.totalorder %s929_s21, 4 }
   0xb   : > { %s1117_s23 = smov (%p29_p4, %s1115_s23), 0 }
   0xc   : > { %s1007_s26 = scalar_select %p58_p5, %s909_s16, %s60_s24  }
   0xd   : > { %175 = sbr.rel (%p749_p6) target bundleno = 32 (0x20), region = 16 }
  0x14   : > { %185 = sbr.rel (!%p69_p3) target bundleno = 32 (0x20), region = 24  ;;  %s187_s27 = sand.u32 (%p69_p3), 1, %s909_s16  }
  0x15   : > { %s783_s28 = sshll.u32 (%p69_p3), %s921_s19, 3  ;;  %s750_s29 = sshll.u32 (%p69_p3), %s187_s27, 7 }
  0x16   : > { %s1015_s6 = scalar_lea.vmem (%p69_p3), %s1102_s1, %s783_s28  ;;  %s189_s7 = scalar_lea.vmem (%p69_p3), [#allocation2], %s750_s29 }
  0x17   : > { %v250_v0 = vld [vmem:[%s1015_s6] sm:$0xff] (%p69_p3)  ;;  %v252_v1 = vld [vmem:[%s1015_s6 + $0x10] sm:$0xff] (%p69_p3) }
  0x18   : > { %v254_v2 = vld [vmem:[%s1015_s6 + $0x20] sm:$0xff] (%p69_p3)  ;;  %251 = vst [vmem:[%s189_s7] sm:$0xff] (%p69_p3), %v250_v0  ;;  %253 = vst [vmem:[%s189_s7 + $0x8] sm:$0xff] (%p69_p3), %v252_v1  ;;  %v256_v3 = vld [vmem:[%s1015_s6 + $0x30] sm:$0xff] (%p69_p3) }
  0x19   : > { %255 = vst [vmem:[%s189_s7 + $0x10] sm:$0xff] (%p69_p3), %v254_v2  ;;  %v258_v4 = vld [vmem:[%s1015_s6 + $0x40] sm:$0xff] (%p69_p3)  ;;  %v260_v5 = vld [vmem:[%s1015_s6 + $0x50] sm:$0xff] (%p69_p3)  ;;  %257 = vst [vmem:[%s189_s7 + $0x18] sm:$0xff] (%p69_p3), %v256_v3 }
  0x1a   : > { %259 = vst [vmem:[%s189_s7 + $0x20] sm:$0xff] (%p69_p3), %v258_v4  ;;  %261 = vst [vmem:[%s189_s7 + $0x28] sm:$0xff] (%p69_p3), %v260_v5  ;;  %v262_v6 = vld [vmem:[%s1015_s6 + $0x60] sm:$0xff] (%p69_p3)  ;;  %v264_v7 = vld [vmem:[%s1015_s6 + $0x70] sm:$0xff] (%p69_p3) }
  0x1b   : > { %v266_v8 = vld [vmem:[%s1015_s6 + $0x80] sm:$0xff]  ;;  %263 = vst [vmem:[%s189_s7 + $0x30] sm:$0xff] %v262_v6  ;;  %265 = vst [vmem:[%s189_s7 + $0x38] sm:$0xff] %v264_v7  ;;  %v268_v9 = vld [vmem:[%s1015_s6 + $0x90] sm:$0xff] }
  0x1c   : > { %267 = vst [vmem:[%s189_s7 + $0x40] sm:$0xff] %v266_v8  ;;  %v270_v10 = vld [vmem:[%s1015_s6 + $0xa0] sm:$0xff]  ;;  %v272_v11 = vld [vmem:[%s1015_s6 + $0xb0] sm:$0xff]  ;;  %269 = vst [vmem:[%s189_s7 + $0x48] sm:$0xff] %v268_v9 }
  0x1d   : > { %271 = vst [vmem:[%s189_s7 + $0x50] sm:$0xff] %v270_v10  ;;  %273 = vst [vmem:[%s189_s7 + $0x58] sm:$0xff] %v272_v11  ;;  %v274_v12 = vld [vmem:[%s1015_s6 + $0xc0] sm:$0xff]  ;;  %v276_v13 = vld [vmem:[%s1015_s6 + $0xd0] sm:$0xff] }
  0x1e   : > { %v278_v14 = vld [vmem:[%s1015_s6 + $0xe0] sm:$0xff]  ;;  %275 = vst [vmem:[%s189_s7 + $0x60] sm:$0xff] %v274_v12  ;;  %277 = vst [vmem:[%s189_s7 + $0x68] sm:$0xff] %v276_v13  ;;  %v280_v15 = vld [vmem:[%s1015_s6 + $0xf0] sm:$0xff] }
  0x1f   : > { %279 = vst [vmem:[%s189_s7 + $0x70] sm:$0xff] %v278_v14  ;;  %281 = vst [vmem:[%s189_s7 + $0x78] sm:$0xff] %v280_v15 }
  0x20 PF: > { %p753_p7 = scmp.ge.s32.totalorder %s929_s21, 1  ;;  %p294_p8 = scmp.lt.s32.totalorder %s929_s21, 5 }
  0x22   : > { %p295_p9 = pnand %p753_p7, %p294_p8 }
  0x23   : > { %s301_s8 = sand.u32 (!%p295_p9), 1, %s905_s15   ;;  %v931_v16 = vmov (!%p295_p9), 0   ;;  %p346_p10 = scmp.lt.s32.totalorder (!%p295_p9), %s917_s18, 1  ;;  %v395_v34 = vlaneseq (!%p295_p9)  ;;  %v932_v0 = vmov (!%p295_p9), 1966171168  }
  0x24   : > { %298 = sbr.rel (%p295_p9) target bundleno = 334 (0x14e), region = 66  ;;  %s754_s9 = sshll.u32 (!%p295_p9), %s301_s8, 7  ;;  %517 = vmatprep.mubr.bf16.mxu0 (!%p295_p9), %v931_v16  ;;  %v572_v1 = vunpack.c.l.s4 (!%p295_p9), %v932_v0 }
  0x25   : > { %s1036_s10 = scalar_lea.vmem (!%p295_p9), [#allocation2], %s754_s9  ;;  %s756_s15 = sshll.u32 (!%p295_p9), %s913_s17, 1  ;;  %v396_v35 = vshrl.u32 (!%p295_p9), %v395_v34, 7  ;;  %vm588_vm1 = vcmp.lt.s32.totalorder (!%p295_p9), %v395_v34, 256 }
  0x26   : > { %v843_v17 = vld [vmem:[%s1036_s10 + $0x4] ss:$8 sps:$4 sm:$0xff] (!%p295_p9)   ;;  %v845_v18 = vld [vmem:[%s1036_s10] ss:$8 sps:$4 sm:$0xff] (!%p295_p9)   ;;  %v846_v19 = vld [vmem:[%s1036_s10 + $0x14] ss:$8 sps:$4 sm:$0xff] (!%p295_p9)   ;;  %v573_v6 = vunpack.c.0.s8 (!%p295_p9), %v572_v1 }
  0x27   : > { %485 = vmatprep.subr.bf16.mxu0 (!%p295_p9), %v843_v17  ;;  %v848_v20 = vld [vmem:[%s1036_s10 + $0x10] ss:$8 sps:$4 sm:$0xff] (!%p295_p9)   ;;  %v849_v21 = vld [vmem:[%s1036_s10 + $0x24] ss:$8 sps:$4 sm:$0xff] (!%p295_p9)   ;;  %v851_v22 = vld [vmem:[%s1036_s10 + $0x20] ss:$8 sps:$4 sm:$0xff] (!%p295_p9)  }
  0x28   : > { %486 = vmatpush1.bf16.msra.mxu0 (!%p295_p9), %v845_v18  ;;  %v852_v23 = vld [vmem:[%s1036_s10 + $0x34] ss:$8 sps:$4 sm:$0xff] (!%p295_p9)   ;;  %v854_v24 = vld [vmem:[%s1036_s10 + $0x30] ss:$8 sps:$4 sm:$0xff] (!%p295_p9)   ;;  %v855_v25 = vld [vmem:[%s1036_s10 + $0x44] ss:$8 sps:$4 sm:$0xff] (!%p295_p9)   ;;  %v576_v11 = vsub.s32 (!%p295_p9), %v573_v6, %v396_v35 }
  0x29   : > { %487 = vmatprep.subr.bf16.mxu0 (!%p295_p9), %v846_v19  ;;  %v857_v26 = vld [vmem:[%s1036_s10 + $0x40] ss:$8 sps:$4 sm:$0xff] (!%p295_p9)   ;;  %v858_v27 = vld [vmem:[%s1036_s10 + $0x54] ss:$8 sps:$4 sm:$0xff] (!%p295_p9)   ;;  %v860_v28 = vld [vmem:[%s1036_s10 + $0x50] ss:$8 sps:$4 sm:$0xff] (!%p295_p9)  }
  0x2a   : > { %v861_v29 = vld [vmem:[%s1036_s10 + $0x64] ss:$8 sps:$4 sm:$0xff] (!%p295_p9)   ;;  %v863_v30 = vld [vmem:[%s1036_s10 + $0x60] ss:$8 sps:$4 sm:$0xff] (!%p295_p9)   ;;  %v864_v31 = vld [vmem:[%s1036_s10 + $0x74] ss:$8 sps:$4 sm:$0xff] (!%p295_p9)  }
  0x2b   : > { %s1119_s18 = smov (!%p346_p10, %s917_s18), 1  ;;  %v866_v32 = vld [vmem:[%s1036_s10 + $0x70] ss:$8 sps:$4 sm:$0xff]   ;;  %p352_p11 = scmp.lt.s32.totalorder %s756_s15, 3  ;;  %v397_v36 = vsub.s32 0, %v396_v35  ;;  %v401_v38 = vsub.s32 1, %v396_v35 }
  0x2c   : > { %488 = vmatpush1.bf16.msra.mxu0 %v848_v20  ;;  %s755_s11 = sshll.u32 %s1119_s18, 2  ;;  %vm551_vm0 = vcmp.lt.s32.totalorder %v396_v35, 4 }
  0x2d   : > { %489 = vmatprep.subr.bf16.mxu0 %v849_v21  ;;  %s349_s14 = scalar_lea.vmem %s1101_s0, %s755_s11  ;;  %s1121_s15 = smov (!%p352_p11, %s756_s15), 3 }
  0x2e   : > { %v376_v33 = vld [vmem:[%s349_s14] sm:$0xf]  ;;  %s354_s27 = scalar_lea.vmem %s1103_s2, %s1121_s15  ;;  %s1070_s17 = sadd.s32 %s755_s11, %s1121_s15 }
  0x2f   : > { %v393_v37 = vld [vmem:[%s354_s27] sm:$0x3]  ;;  %s759_s28 = sshll.u32 %s1070_s17, 2  ;;  %s373_s7 = scalar_lea.vmem %s1105_s4, %s1070_s17 }
  0x30   : > { %490 = vmatpush1.bf16.msra.mxu0 %v851_v22  ;;  %v398_v39 = vrot.slane %v393_v37, %v397_v36  ;;  %v402_v40 = vrot.slane %v393_v37, %v401_v38  ;;  %s364_s5 = scalar_lea.vmem %s1104_s3, %s759_s28 }
  0x31   : > { %491 = vmatprep.subr.bf16.mxu0 %v852_v23 }
  0x34   : > { %492 = vmatpush1.bf16.msra.mxu0 %v854_v24 }
  0x35   : > { %493 = vmatprep.subr.bf16.mxu0 %v855_v25 }
  0x38   : > { %494 = vmatpush1.bf16.msra.mxu0 %v857_v26 }
  0x39   : > { %495 = vmatprep.subr.bf16.mxu0 %v858_v27 }
  0x3c   : > { %496 = vmatpush1.bf16.msra.mxu0 %v860_v28 }
  0x3d   : > { %497 = vmatprep.subr.bf16.mxu0 %v861_v29 }
  0x40   : > { %498 = vmatpush1.bf16.msra.mxu0 %v863_v30 }
  0x41   : > { %499 = vmatprep.subr.bf16.mxu0 %v864_v31 }
  0x44   : > { %500 = vmatpush1.bf16.msra.mxu0 %v866_v32 }
  0x47   : > { %518 = vmatmul.mubr.bf16.vlgmr.msra.gmra.mrb[0].mxu0 %v376_v33 }
 0x11a   : > { %v519_v41 = vpop.f32.mrb[0].mxu0 }
 0x11b   : > { %v520_v42 = vadd.f32 %v519_v41, %v398_v39  ;;  %v521_v43 = vpop.f32.mrb[1].mxu0 }
 0x11c   : > { %v522_v44 = vadd.f32 %v521_v43, %v402_v40  ;;  %v523_v45 = vpop.f32.mrb[2].mxu0 }
 0x11d   : > { %v778_v46 = vmul.f32 -1.442695, %v520_v42  ;;  %v524_v47 = vpop.f32.mrb[3].mxu0 }
 0x11e   : > { %v779_v48 = vmul.f32 -1.442695, %v522_v44 }
 0x11f   : > { %867 = vpow2.f32 %v778_v46 }
 0x120   : > { %869 = vpow2.f32 %v779_v48 }
 0x129   : > { %v868_v49 = vpop.eup %867 }
 0x12a   : > { %v870_v50 = vpop.eup %869  ;;  %v532_v51 = vadd.f32 1.0, %v868_v49 }
 0x12b   : > { %v533_v52 = vadd.f32 1.0, %v870_v50 }
 0x12c   : > { %871 = vrcp.f32 %v532_v51 }
 0x12d   : > { %873 = vrcp.f32 %v533_v52 }
 0x136   : > { %v872_v53 = vpop.eup %871 }
 0x137   : > { %v874_v54 = vpop.eup %873  ;;  %v538_v55 = vmul.f32 %v872_v53, %v520_v42 }
 0x138   : > { %v539_v56 = vmul.f32 %v874_v54, %v522_v44 }
 0x139   : > { %v554_v57 = vsel %vm551_vm0, %v538_v55, 0.0 }
 0x13a   : > { %v556_v58 = vrot.slane %v554_v57, 4  ;;  %v784_v59 = vpack.c.bf16 %v539_v56, %v538_v55  ;;  %v555_v60 = vsel %vm551_vm0, %v539_v56, 0.0 }
 0x13b   : > { %v562_v61 = vrot.slane %v555_v60, 4 }
 0x13c   : > { %v557_v62 = vadd.f32 %v556_v58, %v554_v57  ;;  %548 = vst [vmem:[%s364_s5] sm:$0xff] %v784_v59 }
 0x13d   : > { %v563_v63 = vadd.f32 %v562_v61, %v555_v60 }
 0x13e   : > { %v558_v2 = vrot.slane %v557_v62, 2 }
 0x13f   : > { %v564_v3 = vrot.slane %v563_v63, 2 }
 0x140   : > { %v559_v4 = vadd.f32 %v558_v2, %v557_v62 }
 0x141   : > { %v565_v5 = vadd.f32 %v564_v3, %v563_v63 }
 0x142   : > { %v560_v7 = vrot.slane %v559_v4, 1 }
 0x143   : > { %v566_v8 = vrot.slane %v565_v5, 1 }
 0x144   : > { %v561_v9 = vadd.f32 %v560_v7, %v559_v4 }
 0x145   : > { %v567_v10 = vadd.f32 %v566_v8, %v565_v5 }
 0x147   : > { %v570_v12 = vcombine.low %v561_v9, %v567_v10 }
 0x149   : > { %v577_v13 = vrot.slane %v570_v12, %v576_v11 }
 0x14b   : > { %v584_v14 = vrot.slane %v577_v13, %v576_v11 }
 0x14d   : > { %590 = vst.msk [vmem:[%s373_s7] sm:$0x3] %vm588_vm1, %v584_v14 }
 0x14e PF: > { %s15_s21 = sadd.s32 1, %s929_s21   ;;  %s1106_s15 = smov %s909_s16 }
 0x14f   : > { %p12_p12 = scmp.ge.s32.totalorder %s15_s21, 6   ;;  %s1107_s16 = smov %s1007_s26 }
 0x150   : > { %s1108_s17 = smov %s921_s19  ;;  %s1109_s18 = smov %s925_s20 }
 0x151   : > { %s1110_s19 = smov %s1113_s22  ;;  %s1111_s20 = smov %s1117_s23 }
 0x152   :  { %14 = sbr.rel (!%p12_p12) target bundleno = 4 (0x4), region = 123 }

// kernel: efficientnet1d_forward.22
= control target key start
LH: loop header
LB: loop body
LE: loop exit
PB: predicated region body
PF: predicated region fallthrough
CT: control target
= control target key end

     0   :  { %s3312_s12 = smov 0   ;;  %s3314_s13 = smov 0   ;;  %s3951_s0 = inlined_call_operand.vmem [shape: bf16[2,2,13,256], index: 0, kind: input, shape index: {}]   ;;  %s3952_s1 = inlined_call_operand.vmem [shape: bf16[11,256,128], index: 1, kind: input, shape index: {}]   ;;  %s3953_s2 = inlined_call_operand.vmem [shape: f32[1,128], index: 2, kind: input, shape index: {}]   ;;  %s3954_s3 = inlined_call_operand.vmem [shape: bf16[2,8,128], index: 3, kind: output, shape index: {}]  }
   0x1   :  { %s3316_s14 = smov 0  }
   0x2 LB: > { %s25_s15 = sadd.s32 1, %s3286_s13  ;;  %p2304_p0 = scmp.ge.s32.totalorder %s3290_s14, 1  ;;  %s3290_s14 = sphi %s3316_s14, %s13_s14   ;;  %s3286_s13 = sphi %s3314_s13, %s3956_s13   ;;  %s3282_s12 = sphi %s3312_s12, %s3955_s12  }
   0x3   : > { %p27_p1 = scmp.ge.s32.totalorder %s25_s15, 2  ;;  %p168_p2 = scmp.lt.s32.totalorder %s3290_s14, 3 }
   0x5   : > { %s3958_s15 = smov (%p27_p1, %s25_s15), 0  ;;  %p169_p3 = pnand %p2304_p0, %p168_p2 }
   0x6   : > { %v3084_v0 = vld [vmem:[%s3952_s1 + $0xc0] sm:$0xff] (!%p169_p3)   ;;  %v3088_v4 = vld [vmem:[%s3952_s1 + $0xc8] sm:$0xff] (!%p169_p3)   ;;  %v3092_v8 = vld [vmem:[%s3952_s1 + $0xd0] sm:$0xff] (!%p169_p3)   ;;  %p201_p4 = scmp.lt.s32.totalorder (!%p169_p3), %s3282_s12, 1 }
   0x7   : > { %172 = sbr.rel (%p169_p3) target bundleno = 422 (0x1a6), region = 32  ;;  %v3085_v1 = vld [vmem:[%s3952_s1 + $0x40] sm:$0xff] (!%p169_p3)   ;;  %2818 = vmatprep.subr.bf16.mxu0 (!%p169_p3), %v3084_v0  ;;  %v3089_v5 = vld [vmem:[%s3952_s1 + $0x48] sm:$0xff] (!%p169_p3)   ;;  %v3093_v9 = vld [vmem:[%s3952_s1 + $0x50] sm:$0xff] (!%p169_p3)  }
   0x8   : > { %v3086_v2 = vld [vmem:[%s3952_s1 + $0x80] sm:$0xff] (!%p169_p3)   ;;  %2840 = vmatprep.subr.bf16.mxu1 (!%p169_p3), %v3085_v1  ;;  %v3090_v6 = vld [vmem:[%s3952_s1 + $0x88] sm:$0xff] (!%p169_p3)   ;;  %v3094_v10 = vld [vmem:[%s3952_s1 + $0x90] sm:$0xff] (!%p169_p3)  }
   0x9   : > { %v3087_v3 = vld [vmem:[%s3952_s1] sm:$0xff] (!%p169_p3)   ;;  %2819 = vmatpush3.bf16.msra.mxu0 (!%p169_p3), %v3086_v2  ;;  %v3091_v7 = vld [vmem:[%s3952_s1 + $0x8] sm:$0xff] (!%p169_p3)   ;;  %v3095_v11 = vld [vmem:[%s3952_s1 + $0x10] sm:$0xff] (!%p169_p3)  }
   0xa   : > { %2841 = vmatpush3.bf16.msra.mxu1 (!%p169_p3), %v3087_v3  ;;  %2820 = vmatprep.subr.bf16.mxu0 (!%p169_p3), %v3088_v4  ;;  %v3096_v12 = vld [vmem:[%s3952_s1 + $0xd8] sm:$0xff] (!%p169_p3)   ;;  %v3100_v16 = vld [vmem:[%s3952_s1 + $0xe0] sm:$0xff] (!%p169_p3)   ;;  %v3104_v20 = vld [vmem:[%s3952_s1 + $0xe8] sm:$0xff] (!%p169_p3)  }
   0xb   : > { %2842 = vmatprep.subr.bf16.mxu1 (!%p169_p3), %v3089_v5  ;;  %v3097_v13 = vld [vmem:[%s3952_s1 + $0x58] sm:$0xff] (!%p169_p3)   ;;  %v3101_v17 = vld [vmem:[%s3952_s1 + $0x60] sm:$0xff] (!%p169_p3)   ;;  %v3105_v21 = vld [vmem:[%s3952_s1 + $0x68] sm:$0xff] (!%p169_p3)  }
   0xc   : > { %v3098_v14 = vld [vmem:[%s3952_s1 + $0x98] sm:$0xff] (!%p169_p3)   ;;  %v3102_v18 = vld [vmem:[%s3952_s1 + $0xa0] sm:$0xff] (!%p169_p3)   ;;  %v3106_v22 = vld [vmem:[%s3952_s1 + $0xa8] sm:$0xff] (!%p169_p3)  }
   0xd   : > { %2821 = vmatpush3.bf16.msra.mxu0 (!%p169_p3), %v3090_v6  ;;  %v3099_v15 = vld [vmem:[%s3952_s1 + $0x18] sm:$0xff] (!%p169_p3)   ;;  %v3103_v19 = vld [vmem:[%s3952_s1 + $0x20] sm:$0xff] (!%p169_p3)   ;;  %v3107_v23 = vld [vmem:[%s3952_s1 + $0x28] sm:$0xff] (!%p169_p3)  }
   0xe   : > { %2843 = vmatpush3.bf16.msra.mxu1 %v3091_v7  ;;  %2822 = vmatprep.subr.bf16.mxu0 %v3092_v8  ;;  %s3960_s12 = smov (!%p201_p4, %s3282_s12), 1  ;;  %v3108_v24 = vld [vmem:[%s3952_s1 + $0xf0] sm:$0xff]   ;;  %v3112_v28 = vld [vmem:[%s3952_s1 + $0xf8] sm:$0xff]   ;;  %v3124_v41 = vld [vmem:[%s3952_s1 + $0x140] sm:$0xff]  }
   0xf   : > { %2844 = vmatprep.subr.bf16.mxu1 %v3093_v9  ;;  %v3109_v25 = vld [vmem:[%s3952_s1 + $0x70] sm:$0xff]   ;;  %s2817_s24 = sshll.u32 %s3960_s12, 5  ;;  %v3113_v29 = vld [vmem:[%s3952_s1 + $0x78] sm:$0xff]   ;;  %v3125_v42 = vld [vmem:[%s3952_s1 + $0x100] sm:$0xff]   ;;  %s2307_s29 = sshll.u32 %s3960_s12, 2 }
  0x10   : > { %v3110_v26 = vld [vmem:[%s3952_s1 + $0xb0] sm:$0xff]   ;;  %s205_s6 = scalar_lea.vmem %s3951_s0, %s2817_s24  ;;  %v3114_v30 = vld [vmem:[%s3952_s1 + $0xb8] sm:$0xff]   ;;  %v3126_v43 = vld [vmem:[%s3952_s1 + $0x1c0] sm:$0xff]   ;;  %s219_s5 = scalar_lea.vmem %s3954_s3, %s2307_s29 }
  0x11   : > { %2823 = vmatpush3.bf16.msra.mxu0 %v3094_v10  ;;  %v3111_v27 = vld [vmem:[%s3952_s1 + $0x30] sm:$0xff]   ;;  %v3115_v31 = vld [vmem:[%s3952_s1 + $0x38] sm:$0xff]   ;;  %v221_v34 = vld [vmem:[%s205_s6] sm:$0xff] }
  0x12   : > { %2845 = vmatpush3.bf16.msra.mxu1 %v3095_v11  ;;  %2824 = vmatprep.subr.bf16.mxu0 %v3096_v12  ;;  %v2308_v32 = vld [vmem:[%s205_s6 + $0x10] sm:$0xff]  ;;  %v2309_v33 = vld [vmem:[%s205_s6 + $0x18] sm:$0x77]  ;;  %v222_v36 = vld [vmem:[%s205_s6 + $0x8] sm:$0x77]  ;;  %v2361_v37 = vcombine.high %v221_v34, %v221_v34  ;;  %v2360_v40 = vcombine.low %v221_v34, %v221_v34 }
  0x13   : > { %2846 = vmatprep.subr.bf16.mxu1 %v3097_v13  ;;  %v2343_v35 = vcombine.high %v2308_v32, %v2308_v32  ;;  %v3436_v38 = vcombine.high %v221_v34, %v222_v36  ;;  %v2342_v39 = vcombine.low %v2308_v32, %v2308_v32  ;;  %v3450_v45 = vcombine.high %v2308_v32, %v2309_v33  ;;  %v3127_v46 = vld [vmem:[%s3952_s1 + $0x180] sm:$0xff]   ;;  %v3128_v48 = vld [vmem:[%s3952_s1 + $0x148] sm:$0xff]   ;;  %v3132_v56 = vld [vmem:[%s3952_s1 + $0x150] sm:$0xff]  }
  0x14   : > { %569 = vmatprep.mubr.bf16.mxu1 %v2361_v37  ;;  %v3129_v49 = vld [vmem:[%s3952_s1 + $0x108] sm:$0xff]   ;;  %v3133_v57 = vld [vmem:[%s3952_s1 + $0x110] sm:$0xff]   ;;  %v3136_v62 = vld [vmem:[%s3952_s1 + $0x158] sm:$0xff]   ;;  %v3502_v2 = vcombine.low %v221_v34, %v222_v36  ;;  %v3510_v5 = vcombine.low %v2308_v32, %v2309_v33 }
  0x15   : > { %2825 = vmatpush3.bf16.msra.mxu0 %v3098_v14  ;;  %426 = vmatprep.mubr.bf16.mxu0 %v2343_v35  ;;  %v3448_v44 = vshrl.u32 %v3436_v38, 16  ;;  %v3456_v47 = vshll.u32 %v3436_v38, 16  ;;  %v3130_v51 = vld [vmem:[%s3952_s1 + $0x1c8] sm:$0xff]   ;;  %v814_v52 = vshrl.u32 %v3450_v45, 16  ;;  %v816_v55 = vshll.u32 %v3450_v45, 16  ;;  %v3134_v59 = vld [vmem:[%s3952_s1 + $0x1d0] sm:$0xff]  }
  0x16   : > { %2847 = vmatpush3.bf16.msra.mxu1 %v3099_v15  ;;  %2826 = vmatprep.subr.bf16.mxu0 %v3100_v16  ;;  %v3131_v53 = vld [vmem:[%s3952_s1 + $0x188] sm:$0xff]   ;;  %v3135_v60 = vld [vmem:[%s3952_s1 + $0x190] sm:$0xff]   ;;  %v3137_v63 = vld [vmem:[%s3952_s1 + $0x118] sm:$0xff]   ;;  %v3522_v9 = vshll.u32 %v3502_v2, 16  ;;  %v807_v11 = vshrl.u32 %v3510_v5, 16  ;;  %v809_v13 = vshll.u32 %v3510_v5, 16 }
  0x17   : > { %2848 = vmatprep.subr.bf16.mxu1 %v3101_v17  ;;  %v627_v50 = vrot.slane %v3456_v47, 1  ;;  %v818_v58 = vrot.slane %v816_v55, 1  ;;  %v3138_v0 = vld [vmem:[%s3952_s1 + $0x1d8] sm:$0xff]   ;;  %v3140_v3 = vld [vmem:[%s3952_s1 + $0x160] sm:$0xff]   ;;  %v3144_v8 = vld [vmem:[%s3952_s1 + $0x168] sm:$0xff]   ;;  %v2048_v32 = vrot.slane %v3456_v47, 3 }
  0x18   : > { %v3139_v1 = vld [vmem:[%s3952_s1 + $0x198] sm:$0xff]   ;;  %v3141_v4 = vld [vmem:[%s3952_s1 + $0x120] sm:$0xff]   ;;  %v3145_v10 = vld [vmem:[%s3952_s1 + $0x128] sm:$0xff]   ;;  %v3535_v15 = vrot.slane %v807_v11, 1  ;;  %v3540_v17 = vrot.slane %v809_v13, 2 }
  0x19   : > { %2827 = vmatpush3.bf16.msra.mxu0 %v3102_v18  ;;  %v628_v54 = vor.u32 %v627_v50, %v3448_v44  ;;  %v819_v61 = vor.u32 %v818_v58, %v814_v52  ;;  %v3142_v6 = vld [vmem:[%s3952_s1 + $0x1e0] sm:$0xff]   ;;  %v3146_v12 = vld [vmem:[%s3952_s1 + $0x1e8] sm:$0xff]   ;;  %v3148_v16 = vld [vmem:[%s3952_s1 + $0x170] sm:$0xff]  }
  0x1a   : > { %2849 = vmatpush3.bf16.msra.mxu1 %v3103_v19  ;;  %2828 = vmatprep.subr.bf16.mxu0 %v3104_v20  ;;  %v3143_v7 = vld [vmem:[%s3952_s1 + $0x1a0] sm:$0xff]   ;;  %v3147_v14 = vld [vmem:[%s3952_s1 + $0x1a8] sm:$0xff]   ;;  %v3149_v18 = vld [vmem:[%s3952_s1 + $0x130] sm:$0xff]   ;;  %v3549_v20 = vshrl.u32 %v3502_v2, 16 }
  0x1b   : > { %2850 = vmatprep.subr.bf16.mxu1 %v3105_v21  ;;  %v3150_v19 = vld [vmem:[%s3952_s1 + $0x1f0] sm:$0xff]   ;;  %v1520_v21 = vor.u32 %v3540_v17, %v3535_v15  ;;  %v3156_v33 = vld [vmem:[%s3952_s1 + $0x240] sm:$0xff]   ;;  %v3163_v50 = vld [vmem:[%s3952_s1 + $0x288] sm:$0xff]  }
  0x1c   : > { %v2044_v35 = vrot.slane %v3549_v20, 2  ;;  %v3157_v36 = vld [vmem:[%s3952_s1 + $0x200] sm:$0xff]   ;;  %v3169_v58 = vld [vmem:[%s3952_s1 + $0x218] sm:$0xff]   ;;  %v3228_v15 = vld [vmem:[%s3952_s1 + $0x450] sm:$0xff]  }
  0x1d   : > { %2829 = vmatpush3.bf16.msra.mxu0 %v3106_v22  ;;  %v3151_v22 = vld [vmem:[%s3952_s1 + $0x1b0] sm:$0xff]  }
  0x1e   : > { %2851 = vmatpush3.bf16.msra.mxu1 %v3107_v23  ;;  %2830 = vmatprep.subr.bf16.mxu0 %v3108_v24  ;;  %v620_v23 = vrot.slane %v3522_v9, 1  ;;  %v3152_v24 = vld [vmem:[%s3952_s1 + $0x178] sm:$0xff]   ;;  %v3229_v17 = vld [vmem:[%s3952_s1 + $0x410] sm:$0xff]  }
  0x1f   : > { %2852 = vmatprep.subr.bf16.mxu1 %v3109_v25  ;;  %v811_v25 = vrot.slane %v809_v13, 1  ;;  %v3184_v13 = vld [vmem:[%s3952_s1 + $0x278] sm:$0xff]  }
  0x21   : > { %2831 = vmatpush3.bf16.msra.mxu0 %v3110_v26  ;;  %v3153_v26 = vld [vmem:[%s3952_s1 + $0x138] sm:$0xff]   ;;  %v812_v34 = vor.u32 %v811_v25, %v807_v11  ;;  %v3183_v11 = vld [vmem:[%s3952_s1 + $0x2b0] sm:$0xff]   ;;  %v1166_v25 = vrot.slane %v3510_v5, 1 }
  0x22   : > { %2853 = vmatpush3.bf16.msra.mxu1 %v3111_v27  ;;  %2832 = vmatprep.subr.bf16.mxu0 %v3112_v28  ;;  %v993_v27 = vrot.slane %v3436_v38, 1  ;;  %v3154_v28 = vld [vmem:[%s3952_s1 + $0x1f8] sm:$0xff]  }
  0x23   : > { %2854 = vmatprep.subr.bf16.mxu1 %v3113_v29  ;;  %v2047_v29 = vrot.slane %v3448_v44, 2 }
  0x25   : > { %2833 = vmatpush3.bf16.msra.mxu0 %v3114_v30  ;;  %v3155_v30 = vld [vmem:[%s3952_s1 + $0x1b8] sm:$0xff]   ;;  %v3580_v37 = vor.u32 %v2048_v32, %v2047_v29  ;;  %v3193_v29 = vld [vmem:[%s3952_s1 + $0x308] sm:$0xff]   ;;  %v3196_v32 = vld [vmem:[%s3952_s1 + $0x350] sm:$0xff]  }
  0x26   : > { %2855 = vmatpush3.bf16.msra.mxu1 %v3115_v31  ;;  %2862 = vmatprep.subr.bf16.mxu0 %v3124_v41  ;;  %v621_v31 = vor.u32 %v620_v23, %v3549_v20  ;;  %v3159_v41 = vld [vmem:[%s3952_s1 + $0x280] sm:$0xff]   ;;  %v3187_v23 = vld [vmem:[%s3952_s1 + $0x2b8] sm:$0xff]  }
  0x27   : > { %2884 = vmatprep.subr.bf16.mxu1 %v3126_v43 }
  0x28   : > { %427 = vmatmul.mubr.bf16.vlgmr.msra.gmra.mrb[0].mxu0 %v2342_v39  ;;  %v2045_v39 = vrot.slane %v3522_v9, 3 }
  0x29   : > { %570 = vmatmul.mubr.bf16.vlgmr.msra.gmra.mrb[0].mxu1 %v2360_v40  ;;  %2863 = vmatpush3.bf16.msra.mxu0 %v3125_v42  ;;  %v3158_v40 = vld [vmem:[%s3952_s1 + $0x2c0] sm:$0xff]   ;;  %v1167_v42 = vrot.slane %v3450_v45, 1 }
  0x2a   : > { %2885 = vmatpush3.bf16.msra.mxu1 %v3127_v46  ;;  %2864 = vmatprep.subr.bf16.mxu0 %v3128_v48  ;;  %v3590_v43 = vor.u32 %v2045_v39, %v2044_v35  ;;  %v3160_v46 = vld [vmem:[%s3952_s1 + $0x248] sm:$0xff]   ;;  %v3199_v35 = vld [vmem:[%s3952_s1 + $0x390] sm:$0xff]   ;;  %v3201_v39 = vld [vmem:[%s3952_s1 + $0x318] sm:$0xff]  }
  0x2b   : > { %2886 = vmatprep.subr.bf16.mxu1 %v3130_v51  ;;  %759 = vmatprep.mubr.bf16.mxu0 %v628_v54  ;;  %v3161_v48 = vld [vmem:[%s3952_s1 + $0x208] sm:$0xff]   ;;  %v3164_v51 = vld [vmem:[%s3952_s1 + $0x250] sm:$0xff]  }
  0x2c   : > { %950 = vmatprep.mubr.bf16.mxu1 %v819_v61  ;;  %v3166_v54 = vld [vmem:[%s3952_s1 + $0x2d0] sm:$0xff]   ;;  %v3172_v61 = vld [vmem:[%s3952_s1 + $0x260] sm:$0xff]  }
  0x2d   : > { %2865 = vmatpush3.bf16.msra.mxu0 %v3129_v49  ;;  %v3162_v49 = vld [vmem:[%s3952_s1 + $0x2c8] sm:$0xff]  }
  0x2e   : > { %2887 = vmatpush3.bf16.msra.mxu1 %v3131_v53  ;;  %2866 = vmatprep.subr.bf16.mxu0 %v3132_v56  ;;  %v3165_v53 = vld [vmem:[%s3952_s1 + $0x210] sm:$0xff]  }
  0x2f   : > { %2888 = vmatprep.subr.bf16.mxu1 %v3134_v59  ;;  %v3167_v56 = vld [vmem:[%s3952_s1 + $0x290] sm:$0xff]   ;;  %v3170_v59 = vld [vmem:[%s3952_s1 + $0x2d8] sm:$0xff]  }
  0x31   : > { %2867 = vmatpush3.bf16.msra.mxu0 %v3133_v57  ;;  %v3168_v57 = vld [vmem:[%s3952_s1 + $0x258] sm:$0xff]  }
  0x32   : > { %2889 = vmatpush3.bf16.msra.mxu1 %v3135_v60  ;;  %2868 = vmatprep.subr.bf16.mxu0 %v3136_v62  ;;  %v3171_v60 = vld [vmem:[%s3952_s1 + $0x298] sm:$0xff]   ;;  %v3173_v62 = vld [vmem:[%s3952_s1 + $0x220] sm:$0xff]  }
  0x33   : > { %2890 = vmatprep.subr.bf16.mxu1 %v3138_v0  ;;  %v3175_v0 = vld [vmem:[%s3952_s1 + $0x2a0] sm:$0xff]  }
  0x35   : > { %2869 = vmatpush3.bf16.msra.mxu0 %v3137_v63  ;;  %v3174_v63 = vld [vmem:[%s3952_s1 + $0x2e0] sm:$0xff]  }
  0x36   : > { %2891 = vmatpush3.bf16.msra.mxu1 %v3139_v1  ;;  %2870 = vmatprep.subr.bf16.mxu0 %v3140_v3  ;;  %v3176_v1 = vld [vmem:[%s3952_s1 + $0x268] sm:$0xff]  }
  0x37   : > { %2892 = vmatprep.subr.bf16.mxu1 %v3142_v6  ;;  %v3177_v3 = vld [vmem:[%s3952_s1 + $0x228] sm:$0xff]  }
  0x38   : > { %v3179_v6 = vld [vmem:[%s3952_s1 + $0x2a8] sm:$0xff]  }
  0x39   : > { %2871 = vmatpush3.bf16.msra.mxu0 %v3141_v4  ;;  %v3178_v4 = vld [vmem:[%s3952_s1 + $0x2e8] sm:$0xff]  }
  0x3a   : > { %2893 = vmatpush3.bf16.msra.mxu1 %v3143_v7  ;;  %2872 = vmatprep.subr.bf16.mxu0 %v3144_v8  ;;  %v3180_v7 = vld [vmem:[%s3952_s1 + $0x270] sm:$0xff]  }
  0x3b   : > { %2894 = vmatprep.subr.bf16.mxu1 %v3146_v12  ;;  %v3181_v8 = vld [vmem:[%s3952_s1 + $0x230] sm:$0xff]   ;;  %v992_v12 = vrot.slane %v3502_v2, 1 }
  0x3d   : > { %2873 = vmatpush3.bf16.msra.mxu0 %v3145_v10  ;;  %v3182_v10 = vld [vmem:[%s3952_s1 + $0x2f0] sm:$0xff]  }
  0x3e   : > { %2895 = vmatpush3.bf16.msra.mxu1 %v3147_v14  ;;  %2874 = vmatprep.subr.bf16.mxu0 %v3148_v16  ;;  %v1343_v14 = vrot.slane %v3448_v44, 1  ;;  %v3185_v16 = vld [vmem:[%s3952_s1 + $0x238] sm:$0xff]   ;;  %v1522_v44 = vrot.slane %v816_v55, 2  ;;  %v3191_v55 = vld [vmem:[%s3952_s1 + $0x380] sm:$0xff]  }
  0x3f   : > { %2896 = vmatprep.subr.bf16.mxu1 %v3150_v19  ;;  %v3186_v19 = vld [vmem:[%s3952_s1 + $0x2f8] sm:$0xff]  }
  0x41   : > { %2875 = vmatpush3.bf16.msra.mxu0 %v3149_v18  ;;  %v1344_v18 = vrot.slane %v3456_v47, 2  ;;  %v3188_v47 = vld [vmem:[%s3952_s1 + $0x340] sm:$0xff]  }
  0x42   : > { %2897 = vmatpush3.bf16.msra.mxu1 %v3151_v22  ;;  %2876 = vmatprep.subr.bf16.mxu0 %v3152_v24  ;;  %v1521_v22 = vrot.slane %v814_v52, 1  ;;  %v3189_v24 = vld [vmem:[%s3952_s1 + $0x300] sm:$0xff]  }
  0x43   : > { %2898 = vmatprep.subr.bf16.mxu1 %v3154_v28  ;;  %v1345_v52 = vor.u32 %v1344_v18, %v1343_v14  ;;  %v3192_v28 = vld [vmem:[%s3952_s1 + $0x348] sm:$0xff]   ;;  %v3233_v14 = vld [vmem:[%s3952_s1 + $0x418] sm:$0xff]  }
  0x44   : > { %v3235_v18 = vld [vmem:[%s3952_s1 + $0x498] sm:$0xff]  }
  0x45   : > { %2877 = vmatpush3.bf16.msra.mxu0 %v3153_v26  ;;  %v3190_v26 = vld [vmem:[%s3952_s1 + $0x3c0] sm:$0xff]  }
  0x46   : > { %2899 = vmatpush3.bf16.msra.mxu1 %v3155_v30  ;;  %2906 = vmatprep.subr.bf16.mxu0 %v3156_v33  ;;  %v3194_v30 = vld [vmem:[%s3952_s1 + $0x3c8] sm:$0xff]   ;;  %v3197_v33 = vld [vmem:[%s3952_s1 + $0x310] sm:$0xff]  }
  0x47   : > { %2928 = vmatprep.subr.bf16.mxu1 %v3158_v40  ;;  %v3202_v40 = vld [vmem:[%s3952_s1 + $0x3d8] sm:$0xff]  }
  0x48   : > { %760 = vmatmul.mubr.bf16.vlgmr.msra.gmra.mrb[4].mxu0 %v621_v31  ;;  %v3195_v31 = vld [vmem:[%s3952_s1 + $0x388] sm:$0xff]  }
  0x49   : > { %2907 = vmatpush3.bf16.msra.mxu0 %v3157_v36  ;;  %951 = vmatmul.mubr.bf16.vlgmr.msra.gmra.mrb[4].mxu1 %v812_v34  ;;  %v3198_v34 = vld [vmem:[%s3952_s1 + $0x3d0] sm:$0xff]   ;;  %v3200_v36 = vld [vmem:[%s3952_s1 + $0x358] sm:$0xff]  }
  0x4a   : > { %1124 = vmatprep.mubr.bf16.mxu0 %v993_v27  ;;  %2929 = vmatpush3.bf16.msra.mxu1 %v3159_v41  ;;  %v1523_v27 = vor.u32 %v1522_v44, %v1521_v22  ;;  %v3203_v41 = vld [vmem:[%s3952_s1 + $0x398] sm:$0xff]   ;;  %v3237_v22 = vld [vmem:[%s3952_s1 + $0x420] sm:$0xff]  }
  0x4b   : > { %2908 = vmatprep.subr.bf16.mxu0 %v3160_v46  ;;  %1298 = vmatprep.mubr.bf16.mxu1 %v1167_v42  ;;  %v3204_v42 = vld [vmem:[%s3952_s1 + $0x360] sm:$0xff]  }
  0x4c   : > { %2930 = vmatprep.subr.bf16.mxu1 %v3162_v49  ;;  %v3205_v46 = vld [vmem:[%s3952_s1 + $0x320] sm:$0xff]  }
  0x4d   : > { %2909 = vmatpush3.bf16.msra.mxu0 %v3161_v48  ;;  %v3206_v48 = vld [vmem:[%s3952_s1 + $0x3e0] sm:$0xff]  }
  0x4e   : > { %2931 = vmatpush3.bf16.msra.mxu1 %v3163_v50  ;;  %2910 = vmatprep.subr.bf16.mxu0 %v3164_v51  ;;  %v3207_v49 = vld [vmem:[%s3952_s1 + $0x3a0] sm:$0xff]   ;;  %v3208_v50 = vld [vmem:[%s3952_s1 + $0x368] sm:$0xff]  }
  0x4f   : > { %2932 = vmatprep.subr.bf16.mxu1 %v3166_v54  ;;  %v3209_v51 = vld [vmem:[%s3952_s1 + $0x328] sm:$0xff]   ;;  %v3239_v44 = vld [vmem:[%s3952_s1 + $0x4a0] sm:$0xff]  }
  0x50   : > { %v3211_v54 = vld [vmem:[%s3952_s1 + $0x3a8] sm:$0xff]  }
  0x51   : > { %2911 = vmatpush3.bf16.msra.mxu0 %v3165_v53  ;;  %v3210_v53 = vld [vmem:[%s3952_s1 + $0x3e8] sm:$0xff]  }
  0x52   : > { %2933 = vmatpush3.bf16.msra.mxu1 %v3167_v56  ;;  %2912 = vmatprep.subr.bf16.mxu0 %v3168_v57  ;;  %v3212_v56 = vld [vmem:[%s3952_s1 + $0x370] sm:$0xff]  }
  0x53   : > { %2934 = vmatprep.subr.bf16.mxu1 %v3170_v59  ;;  %v3213_v57 = vld [vmem:[%s3952_s1 + $0x330] sm:$0xff]   ;;  %v1340_v59 = vrot.slane %v3549_v20, 1  ;;  %v3218_v20 = vld [vmem:[%s3952_s1 + $0x3f8] sm:$0xff]  }
  0x55   : > { %2913 = vmatpush3.bf16.msra.mxu0 %v3169_v58  ;;  %v3214_v58 = vld [vmem:[%s3952_s1 + $0x3f0] sm:$0xff]  }
  0x56   : > { %2935 = vmatpush3.bf16.msra.mxu1 %v3171_v60  ;;  %2914 = vmatprep.subr.bf16.mxu0 %v3172_v61  ;;  %v3215_v60 = vld [vmem:[%s3952_s1 + $0x3b0] sm:$0xff]   ;;  %v1341_v61 = vrot.slane %v3522_v9, 2  ;;  %v3219_v9 = vld [vmem:[%s3952_s1 + $0x3b8] sm:$0xff]  }
  0x57   : > { %2936 = vmatprep.subr.bf16.mxu1 %v3174_v63  ;;  %v3217_v63 = vld [vmem:[%s3952_s1 + $0x338] sm:$0xff]  }
  0x59   : > { %2915 = vmatpush3.bf16.msra.mxu0 %v3173_v62  ;;  %v3216_v62 = vld [vmem:[%s3952_s1 + $0x378] sm:$0xff]  }
  0x5a   : > { %2937 = vmatpush3.bf16.msra.mxu1 %v3175_v0  ;;  %2916 = vmatprep.subr.bf16.mxu0 %v3176_v1  ;;  %v1342_v0 = vor.u32 %v1341_v61, %v1340_v59  ;;  %v3220_v1 = vld [vmem:[%s3952_s1 + $0x440] sm:$0xff]  }
  0x5b   : > { %2938 = vmatprep.subr.bf16.mxu1 %v3178_v4  ;;  %v1697_v4 = vrot.slane %v3436_v38, 2  ;;  %v3225_v38 = vld [vmem:[%s3952_s1 + $0x408] sm:$0xff]  }
  0x5d   : > { %2917 = vmatpush3.bf16.msra.mxu0 %v3177_v3  ;;  %v3221_v3 = vld [vmem:[%s3952_s1 + $0x400] sm:$0xff]  }
  0x5e   : > { %2939 = vmatpush3.bf16.msra.mxu1 %v3179_v6  ;;  %2918 = vmatprep.subr.bf16.mxu0 %v3180_v7  ;;  %v3222_v6 = vld [vmem:[%s3952_s1 + $0x4c0] sm:$0xff]  }
  0x5f   : > { %2940 = vmatprep.subr.bf16.mxu1 %v3182_v10  ;;  %v3223_v7 = vld [vmem:[%s3952_s1 + $0x480] sm:$0xff]   ;;  %v3224_v10 = vld [vmem:[%s3952_s1 + $0x448] sm:$0xff]  }
  0x61   : > { %2919 = vmatpush3.bf16.msra.mxu0 %v3181_v8  ;;  %v1871_v8 = vrot.slane %v3450_v45, 2  ;;  %v3226_v45 = vld [vmem:[%s3952_s1 + $0x4c8] sm:$0xff]  }
  0x62   : > { %2941 = vmatpush3.bf16.msra.mxu1 %v3183_v11  ;;  %2920 = vmatprep.subr.bf16.mxu0 %v3184_v13  ;;  %v3227_v11 = vld [vmem:[%s3952_s1 + $0x488] sm:$0xff]   ;;  %v3232_v13 = vld [vmem:[%s3952_s1 + $0x458] sm:$0xff]  }
  0x63   : > { %2942 = vmatprep.subr.bf16.mxu1 %v3186_v19  ;;  %v3236_v19 = vld [vmem:[%s3952_s1 + $0x460] sm:$0xff]  }
  0x65   : > { %2921 = vmatpush3.bf16.msra.mxu0 %v3185_v16  ;;  %v3234_v16 = vld [vmem:[%s3952_s1 + $0x4d8] sm:$0xff]  }
  0x66   : > { %2943 = vmatpush3.bf16.msra.mxu1 %v3187_v23  ;;  %2950 = vmatprep.subr.bf16.mxu0 %v3188_v47  ;;  %v3238_v23 = vld [vmem:[%s3952_s1 + $0x4e0] sm:$0xff]   ;;  %v3240_v47 = vld [vmem:[%s3952_s1 + $0x468] sm:$0xff]  }
  0x67   : > { %2972 = vmatprep.subr.bf16.mxu1 %v3190_v26  ;;  %v3244_v26 = vld [vmem:[%s3952_s1 + $0x470] sm:$0xff]  }
  0x68   : > { %1125 = vmatmul.mubr.bf16.vlgmr.msra.gmra.mrb[8].mxu0 %v992_v12  ;;  %v3231_v12 = vld [vmem:[%s3952_s1 + $0x490] sm:$0xff]  }
  0x69   : > { %2951 = vmatpush3.bf16.msra.mxu0 %v3189_v24  ;;  %1299 = vmatmul.mubr.bf16.vlgmr.msra.gmra.mrb[8].mxu1 %v1166_v25  ;;  %v3241_v24 = vld [vmem:[%s3952_s1 + $0x428] sm:$0xff]  }
  0x6a   : > { %1476 = vmatprep.mubr.bf16.mxu0 %v1345_v52  ;;  %2973 = vmatpush3.bf16.msra.mxu1 %v3191_v55  ;;  %v3242_v25 = vld [vmem:[%s3952_s1 + $0x4e8] sm:$0xff]   ;;  %v3245_v55 = vld [vmem:[%s3952_s1 + $0x430] sm:$0xff]  }
  0x6b   : > { %2952 = vmatprep.subr.bf16.mxu0 %v3192_v28  ;;  %1654 = vmatprep.mubr.bf16.mxu1 %v1523_v27  ;;  %v3243_v52 = vld [vmem:[%s3952_s1 + $0x4a8] sm:$0xff]   ;;  %v3246_v27 = vld [vmem:[%s3952_s1 + $0x4f0] sm:$0xff]  }
  0x6c   : > { %2974 = vmatprep.subr.bf16.mxu1 %v3194_v30  ;;  %v3247_v28 = vld [vmem:[%s3952_s1 + $0x4b0] sm:$0xff]   ;;  %v3249_v30 = vld [vmem:[%s3952_s1 + $0x438] sm:$0xff]  }
  0x6d   : > { %2953 = vmatpush3.bf16.msra.mxu0 %v3193_v29  ;;  %v3248_v29 = vld [vmem:[%s3952_s1 + $0x478] sm:$0xff]  }
  0x6e   : > { %2975 = vmatpush3.bf16.msra.mxu1 %v3195_v31  ;;  %2954 = vmatprep.subr.bf16.mxu0 %v3196_v32  ;;  %v3250_v31 = vld [vmem:[%s3952_s1 + $0x4f8] sm:$0xff]  }
  0x6f   : > { %2976 = vmatprep.subr.bf16.mxu1 %v3198_v34  ;;  %v3251_v32 = vld [vmem:[%s3952_s1 + $0x4b8] sm:$0xff]   ;;  %v3252_v34 = vld [vmem:[%s3952_s1 + $0x540] sm:$0xff]  }
  0x71   : > { %2955 = vmatpush3.bf16.msra.mxu0 %v3197_v33  ;;  %v1696_v33 = vrot.slane %v3502_v2, 2  ;;  %v3255_v2 = vld [vmem:[%s3952_s1 + $0x508] sm:$0xff]  }
  0x72   : > { %2977 = vmatpush3.bf16.msra.mxu1 %v3199_v35  ;;  %2956 = vmatprep.subr.bf16.mxu0 %v3200_v36  ;;  %v3253_v35 = vld [vmem:[%s3952_s1 + $0x500] sm:$0xff]   ;;  %v1870_v36 = vrot.slane %v3510_v5, 2  ;;  %v3256_v5 = vld [vmem:[%s3952_s1 + $0x550] sm:$0xff]  }
  0x73   : > { %2978 = vmatprep.subr.bf16.mxu1 %v3202_v40  ;;  %v3257_v40 = vld [vmem:[%s3952_s1 + $0x510] sm:$0xff]  }
  0x75   : > { %2957 = vmatpush3.bf16.msra.mxu0 %v3201_v39  ;;  %v3254_v39 = vld [vmem:[%s3952_s1 + $0x548] sm:$0xff]  }
  0x76   : > { %2979 = vmatpush3.bf16.msra.mxu1 %v3203_v41  ;;  %2958 = vmatprep.subr.bf16.mxu0 %v3204_v42  ;;  %v3258_v41 = vld [vmem:[%s3952_s1 + $0x558] sm:$0xff]   ;;  %v3260_v42 = vld [vmem:[%s3952_s1 + $0x560] sm:$0xff]  }
  0x77   : > { %2980 = vmatprep.subr.bf16.mxu1 %v3206_v48  ;;  %v3262_v48 = vld [vmem:[%s3952_s1 + $0x568] sm:$0xff]  }
  0x79   : > { %2959 = vmatpush3.bf16.msra.mxu0 %v3205_v46  ;;  %v3261_v46 = vld [vmem:[%s3952_s1 + $0x520] sm:$0xff]  }
  0x7a   : > { %2981 = vmatpush3.bf16.msra.mxu1 %v3207_v49  ;;  %2960 = vmatprep.subr.bf16.mxu0 %v3208_v50  ;;  %v3263_v49 = vld [vmem:[%s3952_s1 + $0x528] sm:$0xff]   ;;  %v3264_v50 = vld [vmem:[%s3952_s1 + $0x570] sm:$0xff]  }
  0x7b   : > { %2982 = vmatprep.subr.bf16.mxu1 %v3210_v53  ;;  %v3266_v53 = vld [vmem:[%s3952_s1 + $0x578] sm:$0xff]  }
  0x7d   : > { %2961 = vmatpush3.bf16.msra.mxu0 %v3209_v51  ;;  %v3265_v51 = vld [vmem:[%s3952_s1 + $0x530] sm:$0xff]  }
  0x7e   : > { %2983 = vmatpush3.bf16.msra.mxu1 %v3211_v54  ;;  %2962 = vmatprep.subr.bf16.mxu0 %v3212_v56  ;;  %v3267_v54 = vld [vmem:[%s3952_s1 + $0x538] sm:$0xff]  }
  0x7f   : > { %2984 = vmatprep.subr.bf16.mxu1 %v3214_v58 }
  0x81   : > { %2963 = vmatpush3.bf16.msra.mxu0 %v3213_v57 }
  0x82   : > { %2985 = vmatpush3.bf16.msra.mxu1 %v3215_v60  ;;  %2964 = vmatprep.subr.bf16.mxu0 %v3216_v62 }
  0x83   : > { %2986 = vmatprep.subr.bf16.mxu1 %v3218_v20 }
  0x85   : > { %2965 = vmatpush3.bf16.msra.mxu0 %v3217_v63 }
  0x86   : > { %2987 = vmatpush3.bf16.msra.mxu1 %v3219_v9  ;;  %2994 = vmatprep.subr.bf16.mxu0 %v3220_v1 }
  0x87   : > { %3016 = vmatprep.subr.bf16.mxu1 %v3222_v6 }
  0x88   : > { %1477 = vmatmul.mubr.bf16.vlgmr.msra.gmra.mrb[12].mxu0 %v1342_v0 }
  0x89   : > { %2995 = vmatpush3.bf16.msra.mxu0 %v3221_v3  ;;  %1655 = vmatmul.mubr.bf16.vlgmr.msra.gmra.mrb[12].mxu1 %v1520_v21  ;;  %v3230_v21 = vld [vmem:[%s3952_s1 + $0x4d0] sm:$0xff]  }
  0x8a   : > { %1828 = vmatprep.mubr.bf16.mxu0 %v1697_v4  ;;  %3017 = vmatpush3.bf16.msra.mxu1 %v3223_v7 }
  0x8b   : > { %2996 = vmatprep.subr.bf16.mxu0 %v3224_v10  ;;  %2002 = vmatprep.mubr.bf16.mxu1 %v1871_v8 }
  0x8c   : > { %3018 = vmatprep.subr.bf16.mxu1 %v3226_v45 }
  0x8d   : > { %2997 = vmatpush3.bf16.msra.mxu0 %v3225_v38 }
  0x8e   : > { %3019 = vmatpush3.bf16.msra.mxu1 %v3227_v11  ;;  %2998 = vmatprep.subr.bf16.mxu0 %v3228_v15 }
  0x8f   : > { %3020 = vmatprep.subr.bf16.mxu1 %v3230_v21 }
  0x91   : > { %2999 = vmatpush3.bf16.msra.mxu0 %v3229_v17 }
  0x92   : > { %3021 = vmatpush3.bf16.msra.mxu1 %v3231_v12  ;;  %3000 = vmatprep.subr.bf16.mxu0 %v3232_v13 }
  0x93   : > { %3022 = vmatprep.subr.bf16.mxu1 %v3234_v16 }
  0x95   : > { %3001 = vmatpush3.bf16.msra.mxu0 %v3233_v14 }
  0x96   : > { %3023 = vmatpush3.bf16.msra.mxu1 %v3235_v18  ;;  %3002 = vmatprep.subr.bf16.mxu0 %v3236_v19 }
  0x97   : > { %3024 = vmatprep.subr.bf16.mxu1 %v3238_v23 }
  0x99   : > { %3003 = vmatpush3.bf16.msra.mxu0 %v3237_v22 }
  0x9a   : > { %3025 = vmatpush3.bf16.msra.mxu1 %v3239_v44  ;;  %3004 = vmatprep.subr.bf16.mxu0 %v3240_v47 }
  0x9b   : > { %3026 = vmatprep.subr.bf16.mxu1 %v3242_v25 }
  0x9d   : > { %3005 = vmatpush3.bf16.msra.mxu0 %v3241_v24 }
  0x9e   : > { %3027 = vmatpush3.bf16.msra.mxu1 %v3243_v52  ;;  %3006 = vmatprep.subr.bf16.mxu0 %v3244_v26 }
  0x9f   : > { %3028 = vmatprep.subr.bf16.mxu1 %v3246_v27 }
  0xa1   : > { %3007 = vmatpush3.bf16.msra.mxu0 %v3245_v55 }
  0xa2   : > { %3029 = vmatpush3.bf16.msra.mxu1 %v3247_v28  ;;  %3008 = vmatprep.subr.bf16.mxu0 %v3248_v29 }
  0xa3   : > { %3030 = vmatprep.subr.bf16.mxu1 %v3250_v31 }
  0xa5   : > { %3009 = vmatpush3.bf16.msra.mxu0 %v3249_v30 }
  0xa6   : > { %3031 = vmatpush3.bf16.msra.mxu1 %v3251_v32  ;;  %3038 = vmatprep.subr.bf16.mxu0 %v3252_v34 }
  0xa8   : > { %1829 = vmatmul.mubr.bf16.vlgmr.msra.gmra.mrb[16].mxu0 %v1696_v33 }
  0xa9   : > { %3039 = vmatpush3.bf16.msra.mxu0 %v3253_v35  ;;  %2180 = vmatprep.mubr.bf16.mxu0 %v3580_v37  ;;  %v3259_v37 = vld [vmem:[%s3952_s1 + $0x518] sm:$0xff]  }
  0xaa   : > { %2003 = vmatmul.mubr.bf16.vlgmr.msra.gmra.mrb[16].mxu1 %v1870_v36  ;;  %3040 = vmatprep.subr.bf16.mxu0 %v3254_v39 }
  0xad   : > { %3041 = vmatpush3.bf16.msra.mxu0 %v3255_v2 }
  0xae   : > { %3042 = vmatprep.subr.bf16.mxu0 %v3256_v5 }
  0xb1   : > { %3043 = vmatpush3.bf16.msra.mxu0 %v3257_v40 }
  0xb2   : > { %3044 = vmatprep.subr.bf16.mxu0 %v3258_v41 }
  0xb5   : > { %3045 = vmatpush3.bf16.msra.mxu0 %v3259_v37 }
  0xb6   : > { %3046 = vmatprep.subr.bf16.mxu0 %v3260_v42 }
  0xb9   : > { %3047 = vmatpush3.bf16.msra.mxu0 %v3261_v46 }
  0xba   : > { %3048 = vmatprep.subr.bf16.mxu0 %v3262_v48 }
  0xbd   : > { %3049 = vmatpush3.bf16.msra.mxu0 %v3263_v49 }
  0xbe   : > { %3050 = vmatprep.subr.bf16.mxu0 %v3264_v50 }
  0xc1   : > { %3051 = vmatpush3.bf16.msra.mxu0 %v3265_v51 }
  0xc2   : > { %3052 = vmatprep.subr.bf16.mxu0 %v3266_v53 }
  0xc5   : > { %3053 = vmatpush3.bf16.msra.mxu0 %v3267_v54  ;;  %v2814_v54 = vld [vmem:[%s3953_s2] ss:$0 sm:$0xff] }
  0xc8   : > { %2181 = vmatmul.mubr.bf16.vlgmr.msra.gmra.mrb[20].mxu0 %v3590_v43 }
  0xfb   : > { %v2834_v56 = vpop.f32.mrb[0].mxu0 }
  0xfc   : > { %v2856_v57 = vpop.f32.mrb[0].mxu1  ;;  %v2835_v58 = vpop.f32.mrb[1].mxu0 }
  0xfd   : > { %v2857_v59 = vpop.f32.mrb[1].mxu1  ;;  %v2836_v60 = vadd.f32 %v2835_v58, %v2834_v56  ;;  %v2837_v62 = vpop.f32.mrb[2].mxu0 }
  0xfe   : > { %v2858_v61 = vadd.f32 %v2857_v59, %v2856_v57  ;;  %v2859_v63 = vpop.f32.mrb[2].mxu1  ;;  %v2838_v20 = vpop.f32.mrb[3].mxu0 }
  0xff   : > { %v2860_v9 = vpop.f32.mrb[3].mxu1 }
 0x100   : > { %v572_v0 = vadd.f32 %v2858_v61, %v2836_v60 }
 0x11b   : > { %v2878_v1 = vpop.f32.mrb[4].mxu0 }
 0x11c   : > { %v2879_v3 = vpop.f32.mrb[5].mxu0  ;;  %v2900_v4 = vpop.f32.mrb[4].mxu1 }
 0x11d   : > { %v2880_v6 = vadd.f32 %v2879_v3, %v2878_v1  ;;  %v2881_v7 = vpop.f32.mrb[6].mxu0  ;;  %v2901_v8 = vpop.f32.mrb[5].mxu1 }
 0x11e   : > { %v2882_v10 = vpop.f32.mrb[7].mxu0  ;;  %v2902_v38 = vadd.f32 %v2901_v8, %v2900_v4  ;;  %v2903_v43 = vpop.f32.mrb[6].mxu1 }
 0x11f   : > { %v767_v45 = vadd.f32 %v2880_v6, %v572_v0  ;;  %v2904_v11 = vpop.f32.mrb[7].mxu1 }
 0x121   : > { %v958_v15 = vadd.f32 %v2902_v38, %v767_v45 }
 0x13b   : > { %v2922_v17 = vpop.f32.mrb[8].mxu0 }
 0x13c   : > { %v2923_v21 = vpop.f32.mrb[9].mxu0  ;;  %v2944_v14 = vpop.f32.mrb[8].mxu1 }
 0x13d   : > { %v2924_v12 = vadd.f32 %v2923_v21, %v2922_v17  ;;  %v2925_v13 = vpop.f32.mrb[10].mxu0  ;;  %v2945_v18 = vpop.f32.mrb[9].mxu1 }
 0x13e   : > { %v2926_v16 = vpop.f32.mrb[11].mxu0  ;;  %v2946_v22 = vadd.f32 %v2945_v18, %v2944_v14  ;;  %v2947_v23 = vpop.f32.mrb[10].mxu1 }
 0x13f   : > { %v1132_v19 = vadd.f32 %v2924_v12, %v958_v15  ;;  %v2948_v44 = vpop.f32.mrb[11].mxu1 }
 0x141   : > { %v1306_v47 = vadd.f32 %v2946_v22, %v1132_v19 }
 0x15b   : > { %v2966_v24 = vpop.f32.mrb[12].mxu0 }
 0x15c   : > { %v2967_v25 = vpop.f32.mrb[13].mxu0  ;;  %v2988_v55 = vpop.f32.mrb[12].mxu1 }
 0x15d   : > { %v2968_v52 = vadd.f32 %v2967_v25, %v2966_v24  ;;  %v2969_v26 = vpop.f32.mrb[14].mxu0  ;;  %v2989_v28 = vpop.f32.mrb[13].mxu1 }
 0x15e   : > { %v2970_v27 = vpop.f32.mrb[15].mxu0  ;;  %v2990_v30 = vadd.f32 %v2989_v28, %v2988_v55  ;;  %v2991_v31 = vpop.f32.mrb[14].mxu1 }
 0x15f   : > { %v1484_v29 = vadd.f32 %v2968_v52, %v1306_v47  ;;  %v2992_v32 = vpop.f32.mrb[15].mxu1 }
 0x161   : > { %v1662_v33 = vadd.f32 %v2990_v30, %v1484_v29 }
 0x17b   : > { %v3010_v34 = vpop.f32.mrb[16].mxu0 }
 0x17c   : > { %v3011_v35 = vpop.f32.mrb[17].mxu0 }
 0x17d   : > { %v3012_v36 = vadd.f32 %v3011_v35, %v3010_v34  ;;  %v3013_v39 = vpop.f32.mrb[18].mxu0  ;;  %v3032_v2 = vpop.f32.mrb[16].mxu1 }
 0x17e   : > { %v3014_v5 = vpop.f32.mrb[19].mxu0  ;;  %v3033_v40 = vpop.f32.mrb[17].mxu1 }
 0x17f   : > { %v1836_v41 = vadd.f32 %v3012_v36, %v1662_v33  ;;  %v3034_v37 = vadd.f32 %v3033_v40, %v3032_v2  ;;  %v3035_v42 = vpop.f32.mrb[18].mxu1 }
 0x180   : > { %v3036_v46 = vpop.f32.mrb[19].mxu1 }
 0x181   : > { %v2010_v48 = vadd.f32 %v3034_v37, %v1836_v41 }
 0x19b   : > { %v3054_v49 = vpop.f32.mrb[20].mxu0 }
 0x19c   : > { %v3055_v50 = vpop.f32.mrb[21].mxu0 }
 0x19d   : > { %v3056_v51 = vadd.f32 %v3055_v50, %v3054_v49  ;;  %v3057_v53 = vpop.f32.mrb[22].mxu0 }
 0x19e   : > { %v3058_v56 = vpop.f32.mrb[23].mxu0 }
 0x19f   : > { %v2188_v57 = vadd.f32 %v3056_v51, %v2010_v48 }
 0x1a1   : > { %v2196_v58 = vadd.f32 %v2814_v54, %v2188_v57 }
 0x1a3   : > { %v2197_v59 = vpack.c.bf16 %v2196_v58, %v2196_v58 }
 0x1a5   : > { %2198 = vst [vmem:[%s219_s5] sm:$0xf] %v2197_v59 }
 0x1a6 PF: > { %s13_s14 = sadd.s32 1, %s3290_s14   ;;  %s3955_s12 = smov %s3286_s13 }
 0x1a7   : > { %p10_p5 = scmp.ge.s32.totalorder %s13_s14, 4   ;;  %s3956_s13 = smov %s3958_s15 }
 0x1a9   :  { %12 = sbr.rel (!%p10_p5) target bundleno = 2 (0x2), region = 79 }

// kernel: efficientnet1d_forward.24
= control target key start
LH: loop header
LB: loop body
LE: loop exit
PB: predicated region body
PF: predicated region fallthrough
CT: control target
= control target key end

     0   :  { %s6259_s15 = smov 0   ;;  %s6261_s16 = smov 0   ;;  %s7499_s0 = inlined_call_operand.vmem [shape: bf16[2,1,18,512], index: 0, kind: input, shape index: {}]   ;;  %s7500_s1 = inlined_call_operand.vmem [shape: bf16[11,512,128], index: 1, kind: input, shape index: {}]   ;;  %s7501_s2 = inlined_call_operand.vmem [shape: f32[1,128], index: 2, kind: input, shape index: {}]   ;;  %s7502_s3 = inlined_call_operand.vmem [shape: bf16[2,8,128], index: 3, kind: input, shape index: {}]   ;;  %s7503_s4 = inlined_call_operand.vmem [shape: bf16[2,8,128], index: 4, kind: output, shape index: {}]  }
   0x1   :  { %s6263_s17 = smov 0  }
   0x2 LB: > { %s26_s18 = sadd.s32 1, %s6228_s16  ;;  %p4316_p0 = scmp.ge.s32.totalorder %s6232_s17, 1  ;;  %s6232_s17 = sphi %s6263_s17, %s14_s17   ;;  %s6228_s16 = sphi %s6261_s16, %s7505_s16   ;;  %s6224_s15 = sphi %s6259_s15, %s7504_s15  }
   0x3   : > { %p28_p1 = scmp.ge.s32.totalorder %s26_s18, 2  ;;  %p207_p2 = scmp.lt.s32.totalorder %s6232_s17, 3 }
   0x5   : > { %s7507_s18 = smov (%p28_p1, %s26_s18), 0  ;;  %p208_p3 = pnand %p4316_p0, %p207_p2 }
   0x6   : > { %v5840_v0 = vld [vmem:[%s7500_s1 + $0x140] sm:$0xff] (!%p208_p3)   ;;  %v5844_v4 = vld [vmem:[%s7500_s1 + $0x148] sm:$0xff] (!%p208_p3)   ;;  %v5848_v8 = vld [vmem:[%s7500_s1 + $0x150] sm:$0xff] (!%p208_p3)   ;;  %p249_p4 = scmp.lt.s32.totalorder (!%p208_p3), %s6224_s15, 1 }
   0x7   : > { %211 = sbr.rel (%p208_p3) target bundleno = 587 (0x24b), region = 36  ;;  %v5841_v1 = vld [vmem:[%s7500_s1 + $0x1c0] sm:$0xff] (!%p208_p3)   ;;  %5331 = vmatprep.subr.bf16.mxu0 (!%p208_p3), %v5840_v0  ;;  %v5845_v5 = vld [vmem:[%s7500_s1 + $0x1c8] sm:$0xff] (!%p208_p3)   ;;  %v5849_v9 = vld [vmem:[%s7500_s1 + $0x1d0] sm:$0xff] (!%p208_p3)  }
   0x8   : > { %v5842_v2 = vld [vmem:[%s7500_s1 + $0x100] sm:$0xff] (!%p208_p3)   ;;  %5353 = vmatprep.subr.bf16.mxu1 (!%p208_p3), %v5841_v1  ;;  %v5846_v6 = vld [vmem:[%s7500_s1 + $0x108] sm:$0xff] (!%p208_p3)   ;;  %v5850_v10 = vld [vmem:[%s7500_s1 + $0x110] sm:$0xff] (!%p208_p3)  }
   0x9   : > { %v5843_v3 = vld [vmem:[%s7500_s1 + $0x180] sm:$0xff] (!%p208_p3)   ;;  %5332 = vmatpush3.bf16.msra.mxu0 (!%p208_p3), %v5842_v2  ;;  %v5847_v7 = vld [vmem:[%s7500_s1 + $0x188] sm:$0xff] (!%p208_p3)   ;;  %v5851_v11 = vld [vmem:[%s7500_s1 + $0x190] sm:$0xff] (!%p208_p3)  }
   0xa   : > { %5354 = vmatpush3.bf16.msra.mxu1 (!%p208_p3), %v5843_v3  ;;  %5333 = vmatprep.subr.bf16.mxu0 (!%p208_p3), %v5844_v4  ;;  %v5852_v12 = vld [vmem:[%s7500_s1 + $0x158] sm:$0xff] (!%p208_p3)   ;;  %v5856_v16 = vld [vmem:[%s7500_s1 + $0x160] sm:$0xff] (!%p208_p3)   ;;  %v5860_v20 = vld [vmem:[%s7500_s1 + $0x168] sm:$0xff] (!%p208_p3)  }
   0xb   : > { %5355 = vmatprep.subr.bf16.mxu1 (!%p208_p3), %v5845_v5  ;;  %v5853_v13 = vld [vmem:[%s7500_s1 + $0x1d8] sm:$0xff] (!%p208_p3)   ;;  %v5857_v17 = vld [vmem:[%s7500_s1 + $0x1e0] sm:$0xff] (!%p208_p3)   ;;  %v5861_v21 = vld [vmem:[%s7500_s1 + $0x1e8] sm:$0xff] (!%p208_p3)  }
   0xc   : > { %v5854_v14 = vld [vmem:[%s7500_s1 + $0x118] sm:$0xff] (!%p208_p3)   ;;  %v5858_v18 = vld [vmem:[%s7500_s1 + $0x120] sm:$0xff] (!%p208_p3)   ;;  %v5862_v22 = vld [vmem:[%s7500_s1 + $0x128] sm:$0xff] (!%p208_p3)  }
   0xd   : > { %5334 = vmatpush3.bf16.msra.mxu0 (!%p208_p3), %v5846_v6  ;;  %v5855_v15 = vld [vmem:[%s7500_s1 + $0x198] sm:$0xff] (!%p208_p3)   ;;  %v5859_v19 = vld [vmem:[%s7500_s1 + $0x1a0] sm:$0xff] (!%p208_p3)   ;;  %v5863_v23 = vld [vmem:[%s7500_s1 + $0x1a8] sm:$0xff] (!%p208_p3)  }
   0xe   : > { %5356 = vmatpush3.bf16.msra.mxu1 %v5847_v7  ;;  %5335 = vmatprep.subr.bf16.mxu0 %v5848_v8  ;;  %s7509_s15 = smov (!%p249_p4, %s6224_s15), 1  ;;  %v5864_v24 = vld [vmem:[%s7500_s1 + $0x170] sm:$0xff]   ;;  %v5868_v28 = vld [vmem:[%s7500_s1 + $0x178] sm:$0xff]   ;;  %v5876_v40 = vld [vmem:[%s7500_s1 + $0x40] sm:$0xff]  }
   0xf   : > { %5357 = vmatprep.subr.bf16.mxu1 %v5849_v9  ;;  %v5865_v25 = vld [vmem:[%s7500_s1 + $0x1f0] sm:$0xff]   ;;  %s5815_s27 = smul.u32 48, %s7509_s15  ;;  %v5869_v29 = vld [vmem:[%s7500_s1 + $0x1f8] sm:$0xff]   ;;  %v5877_v45 = vld [vmem:[%s7500_s1 + $0xc0] sm:$0xff]   ;;  %s4318_s28 = sshll.u32 %s7509_s15, 2 }
  0x10   : > { %v5866_v26 = vld [vmem:[%s7500_s1 + $0x130] sm:$0xff]   ;;  %v5870_v30 = vld [vmem:[%s7500_s1 + $0x138] sm:$0xff]   ;;  %v5878_v52 = vld [vmem:[%s7500_s1] sm:$0xff]   ;;  %s267_s5 = scalar_lea.vmem %s7502_s3, %s4318_s28  ;;  %s274_s8 = scalar_lea.vmem %s7503_s4, %s4318_s28 }
  0x11   : > { %5336 = vmatpush3.bf16.msra.mxu0 %v5850_v10  ;;  %v5867_v27 = vld [vmem:[%s7500_s1 + $0x1b0] sm:$0xff]   ;;  %s6377_s12 = scalar_lea.vmem %s7499_s0, %s5815_s27  ;;  %v5871_v31 = vld [vmem:[%s7500_s1 + $0x1b8] sm:$0xff]   ;;  %v5879_v55 = vld [vmem:[%s7500_s1 + $0x80] sm:$0xff]  }
  0x12   : > { %5358 = vmatpush3.bf16.msra.mxu1 %v5851_v11  ;;  %5337 = vmatprep.subr.bf16.mxu0 %v5852_v12  ;;  %v6386_v32 = vld [vmem:[%s6377_s12] sm:$0xff]  ;;  %v278_v33 = vld [vmem:[%s6377_s12 + $0x10] sm:$0xff]  ;;  %v6390_v34 = vld [vmem:[%s6377_s12 + $0x8] sm:$0xff] }
  0x13   : > { %5359 = vmatprep.subr.bf16.mxu1 %v5853_v13  ;;  %v6393_v35 = vcombine.high %v6386_v32, %v278_v33  ;;  %v279_v36 = vld [vmem:[%s6377_s12 + $0x18] sm:$0xff]  ;;  %v6397_v37 = vcombine.low %v6386_v32, %v278_v33  ;;  %v5880_v56 = vld [vmem:[%s7500_s1 + $0x48] sm:$0xff]   ;;  %v4421_v63 = vcombine.high %v6386_v32, %v6386_v32  ;;  %v4423_v1 = vcombine.high %v6390_v34, %v6390_v34  ;;  %v5884_v2 = vld [vmem:[%s7500_s1 + $0x50] sm:$0xff]  }
  0x14   : > { %v6400_v38 = vcombine.high %v6390_v34, %v279_v36  ;;  %v6403_v39 = vcombine.low %v6390_v34, %v279_v36  ;;  %v5881_v61 = vld [vmem:[%s7500_s1 + $0xc8] sm:$0xff]   ;;  %v5885_v3 = vld [vmem:[%s7500_s1 + $0xd0] sm:$0xff]   ;;  %v5888_v6 = vld [vmem:[%s7500_s1 + $0x58] sm:$0xff]  }
  0x15   : > { %5338 = vmatpush3.bf16.msra.mxu0 %v5854_v14  ;;  %v6409_v41 = vshrl.u32 %v6393_v35, 16  ;;  %v6412_v42 = vshll.u32 %v6393_v35, 16  ;;  %v6415_v43 = vshrl.u32 %v6397_v37, 16  ;;  %v6418_v44 = vshll.u32 %v6397_v37, 16  ;;  %v5882_v62 = vld [vmem:[%s7500_s1 + $0x8] sm:$0xff]   ;;  %v5886_v4 = vld [vmem:[%s7500_s1 + $0x10] sm:$0xff]  }
  0x16   : > { %5360 = vmatpush3.bf16.msra.mxu1 %v5855_v15  ;;  %5339 = vmatprep.subr.bf16.mxu0 %v5856_v16  ;;  %v6424_v46 = vshrl.u32 %v6400_v38, 16  ;;  %v6427_v47 = vshll.u32 %v6400_v38, 16  ;;  %v6430_v48 = vshrl.u32 %v6403_v39, 16  ;;  %v6433_v49 = vshll.u32 %v6403_v39, 16  ;;  %v5883_v0 = vld [vmem:[%s7500_s1 + $0x88] sm:$0xff]   ;;  %v5887_v5 = vld [vmem:[%s7500_s1 + $0x90] sm:$0xff]  }
  0x17   : > { %5361 = vmatprep.subr.bf16.mxu1 %v5857_v17  ;;  %v439_v50 = vrot.slane %v6412_v42, 1  ;;  %v432_v51 = vrot.slane %v6418_v44, 1  ;;  %v5889_v7 = vld [vmem:[%s7500_s1 + $0xd8] sm:$0xff]   ;;  %v5892_v10 = vld [vmem:[%s7500_s1 + $0x60] sm:$0xff]   ;;  %v5896_v14 = vld [vmem:[%s7500_s1 + $0x68] sm:$0xff]  }
  0x18   : > { %v453_v53 = vrot.slane %v6427_v47, 1  ;;  %v446_v54 = vrot.slane %v6433_v49, 1  ;;  %v5890_v8 = vld [vmem:[%s7500_s1 + $0x18] sm:$0xff]   ;;  %v5893_v11 = vld [vmem:[%s7500_s1 + $0xe0] sm:$0xff]   ;;  %v5897_v15 = vld [vmem:[%s7500_s1 + $0xe8] sm:$0xff]  }
  0x19   : > { %5340 = vmatpush3.bf16.msra.mxu0 %v5858_v18  ;;  %v440_v57 = vor.u32 %v439_v50, %v6409_v41  ;;  %v433_v58 = vor.u32 %v432_v51, %v6415_v43  ;;  %v5891_v9 = vld [vmem:[%s7500_s1 + $0x98] sm:$0xff]   ;;  %v5894_v12 = vld [vmem:[%s7500_s1 + $0x20] sm:$0xff]   ;;  %v5898_v16 = vld [vmem:[%s7500_s1 + $0x28] sm:$0xff]  }
  0x1a   : > { %5362 = vmatpush3.bf16.msra.mxu1 %v5859_v19  ;;  %5341 = vmatprep.subr.bf16.mxu0 %v5860_v20  ;;  %v454_v59 = vor.u32 %v453_v53, %v6424_v46  ;;  %v447_v60 = vor.u32 %v446_v54, %v6430_v48  ;;  %v5895_v13 = vld [vmem:[%s7500_s1 + $0xa0] sm:$0xff]   ;;  %v5899_v17 = vld [vmem:[%s7500_s1 + $0xa8] sm:$0xff]   ;;  %v5900_v18 = vld [vmem:[%s7500_s1 + $0x70] sm:$0xff]  }
  0x1b   : > { %5363 = vmatprep.subr.bf16.mxu1 %v5861_v21  ;;  %683 = vmatprep.mubr.bf16.mxu0 %v440_v57  ;;  %v5901_v19 = vld [vmem:[%s7500_s1 + $0xf0] sm:$0xff]   ;;  %v5916_v33 = vld [vmem:[%s7500_s1 + $0x248] sm:$0xff]   ;;  %v5924_v54 = vld [vmem:[%s7500_s1 + $0x258] sm:$0xff]  }
  0x1c   : > { %723 = vmatprep.mubr.bf16.mxu1 %v454_v59  ;;  %v5902_v20 = vld [vmem:[%s7500_s1 + $0x30] sm:$0xff]   ;;  %v5917_v36 = vld [vmem:[%s7500_s1 + $0x2c8] sm:$0xff]   ;;  %v5927_v57 = vld [vmem:[%s7500_s1 + $0x298] sm:$0xff]  }
  0x1d   : > { %5342 = vmatpush3.bf16.msra.mxu0 %v5862_v22  ;;  %v5903_v21 = vld [vmem:[%s7500_s1 + $0xb0] sm:$0xff]   ;;  %v5904_v22 = vld [vmem:[%s7500_s1 + $0x78] sm:$0xff]   ;;  %v5929_v59 = vld [vmem:[%s7500_s1 + $0x2e0] sm:$0xff]  }
  0x1e   : > { %5364 = vmatpush3.bf16.msra.mxu1 %v5863_v23  ;;  %5343 = vmatprep.subr.bf16.mxu0 %v5864_v24  ;;  %v5905_v23 = vld [vmem:[%s7500_s1 + $0xf8] sm:$0xff]   ;;  %v5920_v50 = vld [vmem:[%s7500_s1 + $0x250] sm:$0xff]  }
  0x1f   : > { %5365 = vmatprep.subr.bf16.mxu1 %v5865_v25  ;;  %v5906_v24 = vld [vmem:[%s7500_s1 + $0x38] sm:$0xff]   ;;  %v5921_v51 = vld [vmem:[%s7500_s1 + $0x2d0] sm:$0xff]  }
  0x20   : > { %v5907_v25 = vld [vmem:[%s7500_s1 + $0xb8] sm:$0xff]   ;;  %v5923_v53 = vld [vmem:[%s7500_s1 + $0x290] sm:$0xff]  }
  0x21   : > { %5344 = vmatpush3.bf16.msra.mxu0 %v5866_v26  ;;  %v5912_v26 = vld [vmem:[%s7500_s1 + $0x240] sm:$0xff]  }
  0x22   : > { %5366 = vmatpush3.bf16.msra.mxu1 %v5867_v27  ;;  %5345 = vmatprep.subr.bf16.mxu0 %v5868_v28  ;;  %v5913_v27 = vld [vmem:[%s7500_s1 + $0x2c0] sm:$0xff]  }
  0x23   : > { %5367 = vmatprep.subr.bf16.mxu1 %v5869_v29  ;;  %v5914_v28 = vld [vmem:[%s7500_s1 + $0x200] sm:$0xff]   ;;  %v4420_v29 = vcombine.low %v6386_v32, %v6386_v32  ;;  %v5918_v32 = vld [vmem:[%s7500_s1 + $0x208] sm:$0xff]  }
  0x25   : > { %5346 = vmatpush3.bf16.msra.mxu0 %v5870_v30  ;;  %v5915_v30 = vld [vmem:[%s7500_s1 + $0x280] sm:$0xff]  }
  0x26   : > { %5368 = vmatpush3.bf16.msra.mxu1 %v5871_v31  ;;  %5375 = vmatprep.subr.bf16.mxu0 %v5876_v40  ;;  %v4422_v31 = vcombine.low %v6390_v34, %v6390_v34  ;;  %v1077_v40 = vrot.slane %v6393_v35, 1  ;;  %v5919_v34 = vld [vmem:[%s7500_s1 + $0x288] sm:$0xff]  }
  0x27   : > { %5397 = vmatprep.subr.bf16.mxu1 %v5877_v45  ;;  %v1079_v45 = vrot.slane %v6400_v38, 1 }
  0x28   : > { %684 = vmatmul.mubr.bf16.vlgmr.msra.gmra.mrb[0].mxu0 %v433_v58  ;;  %v5928_v58 = vld [vmem:[%s7500_s1 + $0x260] sm:$0xff]  }
  0x29   : > { %724 = vmatmul.mubr.bf16.vlgmr.msra.gmra.mrb[0].mxu1 %v447_v60  ;;  %5376 = vmatpush3.bf16.msra.mxu0 %v5878_v52  ;;  %v5922_v52 = vld [vmem:[%s7500_s1 + $0x210] sm:$0xff]   ;;  %v5930_v60 = vld [vmem:[%s7500_s1 + $0x220] sm:$0xff]  }
  0x2a   : > { %5398 = vmatpush3.bf16.msra.mxu1 %v5879_v55  ;;  %5377 = vmatprep.subr.bf16.mxu0 %v5880_v56  ;;  %v5925_v55 = vld [vmem:[%s7500_s1 + $0x2d8] sm:$0xff]  }
  0x2b   : > { %5399 = vmatprep.subr.bf16.mxu1 %v5881_v61  ;;  %963 = vmatprep.mubr.bf16.mxu0 %v4421_v63  ;;  %v5926_v56 = vld [vmem:[%s7500_s1 + $0x218] sm:$0xff]   ;;  %v5931_v61 = vld [vmem:[%s7500_s1 + $0x2a0] sm:$0xff]   ;;  %v5933_v63 = vld [vmem:[%s7500_s1 + $0x2e8] sm:$0xff]  }
  0x2c   : > { %1003 = vmatprep.mubr.bf16.mxu1 %v4423_v1  ;;  %v5935_v1 = vld [vmem:[%s7500_s1 + $0x2a8] sm:$0xff]  }
  0x2d   : > { %5378 = vmatpush3.bf16.msra.mxu0 %v5882_v62  ;;  %v5932_v62 = vld [vmem:[%s7500_s1 + $0x268] sm:$0xff]  }
  0x2e   : > { %5400 = vmatpush3.bf16.msra.mxu1 %v5883_v0  ;;  %5379 = vmatprep.subr.bf16.mxu0 %v5884_v2  ;;  %v5934_v0 = vld [vmem:[%s7500_s1 + $0x228] sm:$0xff]   ;;  %v5936_v2 = vld [vmem:[%s7500_s1 + $0x270] sm:$0xff]  }
  0x2f   : > { %5401 = vmatprep.subr.bf16.mxu1 %v5885_v3  ;;  %v5937_v3 = vld [vmem:[%s7500_s1 + $0x2f0] sm:$0xff]  }
  0x31   : > { %5380 = vmatpush3.bf16.msra.mxu0 %v5886_v4  ;;  %v5938_v4 = vld [vmem:[%s7500_s1 + $0x230] sm:$0xff]  }
  0x32   : > { %5402 = vmatpush3.bf16.msra.mxu1 %v5887_v5  ;;  %5381 = vmatprep.subr.bf16.mxu0 %v5888_v6  ;;  %v5939_v5 = vld [vmem:[%s7500_s1 + $0x2b0] sm:$0xff]   ;;  %v5940_v6 = vld [vmem:[%s7500_s1 + $0x278] sm:$0xff]  }
  0x33   : > { %5403 = vmatprep.subr.bf16.mxu1 %v5889_v7  ;;  %v5941_v7 = vld [vmem:[%s7500_s1 + $0x2f8] sm:$0xff]  }
  0x35   : > { %5382 = vmatpush3.bf16.msra.mxu0 %v5890_v8  ;;  %v5942_v8 = vld [vmem:[%s7500_s1 + $0x238] sm:$0xff]  }
  0x36   : > { %5404 = vmatpush3.bf16.msra.mxu1 %v5891_v9  ;;  %5383 = vmatprep.subr.bf16.mxu0 %v5892_v10  ;;  %v5943_v9 = vld [vmem:[%s7500_s1 + $0x2b8] sm:$0xff]   ;;  %v1076_v10 = vrot.slane %v6397_v37, 1 }
  0x37   : > { %5405 = vmatprep.subr.bf16.mxu1 %v5893_v11  ;;  %v5944_v11 = vld [vmem:[%s7500_s1 + $0x340] sm:$0xff]  }
  0x39   : > { %5384 = vmatpush3.bf16.msra.mxu0 %v5894_v12  ;;  %v1425_v12 = vrot.slane %v6409_v41, 1 }
  0x3a   : > { %5406 = vmatpush3.bf16.msra.mxu1 %v5895_v13  ;;  %5385 = vmatprep.subr.bf16.mxu0 %v5896_v14  ;;  %v5945_v13 = vld [vmem:[%s7500_s1 + $0x3c0] sm:$0xff]   ;;  %v1426_v14 = vrot.slane %v6412_v42, 2 }
  0x3b   : > { %5407 = vmatprep.subr.bf16.mxu1 %v5897_v15  ;;  %v5946_v15 = vld [vmem:[%s7500_s1 + $0x300] sm:$0xff]  }
  0x3d   : > { %5386 = vmatpush3.bf16.msra.mxu0 %v5898_v16  ;;  %v1431_v16 = vrot.slane %v6424_v46, 1 }
  0x3e   : > { %5408 = vmatpush3.bf16.msra.mxu1 %v5899_v17  ;;  %5387 = vmatprep.subr.bf16.mxu0 %v5900_v18  ;;  %v5947_v17 = vld [vmem:[%s7500_s1 + $0x380] sm:$0xff]   ;;  %v1432_v18 = vrot.slane %v6427_v47, 2 }
  0x3f   : > { %5409 = vmatprep.subr.bf16.mxu1 %v5901_v19  ;;  %v1078_v19 = vrot.slane %v6403_v39, 1 }
  0x41   : > { %5388 = vmatpush3.bf16.msra.mxu0 %v5902_v20  ;;  %v5948_v20 = vld [vmem:[%s7500_s1 + $0x348] sm:$0xff]  }
  0x42   : > { %5410 = vmatpush3.bf16.msra.mxu1 %v5903_v21  ;;  %5389 = vmatprep.subr.bf16.mxu0 %v5904_v22  ;;  %v5949_v21 = vld [vmem:[%s7500_s1 + $0x3c8] sm:$0xff]  }
  0x43   : > { %5411 = vmatprep.subr.bf16.mxu1 %v5905_v23  ;;  %v5950_v22 = vld [vmem:[%s7500_s1 + $0x308] sm:$0xff]   ;;  %v1427_v23 = vor.u32 %v1426_v14, %v1425_v12  ;;  %v5984_v14 = vld [vmem:[%s7500_s1 + $0x450] sm:$0xff]  }
  0x44   : > { %v5983_v12 = vld [vmem:[%s7500_s1 + $0x488] sm:$0xff]  }
  0x45   : > { %5390 = vmatpush3.bf16.msra.mxu0 %v5906_v24  ;;  %v5951_v24 = vld [vmem:[%s7500_s1 + $0x388] sm:$0xff]  }
  0x46   : > { %5412 = vmatpush3.bf16.msra.mxu1 %v5907_v25  ;;  %5419 = vmatprep.subr.bf16.mxu0 %v5912_v26  ;;  %v1433_v25 = vor.u32 %v1432_v18, %v1431_v16  ;;  %v5952_v26 = vld [vmem:[%s7500_s1 + $0x350] sm:$0xff]   ;;  %v5988_v18 = vld [vmem:[%s7500_s1 + $0x458] sm:$0xff]  }
  0x47   : > { %5441 = vmatprep.subr.bf16.mxu1 %v5913_v27  ;;  %v5953_v27 = vld [vmem:[%s7500_s1 + $0x3d0] sm:$0xff]  }
  0x48   : > { %964 = vmatmul.mubr.bf16.vlgmr.msra.gmra.mrb[4].mxu0 %v4420_v29  ;;  %v5955_v29 = vld [vmem:[%s7500_s1 + $0x390] sm:$0xff]  }
  0x49   : > { %1004 = vmatmul.mubr.bf16.vlgmr.msra.gmra.mrb[4].mxu1 %v4422_v31  ;;  %5420 = vmatpush3.bf16.msra.mxu0 %v5914_v28  ;;  %v5954_v28 = vld [vmem:[%s7500_s1 + $0x310] sm:$0xff]   ;;  %v5957_v31 = vld [vmem:[%s7500_s1 + $0x3d8] sm:$0xff]  }
  0x4a   : > { %5442 = vmatpush3.bf16.msra.mxu1 %v5915_v30  ;;  %5421 = vmatprep.subr.bf16.mxu0 %v5916_v33  ;;  %v5956_v30 = vld [vmem:[%s7500_s1 + $0x358] sm:$0xff]   ;;  %v5986_v16 = vld [vmem:[%s7500_s1 + $0x410] sm:$0xff]  }
  0x4b   : > { %5443 = vmatprep.subr.bf16.mxu1 %v5917_v36  ;;  %1308 = vmatprep.mubr.bf16.mxu0 %v1077_v40  ;;  %v5958_v33 = vld [vmem:[%s7500_s1 + $0x318] sm:$0xff]   ;;  %v5961_v40 = vld [vmem:[%s7500_s1 + $0x3e0] sm:$0xff]  }
  0x4c   : > { %1348 = vmatprep.mubr.bf16.mxu1 %v1079_v45  ;;  %v5959_v36 = vld [vmem:[%s7500_s1 + $0x398] sm:$0xff]   ;;  %v5963_v45 = vld [vmem:[%s7500_s1 + $0x3a0] sm:$0xff]  }
  0x4d   : > { %5422 = vmatpush3.bf16.msra.mxu0 %v5918_v32  ;;  %v5960_v32 = vld [vmem:[%s7500_s1 + $0x360] sm:$0xff]  }
  0x4e   : > { %5444 = vmatpush3.bf16.msra.mxu1 %v5919_v34  ;;  %5423 = vmatprep.subr.bf16.mxu0 %v5920_v50  ;;  %v5962_v34 = vld [vmem:[%s7500_s1 + $0x320] sm:$0xff]   ;;  %v5964_v50 = vld [vmem:[%s7500_s1 + $0x368] sm:$0xff]  }
  0x4f   : > { %5445 = vmatprep.subr.bf16.mxu1 %v5921_v51  ;;  %v5965_v51 = vld [vmem:[%s7500_s1 + $0x3e8] sm:$0xff]  }
  0x51   : > { %5424 = vmatpush3.bf16.msra.mxu0 %v5922_v52  ;;  %v5966_v52 = vld [vmem:[%s7500_s1 + $0x328] sm:$0xff]  }
  0x52   : > { %5446 = vmatpush3.bf16.msra.mxu1 %v5923_v53  ;;  %5425 = vmatprep.subr.bf16.mxu0 %v5924_v54  ;;  %v5967_v53 = vld [vmem:[%s7500_s1 + $0x3a8] sm:$0xff]   ;;  %v5968_v54 = vld [vmem:[%s7500_s1 + $0x370] sm:$0xff]  }
  0x53   : > { %5447 = vmatprep.subr.bf16.mxu1 %v5925_v55  ;;  %v5969_v55 = vld [vmem:[%s7500_s1 + $0x3f0] sm:$0xff]  }
  0x55   : > { %5426 = vmatpush3.bf16.msra.mxu0 %v5926_v56  ;;  %v5970_v56 = vld [vmem:[%s7500_s1 + $0x330] sm:$0xff]  }
  0x56   : > { %5448 = vmatpush3.bf16.msra.mxu1 %v5927_v57  ;;  %5427 = vmatprep.subr.bf16.mxu0 %v5928_v58  ;;  %v5971_v57 = vld [vmem:[%s7500_s1 + $0x3b0] sm:$0xff]   ;;  %v5972_v58 = vld [vmem:[%s7500_s1 + $0x378] sm:$0xff]  }
  0x57   : > { %5449 = vmatprep.subr.bf16.mxu1 %v5929_v59  ;;  %v5973_v59 = vld [vmem:[%s7500_s1 + $0x3f8] sm:$0xff]  }
  0x59   : > { %5428 = vmatpush3.bf16.msra.mxu0 %v5930_v60  ;;  %v1422_v60 = vrot.slane %v6415_v43, 1 }
  0x5a   : > { %5450 = vmatpush3.bf16.msra.mxu1 %v5931_v61  ;;  %5429 = vmatprep.subr.bf16.mxu0 %v5932_v62  ;;  %v5974_v61 = vld [vmem:[%s7500_s1 + $0x338] sm:$0xff]   ;;  %v1423_v62 = vrot.slane %v6418_v44, 2 }
  0x5b   : > { %5451 = vmatprep.subr.bf16.mxu1 %v5933_v63  ;;  %v5975_v63 = vld [vmem:[%s7500_s1 + $0x3b8] sm:$0xff]  }
  0x5d   : > { %5430 = vmatpush3.bf16.msra.mxu0 %v5934_v0  ;;  %v1428_v0 = vrot.slane %v6430_v48, 1 }
  0x5e   : > { %5452 = vmatpush3.bf16.msra.mxu1 %v5935_v1  ;;  %5431 = vmatprep.subr.bf16.mxu0 %v5936_v2  ;;  %v1429_v1 = vrot.slane %v6433_v49, 2  ;;  %v5976_v2 = vld [vmem:[%s7500_s1 + $0x440] sm:$0xff]  }
  0x5f   : > { %5453 = vmatprep.subr.bf16.mxu1 %v5937_v3  ;;  %v5977_v3 = vld [vmem:[%s7500_s1 + $0x4c0] sm:$0xff]  }
  0x61   : > { %5432 = vmatpush3.bf16.msra.mxu0 %v5938_v4  ;;  %v5978_v4 = vld [vmem:[%s7500_s1 + $0x400] sm:$0xff]  }
  0x62   : > { %5454 = vmatpush3.bf16.msra.mxu1 %v5939_v5  ;;  %5433 = vmatprep.subr.bf16.mxu0 %v5940_v6  ;;  %v1424_v5 = vor.u32 %v1423_v62, %v1422_v60  ;;  %v5979_v6 = vld [vmem:[%s7500_s1 + $0x480] sm:$0xff]   ;;  %v6012_v60 = vld [vmem:[%s7500_s1 + $0x548] sm:$0xff]  }
  0x63   : > { %5455 = vmatprep.subr.bf16.mxu1 %v5941_v7  ;;  %v1430_v7 = vor.u32 %v1429_v1, %v1428_v0  ;;  %v6014_v62 = vld [vmem:[%s7500_s1 + $0x508] sm:$0xff]  }
  0x64   : > { %v6015_v0 = vld [vmem:[%s7500_s1 + $0x588] sm:$0xff]  }
  0x65   : > { %5434 = vmatpush3.bf16.msra.mxu0 %v5942_v8  ;;  %v5980_v8 = vld [vmem:[%s7500_s1 + $0x448] sm:$0xff]  }
  0x66   : > { %5456 = vmatpush3.bf16.msra.mxu1 %v5943_v9  ;;  %5463 = vmatprep.subr.bf16.mxu0 %v5944_v11  ;;  %v5981_v9 = vld [vmem:[%s7500_s1 + $0x4c8] sm:$0xff]   ;;  %v1777_v11 = vrot.slane %v6393_v35, 2 }
  0x67   : > { %5485 = vmatprep.subr.bf16.mxu1 %v5945_v13  ;;  %v1779_v13 = vrot.slane %v6400_v38, 2 }
  0x68   : > { %1309 = vmatmul.mubr.bf16.vlgmr.msra.gmra.mrb[8].mxu0 %v1076_v10  ;;  %v5982_v10 = vld [vmem:[%s7500_s1 + $0x408] sm:$0xff]  }
  0x69   : > { %1349 = vmatmul.mubr.bf16.vlgmr.msra.gmra.mrb[8].mxu1 %v1078_v19  ;;  %5464 = vmatpush3.bf16.msra.mxu0 %v5946_v15  ;;  %v5985_v15 = vld [vmem:[%s7500_s1 + $0x4d0] sm:$0xff]   ;;  %v5989_v19 = vld [vmem:[%s7500_s1 + $0x4d8] sm:$0xff]  }
  0x6a   : > { %5486 = vmatpush3.bf16.msra.mxu1 %v5947_v17  ;;  %5465 = vmatprep.subr.bf16.mxu0 %v5948_v20  ;;  %v5987_v17 = vld [vmem:[%s7500_s1 + $0x490] sm:$0xff]   ;;  %v5990_v20 = vld [vmem:[%s7500_s1 + $0x418] sm:$0xff]  }
  0x6b   : > { %5487 = vmatprep.subr.bf16.mxu1 %v5949_v21  ;;  %1662 = vmatprep.mubr.bf16.mxu0 %v1427_v23  ;;  %v5991_v21 = vld [vmem:[%s7500_s1 + $0x498] sm:$0xff]   ;;  %v5993_v23 = vld [vmem:[%s7500_s1 + $0x4e0] sm:$0xff]  }
  0x6c   : > { %1702 = vmatprep.mubr.bf16.mxu1 %v1433_v25  ;;  %v5995_v25 = vld [vmem:[%s7500_s1 + $0x4a0] sm:$0xff]  }
  0x6d   : > { %5466 = vmatpush3.bf16.msra.mxu0 %v5950_v22  ;;  %v5992_v22 = vld [vmem:[%s7500_s1 + $0x460] sm:$0xff]  }
  0x6e   : > { %5488 = vmatpush3.bf16.msra.mxu1 %v5951_v24  ;;  %5467 = vmatprep.subr.bf16.mxu0 %v5952_v26  ;;  %v5994_v24 = vld [vmem:[%s7500_s1 + $0x420] sm:$0xff]   ;;  %v5996_v26 = vld [vmem:[%s7500_s1 + $0x468] sm:$0xff]  }
  0x6f   : > { %5489 = vmatprep.subr.bf16.mxu1 %v5953_v27  ;;  %v5997_v27 = vld [vmem:[%s7500_s1 + $0x4e8] sm:$0xff]  }
  0x71   : > { %5468 = vmatpush3.bf16.msra.mxu0 %v5954_v28  ;;  %v5998_v28 = vld [vmem:[%s7500_s1 + $0x428] sm:$0xff]  }
  0x72   : > { %5490 = vmatpush3.bf16.msra.mxu1 %v5955_v29  ;;  %5469 = vmatprep.subr.bf16.mxu0 %v5956_v30  ;;  %v5999_v29 = vld [vmem:[%s7500_s1 + $0x4a8] sm:$0xff]   ;;  %v6000_v30 = vld [vmem:[%s7500_s1 + $0x470] sm:$0xff]  }
  0x73   : > { %5491 = vmatprep.subr.bf16.mxu1 %v5957_v31  ;;  %v6001_v31 = vld [vmem:[%s7500_s1 + $0x4f0] sm:$0xff]  }
  0x75   : > { %5470 = vmatpush3.bf16.msra.mxu0 %v5958_v33  ;;  %v6002_v33 = vld [vmem:[%s7500_s1 + $0x430] sm:$0xff]  }
  0x76   : > { %5492 = vmatpush3.bf16.msra.mxu1 %v5959_v36  ;;  %5471 = vmatprep.subr.bf16.mxu0 %v5960_v32  ;;  %v6003_v36 = vld [vmem:[%s7500_s1 + $0x4b0] sm:$0xff]   ;;  %v6004_v32 = vld [vmem:[%s7500_s1 + $0x478] sm:$0xff]  }
  0x77   : > { %5493 = vmatprep.subr.bf16.mxu1 %v5961_v40  ;;  %v6005_v40 = vld [vmem:[%s7500_s1 + $0x4f8] sm:$0xff]  }
  0x79   : > { %5472 = vmatpush3.bf16.msra.mxu0 %v5962_v34  ;;  %v6006_v34 = vld [vmem:[%s7500_s1 + $0x438] sm:$0xff]  }
  0x7a   : > { %5494 = vmatpush3.bf16.msra.mxu1 %v5963_v45  ;;  %5473 = vmatprep.subr.bf16.mxu0 %v5964_v50  ;;  %v6007_v45 = vld [vmem:[%s7500_s1 + $0x4b8] sm:$0xff]   ;;  %v1776_v50 = vrot.slane %v6397_v37, 2 }
  0x7b   : > { %5495 = vmatprep.subr.bf16.mxu1 %v5965_v51  ;;  %v6008_v51 = vld [vmem:[%s7500_s1 + $0x540] sm:$0xff]  }
  0x7d   : > { %5474 = vmatpush3.bf16.msra.mxu0 %v5966_v52  ;;  %v2125_v52 = vrot.slane %v6409_v41, 2 }
  0x7e   : > { %5496 = vmatpush3.bf16.msra.mxu1 %v5967_v53  ;;  %5475 = vmatprep.subr.bf16.mxu0 %v5968_v54  ;;  %v6009_v53 = vld [vmem:[%s7500_s1 + $0x5c0] sm:$0xff]   ;;  %v2126_v54 = vrot.slane %v6412_v42, 3 }
  0x7f   : > { %5497 = vmatprep.subr.bf16.mxu1 %v5969_v55  ;;  %v6010_v55 = vld [vmem:[%s7500_s1 + $0x500] sm:$0xff]  }
  0x81   : > { %5476 = vmatpush3.bf16.msra.mxu0 %v5970_v56  ;;  %v2131_v56 = vrot.slane %v6424_v46, 2 }
  0x82   : > { %5498 = vmatpush3.bf16.msra.mxu1 %v5971_v57  ;;  %5477 = vmatprep.subr.bf16.mxu0 %v5972_v58  ;;  %v6011_v57 = vld [vmem:[%s7500_s1 + $0x580] sm:$0xff]   ;;  %v2132_v58 = vrot.slane %v6427_v47, 3 }
  0x83   : > { %5499 = vmatprep.subr.bf16.mxu1 %v5973_v59  ;;  %v1778_v59 = vrot.slane %v6403_v39, 2 }
  0x84   : > { %v2133_v1 = vor.u32 %v2132_v58, %v2131_v56  ;;  %v6052_v56 = vld [vmem:[%s7500_s1 + $0x658] sm:$0xff]  }
  0x85   : > { %5478 = vmatpush3.bf16.msra.mxu0 %v5974_v61  ;;  %v6013_v61 = vld [vmem:[%s7500_s1 + $0x5c8] sm:$0xff]   ;;  %v6054_v58 = vld [vmem:[%s7500_s1 + $0x618] sm:$0xff]  }
  0x86   : > { %5500 = vmatpush3.bf16.msra.mxu1 %v5975_v63  ;;  %5507 = vmatprep.subr.bf16.mxu0 %v5976_v2  ;;  %v2127_v63 = vor.u32 %v2126_v54, %v2125_v52  ;;  %v6016_v2 = vld [vmem:[%s7500_s1 + $0x550] sm:$0xff]   ;;  %v6047_v52 = vld [vmem:[%s7500_s1 + $0x688] sm:$0xff]  }
  0x87   : > { %5529 = vmatprep.subr.bf16.mxu1 %v5977_v3  ;;  %v6017_v3 = vld [vmem:[%s7500_s1 + $0x5d0] sm:$0xff]  }
  0x88   : > { %1663 = vmatmul.mubr.bf16.vlgmr.msra.gmra.mrb[12].mxu0 %v1424_v5  ;;  %v6019_v5 = vld [vmem:[%s7500_s1 + $0x590] sm:$0xff]  }
  0x89   : > { %1703 = vmatmul.mubr.bf16.vlgmr.msra.gmra.mrb[12].mxu1 %v1430_v7  ;;  %5508 = vmatpush3.bf16.msra.mxu0 %v5978_v4  ;;  %v6018_v4 = vld [vmem:[%s7500_s1 + $0x510] sm:$0xff]   ;;  %v6021_v7 = vld [vmem:[%s7500_s1 + $0x5d8] sm:$0xff]  }
  0x8a   : > { %5530 = vmatpush3.bf16.msra.mxu1 %v5979_v6  ;;  %5509 = vmatprep.subr.bf16.mxu0 %v5980_v8  ;;  %v6020_v6 = vld [vmem:[%s7500_s1 + $0x558] sm:$0xff]   ;;  %v6048_v54 = vld [vmem:[%s7500_s1 + $0x650] sm:$0xff]  }
  0x8b   : > { %5531 = vmatprep.subr.bf16.mxu1 %v5981_v9  ;;  %2008 = vmatprep.mubr.bf16.mxu0 %v1777_v11  ;;  %v6022_v8 = vld [vmem:[%s7500_s1 + $0x518] sm:$0xff]   ;;  %v6025_v11 = vld [vmem:[%s7500_s1 + $0x5e0] sm:$0xff]  }
  0x8c   : > { %2048 = vmatprep.mubr.bf16.mxu1 %v1779_v13  ;;  %v6023_v9 = vld [vmem:[%s7500_s1 + $0x598] sm:$0xff]   ;;  %v6027_v13 = vld [vmem:[%s7500_s1 + $0x5a0] sm:$0xff]  }
  0x8d   : > { %5510 = vmatpush3.bf16.msra.mxu0 %v5982_v10  ;;  %v6024_v10 = vld [vmem:[%s7500_s1 + $0x560] sm:$0xff]  }
  0x8e   : > { %5532 = vmatpush3.bf16.msra.mxu1 %v5983_v12  ;;  %5511 = vmatprep.subr.bf16.mxu0 %v5984_v14  ;;  %v6026_v12 = vld [vmem:[%s7500_s1 + $0x520] sm:$0xff]   ;;  %v6028_v14 = vld [vmem:[%s7500_s1 + $0x568] sm:$0xff]  }
  0x8f   : > { %5533 = vmatprep.subr.bf16.mxu1 %v5985_v15  ;;  %v6029_v15 = vld [vmem:[%s7500_s1 + $0x5e8] sm:$0xff]  }
  0x91   : > { %5512 = vmatpush3.bf16.msra.mxu0 %v5986_v16  ;;  %v6030_v16 = vld [vmem:[%s7500_s1 + $0x528] sm:$0xff]  }
  0x92   : > { %5534 = vmatpush3.bf16.msra.mxu1 %v5987_v17  ;;  %5513 = vmatprep.subr.bf16.mxu0 %v5988_v18  ;;  %v6031_v17 = vld [vmem:[%s7500_s1 + $0x5a8] sm:$0xff]   ;;  %v6032_v18 = vld [vmem:[%s7500_s1 + $0x570] sm:$0xff]  }
  0x93   : > { %5535 = vmatprep.subr.bf16.mxu1 %v5989_v19  ;;  %v6033_v19 = vld [vmem:[%s7500_s1 + $0x5f0] sm:$0xff]  }
  0x95   : > { %5514 = vmatpush3.bf16.msra.mxu0 %v5990_v20  ;;  %v6034_v20 = vld [vmem:[%s7500_s1 + $0x530] sm:$0xff]  }
  0x96   : > { %5536 = vmatpush3.bf16.msra.mxu1 %v5991_v21  ;;  %5515 = vmatprep.subr.bf16.mxu0 %v5992_v22  ;;  %v6035_v21 = vld [vmem:[%s7500_s1 + $0x5b0] sm:$0xff]   ;;  %v6036_v22 = vld [vmem:[%s7500_s1 + $0x578] sm:$0xff]  }
  0x97   : > { %5537 = vmatprep.subr.bf16.mxu1 %v5993_v23  ;;  %v6037_v23 = vld [vmem:[%s7500_s1 + $0x5f8] sm:$0xff]  }
  0x99   : > { %5516 = vmatpush3.bf16.msra.mxu0 %v5994_v24  ;;  %v2122_v24 = vrot.slane %v6415_v43, 2 }
  0x9a   : > { %5538 = vmatpush3.bf16.msra.mxu1 %v5995_v25  ;;  %5517 = vmatprep.subr.bf16.mxu0 %v5996_v26  ;;  %v6038_v25 = vld [vmem:[%s7500_s1 + $0x538] sm:$0xff]   ;;  %v2123_v26 = vrot.slane %v6418_v44, 3 }
  0x9b   : > { %5539 = vmatprep.subr.bf16.mxu1 %v5997_v27  ;;  %v6039_v27 = vld [vmem:[%s7500_s1 + $0x5b8] sm:$0xff]  }
  0x9d   : > { %5518 = vmatpush3.bf16.msra.mxu0 %v5998_v28  ;;  %v2128_v28 = vrot.slane %v6430_v48, 2 }
  0x9e   : > { %5540 = vmatpush3.bf16.msra.mxu1 %v5999_v29  ;;  %5519 = vmatprep.subr.bf16.mxu0 %v6000_v30  ;;  %v2129_v29 = vrot.slane %v6433_v49, 3  ;;  %v6040_v30 = vld [vmem:[%s7500_s1 + $0x640] sm:$0xff]  }
  0x9f   : > { %5541 = vmatprep.subr.bf16.mxu1 %v6001_v31  ;;  %v6041_v31 = vld [vmem:[%s7500_s1 + $0x6c0] sm:$0xff]  }
  0xa1   : > { %5520 = vmatpush3.bf16.msra.mxu0 %v6002_v33  ;;  %v6042_v33 = vld [vmem:[%s7500_s1 + $0x600] sm:$0xff]  }
  0xa2   : > { %5542 = vmatpush3.bf16.msra.mxu1 %v6003_v36  ;;  %5521 = vmatprep.subr.bf16.mxu0 %v6004_v32  ;;  %v2124_v36 = vor.u32 %v2123_v26, %v2122_v24  ;;  %v6043_v32 = vld [vmem:[%s7500_s1 + $0x680] sm:$0xff]   ;;  %v6082_v24 = vld [vmem:[%s7500_s1 + $0x710] sm:$0xff]   ;;  %v6084_v26 = vld [vmem:[%s7500_s1 + $0x758] sm:$0xff]  }
  0xa3   : > { %5543 = vmatprep.subr.bf16.mxu1 %v6005_v40  ;;  %v2130_v40 = vor.u32 %v2129_v29, %v2128_v28  ;;  %v6086_v28 = vld [vmem:[%s7500_s1 + $0x718] sm:$0xff]  }
  0xa4   : > { %v6087_v29 = vld [vmem:[%s7500_s1 + $0x798] sm:$0xff]  }
  0xa5   : > { %5522 = vmatpush3.bf16.msra.mxu0 %v6006_v34  ;;  %v6044_v34 = vld [vmem:[%s7500_s1 + $0x648] sm:$0xff]  }
  0xa6   : > { %5544 = vmatpush3.bf16.msra.mxu1 %v6007_v45  ;;  %5551 = vmatprep.subr.bf16.mxu0 %v6008_v51  ;;  %v6045_v45 = vld [vmem:[%s7500_s1 + $0x6c8] sm:$0xff]   ;;  %v2477_v51 = vrot.slane %v6393_v35, 3  ;;  %v6050_v35 = vld [vmem:[%s7500_s1 + $0x610] sm:$0xff]  }
  0xa7   : > { %5573 = vmatprep.subr.bf16.mxu1 %v6009_v53  ;;  %v2479_v53 = vrot.slane %v6400_v38, 3  ;;  %v6051_v38 = vld [vmem:[%s7500_s1 + $0x690] sm:$0xff]  }
  0xa8   : > { %2009 = vmatmul.mubr.bf16.vlgmr.msra.gmra.mrb[16].mxu0 %v1776_v50  ;;  %v6046_v50 = vld [vmem:[%s7500_s1 + $0x608] sm:$0xff]  }
  0xa9   : > { %2049 = vmatmul.mubr.bf16.vlgmr.msra.gmra.mrb[16].mxu1 %v1778_v59  ;;  %5552 = vmatpush3.bf16.msra.mxu0 %v6010_v55  ;;  %v6049_v55 = vld [vmem:[%s7500_s1 + $0x6d0] sm:$0xff]   ;;  %v6055_v59 = vld [vmem:[%s7500_s1 + $0x698] sm:$0xff]  }
  0xaa   : > { %5574 = vmatpush3.bf16.msra.mxu1 %v6011_v57  ;;  %5553 = vmatprep.subr.bf16.mxu0 %v6012_v60  ;;  %v6053_v57 = vld [vmem:[%s7500_s1 + $0x6d8] sm:$0xff]   ;;  %v6056_v60 = vld [vmem:[%s7500_s1 + $0x660] sm:$0xff]  }
  0xab   : > { %5575 = vmatprep.subr.bf16.mxu1 %v6013_v61  ;;  %2362 = vmatprep.mubr.bf16.mxu0 %v2127_v63  ;;  %v6057_v61 = vld [vmem:[%s7500_s1 + $0x6e0] sm:$0xff]  }
  0xac   : > { %2402 = vmatprep.mubr.bf16.mxu1 %v2133_v1  ;;  %v6059_v63 = vld [vmem:[%s7500_s1 + $0x6a0] sm:$0xff]   ;;  %v6061_v1 = vld [vmem:[%s7500_s1 + $0x6e8] sm:$0xff]  }
  0xad   : > { %5554 = vmatpush3.bf16.msra.mxu0 %v6014_v62  ;;  %v6058_v62 = vld [vmem:[%s7500_s1 + $0x620] sm:$0xff]  }
  0xae   : > { %5576 = vmatpush3.bf16.msra.mxu1 %v6015_v0  ;;  %5555 = vmatprep.subr.bf16.mxu0 %v6016_v2  ;;  %v6060_v0 = vld [vmem:[%s7500_s1 + $0x668] sm:$0xff]  }
  0xaf   : > { %5577 = vmatprep.subr.bf16.mxu1 %v6017_v3  ;;  %v6062_v2 = vld [vmem:[%s7500_s1 + $0x628] sm:$0xff]  }
  0xb0   : > { %v6063_v3 = vld [vmem:[%s7500_s1 + $0x6a8] sm:$0xff]  }
  0xb1   : > { %5556 = vmatpush3.bf16.msra.mxu0 %v6018_v4  ;;  %v6064_v4 = vld [vmem:[%s7500_s1 + $0x670] sm:$0xff]  }
  0xb2   : > { %5578 = vmatpush3.bf16.msra.mxu1 %v6019_v5  ;;  %5557 = vmatprep.subr.bf16.mxu0 %v6020_v6  ;;  %v6065_v5 = vld [vmem:[%s7500_s1 + $0x6f0] sm:$0xff]  }
  0xb3   : > { %5579 = vmatprep.subr.bf16.mxu1 %v6021_v7  ;;  %v6066_v6 = vld [vmem:[%s7500_s1 + $0x630] sm:$0xff]  }
  0xb4   : > { %v6067_v7 = vld [vmem:[%s7500_s1 + $0x6b0] sm:$0xff]  }
  0xb5   : > { %5558 = vmatpush3.bf16.msra.mxu0 %v6022_v8  ;;  %v6068_v8 = vld [vmem:[%s7500_s1 + $0x678] sm:$0xff]  }
  0xb6   : > { %5580 = vmatpush3.bf16.msra.mxu1 %v6023_v9  ;;  %5559 = vmatprep.subr.bf16.mxu0 %v6024_v10  ;;  %v6069_v9 = vld [vmem:[%s7500_s1 + $0x6f8] sm:$0xff]  }
  0xb7   : > { %5581 = vmatprep.subr.bf16.mxu1 %v6025_v11  ;;  %v6070_v10 = vld [vmem:[%s7500_s1 + $0x638] sm:$0xff]  }
  0xb8   : > { %v6071_v11 = vld [vmem:[%s7500_s1 + $0x6b8] sm:$0xff]  }
  0xb9   : > { %5560 = vmatpush3.bf16.msra.mxu0 %v6026_v12  ;;  %v2476_v12 = vrot.slane %v6397_v37, 3  ;;  %v6074_v37 = vld [vmem:[%s7500_s1 + $0x700] sm:$0xff]  }
  0xba   : > { %5582 = vmatpush3.bf16.msra.mxu1 %v6027_v13  ;;  %5561 = vmatprep.subr.bf16.mxu0 %v6028_v14  ;;  %v6072_v13 = vld [vmem:[%s7500_s1 + $0x740] sm:$0xff]   ;;  %v2825_v14 = vrot.slane %v6409_v41, 3  ;;  %v2832_v41 = vrot.slane %v6427_v47, 4 }
  0xbb   : > { %5583 = vmatprep.subr.bf16.mxu1 %v6029_v15  ;;  %v6073_v15 = vld [vmem:[%s7500_s1 + $0x7c0] sm:$0xff]  }
  0xbd   : > { %5562 = vmatpush3.bf16.msra.mxu0 %v6030_v16  ;;  %v2826_v16 = vrot.slane %v6412_v42, 4  ;;  %v6076_v42 = vld [vmem:[%s7500_s1 + $0x748] sm:$0xff]  }
  0xbe   : > { %5584 = vmatpush3.bf16.msra.mxu1 %v6031_v17  ;;  %5563 = vmatprep.subr.bf16.mxu0 %v6032_v18  ;;  %v2831_v17 = vrot.slane %v6424_v46, 3  ;;  %v6075_v18 = vld [vmem:[%s7500_s1 + $0x780] sm:$0xff]   ;;  %v6078_v46 = vld [vmem:[%s7500_s1 + $0x708] sm:$0xff]  }
  0xbf   : > { %5585 = vmatprep.subr.bf16.mxu1 %v6033_v19  ;;  %v2478_v19 = vrot.slane %v6403_v39, 3  ;;  %v6079_v39 = vld [vmem:[%s7500_s1 + $0x788] sm:$0xff]  }
  0xc0   : > { %v2833_v47 = vor.u32 %v2832_v41, %v2831_v17  ;;  %v6113_v17 = vld [vmem:[%s7500_s1 + $0x8d0] sm:$0xff]  }
  0xc1   : > { %5564 = vmatpush3.bf16.msra.mxu0 %v6034_v20  ;;  %v6077_v20 = vld [vmem:[%s7500_s1 + $0x7c8] sm:$0xff]   ;;  %v6115_v41 = vld [vmem:[%s7500_s1 + $0x890] sm:$0xff]  }
  0xc2   : > { %5586 = vmatpush3.bf16.msra.mxu1 %v6035_v21  ;;  %5565 = vmatprep.subr.bf16.mxu0 %v6036_v22  ;;  %v2827_v21 = vor.u32 %v2826_v16, %v2825_v14  ;;  %v6080_v22 = vld [vmem:[%s7500_s1 + $0x750] sm:$0xff]   ;;  %v7182_v14 = vld [vmem:[%s6377_s12 + $0x18] sm:$0xff]  ;;  %v6111_v16 = vld [vmem:[%s7500_s1 + $0x888] sm:$0xff]  }
  0xc3   : > { %5587 = vmatprep.subr.bf16.mxu1 %v6037_v23  ;;  %v6081_v23 = vld [vmem:[%s7500_s1 + $0x7d0] sm:$0xff]  }
  0xc5   : > { %5566 = vmatpush3.bf16.msra.mxu0 %v6038_v25  ;;  %v6083_v25 = vld [vmem:[%s7500_s1 + $0x790] sm:$0xff]  }
  0xc6   : > { %5588 = vmatpush3.bf16.msra.mxu1 %v6039_v27  ;;  %5595 = vmatprep.subr.bf16.mxu0 %v6040_v30  ;;  %v6085_v27 = vld [vmem:[%s7500_s1 + $0x7d8] sm:$0xff]   ;;  %v6088_v30 = vld [vmem:[%s7500_s1 + $0x760] sm:$0xff]  }
  0xc7   : > { %5617 = vmatprep.subr.bf16.mxu1 %v6041_v31  ;;  %v6089_v31 = vld [vmem:[%s7500_s1 + $0x7e0] sm:$0xff]  }
  0xc8   : > { %2363 = vmatmul.mubr.bf16.vlgmr.msra.gmra.mrb[20].mxu0 %v2124_v36  ;;  %v6091_v36 = vld [vmem:[%s7500_s1 + $0x7a0] sm:$0xff]  }
  0xc9   : > { %2403 = vmatmul.mubr.bf16.vlgmr.msra.gmra.mrb[20].mxu1 %v2130_v40  ;;  %5596 = vmatpush3.bf16.msra.mxu0 %v6042_v33  ;;  %v6090_v33 = vld [vmem:[%s7500_s1 + $0x720] sm:$0xff]   ;;  %v6093_v40 = vld [vmem:[%s7500_s1 + $0x7e8] sm:$0xff]  }
  0xca   : > { %5618 = vmatpush3.bf16.msra.mxu1 %v6043_v32  ;;  %5597 = vmatprep.subr.bf16.mxu0 %v6044_v34  ;;  %v6092_v32 = vld [vmem:[%s7500_s1 + $0x768] sm:$0xff]  }
  0xcb   : > { %5619 = vmatprep.subr.bf16.mxu1 %v6045_v45  ;;  %2708 = vmatprep.mubr.bf16.mxu0 %v2477_v51  ;;  %v6094_v34 = vld [vmem:[%s7500_s1 + $0x728] sm:$0xff]   ;;  %v2822_v51 = vrot.slane %v6415_v43, 3  ;;  %v6099_v43 = vld [vmem:[%s7500_s1 + $0x7b0] sm:$0xff]  }
  0xcc   : > { %2748 = vmatprep.mubr.bf16.mxu1 %v2479_v53  ;;  %v6095_v45 = vld [vmem:[%s7500_s1 + $0x7a8] sm:$0xff]   ;;  %v2823_v53 = vrot.slane %v6418_v44, 4 }
  0xcd   : > { %5598 = vmatpush3.bf16.msra.mxu0 %v6046_v50  ;;  %v6096_v50 = vld [vmem:[%s7500_s1 + $0x770] sm:$0xff]  }
  0xce   : > { %5620 = vmatpush3.bf16.msra.mxu1 %v6047_v52  ;;  %5599 = vmatprep.subr.bf16.mxu0 %v6048_v54  ;;  %v6097_v52 = vld [vmem:[%s7500_s1 + $0x7f0] sm:$0xff]  }
  0xcf   : > { %5621 = vmatprep.subr.bf16.mxu1 %v6049_v55  ;;  %v6098_v55 = vld [vmem:[%s7500_s1 + $0x730] sm:$0xff]  }
  0xd1   : > { %5600 = vmatpush3.bf16.msra.mxu0 %v6050_v35 }
  0xd2   : > { %5622 = vmatpush3.bf16.msra.mxu1 %v6051_v38  ;;  %5601 = vmatprep.subr.bf16.mxu0 %v6052_v56  ;;  %v6100_v56 = vld [vmem:[%s7500_s1 + $0x778] sm:$0xff]  }
  0xd3   : > { %5623 = vmatprep.subr.bf16.mxu1 %v6053_v57 }
  0xd5   : > { %5602 = vmatpush3.bf16.msra.mxu0 %v6054_v58 }
  0xd6   : > { %5624 = vmatpush3.bf16.msra.mxu1 %v6055_v59  ;;  %5603 = vmatprep.subr.bf16.mxu0 %v6056_v60 }
  0xd7   : > { %5625 = vmatprep.subr.bf16.mxu1 %v6057_v61 }
  0xd9   : > { %5604 = vmatpush3.bf16.msra.mxu0 %v6058_v62 }
  0xda   : > { %5626 = vmatpush3.bf16.msra.mxu1 %v6059_v63  ;;  %5605 = vmatprep.subr.bf16.mxu0 %v6060_v0  ;;  %v6101_v63 = vld [vmem:[%s7500_s1 + $0x7f8] sm:$0xff]  }
  0xdb   : > { %5627 = vmatprep.subr.bf16.mxu1 %v6061_v1  ;;  %v6102_v1 = vld [vmem:[%s7500_s1 + $0x738] sm:$0xff]  }
  0xdd   : > { %5606 = vmatpush3.bf16.msra.mxu0 %v6062_v2  ;;  %v2828_v2 = vrot.slane %v6430_v48, 3  ;;  %v6105_v48 = vld [vmem:[%s7500_s1 + $0x8c0] sm:$0xff]  }
  0xde   : > { %5628 = vmatpush3.bf16.msra.mxu1 %v6063_v3  ;;  %5607 = vmatprep.subr.bf16.mxu0 %v6064_v4  ;;  %v6103_v3 = vld [vmem:[%s7500_s1 + $0x7b8] sm:$0xff]   ;;  %v2829_v4 = vrot.slane %v6433_v49, 4 }
  0xdf   : > { %5629 = vmatprep.subr.bf16.mxu1 %v6065_v5  ;;  %v6104_v5 = vld [vmem:[%s7500_s1 + $0x840] sm:$0xff]  }
  0xe0   : > { %v2830_v49 = vor.u32 %v2829_v4, %v2828_v2  ;;  %v6149_v2 = vld [vmem:[%s7500_s1 + $0x9d0] sm:$0xff]  }
  0xe1   : > { %5608 = vmatpush3.bf16.msra.mxu0 %v6066_v6  ;;  %v2824_v6 = vor.u32 %v2823_v53, %v2822_v51  ;;  %v6133_v53 = vld [vmem:[%s7500_s1 + $0x8f8] sm:$0xff]   ;;  %v6151_v4 = vld [vmem:[%s7500_s1 + $0x990] sm:$0xff]  }
  0xe2   : > { %5630 = vmatpush3.bf16.msra.mxu1 %v6067_v7  ;;  %5609 = vmatprep.subr.bf16.mxu0 %v6068_v8  ;;  %v6106_v7 = vld [vmem:[%s7500_s1 + $0x800] sm:$0xff]  }
  0xe3   : > { %5631 = vmatprep.subr.bf16.mxu1 %v6069_v9  ;;  %v6107_v8 = vld [vmem:[%s7500_s1 + $0x880] sm:$0xff]   ;;  %v6108_v9 = vld [vmem:[%s7500_s1 + $0x848] sm:$0xff]  }
  0xe5   : > { %5610 = vmatpush3.bf16.msra.mxu0 %v6070_v10  ;;  %v6109_v10 = vld [vmem:[%s7500_s1 + $0x8c8] sm:$0xff]  }
  0xe6   : > { %5632 = vmatpush3.bf16.msra.mxu1 %v6071_v11  ;;  %5639 = vmatprep.subr.bf16.mxu0 %v6072_v13  ;;  %v7174_v11 = vld [vmem:[%s6377_s12 + $0x10] sm:$0xff]  ;;  %v6110_v13 = vld [vmem:[%s7500_s1 + $0x808] sm:$0xff]  }
  0xe7   : > { %5661 = vmatprep.subr.bf16.mxu1 %v6073_v15  ;;  %v5099_v15 = vcombine.high %v7182_v14, %v7182_v14 }
  0xe8   : > { %2709 = vmatmul.mubr.bf16.vlgmr.msra.gmra.mrb[24].mxu0 %v2476_v12  ;;  %v5097_v12 = vcombine.high %v7174_v11, %v7174_v11 }
  0xe9   : > { %2749 = vmatmul.mubr.bf16.vlgmr.msra.gmra.mrb[24].mxu1 %v2478_v19  ;;  %5640 = vmatpush3.bf16.msra.mxu0 %v6074_v37  ;;  %v6112_v37 = vld [vmem:[%s7500_s1 + $0x850] sm:$0xff]   ;;  %v6116_v19 = vld [vmem:[%s7500_s1 + $0x858] sm:$0xff]  }
  0xea   : > { %5662 = vmatpush3.bf16.msra.mxu1 %v6075_v18  ;;  %5641 = vmatprep.subr.bf16.mxu0 %v6076_v42  ;;  %v6114_v18 = vld [vmem:[%s7500_s1 + $0x810] sm:$0xff]   ;;  %v6117_v42 = vld [vmem:[%s7500_s1 + $0x8d8] sm:$0xff]  }
  0xeb   : > { %5663 = vmatprep.subr.bf16.mxu1 %v6077_v20  ;;  %3062 = vmatprep.mubr.bf16.mxu0 %v2827_v21  ;;  %v6118_v20 = vld [vmem:[%s7500_s1 + $0x818] sm:$0xff]   ;;  %v6120_v21 = vld [vmem:[%s7500_s1 + $0x860] sm:$0xff]  }
  0xec   : > { %3102 = vmatprep.mubr.bf16.mxu1 %v2833_v47  ;;  %v6122_v47 = vld [vmem:[%s7500_s1 + $0x820] sm:$0xff]  }
  0xed   : > { %5642 = vmatpush3.bf16.msra.mxu0 %v6078_v46  ;;  %v6119_v46 = vld [vmem:[%s7500_s1 + $0x898] sm:$0xff]  }
  0xee   : > { %5664 = vmatpush3.bf16.msra.mxu1 %v6079_v39  ;;  %5643 = vmatprep.subr.bf16.mxu0 %v6080_v22  ;;  %v6121_v39 = vld [vmem:[%s7500_s1 + $0x8e0] sm:$0xff]  }
  0xef   : > { %5665 = vmatprep.subr.bf16.mxu1 %v6081_v23  ;;  %v6123_v22 = vld [vmem:[%s7500_s1 + $0x8a0] sm:$0xff]   ;;  %v6124_v23 = vld [vmem:[%s7500_s1 + $0x868] sm:$0xff]  }
  0xf1   : > { %5644 = vmatpush3.bf16.msra.mxu0 %v6082_v24  ;;  %v6125_v24 = vld [vmem:[%s7500_s1 + $0x8e8] sm:$0xff]  }
  0xf2   : > { %5666 = vmatpush3.bf16.msra.mxu1 %v6083_v25  ;;  %5645 = vmatprep.subr.bf16.mxu0 %v6084_v26  ;;  %v6126_v25 = vld [vmem:[%s7500_s1 + $0x828] sm:$0xff]  }
  0xf3   : > { %5667 = vmatprep.subr.bf16.mxu1 %v6085_v27  ;;  %v6127_v26 = vld [vmem:[%s7500_s1 + $0x8a8] sm:$0xff]   ;;  %v6128_v27 = vld [vmem:[%s7500_s1 + $0x870] sm:$0xff]  }
  0xf5   : > { %5646 = vmatpush3.bf16.msra.mxu0 %v6086_v28 }
  0xf6   : > { %5668 = vmatpush3.bf16.msra.mxu1 %v6087_v29  ;;  %5647 = vmatprep.subr.bf16.mxu0 %v6088_v30  ;;  %v6129_v29 = vld [vmem:[%s7500_s1 + $0x8f0] sm:$0xff]  }
  0xf7   : > { %5669 = vmatprep.subr.bf16.mxu1 %v6089_v31 }
  0xf9   : > { %5648 = vmatpush3.bf16.msra.mxu0 %v6090_v33  ;;  %v6130_v33 = vld [vmem:[%s7500_s1 + $0x830] sm:$0xff]  }
  0xfa   : > { %5670 = vmatpush3.bf16.msra.mxu1 %v6091_v36  ;;  %5649 = vmatprep.subr.bf16.mxu0 %v6092_v32  ;;  %v6131_v36 = vld [vmem:[%s7500_s1 + $0x8b0] sm:$0xff]  }
  0xfb   : > { %v5347_v54 = vpop.f32.mrb[0].mxu0  ;;  %5671 = vmatprep.subr.bf16.mxu1 %v6093_v40 }
  0xfc   : > { %v5369_v35 = vpop.f32.mrb[0].mxu1  ;;  %v5348_v38 = vpop.f32.mrb[1].mxu0 }
  0xfd   : > { %v5349_v57 = vadd.f32 %v5348_v38, %v5347_v54  ;;  %v5370_v58 = vpop.f32.mrb[1].mxu1  ;;  %v5350_v59 = vpop.f32.mrb[2].mxu0  ;;  %5650 = vmatpush3.bf16.msra.mxu0 %v6094_v34 }
  0xfe   : > { %v5371_v44 = vadd.f32 %v5370_v58, %v5369_v35  ;;  %v5372_v60 = vpop.f32.mrb[2].mxu1  ;;  %5672 = vmatpush3.bf16.msra.mxu1 %v6095_v45  ;;  %v5351_v61 = vpop.f32.mrb[3].mxu0  ;;  %5651 = vmatprep.subr.bf16.mxu0 %v6096_v50  ;;  %v6134_v35 = vld [vmem:[%s7500_s1 + $0x838] sm:$0xff]   ;;  %v5096_v58 = vcombine.low %v7174_v11, %v7174_v11  ;;  %v6142_v59 = vld [vmem:[%s7500_s1 + $0x900] sm:$0xff]  }
  0xff   : > { %v5373_v62 = vpop.f32.mrb[3].mxu1  ;;  %5673 = vmatprep.subr.bf16.mxu1 %v6097_v52  ;;  %v6132_v52 = vld [vmem:[%s7500_s1 + $0x878] sm:$0xff]   ;;  %v6143_v60 = vld [vmem:[%s7500_s1 + $0x980] sm:$0xff]   ;;  %v6144_v61 = vld [vmem:[%s7500_s1 + $0x948] sm:$0xff]  }
 0x100   : > { %v7145_v0 = vadd.f32 %v5371_v44, %v5349_v57  ;;  %v6141_v57 = vld [vmem:[%s7500_s1 + $0x9c0] sm:$0xff]   ;;  %v5098_v44 = vcombine.low %v7182_v14, %v7182_v14  ;;  %v6145_v62 = vld [vmem:[%s7500_s1 + $0x9c8] sm:$0xff]  }
 0x101   : > { %5652 = vmatpush3.bf16.msra.mxu0 %v6098_v55 }
 0x102   : > { %5674 = vmatpush3.bf16.msra.mxu1 %v6099_v43  ;;  %5653 = vmatprep.subr.bf16.mxu0 %v6100_v56  ;;  %v6135_v43 = vld [vmem:[%s7500_s1 + $0x8b8] sm:$0xff]   ;;  %v6140_v56 = vld [vmem:[%s7500_s1 + $0x940] sm:$0xff]  }
 0x103   : > { %5675 = vmatprep.subr.bf16.mxu1 %v6101_v63  ;;  %v6146_v63 = vld [vmem:[%s7500_s1 + $0x908] sm:$0xff]  }
 0x105   : > { %5654 = vmatpush3.bf16.msra.mxu0 %v6102_v1  ;;  %v6148_v1 = vld [vmem:[%s7500_s1 + $0x950] sm:$0xff]  }
 0x106   : > { %5676 = vmatpush3.bf16.msra.mxu1 %v6103_v3  ;;  %5683 = vmatprep.subr.bf16.mxu0 %v6104_v5  ;;  %v6150_v3 = vld [vmem:[%s7500_s1 + $0x910] sm:$0xff]   ;;  %v6152_v5 = vld [vmem:[%s7500_s1 + $0x958] sm:$0xff]  }
 0x107   : > { %5705 = vmatprep.subr.bf16.mxu1 %v6105_v48  ;;  %v6153_v48 = vld [vmem:[%s7500_s1 + $0x9d8] sm:$0xff]  }
 0x108   : > { %3063 = vmatmul.mubr.bf16.vlgmr.msra.gmra.mrb[28].mxu0 %v2824_v6  ;;  %v6154_v6 = vld [vmem:[%s7500_s1 + $0x918] sm:$0xff]  }
 0x109   : > { %3103 = vmatmul.mubr.bf16.vlgmr.msra.gmra.mrb[28].mxu1 %v2830_v49  ;;  %5684 = vmatpush3.bf16.msra.mxu0 %v6106_v7  ;;  %v6155_v7 = vld [vmem:[%s7500_s1 + $0x998] sm:$0xff]   ;;  %v6156_v49 = vld [vmem:[%s7500_s1 + $0x960] sm:$0xff]  }
 0x10a   : > { %5706 = vmatpush3.bf16.msra.mxu1 %v6107_v8  ;;  %5685 = vmatprep.subr.bf16.mxu0 %v6108_v9  ;;  %v6157_v8 = vld [vmem:[%s7500_s1 + $0x9e0] sm:$0xff]  }
 0x10b   : > { %5707 = vmatprep.subr.bf16.mxu1 %v6109_v10  ;;  %3408 = vmatprep.mubr.bf16.mxu0 %v5097_v12  ;;  %v6158_v9 = vld [vmem:[%s7500_s1 + $0x920] sm:$0xff]   ;;  %v6160_v12 = vld [vmem:[%s7500_s1 + $0x968] sm:$0xff]  }
 0x10c   : > { %3448 = vmatprep.mubr.bf16.mxu1 %v5099_v15  ;;  %v6159_v10 = vld [vmem:[%s7500_s1 + $0x9a0] sm:$0xff]   ;;  %v6162_v15 = vld [vmem:[%s7500_s1 + $0x928] sm:$0xff]  }
 0x10d   : > { %5686 = vmatpush3.bf16.msra.mxu0 %v6110_v13  ;;  %v6161_v13 = vld [vmem:[%s7500_s1 + $0x9e8] sm:$0xff]  }
 0x10e   : > { %5708 = vmatpush3.bf16.msra.mxu1 %v6111_v16  ;;  %5687 = vmatprep.subr.bf16.mxu0 %v6112_v37  ;;  %v6163_v16 = vld [vmem:[%s7500_s1 + $0x9a8] sm:$0xff]   ;;  %v6164_v37 = vld [vmem:[%s7500_s1 + $0x970] sm:$0xff]  }
 0x10f   : > { %5709 = vmatprep.subr.bf16.mxu1 %v6113_v17 }
 0x111   : > { %5688 = vmatpush3.bf16.msra.mxu0 %v6114_v18  ;;  %v6165_v18 = vld [vmem:[%s7500_s1 + $0x9f0] sm:$0xff]  }
 0x112   : > { %5710 = vmatpush3.bf16.msra.mxu1 %v6115_v41  ;;  %5689 = vmatprep.subr.bf16.mxu0 %v6116_v19 }
 0x113   : > { %5711 = vmatprep.subr.bf16.mxu1 %v6117_v42  ;;  %v6166_v42 = vld [vmem:[%s7500_s1 + $0x930] sm:$0xff]  }
 0x115   : > { %5690 = vmatpush3.bf16.msra.mxu0 %v6118_v20  ;;  %v6167_v20 = vld [vmem:[%s7500_s1 + $0x9b0] sm:$0xff]  }
 0x116   : > { %5712 = vmatpush3.bf16.msra.mxu1 %v6119_v46  ;;  %5691 = vmatprep.subr.bf16.mxu0 %v6120_v21 }
 0x117   : > { %5713 = vmatprep.subr.bf16.mxu1 %v6121_v39 }
 0x119   : > { %5692 = vmatpush3.bf16.msra.mxu0 %v6122_v47 }
 0x11a   : > { %5714 = vmatpush3.bf16.msra.mxu1 %v6123_v22  ;;  %5693 = vmatprep.subr.bf16.mxu0 %v6124_v23 }
 0x11b   : > { %v5391_v28 = vpop.f32.mrb[4].mxu0  ;;  %5715 = vmatprep.subr.bf16.mxu1 %v6125_v24 }
 0x11c   : > { %v5413_v30 = vpop.f32.mrb[4].mxu1  ;;  %v5392_v31 = vpop.f32.mrb[5].mxu0 }
 0x11d   : > { %v5393_v32 = vadd.f32 %v5392_v31, %v5391_v28  ;;  %v5414_v40 = vpop.f32.mrb[5].mxu1  ;;  %v5394_v34 = vpop.f32.mrb[6].mxu0  ;;  %5694 = vmatpush3.bf16.msra.mxu0 %v6126_v25  ;;  %v6168_v25 = vld [vmem:[%s7500_s1 + $0x978] sm:$0xff]   ;;  %v280_v31 = vld [vmem:[%s6377_s12 + $0x20] sm:$0x11] }
 0x11e   : > { %v5415_v45 = vadd.f32 %v5414_v40, %v5413_v30  ;;  %v5416_v50 = vpop.f32.mrb[6].mxu1  ;;  %5716 = vmatpush3.bf16.msra.mxu1 %v6127_v26  ;;  %v5395_v51 = vpop.f32.mrb[7].mxu0  ;;  %5695 = vmatprep.subr.bf16.mxu0 %v6128_v27  ;;  %v6169_v27 = vld [vmem:[%s7500_s1 + $0x9f8] sm:$0xff]  }
 0x11f   : > { %v966_v54 = vadd.f32 %v5393_v32, %v7145_v0  ;;  %v5417_v55 = vpop.f32.mrb[7].mxu1  ;;  %5717 = vmatprep.subr.bf16.mxu1 %v6129_v29  ;;  %v6147_v0 = vld [vmem:[%s7500_s1 + $0x988] sm:$0xff]   ;;  %v6170_v28 = vld [vmem:[%s7500_s1 + $0x938] sm:$0xff]   ;;  %v5197_v32 = vcombine.high %v7174_v11, %v280_v31  ;;  %v6177_v50 = vld [vmem:[%s7500_s1 + $0xac0] sm:$0xff]  }
 0x120   : > { %v6171_v30 = vld [vmem:[%s7500_s1 + $0x9b8] sm:$0xff]  }
 0x121   : > { %v7259_v38 = vadd.f32 %v5415_v45, %v966_v54  ;;  %5696 = vmatpush3.bf16.msra.mxu0 %v6130_v33  ;;  %v281_v33 = vld [vmem:[%s6377_s12 + $0x28] sm:$0x11]  ;;  %v6176_v45 = vld [vmem:[%s7500_s1 + $0xa40] sm:$0xff]   ;;  %v3540_v51 = vshrl.u32 %v5197_v32, 16 }
 0x122   : > { %5718 = vmatpush3.bf16.msra.mxu1 %v6131_v36  ;;  %5697 = vmatprep.subr.bf16.mxu0 %v6132_v52  ;;  %v7370_v36 = vcombine.low %v7174_v11, %v280_v31  ;;  %v7374_v40 = vcombine.low %v7182_v14, %v281_v33  ;;  %v5199_v34 = vcombine.high %v7182_v14, %v281_v33  ;;  %v3542_v52 = vshll.u32 %v5197_v32, 16  ;;  %v6204_v33 = vld [vmem:[%s7500_s1 + $0xa78] sm:$0xff]  }
 0x123   : > { %5719 = vmatprep.subr.bf16.mxu1 %v6133_v53 }
 0x124   : > { %v3554_v53 = vshrl.u32 %v5199_v34, 16  ;;  %v3556_v54 = vshll.u32 %v5199_v34, 16  ;;  %v3533_v11 = vshrl.u32 %v7370_v36, 16  ;;  %v3535_v55 = vshll.u32 %v7370_v36, 16 }
 0x125   : > { %5698 = vmatpush3.bf16.msra.mxu0 %v6134_v35  ;;  %v3547_v14 = vshrl.u32 %v7374_v40, 16  ;;  %v3549_v35 = vshll.u32 %v7374_v40, 16 }
 0x126   : > { %5720 = vmatpush3.bf16.msra.mxu1 %v6135_v43  ;;  %5727 = vmatprep.subr.bf16.mxu0 %v6140_v56  ;;  %v3558_v43 = vrot.slane %v3556_v54, 1  ;;  %v6178_v56 = vld [vmem:[%s7500_s1 + $0xa00] sm:$0xff]  }
 0x127   : > { %5749 = vmatprep.subr.bf16.mxu1 %v6141_v57  ;;  %v6179_v57 = vld [vmem:[%s7500_s1 + $0xa80] sm:$0xff]  }
 0x128   : > { %3409 = vmatmul.mubr.bf16.vlgmr.msra.gmra.mrb[32].mxu0 %v5096_v58  ;;  %v3537_v58 = vrot.slane %v3535_v55, 1 }
 0x129   : > { %3449 = vmatmul.mubr.bf16.vlgmr.msra.gmra.mrb[32].mxu1 %v5098_v44  ;;  %5728 = vmatpush3.bf16.msra.mxu0 %v6142_v59  ;;  %v3551_v59 = vrot.slane %v3549_v35, 1 }
 0x12a   : > { %5750 = vmatpush3.bf16.msra.mxu1 %v6143_v60  ;;  %5729 = vmatprep.subr.bf16.mxu0 %v6144_v61  ;;  %v3559_v60 = vor.u32 %v3558_v43, %v3554_v53  ;;  %v6180_v61 = vld [vmem:[%s7500_s1 + $0xa48] sm:$0xff]  }
 0x12b   : > { %5751 = vmatprep.subr.bf16.mxu1 %v6145_v62  ;;  %v3538_v62 = vor.u32 %v3537_v58, %v3533_v11 }
 0x12c   : > { %3828 = vmatprep.mubr.bf16.mxu1 %v3559_v60 }
 0x12d   : > { %5730 = vmatpush3.bf16.msra.mxu0 %v6146_v63  ;;  %v3552_v63 = vor.u32 %v3551_v59, %v3547_v14 }
 0x12e   : > { %5752 = vmatpush3.bf16.msra.mxu1 %v6147_v0  ;;  %5731 = vmatprep.subr.bf16.mxu0 %v6148_v1  ;;  %v6181_v0 = vld [vmem:[%s7500_s1 + $0xac8] sm:$0xff]   ;;  %v3903_v1 = vrot.slane %v5197_v32, 1  ;;  %v6205_v32 = vld [vmem:[%s7500_s1 + $0xaf8] sm:$0xff]  }
 0x12f   : > { %5753 = vmatprep.subr.bf16.mxu1 %v6149_v2  ;;  %v6182_v2 = vld [vmem:[%s7500_s1 + $0xa08] sm:$0xff]  }
 0x131   : > { %5732 = vmatpush3.bf16.msra.mxu0 %v6150_v3  ;;  %v3905_v3 = vrot.slane %v5199_v34, 1  ;;  %v6206_v34 = vld [vmem:[%s7500_s1 + $0xa38] sm:$0xff]  }
 0x132   : > { %5754 = vmatpush3.bf16.msra.mxu1 %v6151_v4  ;;  %5733 = vmatprep.subr.bf16.mxu0 %v6152_v5  ;;  %v6183_v4 = vld [vmem:[%s7500_s1 + $0xa88] sm:$0xff]   ;;  %v6184_v5 = vld [vmem:[%s7500_s1 + $0xa50] sm:$0xff]  }
 0x133   : > { %5755 = vmatprep.subr.bf16.mxu1 %v6153_v48  ;;  %v6185_v48 = vld [vmem:[%s7500_s1 + $0xad0] sm:$0xff]  }
 0x135   : > { %5734 = vmatpush3.bf16.msra.mxu0 %v6154_v6  ;;  %v6186_v6 = vld [vmem:[%s7500_s1 + $0xa10] sm:$0xff]  }
 0x136   : > { %5756 = vmatpush3.bf16.msra.mxu1 %v6155_v7  ;;  %5735 = vmatprep.subr.bf16.mxu0 %v6156_v49  ;;  %v6187_v7 = vld [vmem:[%s7500_s1 + $0xa90] sm:$0xff]   ;;  %v6188_v49 = vld [vmem:[%s7500_s1 + $0xa58] sm:$0xff]  }
 0x137   : > { %5757 = vmatprep.subr.bf16.mxu1 %v6157_v8  ;;  %v6189_v8 = vld [vmem:[%s7500_s1 + $0xad8] sm:$0xff]  }
 0x139   : > { %5736 = vmatpush3.bf16.msra.mxu0 %v6158_v9  ;;  %v6190_v9 = vld [vmem:[%s7500_s1 + $0xa18] sm:$0xff]  }
 0x13a   : > { %5758 = vmatpush3.bf16.msra.mxu1 %v6159_v10  ;;  %5737 = vmatprep.subr.bf16.mxu0 %v6160_v12  ;;  %v6191_v10 = vld [vmem:[%s7500_s1 + $0xa98] sm:$0xff]   ;;  %v6192_v12 = vld [vmem:[%s7500_s1 + $0xa60] sm:$0xff]  }
 0x13b   : > { %v5435_v17 = vpop.f32.mrb[8].mxu0  ;;  %5759 = vmatprep.subr.bf16.mxu1 %v6161_v13  ;;  %v6193_v13 = vld [vmem:[%s7500_s1 + $0xae0] sm:$0xff]  }
 0x13c   : > { %v5457_v41 = vpop.f32.mrb[8].mxu1  ;;  %v5436_v19 = vpop.f32.mrb[9].mxu0 }
 0x13d   : > { %v5437_v46 = vadd.f32 %v5436_v19, %v5435_v17  ;;  %v5458_v21 = vpop.f32.mrb[9].mxu1  ;;  %v5438_v39 = vpop.f32.mrb[10].mxu0  ;;  %5738 = vmatpush3.bf16.msra.mxu0 %v6162_v15  ;;  %v6194_v15 = vld [vmem:[%s7500_s1 + $0xa20] sm:$0xff]   ;;  %v6197_v17 = vld [vmem:[%s7500_s1 + $0xae8] sm:$0xff]  }
 0x13e   : > { %v5459_v47 = vadd.f32 %v5458_v21, %v5457_v41  ;;  %v5460_v22 = vpop.f32.mrb[10].mxu1  ;;  %5760 = vmatpush3.bf16.msra.mxu1 %v6163_v16  ;;  %v5439_v23 = vpop.f32.mrb[11].mxu0  ;;  %5739 = vmatprep.subr.bf16.mxu0 %v6164_v37  ;;  %v6195_v16 = vld [vmem:[%s7500_s1 + $0xaa0] sm:$0xff]   ;;  %v6196_v37 = vld [vmem:[%s7500_s1 + $0xa68] sm:$0xff]  }
 0x13f   : > { %v5461_v24 = vpop.f32.mrb[11].mxu1  ;;  %5761 = vmatprep.subr.bf16.mxu1 %v6165_v18  ;;  %v6198_v41 = vld [vmem:[%s7500_s1 + $0xa28] sm:$0xff]  }
 0x140   : > { %v1351_v26 = vadd.f32 %v5459_v47, %v5437_v46  ;;  %v6200_v46 = vld [vmem:[%s7500_s1 + $0xa70] sm:$0xff]  }
 0x141   : > { %5740 = vmatpush3.bf16.msra.mxu0 %v6166_v42 }
 0x142   : > { %v7362_v29 = vadd.f32 %v1351_v26, %v7259_v38  ;;  %5762 = vmatpush3.bf16.msra.mxu1 %v6167_v20  ;;  %5741 = vmatprep.subr.bf16.mxu0 %v6168_v25  ;;  %v3544_v38 = vrot.slane %v3542_v52, 1  ;;  %v6199_v20 = vld [vmem:[%s7500_s1 + $0xaa8] sm:$0xff]   ;;  %v6201_v26 = vld [vmem:[%s7500_s1 + $0xaf0] sm:$0xff]  }
 0x143   : > { %5763 = vmatprep.subr.bf16.mxu1 %v6169_v27 }
 0x144   : > { %v3545_v44 = vor.u32 %v3544_v38, %v3540_v51 }
 0x145   : > { %5742 = vmatpush3.bf16.msra.mxu0 %v6170_v28  ;;  %v6202_v28 = vld [vmem:[%s7500_s1 + $0xa30] sm:$0xff]  }
 0x146   : > { %5764 = vmatpush3.bf16.msra.mxu1 %v6171_v30  ;;  %5771 = vmatprep.subr.bf16.mxu0 %v6176_v45  ;;  %v6203_v30 = vld [vmem:[%s7500_s1 + $0xab0] sm:$0xff]   ;;  %v3902_v45 = vrot.slane %v7370_v36, 1 }
 0x147   : > { %5793 = vmatprep.subr.bf16.mxu1 %v6177_v50  ;;  %3788 = vmatprep.mubr.bf16.mxu0 %v3545_v44  ;;  %v3904_v50 = vrot.slane %v7374_v40, 1 }
 0x148   : > { %3789 = vmatmul.mubr.bf16.vlgmr.msra.gmra.mrb[36].mxu0 %v3538_v62 }
 0x149   : > { %3829 = vmatmul.mubr.bf16.vlgmr.msra.gmra.mrb[36].mxu1 %v3552_v63  ;;  %5772 = vmatpush3.bf16.msra.mxu0 %v6178_v56 }
 0x14a   : > { %5794 = vmatpush3.bf16.msra.mxu1 %v6179_v57  ;;  %5773 = vmatprep.subr.bf16.mxu0 %v6180_v61 }
 0x14b   : > { %5795 = vmatprep.subr.bf16.mxu1 %v6181_v0  ;;  %4134 = vmatprep.mubr.bf16.mxu0 %v3903_v1 }
 0x14c   : > { %4174 = vmatprep.mubr.bf16.mxu1 %v3905_v3 }
 0x14d   : > { %5774 = vmatpush3.bf16.msra.mxu0 %v6182_v2 }
 0x14e   : > { %5796 = vmatpush3.bf16.msra.mxu1 %v6183_v4  ;;  %5775 = vmatprep.subr.bf16.mxu0 %v6184_v5 }
 0x14f   : > { %5797 = vmatprep.subr.bf16.mxu1 %v6185_v48 }
 0x151   : > { %5776 = vmatpush3.bf16.msra.mxu0 %v6186_v6 }
 0x152   : > { %5798 = vmatpush3.bf16.msra.mxu1 %v6187_v7  ;;  %5777 = vmatprep.subr.bf16.mxu0 %v6188_v49 }
 0x153   : > { %5799 = vmatprep.subr.bf16.mxu1 %v6189_v8 }
 0x155   : > { %5778 = vmatpush3.bf16.msra.mxu0 %v6190_v9 }
 0x156   : > { %5800 = vmatpush3.bf16.msra.mxu1 %v6191_v10  ;;  %5779 = vmatprep.subr.bf16.mxu0 %v6192_v12 }
 0x157   : > { %5801 = vmatprep.subr.bf16.mxu1 %v6193_v13 }
 0x159   : > { %5780 = vmatpush3.bf16.msra.mxu0 %v6194_v15 }
 0x15a   : > { %5802 = vmatpush3.bf16.msra.mxu1 %v6195_v16  ;;  %5781 = vmatprep.subr.bf16.mxu0 %v6196_v37 }
 0x15b   : > { %v5479_v18 = vpop.f32.mrb[12].mxu0  ;;  %5803 = vmatprep.subr.bf16.mxu1 %v6197_v17 }
 0x15c   : > { %v5501_v19 = vpop.f32.mrb[12].mxu1  ;;  %v5480_v42 = vpop.f32.mrb[13].mxu0 }
 0x15d   : > { %v5481_v21 = vadd.f32 %v5480_v42, %v5479_v18  ;;  %v5502_v39 = vpop.f32.mrb[13].mxu1  ;;  %v5482_v47 = vpop.f32.mrb[14].mxu0  ;;  %5782 = vmatpush3.bf16.msra.mxu0 %v6198_v41 }
 0x15e   : > { %v5503_v22 = vadd.f32 %v5502_v39, %v5501_v19  ;;  %v5504_v23 = vpop.f32.mrb[14].mxu1  ;;  %v5483_v24 = vpop.f32.mrb[15].mxu0  ;;  %5804 = vmatpush3.bf16.msra.mxu1 %v6199_v20  ;;  %5783 = vmatprep.subr.bf16.mxu0 %v6200_v46 }
 0x15f   : > { %v5505_v25 = vpop.f32.mrb[15].mxu1  ;;  %5805 = vmatprep.subr.bf16.mxu1 %v6201_v26 }
 0x160   : > { %v1705_v27 = vadd.f32 %v5503_v22, %v5481_v21 }
 0x161   : > { %5784 = vmatpush3.bf16.msra.mxu0 %v6202_v28 }
 0x162   : > { %v1710_v31 = vadd.f32 %v1705_v27, %v7362_v29  ;;  %5806 = vmatpush3.bf16.msra.mxu1 %v6203_v30  ;;  %v6207_v29 = vld [vmem:[%s7500_s1 + $0xab8] sm:$0xff]   ;;  %5785 = vmatprep.subr.bf16.mxu0 %v6204_v33 }
 0x163   : > { %5807 = vmatprep.subr.bf16.mxu1 %v6205_v32 }
 0x165   : > { %5786 = vmatpush3.bf16.msra.mxu0 %v6206_v34 }
 0x166   : > { %5808 = vmatpush3.bf16.msra.mxu1 %v6207_v29 }
 0x168   : > { %4135 = vmatmul.mubr.bf16.vlgmr.msra.gmra.mrb[40].mxu0 %v3902_v45 }
 0x169   : > { %4175 = vmatmul.mubr.bf16.vlgmr.msra.gmra.mrb[40].mxu1 %v3904_v50 }
 0x17b   : > { %v5523_v51 = vpop.f32.mrb[16].mxu0 }
 0x17c   : > { %v5545_v52 = vpop.f32.mrb[16].mxu1  ;;  %v5524_v53 = vpop.f32.mrb[17].mxu0 }
 0x17d   : > { %v5525_v54 = vadd.f32 %v5524_v53, %v5523_v51  ;;  %v5546_v11 = vpop.f32.mrb[17].mxu1  ;;  %v5526_v55 = vpop.f32.mrb[18].mxu0 }
 0x17e   : > { %v5547_v14 = vadd.f32 %v5546_v11, %v5545_v52  ;;  %v5548_v35 = vpop.f32.mrb[18].mxu1  ;;  %v5527_v38 = vpop.f32.mrb[19].mxu0 }
 0x17f   : > { %v5549_v43 = vpop.f32.mrb[19].mxu1 }
 0x180   : > { %v2051_v56 = vadd.f32 %v5547_v14, %v5525_v54 }
 0x182   : > { %v2056_v57 = vadd.f32 %v2051_v56, %v1710_v31 }
 0x19b   : > { %v5567_v58 = vpop.f32.mrb[20].mxu0 }
 0x19c   : > { %v5589_v36 = vpop.f32.mrb[20].mxu1  ;;  %v5568_v59 = vpop.f32.mrb[21].mxu0 }
 0x19d   : > { %v5569_v40 = vadd.f32 %v5568_v59, %v5567_v58  ;;  %v5590_v44 = vpop.f32.mrb[21].mxu1  ;;  %v5570_v60 = vpop.f32.mrb[22].mxu0 }
 0x19e   : > { %v5591_v61 = vadd.f32 %v5590_v44, %v5589_v36  ;;  %v5592_v62 = vpop.f32.mrb[22].mxu1  ;;  %v5571_v63 = vpop.f32.mrb[23].mxu0  ;;  %v4191_v44 = vld [vmem:[%s267_s5] sm:$0xf] }
 0x19f   : > { %v5593_v0 = vpop.f32.mrb[23].mxu1  ;;  %v5328_v63 = vld [vmem:[%s7501_s2] ss:$0 sm:$0xff] }
 0x1a0   : > { %v2405_v1 = vadd.f32 %v5591_v61, %v5569_v40 }
 0x1a2   : > { %v2410_v2 = vadd.f32 %v2405_v1, %v2056_v57  ;;  %v4192_v1 = vunpack.c.l.bf16 %v4191_v44 }
 0x1bb   : > { %v5611_v3 = vpop.f32.mrb[24].mxu0 }
 0x1bc   : > { %v5633_v4 = vpop.f32.mrb[24].mxu1  ;;  %v5612_v5 = vpop.f32.mrb[25].mxu0 }
 0x1bd   : > { %v5613_v48 = vadd.f32 %v5612_v5, %v5611_v3  ;;  %v5634_v6 = vpop.f32.mrb[25].mxu1  ;;  %v5614_v7 = vpop.f32.mrb[26].mxu0 }
 0x1be   : > { %v5635_v49 = vadd.f32 %v5634_v6, %v5633_v4  ;;  %v5636_v8 = vpop.f32.mrb[26].mxu1  ;;  %v5615_v9 = vpop.f32.mrb[27].mxu0 }
 0x1bf   : > { %v5637_v10 = vpop.f32.mrb[27].mxu1 }
 0x1c0   : > { %v2751_v12 = vadd.f32 %v5635_v49, %v5613_v48 }
 0x1c2   : > { %v2756_v13 = vadd.f32 %v2751_v12, %v2410_v2 }
 0x1db   : > { %v5655_v15 = vpop.f32.mrb[28].mxu0 }
 0x1dc   : > { %v5677_v16 = vpop.f32.mrb[28].mxu1  ;;  %v5656_v37 = vpop.f32.mrb[29].mxu0 }
 0x1dd   : > { %v5657_v17 = vadd.f32 %v5656_v37, %v5655_v15  ;;  %v5678_v18 = vpop.f32.mrb[29].mxu1  ;;  %v5658_v41 = vpop.f32.mrb[30].mxu0 }
 0x1de   : > { %v5679_v19 = vadd.f32 %v5678_v18, %v5677_v16  ;;  %v5680_v42 = vpop.f32.mrb[30].mxu1  ;;  %v5659_v20 = vpop.f32.mrb[31].mxu0 }
 0x1df   : > { %v5681_v46 = vpop.f32.mrb[31].mxu1 }
 0x1e0   : > { %v3105_v21 = vadd.f32 %v5679_v19, %v5657_v17 }
 0x1e2   : > { %v3110_v39 = vadd.f32 %v3105_v21, %v2756_v13 }
 0x1fb   : > { %v5699_v47 = vpop.f32.mrb[32].mxu0 }
 0x1fc   : > { %v5721_v22 = vpop.f32.mrb[32].mxu1  ;;  %v5700_v23 = vpop.f32.mrb[33].mxu0 }
 0x1fd   : > { %v5701_v24 = vadd.f32 %v5700_v23, %v5699_v47  ;;  %v5722_v25 = vpop.f32.mrb[33].mxu1  ;;  %v5702_v26 = vpop.f32.mrb[34].mxu0 }
 0x1fe   : > { %v5723_v27 = vadd.f32 %v5722_v25, %v5721_v22  ;;  %v5724_v28 = vpop.f32.mrb[34].mxu1  ;;  %v5703_v30 = vpop.f32.mrb[35].mxu0 }
 0x1ff   : > { %v5725_v31 = vpop.f32.mrb[35].mxu1 }
 0x200   : > { %v3451_v33 = vadd.f32 %v5723_v27, %v5701_v24 }
 0x202   : > { %v3456_v32 = vadd.f32 %v3451_v33, %v3110_v39 }
 0x21b   : > { %v5743_v34 = vpop.f32.mrb[36].mxu0 }
 0x21c   : > { %v5765_v29 = vpop.f32.mrb[36].mxu1  ;;  %v5744_v45 = vpop.f32.mrb[37].mxu0 }
 0x21d   : > { %v5766_v50 = vpop.f32.mrb[37].mxu1  ;;  %v5745_v51 = vadd.f32 %v5744_v45, %v5743_v34  ;;  %v5746_v53 = vpop.f32.mrb[38].mxu0 }
 0x21e   : > { %v5767_v52 = vadd.f32 %v5766_v50, %v5765_v29  ;;  %v5768_v54 = vpop.f32.mrb[38].mxu1  ;;  %v5747_v11 = vpop.f32.mrb[39].mxu0 }
 0x21f   : > { %v5769_v55 = vpop.f32.mrb[39].mxu1 }
 0x220   : > { %v3831_v14 = vadd.f32 %v5767_v52, %v5745_v51 }
 0x222   : > { %v3836_v35 = vadd.f32 %v3831_v14, %v3456_v32 }
 0x23b   : > { %v5787_v38 = vpop.f32.mrb[40].mxu0 }
 0x23c   : > { %v5809_v43 = vpop.f32.mrb[40].mxu1  ;;  %v5788_v56 = vpop.f32.mrb[41].mxu0 }
 0x23d   : > { %v5810_v57 = vpop.f32.mrb[41].mxu1  ;;  %v5789_v58 = vadd.f32 %v5788_v56, %v5787_v38  ;;  %v5790_v59 = vpop.f32.mrb[42].mxu0 }
 0x23e   : > { %v5811_v36 = vadd.f32 %v5810_v57, %v5809_v43  ;;  %v5812_v40 = vpop.f32.mrb[42].mxu1  ;;  %v5791_v60 = vpop.f32.mrb[43].mxu0 }
 0x23f   : > { %v5813_v61 = vpop.f32.mrb[43].mxu1 }
 0x240   : > { %v4177_v62 = vadd.f32 %v5811_v36, %v5789_v58 }
 0x242   : > { %v4182_v0 = vadd.f32 %v4177_v62, %v3836_v35 }
 0x244   : > { %v4190_v2 = vadd.f32 %v5328_v63, %v4182_v0 }
 0x246   : > { %v4193_v3 = vadd.f32 %v4192_v1, %v4190_v2 }
 0x248   : > { %v4194_v4 = vpack.c.bf16 %v4193_v3, %v4193_v3 }
 0x24a   : > { %4195 = vst [vmem:[%s274_s8] sm:$0xf] %v4194_v4 }
 0x24b PF: > { %s14_s17 = sadd.s32 1, %s6232_s17   ;;  %s7504_s15 = smov %s6228_s16 }
 0x24c   : > { %p11_p5 = scmp.ge.s32.totalorder %s14_s17, 4   ;;  %s7505_s16 = smov %s7507_s18 }
 0x24e   :  { %13 = sbr.rel (!%p11_p5) target bundleno = 2 (0x2), region = 85 }

// kernel: efficientnet1d_forward.27
= control target key start
LH: loop header
LB: loop body
LE: loop exit
PB: predicated region body
PF: predicated region fallthrough
CT: control target
= control target key end

     0   :  { %s656_s12 = smov 0   ;;  %s658_s13 = smov 0   ;;  %s747_s0 = inlined_call_operand.vmem [shape: bf16[2,1,8,256], index: 0, kind: input, shape index: {}]   ;;  %s748_s1 = inlined_call_operand.vmem [shape: bf16[1,256,128], index: 1, kind: input, shape index: {}]   ;;  %s749_s2 = inlined_call_operand.vmem [shape: f32[1,128], index: 2, kind: input, shape index: {}]   ;;  %s750_s3 = inlined_call_operand.vmem [shape: f32[2,8,128], index: 3, kind: output, shape index: {}]  }
   0x1   :  { %s660_s14 = smov 0  }
   0x2 LB: > { %s25_s15 = sadd.s32 1, %s630_s13  ;;  %p517_p0 = scmp.ge.s32.totalorder %s634_s14, 1  ;;  %s634_s14 = sphi %s660_s14, %s13_s14   ;;  %s630_s13 = sphi %s658_s13, %s752_s13   ;;  %s626_s12 = sphi %s656_s12, %s751_s12  }
   0x3   : > { %p27_p1 = scmp.ge.s32.totalorder %s25_s15, 2  ;;  %p168_p2 = scmp.lt.s32.totalorder %s634_s14, 3 }
   0x5   : > { %s754_s15 = smov (%p27_p1, %s25_s15), 0  ;;  %p169_p3 = pnand %p517_p0, %p168_p2 }
   0x6   : > { %v590_v0 = vld [vmem:[%s748_s1 + $0x40] sm:$0xff] (!%p169_p3)   ;;  %v592_v2 = vld [vmem:[%s748_s1 + $0x48] sm:$0xff] (!%p169_p3)   ;;  %p201_p4 = scmp.lt.s32.totalorder (!%p169_p3), %s626_s12, 1  ;;  %v594_v4 = vld [vmem:[%s748_s1 + $0x50] sm:$0xff] (!%p169_p3)  }
   0x7   : > { %172 = sbr.rel (%p169_p3) target bundleno = 285 (0x11d), region = 32  ;;  %v591_v1 = vld [vmem:[%s748_s1] sm:$0xff] (!%p169_p3)   ;;  %544 = vmatprep.subr.bf16.mxu0 (!%p169_p3), %v590_v0  ;;  %v593_v3 = vld [vmem:[%s748_s1 + $0x8] sm:$0xff] (!%p169_p3)   ;;  %v595_v5 = vld [vmem:[%s748_s1 + $0x10] sm:$0xff] (!%p169_p3)  }
   0x8   : > { %545 = vmatpush3.bf16.msra.mxu0 (!%p169_p3), %v591_v1  ;;  %v596_v6 = vld [vmem:[%s748_s1 + $0x58] sm:$0xff] (!%p169_p3)   ;;  %v598_v8 = vld [vmem:[%s748_s1 + $0x60] sm:$0xff] (!%p169_p3)   ;;  %v600_v10 = vld [vmem:[%s748_s1 + $0x68] sm:$0xff] (!%p169_p3)  }
   0x9   : > { %546 = vmatprep.subr.bf16.mxu0 (!%p169_p3), %v592_v2  ;;  %v597_v7 = vld [vmem:[%s748_s1 + $0x18] sm:$0xff] (!%p169_p3)   ;;  %v599_v9 = vld [vmem:[%s748_s1 + $0x20] sm:$0xff] (!%p169_p3)   ;;  %v601_v13 = vld [vmem:[%s748_s1 + $0x28] sm:$0xff] (!%p169_p3)  }
   0xa   : > { %v602_v14 = vld [vmem:[%s748_s1 + $0x70] sm:$0xff] (!%p169_p3)   ;;  %v604_v16 = vld [vmem:[%s748_s1 + $0x78] sm:$0xff] (!%p169_p3)   ;;  %v521_v20 = vld [vmem:[%s749_s2] ss:$0 sm:$0xff] (!%p169_p3) }
   0xb   : > { %v603_v15 = vld [vmem:[%s748_s1 + $0x30] sm:$0xff] (!%p169_p3)   ;;  %v605_v17 = vld [vmem:[%s748_s1 + $0x38] sm:$0xff] (!%p169_p3)  }
   0xc   : > { %547 = vmatpush3.bf16.msra.mxu0 (!%p169_p3), %v593_v3 }
   0xd   : > { %548 = vmatprep.subr.bf16.mxu0 (!%p169_p3), %v594_v4 }
   0xe   : > { %s756_s12 = smov (!%p201_p4, %s626_s12), 1 }
   0xf   : > { %s543_s30 = sshll.u32 %s756_s12, 3 }
  0x10   : > { %549 = vmatpush3.bf16.msra.mxu0 %v595_v5  ;;  %s205_s10 = scalar_lea.vmem %s747_s0, %s543_s30  ;;  %s219_s7 = scalar_lea.vmem %s750_s3, %s543_s30 }
  0x11   : > { %550 = vmatprep.subr.bf16.mxu0 %v596_v6  ;;  %v221_v11 = vld [vmem:[%s205_s10] sm:$0xff] }
  0x12   : > { %v523_v12 = vcombine.high %v221_v11, %v221_v11  ;;  %v522_v18 = vcombine.low %v221_v11, %v221_v11 }
  0x14   : > { %551 = vmatpush3.bf16.msra.mxu0 %v597_v7  ;;  %396 = vmatprep.mubr.bf16.mxu0 %v523_v12 }
  0x15   : > { %552 = vmatprep.subr.bf16.mxu0 %v598_v8 }
  0x18   : > { %553 = vmatpush3.bf16.msra.mxu0 %v599_v9 }
  0x19   : > { %554 = vmatprep.subr.bf16.mxu0 %v600_v10 }
  0x1c   : > { %555 = vmatpush3.bf16.msra.mxu0 %v601_v13 }
  0x1d   : > { %556 = vmatprep.subr.bf16.mxu0 %v602_v14 }
  0x20   : > { %557 = vmatpush3.bf16.msra.mxu0 %v603_v15 }
  0x21   : > { %558 = vmatprep.subr.bf16.mxu0 %v604_v16 }
  0x24   : > { %559 = vmatpush3.bf16.msra.mxu0 %v605_v17 }
  0x27   : > { %397 = vmatmul.mubr.bf16.vlgmr.msra.gmra.mrb[0].mxu0 %v522_v18 }
  0xfa   : > { %v560_v19 = vpop.f32.mrb[0].mxu0 }
  0xfb   : > { %v561_v21 = vpop.f32.mrb[1].mxu0 }
  0xfc   : > { %v562_v22 = vadd.f32 %v561_v21, %v560_v19  ;;  %v563_v23 = vpop.f32.mrb[2].mxu0 }
  0xfd   : > { %v564_v24 = vpop.f32.mrb[3].mxu0 }
  0xfe   : > { %v399_v25 = vadd.f32 %v562_v22, %v521_v20 }
 0x100   : > { %v540_v26 = vmul.f32 -1.442695, %v399_v25 }
 0x102   : > { %608 = vpow2.f32 %v540_v26 }
 0x10c   : > { %v609_v27 = vpop.eup %608 }
 0x10d   : > { %v407_v28 = vadd.f32 1.0, %v609_v27 }
 0x10f   : > { %610 = vrcp.f32 %v407_v28 }
 0x119   : > { %v611_v29 = vpop.eup %610 }
 0x11a   : > { %v410_v30 = vmul.f32 %v611_v29, %v399_v25 }
 0x11c   : > { %411 = vst [vmem:[%s219_s7] sm:$0xff] %v410_v30 }
 0x11d PF: > { %s13_s14 = sadd.s32 1, %s634_s14   ;;  %s751_s12 = smov %s630_s13 }
 0x11e   : > { %p10_p5 = scmp.ge.s32.totalorder %s13_s14, 4   ;;  %s752_s13 = smov %s754_s15 }
 0x120   :  { %12 = sbr.rel (!%p10_p5) target bundleno = 2 (0x2), region = 68 }

// kernel: efficientnet1d_forward.26
= control target key start
LH: loop header
LB: loop body
LE: loop exit
PB: predicated region body
PF: predicated region fallthrough
CT: control target
= control target key end

     0   :  { %s8230_s12 = smov 0   ;;  %s8232_s13 = smov 0   ;;  %s10574_s0 = inlined_call_operand.vmem [shape: bf16[2,1,18,512], index: 0, kind: input, shape index: {}]   ;;  %s10575_s1 = inlined_call_operand.vmem [shape: bf16[11,512,256], index: 1, kind: input, shape index: {}]   ;;  %s10576_s2 = inlined_call_operand.vmem [shape: f32[1,256], index: 2, kind: input, shape index: {}]   ;;  %s10577_s3 = inlined_call_operand.vmem [shape: bf16[2,8,256], index: 3, kind: output, shape index: {}]  }
   0x1   :  { %s8234_s14 = smov 0  }
   0x2 LB: > { %s25_s15 = sadd.s32 1, %s8204_s13  ;;  %p5718_p0 = scmp.ge.s32.totalorder %s8208_s14, 1  ;;  %s8208_s14 = sphi %s8234_s14, %s13_s14   ;;  %s8204_s13 = sphi %s8232_s13, %s10579_s13   ;;  %s8200_s12 = sphi %s8230_s12, %s10578_s12  }
   0x3   : > { %p27_p1 = scmp.ge.s32.totalorder %s25_s15, 2  ;;  %p172_p2 = scmp.lt.s32.totalorder %s8208_s14, 3 }
   0x5   : > { %s10581_s15 = smov (%p27_p1, %s25_s15), 0  ;;  %p173_p3 = pnand %p5718_p0, %p172_p2 }
   0x6   : > { %v7112_v0 = vld [vmem:[%s10575_s1 + $0x204] ss:$8 sps:$4 sm:$0xff] (!%p173_p3)   ;;  %v7116_v2 = vld [vmem:[%s10575_s1 + $0x200] ss:$8 sps:$4 sm:$0xff] (!%p173_p3)   ;;  %v7118_v4 = vld [vmem:[%s10575_s1 + $0x214] ss:$8 sps:$4 sm:$0xff] (!%p173_p3)  }
   0x7   : > { %176 = sbr.rel (%p173_p3) target bundleno = 934 (0x3a6), region = 32  ;;  %v7114_v1 = vld [vmem:[%s10575_s1 + $0x304] ss:$8 sps:$4 sm:$0xff] (!%p173_p3)   ;;  %738 = vmatprep.subr.bf16.mxu0 (!%p173_p3), %v7112_v0  ;;  %v7117_v3 = vld [vmem:[%s10575_s1 + $0x300] ss:$8 sps:$4 sm:$0xff] (!%p173_p3)   ;;  %p209_p4 = scmp.lt.s32.totalorder (!%p173_p3), %s8200_s12, 1 }
   0x8   : > { %779 = vmatprep.subr.bf16.mxu1 (!%p173_p3), %v7114_v1  ;;  %739 = vmatpush1.bf16.msra.mxu0 (!%p173_p3), %v7116_v2  ;;  %v7120_v5 = vld [vmem:[%s10575_s1 + $0x314] ss:$8 sps:$4 sm:$0xff] (!%p173_p3)   ;;  %v7122_v6 = vld [vmem:[%s10575_s1 + $0x210] ss:$8 sps:$4 sm:$0xff] (!%p173_p3)   ;;  %v7124_v8 = vld [vmem:[%s10575_s1 + $0x224] ss:$8 sps:$4 sm:$0xff] (!%p173_p3)  }
   0x9   : > { %780 = vmatpush1.bf16.msra.mxu1 (!%p173_p3), %v7117_v3  ;;  %740 = vmatprep.subr.bf16.mxu0 (!%p173_p3), %v7118_v4  ;;  %v7123_v7 = vld [vmem:[%s10575_s1 + $0x310] ss:$8 sps:$4 sm:$0xff] (!%p173_p3)   ;;  %v7126_v9 = vld [vmem:[%s10575_s1 + $0x324] ss:$8 sps:$4 sm:$0xff] (!%p173_p3)   ;;  %v7128_v10 = vld [vmem:[%s10575_s1 + $0x220] ss:$8 sps:$4 sm:$0xff] (!%p173_p3)  }
   0xa   : > { %781 = vmatprep.subr.bf16.mxu1 (!%p173_p3), %v7120_v5  ;;  %v7129_v11 = vld [vmem:[%s10575_s1 + $0x320] ss:$8 sps:$4 sm:$0xff] (!%p173_p3)   ;;  %v7130_v12 = vld [vmem:[%s10575_s1 + $0x234] ss:$8 sps:$4 sm:$0xff] (!%p173_p3)   ;;  %v7134_v14 = vld [vmem:[%s10575_s1 + $0x230] ss:$8 sps:$4 sm:$0xff] (!%p173_p3)  }
   0xb   : > { %v7132_v13 = vld [vmem:[%s10575_s1 + $0x334] ss:$8 sps:$4 sm:$0xff] (!%p173_p3)   ;;  %v7135_v15 = vld [vmem:[%s10575_s1 + $0x330] ss:$8 sps:$4 sm:$0xff] (!%p173_p3)   ;;  %v7136_v16 = vld [vmem:[%s10575_s1 + $0x244] ss:$8 sps:$4 sm:$0xff] (!%p173_p3)  }
   0xc   : > { %741 = vmatpush1.bf16.msra.mxu0 (!%p173_p3), %v7122_v6  ;;  %v7138_v17 = vld [vmem:[%s10575_s1 + $0x344] ss:$8 sps:$4 sm:$0xff] (!%p173_p3)   ;;  %v7140_v18 = vld [vmem:[%s10575_s1 + $0x240] ss:$8 sps:$4 sm:$0xff] (!%p173_p3)   ;;  %v7142_v20 = vld [vmem:[%s10575_s1 + $0x254] ss:$8 sps:$4 sm:$0xff] (!%p173_p3)  }
   0xd   : > { %782 = vmatpush1.bf16.msra.mxu1 (!%p173_p3), %v7123_v7  ;;  %742 = vmatprep.subr.bf16.mxu0 (!%p173_p3), %v7124_v8  ;;  %v7141_v19 = vld [vmem:[%s10575_s1 + $0x340] ss:$8 sps:$4 sm:$0xff] (!%p173_p3)   ;;  %v7144_v21 = vld [vmem:[%s10575_s1 + $0x354] ss:$8 sps:$4 sm:$0xff] (!%p173_p3)   ;;  %v7146_v22 = vld [vmem:[%s10575_s1 + $0x250] ss:$8 sps:$4 sm:$0xff] (!%p173_p3)  }
   0xe   : > { %783 = vmatprep.subr.bf16.mxu1 %v7126_v9  ;;  %v7147_v23 = vld [vmem:[%s10575_s1 + $0x350] ss:$8 sps:$4 sm:$0xff]   ;;  %v7148_v24 = vld [vmem:[%s10575_s1 + $0x264] ss:$8 sps:$4 sm:$0xff]   ;;  %v7152_v26 = vld [vmem:[%s10575_s1 + $0x260] ss:$8 sps:$4 sm:$0xff]  }
   0xf   : > { %v7150_v25 = vld [vmem:[%s10575_s1 + $0x364] ss:$8 sps:$4 sm:$0xff]   ;;  %v7153_v27 = vld [vmem:[%s10575_s1 + $0x360] ss:$8 sps:$4 sm:$0xff]   ;;  %v7154_v28 = vld [vmem:[%s10575_s1 + $0x274] ss:$8 sps:$4 sm:$0xff]  }
  0x10   : > { %743 = vmatpush1.bf16.msra.mxu0 %v7128_v10  ;;  %v7156_v29 = vld [vmem:[%s10575_s1 + $0x374] ss:$8 sps:$4 sm:$0xff]   ;;  %v7158_v30 = vld [vmem:[%s10575_s1 + $0x270] ss:$8 sps:$4 sm:$0xff]   ;;  %v7160_v32 = vld [vmem:[%s10575_s1 + $0x284] ss:$8 sps:$4 sm:$0xff]  }
  0x11   : > { %784 = vmatpush1.bf16.msra.mxu1 %v7129_v11  ;;  %744 = vmatprep.subr.bf16.mxu0 %v7130_v12  ;;  %v7159_v31 = vld [vmem:[%s10575_s1 + $0x370] ss:$8 sps:$4 sm:$0xff]   ;;  %v7162_v33 = vld [vmem:[%s10575_s1 + $0x384] ss:$8 sps:$4 sm:$0xff]   ;;  %v7164_v34 = vld [vmem:[%s10575_s1 + $0x280] ss:$8 sps:$4 sm:$0xff]  }
  0x12   : > { %785 = vmatprep.subr.bf16.mxu1 %v7132_v13  ;;  %v7165_v35 = vld [vmem:[%s10575_s1 + $0x380] ss:$8 sps:$4 sm:$0xff]   ;;  %s10583_s12 = smov (!%p209_p4, %s8200_s12), 1  ;;  %v7166_v36 = vld [vmem:[%s10575_s1 + $0x294] ss:$8 sps:$4 sm:$0xff]  }
  0x13   : > { %v7168_v37 = vld [vmem:[%s10575_s1 + $0x394] ss:$8 sps:$4 sm:$0xff]   ;;  %v7170_v38 = vld [vmem:[%s10575_s1 + $0x290] ss:$8 sps:$4 sm:$0xff]   ;;  %s7087_s25 = smul.u32 48, %s10583_s12  ;;  %s7085_s28 = sshll.u32 %s10583_s12, 3 }
  0x14   : > { %745 = vmatpush1.bf16.msra.mxu0 %v7134_v14  ;;  %v7171_v39 = vld [vmem:[%s10575_s1 + $0x390] ss:$8 sps:$4 sm:$0xff]   ;;  %v7172_v40 = vld [vmem:[%s10575_s1 + $0x2a4] ss:$8 sps:$4 sm:$0xff]   ;;  %v7176_v42 = vld [vmem:[%s10575_s1 + $0x2a0] ss:$8 sps:$4 sm:$0xff]   ;;  %s233_s4 = scalar_lea.vmem %s10577_s3, %s7085_s28 }
  0x15   : > { %786 = vmatpush1.bf16.msra.mxu1 %v7135_v15  ;;  %746 = vmatprep.subr.bf16.mxu0 %v7136_v16  ;;  %v7174_v41 = vld [vmem:[%s10575_s1 + $0x3a4] ss:$8 sps:$4 sm:$0xff]   ;;  %v7177_v43 = vld [vmem:[%s10575_s1 + $0x3a0] ss:$8 sps:$4 sm:$0xff]   ;;  %s8390_s11 = scalar_lea.vmem %s10574_s0, %s7087_s25  ;;  %v7178_v44 = vld [vmem:[%s10575_s1 + $0x2b4] ss:$8 sps:$4 sm:$0xff]  }
  0x16   : > { %787 = vmatprep.subr.bf16.mxu1 %v7138_v17  ;;  %v7180_v45 = vld [vmem:[%s10575_s1 + $0x3b4] ss:$8 sps:$4 sm:$0xff]   ;;  %v7182_v46 = vld [vmem:[%s10575_s1 + $0x2b0] ss:$8 sps:$4 sm:$0xff]   ;;  %v8405_v48 = vld [vmem:[%s8390_s11] sm:$0xff] }
  0x17   : > { %v7183_v47 = vld [vmem:[%s10575_s1 + $0x3b0] ss:$8 sps:$4 sm:$0xff]   ;;  %v8409_v50 = vld [vmem:[%s8390_s11 + $0x8] sm:$0xff]  ;;  %v7190_v62 = vld [vmem:[%s10575_s1 + $0x2d4] ss:$8 sps:$4 sm:$0xff]  }
  0x18   : > { %747 = vmatpush1.bf16.msra.mxu0 %v7140_v18  ;;  %v237_v49 = vld [vmem:[%s8390_s11 + $0x10] sm:$0xff]  ;;  %v238_v51 = vld [vmem:[%s8390_s11 + $0x18] sm:$0xff]  ;;  %v7184_v52 = vld [vmem:[%s10575_s1 + $0x2c4] ss:$8 sps:$4 sm:$0xff]  }
  0x19   : > { %788 = vmatpush1.bf16.msra.mxu1 %v7141_v19  ;;  %748 = vmatprep.subr.bf16.mxu0 %v7142_v20  ;;  %v8416_v53 = vcombine.high %v8405_v48, %v237_v49  ;;  %v8419_v54 = vcombine.high %v8409_v50, %v238_v51  ;;  %v7186_v55 = vld [vmem:[%s10575_s1 + $0x3c4] ss:$8 sps:$4 sm:$0xff]   ;;  %v7188_v60 = vld [vmem:[%s10575_s1 + $0x2c0] ss:$8 sps:$4 sm:$0xff]   ;;  %v7192_v1 = vld [vmem:[%s10575_s1 + $0x3d4] ss:$8 sps:$4 sm:$0xff]   ;;  %v8459_v6 = vcombine.low %v8405_v48, %v237_v49 }
  0x1a   : > { %789 = vmatprep.subr.bf16.mxu1 %v7144_v21  ;;  %v7189_v61 = vld [vmem:[%s10575_s1 + $0x3c0] ss:$8 sps:$4 sm:$0xff]   ;;  %v7194_v4 = vld [vmem:[%s10575_s1 + $0x2d0] ss:$8 sps:$4 sm:$0xff]   ;;  %v8462_v7 = vcombine.low %v8409_v50, %v238_v51  ;;  %v7196_v8 = vld [vmem:[%s10575_s1 + $0x2e4] ss:$8 sps:$4 sm:$0xff]  }
  0x1b   : > { %v8425_v56 = vshrl.u32 %v8416_v53, 16  ;;  %v8428_v57 = vshll.u32 %v8416_v53, 16  ;;  %v8431_v58 = vshrl.u32 %v8419_v54, 16  ;;  %v8434_v59 = vshll.u32 %v8419_v54, 16  ;;  %v7195_v5 = vld [vmem:[%s10575_s1 + $0x3d0] ss:$8 sps:$4 sm:$0xff]  }
  0x1c   : > { %749 = vmatpush1.bf16.msra.mxu0 %v7146_v22  ;;  %v7198_v9 = vld [vmem:[%s10575_s1 + $0x3e4] ss:$8 sps:$4 sm:$0xff]   ;;  %v7200_v10 = vld [vmem:[%s10575_s1 + $0x2e0] ss:$8 sps:$4 sm:$0xff]   ;;  %v8477_v12 = vshll.u32 %v8459_v6, 16  ;;  %v8480_v13 = vshll.u32 %v8462_v7, 16 }
  0x1d   : > { %790 = vmatpush1.bf16.msra.mxu1 %v7147_v23  ;;  %750 = vmatprep.subr.bf16.mxu0 %v7148_v24  ;;  %v398_v63 = vrot.slane %v8428_v57, 1  ;;  %v412_v0 = vrot.slane %v8434_v59, 1  ;;  %v7201_v11 = vld [vmem:[%s10575_s1 + $0x3e0] ss:$8 sps:$4 sm:$0xff]   ;;  %v7202_v14 = vld [vmem:[%s10575_s1 + $0x2f4] ss:$8 sps:$4 sm:$0xff]  }
  0x1e   : > { %791 = vmatprep.subr.bf16.mxu1 %v7150_v25  ;;  %v7204_v15 = vld [vmem:[%s10575_s1 + $0x3f4] ss:$8 sps:$4 sm:$0xff]   ;;  %v7206_v16 = vld [vmem:[%s10575_s1 + $0x2f0] ss:$8 sps:$4 sm:$0xff]   ;;  %v8495_v18 = vshrl.u32 %v8459_v6, 16  ;;  %v391_v19 = vrot.slane %v8477_v12, 1 }
  0x1f   : > { %v399_v2 = vor.u32 %v398_v63, %v8425_v56  ;;  %v413_v3 = vor.u32 %v412_v0, %v8431_v58  ;;  %v7207_v17 = vld [vmem:[%s10575_s1 + $0x3f0] ss:$8 sps:$4 sm:$0xff]   ;;  %v8499_v20 = vshrl.u32 %v8462_v7, 16  ;;  %v405_v21 = vrot.slane %v8480_v13, 1  ;;  %v7214_v22 = vld [vmem:[%s10575_s1 + $0x4] ss:$8 sps:$4 sm:$0xff]  }
  0x20   : > { %751 = vmatpush1.bf16.msra.mxu0 %v7152_v26  ;;  %v7217_v23 = vld [vmem:[%s10575_s1 + $0x104] ss:$8 sps:$4 sm:$0xff]   ;;  %v392_v24 = vor.u32 %v391_v19, %v8495_v18  ;;  %v7212_v26 = vld [vmem:[%s10575_s1] ss:$8 sps:$4 sm:$0xff]   ;;  %v7242_v49 = vld [vmem:[%s10575_s1 + $0x50] ss:$8 sps:$4 sm:$0xff]  }
  0x21   : > { %792 = vmatpush1.bf16.msra.mxu1 %v7153_v27  ;;  %752 = vmatprep.subr.bf16.mxu0 %v7154_v28  ;;  %v406_v25 = vor.u32 %v405_v21, %v8499_v20  ;;  %v7215_v27 = vld [vmem:[%s10575_s1 + $0x100] ss:$8 sps:$4 sm:$0xff]   ;;  %v7220_v28 = vld [vmem:[%s10575_s1 + $0x14] ss:$8 sps:$4 sm:$0xff]   ;;  %v7245_v51 = vld [vmem:[%s10575_s1 + $0x150] ss:$8 sps:$4 sm:$0xff]  }
  0x22   : > { %793 = vmatprep.subr.bf16.mxu1 %v7156_v29  ;;  %770 = vmatprep.mubr.bf16.mxu0 %v399_v2  ;;  %v7223_v29 = vld [vmem:[%s10575_s1 + $0x114] ss:$8 sps:$4 sm:$0xff]   ;;  %v7254_v0 = vld [vmem:[%s10575_s1 + $0x70] ss:$8 sps:$4 sm:$0xff]   ;;  %v7262_v2 = vld [vmem:[%s10575_s1 + $0x84] ss:$8 sps:$4 sm:$0xff]  }
  0x23   : > { %811 = vmatprep.mubr.bf16.mxu1 %v413_v3  ;;  %v7259_v63 = vld [vmem:[%s10575_s1 + $0x174] ss:$8 sps:$4 sm:$0xff]   ;;  %v7265_v3 = vld [vmem:[%s10575_s1 + $0x184] ss:$8 sps:$4 sm:$0xff]  }
  0x24   : > { %753 = vmatpush1.bf16.msra.mxu0 %v7158_v30  ;;  %v5855_v30 = vcombine.high %v8405_v48, %v8405_v48  ;;  %v7280_v19 = vld [vmem:[%s10575_s1 + $0xb4] ss:$8 sps:$4 sm:$0xff]  }
  0x25   : > { %794 = vmatpush1.bf16.msra.mxu1 %v7159_v31  ;;  %754 = vmatprep.subr.bf16.mxu0 %v7160_v32  ;;  %v5857_v31 = vcombine.high %v8409_v50, %v8409_v50  ;;  %v7218_v32 = vld [vmem:[%s10575_s1 + $0x10] ss:$8 sps:$4 sm:$0xff]   ;;  %v7283_v21 = vld [vmem:[%s10575_s1 + $0x1b4] ss:$8 sps:$4 sm:$0xff]  }
  0x26   : > { %795 = vmatprep.subr.bf16.mxu1 %v7162_v33  ;;  %v7221_v33 = vld [vmem:[%s10575_s1 + $0x110] ss:$8 sps:$4 sm:$0xff]  }
  0x28   : > { %755 = vmatpush1.bf16.msra.mxu0 %v7164_v34  ;;  %v7226_v34 = vld [vmem:[%s10575_s1 + $0x24] ss:$8 sps:$4 sm:$0xff]  }
  0x29   : > { %796 = vmatpush1.bf16.msra.mxu1 %v7165_v35  ;;  %756 = vmatprep.subr.bf16.mxu0 %v7166_v36  ;;  %v7229_v35 = vld [vmem:[%s10575_s1 + $0x124] ss:$8 sps:$4 sm:$0xff]   ;;  %v7224_v36 = vld [vmem:[%s10575_s1 + $0x20] ss:$8 sps:$4 sm:$0xff]  }
  0x2a   : > { %797 = vmatprep.subr.bf16.mxu1 %v7168_v37  ;;  %v7227_v37 = vld [vmem:[%s10575_s1 + $0x120] ss:$8 sps:$4 sm:$0xff]  }
  0x2c   : > { %757 = vmatpush1.bf16.msra.mxu0 %v7170_v38  ;;  %v7232_v38 = vld [vmem:[%s10575_s1 + $0x34] ss:$8 sps:$4 sm:$0xff]  }
  0x2d   : > { %798 = vmatpush1.bf16.msra.mxu1 %v7171_v39  ;;  %758 = vmatprep.subr.bf16.mxu0 %v7172_v40  ;;  %v7235_v39 = vld [vmem:[%s10575_s1 + $0x134] ss:$8 sps:$4 sm:$0xff]   ;;  %v7230_v40 = vld [vmem:[%s10575_s1 + $0x30] ss:$8 sps:$4 sm:$0xff]  }
  0x2e   : > { %799 = vmatprep.subr.bf16.mxu1 %v7174_v41  ;;  %v7233_v41 = vld [vmem:[%s10575_s1 + $0x130] ss:$8 sps:$4 sm:$0xff]  }
  0x30   : > { %759 = vmatpush1.bf16.msra.mxu0 %v7176_v42  ;;  %v7238_v42 = vld [vmem:[%s10575_s1 + $0x44] ss:$8 sps:$4 sm:$0xff]  }
  0x31   : > { %800 = vmatpush1.bf16.msra.mxu1 %v7177_v43  ;;  %760 = vmatprep.subr.bf16.mxu0 %v7178_v44  ;;  %v7241_v43 = vld [vmem:[%s10575_s1 + $0x144] ss:$8 sps:$4 sm:$0xff]   ;;  %v7236_v44 = vld [vmem:[%s10575_s1 + $0x40] ss:$8 sps:$4 sm:$0xff]  }
  0x32   : > { %801 = vmatprep.subr.bf16.mxu1 %v7180_v45  ;;  %v7239_v45 = vld [vmem:[%s10575_s1 + $0x140] ss:$8 sps:$4 sm:$0xff]  }
  0x34   : > { %761 = vmatpush1.bf16.msra.mxu0 %v7182_v46  ;;  %v7244_v46 = vld [vmem:[%s10575_s1 + $0x54] ss:$8 sps:$4 sm:$0xff]  }
  0x35   : > { %802 = vmatpush1.bf16.msra.mxu1 %v7183_v47  ;;  %762 = vmatprep.subr.bf16.mxu0 %v7184_v52  ;;  %v7247_v47 = vld [vmem:[%s10575_s1 + $0x154] ss:$8 sps:$4 sm:$0xff]   ;;  %v7250_v52 = vld [vmem:[%s10575_s1 + $0x64] ss:$8 sps:$4 sm:$0xff]  }
  0x36   : > { %803 = vmatprep.subr.bf16.mxu1 %v7186_v55  ;;  %v7253_v55 = vld [vmem:[%s10575_s1 + $0x164] ss:$8 sps:$4 sm:$0xff]  }
  0x38   : > { %763 = vmatpush1.bf16.msra.mxu0 %v7188_v60  ;;  %v7248_v60 = vld [vmem:[%s10575_s1 + $0x60] ss:$8 sps:$4 sm:$0xff]  }
  0x39   : > { %804 = vmatpush1.bf16.msra.mxu1 %v7189_v61  ;;  %764 = vmatprep.subr.bf16.mxu0 %v7190_v62  ;;  %v7251_v61 = vld [vmem:[%s10575_s1 + $0x160] ss:$8 sps:$4 sm:$0xff]   ;;  %v7256_v62 = vld [vmem:[%s10575_s1 + $0x74] ss:$8 sps:$4 sm:$0xff]  }
  0x3a   : > { %805 = vmatprep.subr.bf16.mxu1 %v7192_v1  ;;  %v7257_v1 = vld [vmem:[%s10575_s1 + $0x170] ss:$8 sps:$4 sm:$0xff]  }
  0x3c   : > { %765 = vmatpush1.bf16.msra.mxu0 %v7194_v4  ;;  %v7260_v4 = vld [vmem:[%s10575_s1 + $0x80] ss:$8 sps:$4 sm:$0xff]  }
  0x3d   : > { %806 = vmatpush1.bf16.msra.mxu1 %v7195_v5  ;;  %766 = vmatprep.subr.bf16.mxu0 %v7196_v8  ;;  %v7263_v5 = vld [vmem:[%s10575_s1 + $0x180] ss:$8 sps:$4 sm:$0xff]   ;;  %v7268_v8 = vld [vmem:[%s10575_s1 + $0x94] ss:$8 sps:$4 sm:$0xff]  }
  0x3e   : > { %807 = vmatprep.subr.bf16.mxu1 %v7198_v9  ;;  %v7271_v9 = vld [vmem:[%s10575_s1 + $0x194] ss:$8 sps:$4 sm:$0xff]  }
  0x40   : > { %767 = vmatpush1.bf16.msra.mxu0 %v7200_v10  ;;  %v7266_v10 = vld [vmem:[%s10575_s1 + $0x90] ss:$8 sps:$4 sm:$0xff]  }
  0x41   : > { %808 = vmatpush1.bf16.msra.mxu1 %v7201_v11  ;;  %768 = vmatprep.subr.bf16.mxu0 %v7202_v14  ;;  %v7269_v11 = vld [vmem:[%s10575_s1 + $0x190] ss:$8 sps:$4 sm:$0xff]   ;;  %v7274_v14 = vld [vmem:[%s10575_s1 + $0xa4] ss:$8 sps:$4 sm:$0xff]  }
  0x42   : > { %809 = vmatprep.subr.bf16.mxu1 %v7204_v15  ;;  %v7277_v15 = vld [vmem:[%s10575_s1 + $0x1a4] ss:$8 sps:$4 sm:$0xff]  }
  0x44   : > { %769 = vmatpush1.bf16.msra.mxu0 %v7206_v16  ;;  %v7272_v16 = vld [vmem:[%s10575_s1 + $0xa0] ss:$8 sps:$4 sm:$0xff]  }
  0x45   : > { %810 = vmatpush1.bf16.msra.mxu1 %v7207_v17  ;;  %1148 = vmatprep.subr.bf16.mxu0 %v7214_v22  ;;  %v7275_v17 = vld [vmem:[%s10575_s1 + $0x1a0] ss:$8 sps:$4 sm:$0xff]   ;;  %v7278_v22 = vld [vmem:[%s10575_s1 + $0xb0] ss:$8 sps:$4 sm:$0xff]  }
  0x46   : > { %1189 = vmatprep.subr.bf16.mxu1 %v7217_v23  ;;  %v7281_v23 = vld [vmem:[%s10575_s1 + $0x1b0] ss:$8 sps:$4 sm:$0xff]  }
  0x47   : > { %771 = vmatmul.mubr.bf16.vlgmr.msra.gmra.mrb[0].mxu0 %v392_v24  ;;  %v7286_v24 = vld [vmem:[%s10575_s1 + $0xc4] ss:$8 sps:$4 sm:$0xff]  }
  0x48   : > { %812 = vmatmul.mubr.bf16.vlgmr.msra.gmra.mrb[0].mxu1 %v406_v25  ;;  %1149 = vmatpush1.bf16.msra.mxu0 %v7212_v26  ;;  %v7289_v25 = vld [vmem:[%s10575_s1 + $0x1c4] ss:$8 sps:$4 sm:$0xff]   ;;  %v7284_v26 = vld [vmem:[%s10575_s1 + $0xc0] ss:$8 sps:$4 sm:$0xff]  }
  0x49   : > { %1190 = vmatpush1.bf16.msra.mxu1 %v7215_v27  ;;  %1150 = vmatprep.subr.bf16.mxu0 %v7220_v28  ;;  %v7287_v27 = vld [vmem:[%s10575_s1 + $0x1c0] ss:$8 sps:$4 sm:$0xff]   ;;  %v7292_v28 = vld [vmem:[%s10575_s1 + $0xd4] ss:$8 sps:$4 sm:$0xff]  }
  0x4a   : > { %1191 = vmatprep.subr.bf16.mxu1 %v7223_v29  ;;  %1180 = vmatprep.mubr.bf16.mxu0 %v5855_v30  ;;  %v7295_v29 = vld [vmem:[%s10575_s1 + $0x1d4] ss:$8 sps:$4 sm:$0xff]   ;;  %v7290_v30 = vld [vmem:[%s10575_s1 + $0xd0] ss:$8 sps:$4 sm:$0xff]  }
  0x4b   : > { %1221 = vmatprep.mubr.bf16.mxu1 %v5857_v31  ;;  %v7293_v31 = vld [vmem:[%s10575_s1 + $0x1d0] ss:$8 sps:$4 sm:$0xff]  }
  0x4c   : > { %1151 = vmatpush1.bf16.msra.mxu0 %v7218_v32  ;;  %v7298_v32 = vld [vmem:[%s10575_s1 + $0xe4] ss:$8 sps:$4 sm:$0xff]  }
  0x4d   : > { %1192 = vmatpush1.bf16.msra.mxu1 %v7221_v33  ;;  %1152 = vmatprep.subr.bf16.mxu0 %v7226_v34  ;;  %v7301_v33 = vld [vmem:[%s10575_s1 + $0x1e4] ss:$8 sps:$4 sm:$0xff]   ;;  %v7296_v34 = vld [vmem:[%s10575_s1 + $0xe0] ss:$8 sps:$4 sm:$0xff]  }
  0x4e   : > { %1193 = vmatprep.subr.bf16.mxu1 %v7229_v35  ;;  %v7299_v35 = vld [vmem:[%s10575_s1 + $0x1e0] ss:$8 sps:$4 sm:$0xff]  }
  0x50   : > { %1153 = vmatpush1.bf16.msra.mxu0 %v7224_v36  ;;  %v7304_v36 = vld [vmem:[%s10575_s1 + $0xf4] ss:$8 sps:$4 sm:$0xff]  }
  0x51   : > { %1194 = vmatpush1.bf16.msra.mxu1 %v7227_v37  ;;  %1154 = vmatprep.subr.bf16.mxu0 %v7232_v38  ;;  %v7307_v37 = vld [vmem:[%s10575_s1 + $0x1f4] ss:$8 sps:$4 sm:$0xff]   ;;  %v7302_v38 = vld [vmem:[%s10575_s1 + $0xf0] ss:$8 sps:$4 sm:$0xff]  }
  0x52   : > { %1195 = vmatprep.subr.bf16.mxu1 %v7235_v39  ;;  %v7305_v39 = vld [vmem:[%s10575_s1 + $0x1f0] ss:$8 sps:$4 sm:$0xff]  }
  0x54   : > { %1155 = vmatpush1.bf16.msra.mxu0 %v7230_v40  ;;  %v7314_v40 = vld [vmem:[%s10575_s1 + $0x404] ss:$8 sps:$4 sm:$0xff]  }
  0x55   : > { %1196 = vmatpush1.bf16.msra.mxu1 %v7233_v41  ;;  %1156 = vmatprep.subr.bf16.mxu0 %v7238_v42  ;;  %v7317_v41 = vld [vmem:[%s10575_s1 + $0x504] ss:$8 sps:$4 sm:$0xff]   ;;  %v5854_v42 = vcombine.low %v8405_v48, %v8405_v48  ;;  %v7323_v48 = vld [vmem:[%s10575_s1 + $0x514] ss:$8 sps:$4 sm:$0xff]  }
  0x56   : > { %1197 = vmatprep.subr.bf16.mxu1 %v7241_v43  ;;  %v5856_v43 = vcombine.low %v8409_v50, %v8409_v50  ;;  %v1296_v50 = vrot.slane %v8416_v53, 1 }
  0x58   : > { %1157 = vmatpush1.bf16.msra.mxu0 %v7236_v44  ;;  %v7312_v44 = vld [vmem:[%s10575_s1 + $0x400] ss:$8 sps:$4 sm:$0xff]  }
  0x59   : > { %1198 = vmatpush1.bf16.msra.mxu1 %v7239_v45  ;;  %1158 = vmatprep.subr.bf16.mxu0 %v7244_v46  ;;  %v7315_v45 = vld [vmem:[%s10575_s1 + $0x500] ss:$8 sps:$4 sm:$0xff]   ;;  %v7320_v46 = vld [vmem:[%s10575_s1 + $0x414] ss:$8 sps:$4 sm:$0xff]  }
  0x5a   : > { %1199 = vmatprep.subr.bf16.mxu1 %v7247_v47  ;;  %v1298_v47 = vrot.slane %v8419_v54, 1 }
  0x5c   : > { %1159 = vmatpush1.bf16.msra.mxu0 %v7242_v49  ;;  %v7318_v49 = vld [vmem:[%s10575_s1 + $0x410] ss:$8 sps:$4 sm:$0xff]  }
  0x5d   : > { %1200 = vmatpush1.bf16.msra.mxu1 %v7245_v51  ;;  %1160 = vmatprep.subr.bf16.mxu0 %v7250_v52  ;;  %v7321_v51 = vld [vmem:[%s10575_s1 + $0x510] ss:$8 sps:$4 sm:$0xff]   ;;  %v7326_v52 = vld [vmem:[%s10575_s1 + $0x424] ss:$8 sps:$4 sm:$0xff]  }
  0x5e   : > { %1201 = vmatprep.subr.bf16.mxu1 %v7253_v55  ;;  %v7329_v55 = vld [vmem:[%s10575_s1 + $0x524] ss:$8 sps:$4 sm:$0xff]  }
  0x60   : > { %1161 = vmatpush1.bf16.msra.mxu0 %v7248_v60  ;;  %v7324_v60 = vld [vmem:[%s10575_s1 + $0x420] ss:$8 sps:$4 sm:$0xff]  }
  0x61   : > { %1202 = vmatpush1.bf16.msra.mxu1 %v7251_v61  ;;  %1162 = vmatprep.subr.bf16.mxu0 %v7256_v62  ;;  %v7327_v61 = vld [vmem:[%s10575_s1 + $0x520] ss:$8 sps:$4 sm:$0xff]   ;;  %v7332_v62 = vld [vmem:[%s10575_s1 + $0x434] ss:$8 sps:$4 sm:$0xff]  }
  0x62   : > { %1203 = vmatprep.subr.bf16.mxu1 %v7259_v63  ;;  %v7335_v63 = vld [vmem:[%s10575_s1 + $0x534] ss:$8 sps:$4 sm:$0xff]  }
  0x64   : > { %1163 = vmatpush1.bf16.msra.mxu0 %v7254_v0  ;;  %v7330_v0 = vld [vmem:[%s10575_s1 + $0x430] ss:$8 sps:$4 sm:$0xff]  }
  0x65   : > { %1204 = vmatpush1.bf16.msra.mxu1 %v7257_v1  ;;  %1164 = vmatprep.subr.bf16.mxu0 %v7262_v2  ;;  %v7333_v1 = vld [vmem:[%s10575_s1 + $0x530] ss:$8 sps:$4 sm:$0xff]   ;;  %v7338_v2 = vld [vmem:[%s10575_s1 + $0x444] ss:$8 sps:$4 sm:$0xff]  }
  0x66   : > { %1205 = vmatprep.subr.bf16.mxu1 %v7265_v3  ;;  %v7341_v3 = vld [vmem:[%s10575_s1 + $0x544] ss:$8 sps:$4 sm:$0xff]  }
  0x68   : > { %1165 = vmatpush1.bf16.msra.mxu0 %v7260_v4  ;;  %v7336_v4 = vld [vmem:[%s10575_s1 + $0x440] ss:$8 sps:$4 sm:$0xff]  }
  0x69   : > { %1206 = vmatpush1.bf16.msra.mxu1 %v7263_v5  ;;  %1166 = vmatprep.subr.bf16.mxu0 %v7268_v8  ;;  %v7339_v5 = vld [vmem:[%s10575_s1 + $0x540] ss:$8 sps:$4 sm:$0xff]   ;;  %v7344_v8 = vld [vmem:[%s10575_s1 + $0x454] ss:$8 sps:$4 sm:$0xff]  }
  0x6a   : > { %1207 = vmatprep.subr.bf16.mxu1 %v7271_v9  ;;  %v7347_v9 = vld [vmem:[%s10575_s1 + $0x554] ss:$8 sps:$4 sm:$0xff]  }
  0x6c   : > { %1167 = vmatpush1.bf16.msra.mxu0 %v7266_v10  ;;  %v7342_v10 = vld [vmem:[%s10575_s1 + $0x450] ss:$8 sps:$4 sm:$0xff]  }
  0x6d   : > { %1208 = vmatpush1.bf16.msra.mxu1 %v7269_v11  ;;  %1168 = vmatprep.subr.bf16.mxu0 %v7274_v14  ;;  %v7345_v11 = vld [vmem:[%s10575_s1 + $0x550] ss:$8 sps:$4 sm:$0xff]   ;;  %v7350_v14 = vld [vmem:[%s10575_s1 + $0x464] ss:$8 sps:$4 sm:$0xff]  }
  0x6e   : > { %1209 = vmatprep.subr.bf16.mxu1 %v7277_v15  ;;  %v7353_v15 = vld [vmem:[%s10575_s1 + $0x564] ss:$8 sps:$4 sm:$0xff]  }
  0x70   : > { %1169 = vmatpush1.bf16.msra.mxu0 %v7272_v16  ;;  %v7348_v16 = vld [vmem:[%s10575_s1 + $0x460] ss:$8 sps:$4 sm:$0xff]  }
  0x71   : > { %1210 = vmatpush1.bf16.msra.mxu1 %v7275_v17  ;;  %1170 = vmatprep.subr.bf16.mxu0 %v7280_v19  ;;  %v7351_v17 = vld [vmem:[%s10575_s1 + $0x560] ss:$8 sps:$4 sm:$0xff]   ;;  %v7356_v19 = vld [vmem:[%s10575_s1 + $0x474] ss:$8 sps:$4 sm:$0xff]  }
  0x72   : > { %1211 = vmatprep.subr.bf16.mxu1 %v7283_v21  ;;  %v7359_v21 = vld [vmem:[%s10575_s1 + $0x574] ss:$8 sps:$4 sm:$0xff]  }
  0x74   : > { %1171 = vmatpush1.bf16.msra.mxu0 %v7278_v22  ;;  %v7354_v22 = vld [vmem:[%s10575_s1 + $0x470] ss:$8 sps:$4 sm:$0xff]  }
  0x75   : > { %1212 = vmatpush1.bf16.msra.mxu1 %v7281_v23  ;;  %1172 = vmatprep.subr.bf16.mxu0 %v7286_v24  ;;  %v7357_v23 = vld [vmem:[%s10575_s1 + $0x570] ss:$8 sps:$4 sm:$0xff]   ;;  %v7362_v24 = vld [vmem:[%s10575_s1 + $0x484] ss:$8 sps:$4 sm:$0xff]  }
  0x76   : > { %1213 = vmatprep.subr.bf16.mxu1 %v7289_v25  ;;  %v7365_v25 = vld [vmem:[%s10575_s1 + $0x584] ss:$8 sps:$4 sm:$0xff]  }
  0x78   : > { %1173 = vmatpush1.bf16.msra.mxu0 %v7284_v26  ;;  %v7360_v26 = vld [vmem:[%s10575_s1 + $0x480] ss:$8 sps:$4 sm:$0xff]  }
  0x79   : > { %1214 = vmatpush1.bf16.msra.mxu1 %v7287_v27  ;;  %1174 = vmatprep.subr.bf16.mxu0 %v7292_v28  ;;  %v7363_v27 = vld [vmem:[%s10575_s1 + $0x580] ss:$8 sps:$4 sm:$0xff]   ;;  %v7368_v28 = vld [vmem:[%s10575_s1 + $0x494] ss:$8 sps:$4 sm:$0xff]  }
  0x7a   : > { %1215 = vmatprep.subr.bf16.mxu1 %v7295_v29  ;;  %v7371_v29 = vld [vmem:[%s10575_s1 + $0x594] ss:$8 sps:$4 sm:$0xff]  }
  0x7c   : > { %1175 = vmatpush1.bf16.msra.mxu0 %v7290_v30  ;;  %v7366_v30 = vld [vmem:[%s10575_s1 + $0x490] ss:$8 sps:$4 sm:$0xff]  }
  0x7d   : > { %1216 = vmatpush1.bf16.msra.mxu1 %v7293_v31  ;;  %1176 = vmatprep.subr.bf16.mxu0 %v7298_v32  ;;  %v7369_v31 = vld [vmem:[%s10575_s1 + $0x590] ss:$8 sps:$4 sm:$0xff]   ;;  %v7374_v32 = vld [vmem:[%s10575_s1 + $0x4a4] ss:$8 sps:$4 sm:$0xff]  }
  0x7e   : > { %1217 = vmatprep.subr.bf16.mxu1 %v7301_v33  ;;  %v7377_v33 = vld [vmem:[%s10575_s1 + $0x5a4] ss:$8 sps:$4 sm:$0xff]  }
  0x80   : > { %1177 = vmatpush1.bf16.msra.mxu0 %v7296_v34  ;;  %v7372_v34 = vld [vmem:[%s10575_s1 + $0x4a0] ss:$8 sps:$4 sm:$0xff]  }
  0x81   : > { %1218 = vmatpush1.bf16.msra.mxu1 %v7299_v35  ;;  %1178 = vmatprep.subr.bf16.mxu0 %v7304_v36  ;;  %v7375_v35 = vld [vmem:[%s10575_s1 + $0x5a0] ss:$8 sps:$4 sm:$0xff]   ;;  %v7380_v36 = vld [vmem:[%s10575_s1 + $0x4b4] ss:$8 sps:$4 sm:$0xff]  }
  0x82   : > { %1219 = vmatprep.subr.bf16.mxu1 %v7307_v37  ;;  %v7383_v37 = vld [vmem:[%s10575_s1 + $0x5b4] ss:$8 sps:$4 sm:$0xff]  }
  0x84   : > { %1179 = vmatpush1.bf16.msra.mxu0 %v7302_v38  ;;  %v7378_v38 = vld [vmem:[%s10575_s1 + $0x4b0] ss:$8 sps:$4 sm:$0xff]  }
  0x85   : > { %1220 = vmatpush1.bf16.msra.mxu1 %v7305_v39  ;;  %1623 = vmatprep.subr.bf16.mxu0 %v7314_v40  ;;  %v7381_v39 = vld [vmem:[%s10575_s1 + $0x5b0] ss:$8 sps:$4 sm:$0xff]   ;;  %v7386_v40 = vld [vmem:[%s10575_s1 + $0x4c4] ss:$8 sps:$4 sm:$0xff]  }
  0x86   : > { %1664 = vmatprep.subr.bf16.mxu1 %v7317_v41  ;;  %v7389_v41 = vld [vmem:[%s10575_s1 + $0x5c4] ss:$8 sps:$4 sm:$0xff]  }
  0x87   : > { %1181 = vmatmul.mubr.bf16.vlgmr.msra.gmra.mrb[4].mxu0 %v5854_v42  ;;  %v7384_v42 = vld [vmem:[%s10575_s1 + $0x4c0] ss:$8 sps:$4 sm:$0xff]  }
  0x88   : > { %1222 = vmatmul.mubr.bf16.vlgmr.msra.gmra.mrb[4].mxu1 %v5856_v43  ;;  %1624 = vmatpush1.bf16.msra.mxu0 %v7312_v44  ;;  %v7387_v43 = vld [vmem:[%s10575_s1 + $0x5c0] ss:$8 sps:$4 sm:$0xff]   ;;  %v7392_v44 = vld [vmem:[%s10575_s1 + $0x4d4] ss:$8 sps:$4 sm:$0xff]  }
  0x89   : > { %1665 = vmatpush1.bf16.msra.mxu1 %v7315_v45  ;;  %1625 = vmatprep.subr.bf16.mxu0 %v7320_v46  ;;  %v7395_v45 = vld [vmem:[%s10575_s1 + $0x5d4] ss:$8 sps:$4 sm:$0xff]   ;;  %v7390_v46 = vld [vmem:[%s10575_s1 + $0x4d0] ss:$8 sps:$4 sm:$0xff]  }
  0x8a   : > { %1666 = vmatprep.subr.bf16.mxu1 %v7323_v48  ;;  %1655 = vmatprep.mubr.bf16.mxu0 %v1296_v50  ;;  %v7393_v48 = vld [vmem:[%s10575_s1 + $0x5d0] ss:$8 sps:$4 sm:$0xff]   ;;  %v7398_v50 = vld [vmem:[%s10575_s1 + $0x4e4] ss:$8 sps:$4 sm:$0xff]  }
  0x8b   : > { %1696 = vmatprep.mubr.bf16.mxu1 %v1298_v47  ;;  %v7401_v47 = vld [vmem:[%s10575_s1 + $0x5e4] ss:$8 sps:$4 sm:$0xff]  }
  0x8c   : > { %1626 = vmatpush1.bf16.msra.mxu0 %v7318_v49  ;;  %v7396_v49 = vld [vmem:[%s10575_s1 + $0x4e0] ss:$8 sps:$4 sm:$0xff]  }
  0x8d   : > { %1667 = vmatpush1.bf16.msra.mxu1 %v7321_v51  ;;  %1627 = vmatprep.subr.bf16.mxu0 %v7326_v52  ;;  %v7399_v51 = vld [vmem:[%s10575_s1 + $0x5e0] ss:$8 sps:$4 sm:$0xff]   ;;  %v7404_v52 = vld [vmem:[%s10575_s1 + $0x4f4] ss:$8 sps:$4 sm:$0xff]  }
  0x8e   : > { %1668 = vmatprep.subr.bf16.mxu1 %v7329_v55  ;;  %v7407_v55 = vld [vmem:[%s10575_s1 + $0x5f4] ss:$8 sps:$4 sm:$0xff]  }
  0x90   : > { %1628 = vmatpush1.bf16.msra.mxu0 %v7324_v60  ;;  %v7402_v60 = vld [vmem:[%s10575_s1 + $0x4f0] ss:$8 sps:$4 sm:$0xff]  }
  0x91   : > { %1669 = vmatpush1.bf16.msra.mxu1 %v7327_v61  ;;  %1629 = vmatprep.subr.bf16.mxu0 %v7332_v62  ;;  %v7405_v61 = vld [vmem:[%s10575_s1 + $0x5f0] ss:$8 sps:$4 sm:$0xff]   ;;  %v7410_v62 = vld [vmem:[%s10575_s1 + $0x604] ss:$8 sps:$4 sm:$0xff]  }
  0x92   : > { %1670 = vmatprep.subr.bf16.mxu1 %v7335_v63  ;;  %v1295_v63 = vrot.slane %v8459_v6, 1 }
  0x94   : > { %1630 = vmatpush1.bf16.msra.mxu0 %v7330_v0  ;;  %v7413_v0 = vld [vmem:[%s10575_s1 + $0x704] ss:$8 sps:$4 sm:$0xff]  }
  0x95   : > { %1671 = vmatpush1.bf16.msra.mxu1 %v7333_v1  ;;  %1631 = vmatprep.subr.bf16.mxu0 %v7338_v2  ;;  %v1775_v1 = vrot.slane %v8425_v56, 1  ;;  %v1776_v2 = vrot.slane %v8428_v57, 2 }
  0x96   : > { %1672 = vmatprep.subr.bf16.mxu1 %v7341_v3  ;;  %v1781_v3 = vrot.slane %v8431_v58, 1 }
  0x98   : > { %1632 = vmatpush1.bf16.msra.mxu0 %v7336_v4  ;;  %v1782_v4 = vrot.slane %v8434_v59, 2 }
  0x99   : > { %1673 = vmatpush1.bf16.msra.mxu1 %v7339_v5  ;;  %1633 = vmatprep.subr.bf16.mxu0 %v7344_v8  ;;  %v1297_v5 = vrot.slane %v8462_v7, 1  ;;  %v7408_v8 = vld [vmem:[%s10575_s1 + $0x600] ss:$8 sps:$4 sm:$0xff]  }
  0x9a   : > { %1674 = vmatprep.subr.bf16.mxu1 %v7347_v9  ;;  %v7411_v9 = vld [vmem:[%s10575_s1 + $0x700] ss:$8 sps:$4 sm:$0xff]  }
  0x9c   : > { %1634 = vmatpush1.bf16.msra.mxu0 %v7342_v10  ;;  %v7416_v10 = vld [vmem:[%s10575_s1 + $0x614] ss:$8 sps:$4 sm:$0xff]  }
  0x9d   : > { %1675 = vmatpush1.bf16.msra.mxu1 %v7345_v11  ;;  %1635 = vmatprep.subr.bf16.mxu0 %v7350_v14  ;;  %v7419_v11 = vld [vmem:[%s10575_s1 + $0x714] ss:$8 sps:$4 sm:$0xff]   ;;  %v1777_v14 = vor.u32 %v1776_v2, %v1775_v1  ;;  %v7477_v1 = vld [vmem:[%s10575_s1 + $0x7b0] ss:$8 sps:$4 sm:$0xff]   ;;  %v7482_v2 = vld [vmem:[%s10575_s1 + $0x6c4] ss:$8 sps:$4 sm:$0xff]  }
  0x9e   : > { %1676 = vmatprep.subr.bf16.mxu1 %v7353_v15  ;;  %v1783_v15 = vor.u32 %v1782_v4, %v1781_v3  ;;  %v7485_v3 = vld [vmem:[%s10575_s1 + $0x7c4] ss:$8 sps:$4 sm:$0xff]   ;;  %v7480_v4 = vld [vmem:[%s10575_s1 + $0x6c0] ss:$8 sps:$4 sm:$0xff]  }
  0xa0   : > { %1636 = vmatpush1.bf16.msra.mxu0 %v7348_v16  ;;  %v7414_v16 = vld [vmem:[%s10575_s1 + $0x610] ss:$8 sps:$4 sm:$0xff]  }
  0xa1   : > { %1677 = vmatpush1.bf16.msra.mxu1 %v7351_v17  ;;  %1637 = vmatprep.subr.bf16.mxu0 %v7356_v19  ;;  %v7417_v17 = vld [vmem:[%s10575_s1 + $0x710] ss:$8 sps:$4 sm:$0xff]   ;;  %v7422_v19 = vld [vmem:[%s10575_s1 + $0x624] ss:$8 sps:$4 sm:$0xff]  }
  0xa2   : > { %1678 = vmatprep.subr.bf16.mxu1 %v7359_v21  ;;  %v7425_v21 = vld [vmem:[%s10575_s1 + $0x724] ss:$8 sps:$4 sm:$0xff]  }
  0xa4   : > { %1638 = vmatpush1.bf16.msra.mxu0 %v7354_v22  ;;  %v7420_v22 = vld [vmem:[%s10575_s1 + $0x620] ss:$8 sps:$4 sm:$0xff]  }
  0xa5   : > { %1679 = vmatpush1.bf16.msra.mxu1 %v7357_v23  ;;  %1639 = vmatprep.subr.bf16.mxu0 %v7362_v24  ;;  %v7423_v23 = vld [vmem:[%s10575_s1 + $0x720] ss:$8 sps:$4 sm:$0xff]   ;;  %v7428_v24 = vld [vmem:[%s10575_s1 + $0x634] ss:$8 sps:$4 sm:$0xff]  }
  0xa6   : > { %1680 = vmatprep.subr.bf16.mxu1 %v7365_v25  ;;  %v7431_v25 = vld [vmem:[%s10575_s1 + $0x734] ss:$8 sps:$4 sm:$0xff]  }
  0xa8   : > { %1640 = vmatpush1.bf16.msra.mxu0 %v7360_v26  ;;  %v7426_v26 = vld [vmem:[%s10575_s1 + $0x630] ss:$8 sps:$4 sm:$0xff]  }
  0xa9   : > { %1681 = vmatpush1.bf16.msra.mxu1 %v7363_v27  ;;  %1641 = vmatprep.subr.bf16.mxu0 %v7368_v28  ;;  %v7429_v27 = vld [vmem:[%s10575_s1 + $0x730] ss:$8 sps:$4 sm:$0xff]   ;;  %v7434_v28 = vld [vmem:[%s10575_s1 + $0x644] ss:$8 sps:$4 sm:$0xff]  }
  0xaa   : > { %1682 = vmatprep.subr.bf16.mxu1 %v7371_v29  ;;  %v7437_v29 = vld [vmem:[%s10575_s1 + $0x744] ss:$8 sps:$4 sm:$0xff]  }
  0xac   : > { %1642 = vmatpush1.bf16.msra.mxu0 %v7366_v30  ;;  %v7432_v30 = vld [vmem:[%s10575_s1 + $0x640] ss:$8 sps:$4 sm:$0xff]  }
  0xad   : > { %1683 = vmatpush1.bf16.msra.mxu1 %v7369_v31  ;;  %1643 = vmatprep.subr.bf16.mxu0 %v7374_v32  ;;  %v7435_v31 = vld [vmem:[%s10575_s1 + $0x740] ss:$8 sps:$4 sm:$0xff]   ;;  %v7440_v32 = vld [vmem:[%s10575_s1 + $0x654] ss:$8 sps:$4 sm:$0xff]  }
  0xae   : > { %1684 = vmatprep.subr.bf16.mxu1 %v7377_v33  ;;  %v7443_v33 = vld [vmem:[%s10575_s1 + $0x754] ss:$8 sps:$4 sm:$0xff]  }
  0xb0   : > { %1644 = vmatpush1.bf16.msra.mxu0 %v7372_v34  ;;  %v7438_v34 = vld [vmem:[%s10575_s1 + $0x650] ss:$8 sps:$4 sm:$0xff]  }
  0xb1   : > { %1685 = vmatpush1.bf16.msra.mxu1 %v7375_v35  ;;  %1645 = vmatprep.subr.bf16.mxu0 %v7380_v36  ;;  %v7441_v35 = vld [vmem:[%s10575_s1 + $0x750] ss:$8 sps:$4 sm:$0xff]   ;;  %v7446_v36 = vld [vmem:[%s10575_s1 + $0x664] ss:$8 sps:$4 sm:$0xff]  }
  0xb2   : > { %1686 = vmatprep.subr.bf16.mxu1 %v7383_v37  ;;  %v7449_v37 = vld [vmem:[%s10575_s1 + $0x764] ss:$8 sps:$4 sm:$0xff]  }
  0xb4   : > { %1646 = vmatpush1.bf16.msra.mxu0 %v7378_v38  ;;  %v7444_v38 = vld [vmem:[%s10575_s1 + $0x660] ss:$8 sps:$4 sm:$0xff]  }
  0xb5   : > { %1687 = vmatpush1.bf16.msra.mxu1 %v7381_v39  ;;  %1647 = vmatprep.subr.bf16.mxu0 %v7386_v40  ;;  %v7447_v39 = vld [vmem:[%s10575_s1 + $0x760] ss:$8 sps:$4 sm:$0xff]   ;;  %v7452_v40 = vld [vmem:[%s10575_s1 + $0x674] ss:$8 sps:$4 sm:$0xff]  }
  0xb6   : > { %1688 = vmatprep.subr.bf16.mxu1 %v7389_v41  ;;  %v7455_v41 = vld [vmem:[%s10575_s1 + $0x774] ss:$8 sps:$4 sm:$0xff]  }
  0xb8   : > { %1648 = vmatpush1.bf16.msra.mxu0 %v7384_v42  ;;  %v7450_v42 = vld [vmem:[%s10575_s1 + $0x670] ss:$8 sps:$4 sm:$0xff]  }
  0xb9   : > { %1689 = vmatpush1.bf16.msra.mxu1 %v7387_v43  ;;  %1649 = vmatprep.subr.bf16.mxu0 %v7392_v44  ;;  %v7453_v43 = vld [vmem:[%s10575_s1 + $0x770] ss:$8 sps:$4 sm:$0xff]   ;;  %v7458_v44 = vld [vmem:[%s10575_s1 + $0x684] ss:$8 sps:$4 sm:$0xff]  }
  0xba   : > { %1690 = vmatprep.subr.bf16.mxu1 %v7395_v45  ;;  %v7461_v45 = vld [vmem:[%s10575_s1 + $0x784] ss:$8 sps:$4 sm:$0xff]  }
  0xbc   : > { %1650 = vmatpush1.bf16.msra.mxu0 %v7390_v46  ;;  %v7456_v46 = vld [vmem:[%s10575_s1 + $0x680] ss:$8 sps:$4 sm:$0xff]  }
  0xbd   : > { %1691 = vmatpush1.bf16.msra.mxu1 %v7393_v48  ;;  %1651 = vmatprep.subr.bf16.mxu0 %v7398_v50  ;;  %v7459_v48 = vld [vmem:[%s10575_s1 + $0x780] ss:$8 sps:$4 sm:$0xff]   ;;  %v7464_v50 = vld [vmem:[%s10575_s1 + $0x694] ss:$8 sps:$4 sm:$0xff]  }
  0xbe   : > { %1692 = vmatprep.subr.bf16.mxu1 %v7401_v47  ;;  %v7467_v47 = vld [vmem:[%s10575_s1 + $0x794] ss:$8 sps:$4 sm:$0xff]  }
  0xc0   : > { %1652 = vmatpush1.bf16.msra.mxu0 %v7396_v49  ;;  %v7462_v49 = vld [vmem:[%s10575_s1 + $0x690] ss:$8 sps:$4 sm:$0xff]  }
  0xc1   : > { %1693 = vmatpush1.bf16.msra.mxu1 %v7399_v51  ;;  %1653 = vmatprep.subr.bf16.mxu0 %v7404_v52  ;;  %v7465_v51 = vld [vmem:[%s10575_s1 + $0x790] ss:$8 sps:$4 sm:$0xff]   ;;  %v7470_v52 = vld [vmem:[%s10575_s1 + $0x6a4] ss:$8 sps:$4 sm:$0xff]  }
  0xc2   : > { %1694 = vmatprep.subr.bf16.mxu1 %v7407_v55  ;;  %v7473_v55 = vld [vmem:[%s10575_s1 + $0x7a4] ss:$8 sps:$4 sm:$0xff]  }
  0xc4   : > { %1654 = vmatpush1.bf16.msra.mxu0 %v7402_v60  ;;  %v7468_v60 = vld [vmem:[%s10575_s1 + $0x6a0] ss:$8 sps:$4 sm:$0xff]  }
  0xc5   : > { %1695 = vmatpush1.bf16.msra.mxu1 %v7405_v61  ;;  %2108 = vmatprep.subr.bf16.mxu0 %v7410_v62  ;;  %v7471_v61 = vld [vmem:[%s10575_s1 + $0x7a0] ss:$8 sps:$4 sm:$0xff]   ;;  %v7476_v62 = vld [vmem:[%s10575_s1 + $0x6b4] ss:$8 sps:$4 sm:$0xff]  }
  0xc6   : > { %2149 = vmatprep.subr.bf16.mxu1 %v7413_v0  ;;  %v7474_v0 = vld [vmem:[%s10575_s1 + $0x6b0] ss:$8 sps:$4 sm:$0xff]  }
  0xc7   : > { %1656 = vmatmul.mubr.bf16.vlgmr.msra.gmra.mrb[8].mxu0 %v1295_v63  ;;  %v7479_v63 = vld [vmem:[%s10575_s1 + $0x7b4] ss:$8 sps:$4 sm:$0xff]  }
  0xc8   : > { %1697 = vmatmul.mubr.bf16.vlgmr.msra.gmra.mrb[8].mxu1 %v1297_v5  ;;  %2109 = vmatpush1.bf16.msra.mxu0 %v7408_v8  ;;  %v7483_v5 = vld [vmem:[%s10575_s1 + $0x7c0] ss:$8 sps:$4 sm:$0xff]   ;;  %v7488_v8 = vld [vmem:[%s10575_s1 + $0x6d4] ss:$8 sps:$4 sm:$0xff]  }
  0xc9   : > { %2150 = vmatpush1.bf16.msra.mxu1 %v7411_v9  ;;  %2110 = vmatprep.subr.bf16.mxu0 %v7416_v10  ;;  %v7491_v9 = vld [vmem:[%s10575_s1 + $0x7d4] ss:$8 sps:$4 sm:$0xff]   ;;  %v7486_v10 = vld [vmem:[%s10575_s1 + $0x6d0] ss:$8 sps:$4 sm:$0xff]  }
  0xca   : > { %2151 = vmatprep.subr.bf16.mxu1 %v7419_v11  ;;  %2140 = vmatprep.mubr.bf16.mxu0 %v1777_v14  ;;  %v7489_v11 = vld [vmem:[%s10575_s1 + $0x7d0] ss:$8 sps:$4 sm:$0xff]   ;;  %v7494_v14 = vld [vmem:[%s10575_s1 + $0x6e4] ss:$8 sps:$4 sm:$0xff]  }
  0xcb   : > { %2181 = vmatprep.mubr.bf16.mxu1 %v1783_v15  ;;  %v7497_v15 = vld [vmem:[%s10575_s1 + $0x7e4] ss:$8 sps:$4 sm:$0xff]  }
  0xcc   : > { %2111 = vmatpush1.bf16.msra.mxu0 %v7414_v16  ;;  %v7492_v16 = vld [vmem:[%s10575_s1 + $0x6e0] ss:$8 sps:$4 sm:$0xff]  }
  0xcd   : > { %2152 = vmatpush1.bf16.msra.mxu1 %v7417_v17  ;;  %2112 = vmatprep.subr.bf16.mxu0 %v7422_v19  ;;  %v7495_v17 = vld [vmem:[%s10575_s1 + $0x7e0] ss:$8 sps:$4 sm:$0xff]   ;;  %v7500_v19 = vld [vmem:[%s10575_s1 + $0x6f4] ss:$8 sps:$4 sm:$0xff]  }
  0xce   : > { %2153 = vmatprep.subr.bf16.mxu1 %v7425_v21  ;;  %v7503_v21 = vld [vmem:[%s10575_s1 + $0x7f4] ss:$8 sps:$4 sm:$0xff]  }
  0xd0   : > { %2113 = vmatpush1.bf16.msra.mxu0 %v7420_v22  ;;  %v1772_v22 = vrot.slane %v8495_v18, 1 }
  0xd1   : > { %2154 = vmatpush1.bf16.msra.mxu1 %v7423_v23  ;;  %2114 = vmatprep.subr.bf16.mxu0 %v7428_v24  ;;  %v1773_v23 = vrot.slane %v8477_v12, 2  ;;  %v1778_v24 = vrot.slane %v8499_v20, 1 }
  0xd2   : > { %2155 = vmatprep.subr.bf16.mxu1 %v7431_v25  ;;  %v7498_v25 = vld [vmem:[%s10575_s1 + $0x6f0] ss:$8 sps:$4 sm:$0xff]  }
  0xd4   : > { %2115 = vmatpush1.bf16.msra.mxu0 %v7426_v26  ;;  %v7501_v26 = vld [vmem:[%s10575_s1 + $0x7f0] ss:$8 sps:$4 sm:$0xff]  }
  0xd5   : > { %2156 = vmatpush1.bf16.msra.mxu1 %v7429_v27  ;;  %2116 = vmatprep.subr.bf16.mxu0 %v7434_v28  ;;  %v1779_v27 = vrot.slane %v8480_v13, 2  ;;  %v7506_v28 = vld [vmem:[%s10575_s1 + $0x804] ss:$8 sps:$4 sm:$0xff]  }
  0xd6   : > { %2157 = vmatprep.subr.bf16.mxu1 %v7437_v29  ;;  %v7509_v29 = vld [vmem:[%s10575_s1 + $0x904] ss:$8 sps:$4 sm:$0xff]  }
  0xd8   : > { %2117 = vmatpush1.bf16.msra.mxu0 %v7432_v30  ;;  %v1774_v30 = vor.u32 %v1773_v23, %v1772_v22  ;;  %v7554_v22 = vld [vmem:[%s10575_s1 + $0x884] ss:$8 sps:$4 sm:$0xff]  }
  0xd9   : > { %2158 = vmatpush1.bf16.msra.mxu1 %v7435_v31  ;;  %2118 = vmatprep.subr.bf16.mxu0 %v7440_v32  ;;  %v1780_v31 = vor.u32 %v1779_v27, %v1778_v24  ;;  %v7504_v32 = vld [vmem:[%s10575_s1 + $0x800] ss:$8 sps:$4 sm:$0xff]   ;;  %v7557_v23 = vld [vmem:[%s10575_s1 + $0x984] ss:$8 sps:$4 sm:$0xff]   ;;  %v7563_v27 = vld [vmem:[%s10575_s1 + $0x994] ss:$8 sps:$4 sm:$0xff]  }
  0xda   : > { %2159 = vmatprep.subr.bf16.mxu1 %v7443_v33  ;;  %v7507_v33 = vld [vmem:[%s10575_s1 + $0x900] ss:$8 sps:$4 sm:$0xff]  }
  0xdb   : > { %v7552_v24 = vld [vmem:[%s10575_s1 + $0x880] ss:$8 sps:$4 sm:$0xff]  }
  0xdc   : > { %2119 = vmatpush1.bf16.msra.mxu0 %v7438_v34  ;;  %v7512_v34 = vld [vmem:[%s10575_s1 + $0x814] ss:$8 sps:$4 sm:$0xff]  }
  0xdd   : > { %2160 = vmatpush1.bf16.msra.mxu1 %v7441_v35  ;;  %2120 = vmatprep.subr.bf16.mxu0 %v7446_v36  ;;  %v7515_v35 = vld [vmem:[%s10575_s1 + $0x914] ss:$8 sps:$4 sm:$0xff]   ;;  %v2258_v36 = vrot.slane %v8416_v53, 2 }
  0xde   : > { %2161 = vmatprep.subr.bf16.mxu1 %v7449_v37  ;;  %v2260_v37 = vrot.slane %v8419_v54, 2 }
  0xe0   : > { %2121 = vmatpush1.bf16.msra.mxu0 %v7444_v38  ;;  %v7510_v38 = vld [vmem:[%s10575_s1 + $0x810] ss:$8 sps:$4 sm:$0xff]  }
  0xe1   : > { %2162 = vmatpush1.bf16.msra.mxu1 %v7447_v39  ;;  %2122 = vmatprep.subr.bf16.mxu0 %v7452_v40  ;;  %v7513_v39 = vld [vmem:[%s10575_s1 + $0x910] ss:$8 sps:$4 sm:$0xff]   ;;  %v7518_v40 = vld [vmem:[%s10575_s1 + $0x824] ss:$8 sps:$4 sm:$0xff]  }
  0xe2   : > { %2163 = vmatprep.subr.bf16.mxu1 %v7455_v41  ;;  %v7521_v41 = vld [vmem:[%s10575_s1 + $0x924] ss:$8 sps:$4 sm:$0xff]  }
  0xe4   : > { %2123 = vmatpush1.bf16.msra.mxu0 %v7450_v42  ;;  %v7516_v42 = vld [vmem:[%s10575_s1 + $0x820] ss:$8 sps:$4 sm:$0xff]  }
  0xe5   : > { %2164 = vmatpush1.bf16.msra.mxu1 %v7453_v43  ;;  %2124 = vmatprep.subr.bf16.mxu0 %v7458_v44  ;;  %v7519_v43 = vld [vmem:[%s10575_s1 + $0x920] ss:$8 sps:$4 sm:$0xff]   ;;  %v7524_v44 = vld [vmem:[%s10575_s1 + $0x834] ss:$8 sps:$4 sm:$0xff]  }
  0xe6   : > { %2165 = vmatprep.subr.bf16.mxu1 %v7461_v45  ;;  %v7527_v45 = vld [vmem:[%s10575_s1 + $0x934] ss:$8 sps:$4 sm:$0xff]  }
  0xe8   : > { %2125 = vmatpush1.bf16.msra.mxu0 %v7456_v46  ;;  %v7522_v46 = vld [vmem:[%s10575_s1 + $0x830] ss:$8 sps:$4 sm:$0xff]  }
  0xe9   : > { %2166 = vmatpush1.bf16.msra.mxu1 %v7459_v48  ;;  %2126 = vmatprep.subr.bf16.mxu0 %v7464_v50  ;;  %v7525_v48 = vld [vmem:[%s10575_s1 + $0x930] ss:$8 sps:$4 sm:$0xff]   ;;  %v7530_v50 = vld [vmem:[%s10575_s1 + $0x844] ss:$8 sps:$4 sm:$0xff]  }
  0xea   : > { %2167 = vmatprep.subr.bf16.mxu1 %v7467_v47  ;;  %v7533_v47 = vld [vmem:[%s10575_s1 + $0x944] ss:$8 sps:$4 sm:$0xff]  }
  0xec   : > { %2127 = vmatpush1.bf16.msra.mxu0 %v7462_v49  ;;  %v7528_v49 = vld [vmem:[%s10575_s1 + $0x840] ss:$8 sps:$4 sm:$0xff]  }
  0xed   : > { %2168 = vmatpush1.bf16.msra.mxu1 %v7465_v51  ;;  %2128 = vmatprep.subr.bf16.mxu0 %v7470_v52  ;;  %v7531_v51 = vld [vmem:[%s10575_s1 + $0x940] ss:$8 sps:$4 sm:$0xff]   ;;  %v7536_v52 = vld [vmem:[%s10575_s1 + $0x854] ss:$8 sps:$4 sm:$0xff]  }
  0xee   : > { %2169 = vmatprep.subr.bf16.mxu1 %v7473_v55  ;;  %v7539_v55 = vld [vmem:[%s10575_s1 + $0x954] ss:$8 sps:$4 sm:$0xff]  }
  0xf0   : > { %2129 = vmatpush1.bf16.msra.mxu0 %v7468_v60  ;;  %v7534_v60 = vld [vmem:[%s10575_s1 + $0x850] ss:$8 sps:$4 sm:$0xff]  }
  0xf1   : > { %2170 = vmatpush1.bf16.msra.mxu1 %v7471_v61  ;;  %2130 = vmatprep.subr.bf16.mxu0 %v7476_v62  ;;  %v7537_v61 = vld [vmem:[%s10575_s1 + $0x950] ss:$8 sps:$4 sm:$0xff]   ;;  %v7542_v62 = vld [vmem:[%s10575_s1 + $0x864] ss:$8 sps:$4 sm:$0xff]  }
  0xf2   : > { %2171 = vmatprep.subr.bf16.mxu1 %v7479_v63  ;;  %v7545_v63 = vld [vmem:[%s10575_s1 + $0x964] ss:$8 sps:$4 sm:$0xff]  }
  0xf4   : > { %2131 = vmatpush1.bf16.msra.mxu0 %v7474_v0 }
  0xf5   : > { %2172 = vmatpush1.bf16.msra.mxu1 %v7477_v1  ;;  %2132 = vmatprep.subr.bf16.mxu0 %v7482_v2  ;;  %v7540_v2 = vld [vmem:[%s10575_s1 + $0x860] ss:$8 sps:$4 sm:$0xff]  }
  0xf6   : > { %2173 = vmatprep.subr.bf16.mxu1 %v7485_v3  ;;  %v7543_v3 = vld [vmem:[%s10575_s1 + $0x960] ss:$8 sps:$4 sm:$0xff]  }
  0xf8   : > { %2133 = vmatpush1.bf16.msra.mxu0 %v7480_v4 }
  0xf9   : > { %2174 = vmatpush1.bf16.msra.mxu1 %v7483_v5  ;;  %2134 = vmatprep.subr.bf16.mxu0 %v7488_v8 }
  0xfa   : > { %2175 = vmatprep.subr.bf16.mxu1 %v7491_v9 }
  0xfc   : > { %2135 = vmatpush1.bf16.msra.mxu0 %v7486_v10 }
  0xfd   : > { %2176 = vmatpush1.bf16.msra.mxu1 %v7489_v11  ;;  %2136 = vmatprep.subr.bf16.mxu0 %v7494_v14 }
  0xfe   : > { %2177 = vmatprep.subr.bf16.mxu1 %v7497_v15 }
 0x100   : > { %2137 = vmatpush1.bf16.msra.mxu0 %v7492_v16  ;;  %v7548_v16 = vld [vmem:[%s10575_s1 + $0x874] ss:$8 sps:$4 sm:$0xff]  }
 0x101   : > { %2178 = vmatpush1.bf16.msra.mxu1 %v7495_v17  ;;  %2138 = vmatprep.subr.bf16.mxu0 %v7500_v19  ;;  %v7551_v17 = vld [vmem:[%s10575_s1 + $0x974] ss:$8 sps:$4 sm:$0xff]   ;;  %v7546_v19 = vld [vmem:[%s10575_s1 + $0x870] ss:$8 sps:$4 sm:$0xff]  }
 0x102   : > { %2179 = vmatprep.subr.bf16.mxu1 %v7503_v21  ;;  %v7549_v21 = vld [vmem:[%s10575_s1 + $0x970] ss:$8 sps:$4 sm:$0xff]  }
 0x104   : > { %2139 = vmatpush1.bf16.msra.mxu0 %v7498_v25  ;;  %v7555_v25 = vld [vmem:[%s10575_s1 + $0x980] ss:$8 sps:$4 sm:$0xff]  }
 0x105   : > { %2180 = vmatpush1.bf16.msra.mxu1 %v7501_v26  ;;  %2585 = vmatprep.subr.bf16.mxu0 %v7506_v28  ;;  %v7560_v26 = vld [vmem:[%s10575_s1 + $0x894] ss:$8 sps:$4 sm:$0xff]   ;;  %v7558_v28 = vld [vmem:[%s10575_s1 + $0x890] ss:$8 sps:$4 sm:$0xff]  }
 0x106   : > { %2626 = vmatprep.subr.bf16.mxu1 %v7509_v29  ;;  %v7561_v29 = vld [vmem:[%s10575_s1 + $0x990] ss:$8 sps:$4 sm:$0xff]  }
 0x107   : > { %2141 = vmatmul.mubr.bf16.vlgmr.msra.gmra.mrb[12].mxu0 %v1774_v30  ;;  %v7566_v30 = vld [vmem:[%s10575_s1 + $0x8a4] ss:$8 sps:$4 sm:$0xff]  }
 0x108   : > { %2182 = vmatmul.mubr.bf16.vlgmr.msra.gmra.mrb[12].mxu1 %v1780_v31  ;;  %2586 = vmatpush1.bf16.msra.mxu0 %v7504_v32  ;;  %v7569_v31 = vld [vmem:[%s10575_s1 + $0x9a4] ss:$8 sps:$4 sm:$0xff]   ;;  %v7564_v32 = vld [vmem:[%s10575_s1 + $0x8a0] ss:$8 sps:$4 sm:$0xff]  }
 0x109   : > { %2627 = vmatpush1.bf16.msra.mxu1 %v7507_v33  ;;  %2587 = vmatprep.subr.bf16.mxu0 %v7512_v34  ;;  %v7567_v33 = vld [vmem:[%s10575_s1 + $0x9a0] ss:$8 sps:$4 sm:$0xff]   ;;  %v7572_v34 = vld [vmem:[%s10575_s1 + $0x8b4] ss:$8 sps:$4 sm:$0xff]  }
 0x10a   : > { %2628 = vmatprep.subr.bf16.mxu1 %v7515_v35  ;;  %2617 = vmatprep.mubr.bf16.mxu0 %v2258_v36  ;;  %v7575_v35 = vld [vmem:[%s10575_s1 + $0x9b4] ss:$8 sps:$4 sm:$0xff]   ;;  %v7570_v36 = vld [vmem:[%s10575_s1 + $0x8b0] ss:$8 sps:$4 sm:$0xff]  }
 0x10b   : > { %2658 = vmatprep.mubr.bf16.mxu1 %v2260_v37  ;;  %v7573_v37 = vld [vmem:[%s10575_s1 + $0x9b0] ss:$8 sps:$4 sm:$0xff]  }
 0x10c   : > { %2588 = vmatpush1.bf16.msra.mxu0 %v7510_v38  ;;  %v7578_v38 = vld [vmem:[%s10575_s1 + $0x8c4] ss:$8 sps:$4 sm:$0xff]  }
 0x10d   : > { %2629 = vmatpush1.bf16.msra.mxu1 %v7513_v39  ;;  %2589 = vmatprep.subr.bf16.mxu0 %v7518_v40  ;;  %v7581_v39 = vld [vmem:[%s10575_s1 + $0x9c4] ss:$8 sps:$4 sm:$0xff]   ;;  %v7576_v40 = vld [vmem:[%s10575_s1 + $0x8c0] ss:$8 sps:$4 sm:$0xff]  }
 0x10e   : > { %2630 = vmatprep.subr.bf16.mxu1 %v7521_v41  ;;  %v7579_v41 = vld [vmem:[%s10575_s1 + $0x9c0] ss:$8 sps:$4 sm:$0xff]  }
 0x110   : > { %2590 = vmatpush1.bf16.msra.mxu0 %v7516_v42  ;;  %v7584_v42 = vld [vmem:[%s10575_s1 + $0x8d4] ss:$8 sps:$4 sm:$0xff]  }
 0x111   : > { %2631 = vmatpush1.bf16.msra.mxu1 %v7519_v43  ;;  %2591 = vmatprep.subr.bf16.mxu0 %v7524_v44  ;;  %v7587_v43 = vld [vmem:[%s10575_s1 + $0x9d4] ss:$8 sps:$4 sm:$0xff]   ;;  %v7582_v44 = vld [vmem:[%s10575_s1 + $0x8d0] ss:$8 sps:$4 sm:$0xff]  }
 0x112   : > { %2632 = vmatprep.subr.bf16.mxu1 %v7527_v45  ;;  %v7585_v45 = vld [vmem:[%s10575_s1 + $0x9d0] ss:$8 sps:$4 sm:$0xff]  }
 0x114   : > { %2592 = vmatpush1.bf16.msra.mxu0 %v7522_v46  ;;  %v7590_v46 = vld [vmem:[%s10575_s1 + $0x8e4] ss:$8 sps:$4 sm:$0xff]  }
 0x115   : > { %2633 = vmatpush1.bf16.msra.mxu1 %v7525_v48  ;;  %2593 = vmatprep.subr.bf16.mxu0 %v7530_v50  ;;  %v7593_v48 = vld [vmem:[%s10575_s1 + $0x9e4] ss:$8 sps:$4 sm:$0xff]   ;;  %v7588_v50 = vld [vmem:[%s10575_s1 + $0x8e0] ss:$8 sps:$4 sm:$0xff]  }
 0x116   : > { %2634 = vmatprep.subr.bf16.mxu1 %v7533_v47  ;;  %v7591_v47 = vld [vmem:[%s10575_s1 + $0x9e0] ss:$8 sps:$4 sm:$0xff]  }
 0x118   : > { %2594 = vmatpush1.bf16.msra.mxu0 %v7528_v49  ;;  %v7596_v49 = vld [vmem:[%s10575_s1 + $0x8f4] ss:$8 sps:$4 sm:$0xff]  }
 0x119   : > { %2635 = vmatpush1.bf16.msra.mxu1 %v7531_v51  ;;  %2595 = vmatprep.subr.bf16.mxu0 %v7536_v52  ;;  %v7599_v51 = vld [vmem:[%s10575_s1 + $0x9f4] ss:$8 sps:$4 sm:$0xff]   ;;  %v7594_v52 = vld [vmem:[%s10575_s1 + $0x8f0] ss:$8 sps:$4 sm:$0xff]  }
 0x11a   : > { %2636 = vmatprep.subr.bf16.mxu1 %v7539_v55  ;;  %v772_v0 = vpop.f32.mrb[0].mxu0  ;;  %v7597_v55 = vld [vmem:[%s10575_s1 + $0x9f0] ss:$8 sps:$4 sm:$0xff]  }
 0x11b   : > { %v813_v1 = vpop.f32.mrb[0].mxu1  ;;  %v774_v5 = vpop.f32.mrb[1].mxu0 }
 0x11c   : > { %v9186_v4 = vadd.f32 %v813_v1, %v772_v0  ;;  %v815_v8 = vpop.f32.mrb[1].mxu1  ;;  %v776_v10 = vpop.f32.mrb[2].mxu0  ;;  %2596 = vmatpush1.bf16.msra.mxu0 %v7534_v60  ;;  %v7602_v60 = vld [vmem:[%s10575_s1 + $0xa04] ss:$8 sps:$4 sm:$0xff]   ;;  %v7603_v0 = vld [vmem:[%s10575_s1 + $0xb00] ss:$8 sps:$4 sm:$0xff]  }
 0x11d   : > { %v9188_v9 = vadd.f32 %v815_v8, %v774_v5  ;;  %v817_v11 = vpop.f32.mrb[2].mxu1  ;;  %2637 = vmatpush1.bf16.msra.mxu1 %v7537_v61  ;;  %v777_v14 = vpop.f32.mrb[3].mxu0  ;;  %2597 = vmatprep.subr.bf16.mxu0 %v7542_v62  ;;  %v7605_v61 = vld [vmem:[%s10575_s1 + $0xb04] ss:$8 sps:$4 sm:$0xff]   ;;  %v2737_v62 = vrot.slane %v8425_v56, 2  ;;  %v2738_v1 = vrot.slane %v8428_v57, 3 }
 0x11e   : > { %v818_v15 = vpop.f32.mrb[3].mxu1  ;;  %2638 = vmatprep.subr.bf16.mxu1 %v7545_v63  ;;  %v7600_v63 = vld [vmem:[%s10575_s1 + $0xa00] ss:$8 sps:$4 sm:$0xff]   ;;  %v2257_v5 = vrot.slane %v8459_v6, 2  ;;  %v2259_v8 = vrot.slane %v8462_v7, 2 }
 0x11f   : > { %v7608_v10 = vld [vmem:[%s10575_s1 + $0xa14] ss:$8 sps:$4 sm:$0xff]   ;;  %v2739_v14 = vor.u32 %v2738_v1, %v2737_v62  ;;  %v7648_v62 = vld [vmem:[%s10575_s1 + $0xa80] ss:$8 sps:$4 sm:$0xff]  }
 0x120   : > { %2598 = vmatpush1.bf16.msra.mxu0 %v7540_v2  ;;  %v2743_v2 = vrot.slane %v8431_v58, 2  ;;  %v7611_v11 = vld [vmem:[%s10575_s1 + $0xb14] ss:$8 sps:$4 sm:$0xff]  }
 0x121   : > { %2639 = vmatpush1.bf16.msra.mxu1 %v7543_v3  ;;  %2599 = vmatprep.subr.bf16.mxu0 %v7548_v16  ;;  %v2744_v3 = vrot.slane %v8434_v59, 3  ;;  %v7606_v16 = vld [vmem:[%s10575_s1 + $0xa10] ss:$8 sps:$4 sm:$0xff]   ;;  %v7659_v1 = vld [vmem:[%s10575_s1 + $0xb94] ss:$8 sps:$4 sm:$0xff]  }
 0x122   : > { %2640 = vmatprep.subr.bf16.mxu1 %v7551_v17  ;;  %v7609_v17 = vld [vmem:[%s10575_s1 + $0xb10] ss:$8 sps:$4 sm:$0xff]  }
 0x123   : > { %v2745_v15 = vor.u32 %v2744_v3, %v2743_v2  ;;  %v7654_v2 = vld [vmem:[%s10575_s1 + $0xa90] ss:$8 sps:$4 sm:$0xff]  }
 0x124   : > { %2600 = vmatpush1.bf16.msra.mxu0 %v7546_v19  ;;  %v7614_v19 = vld [vmem:[%s10575_s1 + $0xa24] ss:$8 sps:$4 sm:$0xff]   ;;  %v7657_v3 = vld [vmem:[%s10575_s1 + $0xb90] ss:$8 sps:$4 sm:$0xff]  }
 0x125   : > { %2641 = vmatpush1.bf16.msra.mxu1 %v7549_v21  ;;  %2601 = vmatprep.subr.bf16.mxu0 %v7554_v22  ;;  %v7617_v21 = vld [vmem:[%s10575_s1 + $0xb24] ss:$8 sps:$4 sm:$0xff]   ;;  %v7612_v22 = vld [vmem:[%s10575_s1 + $0xa20] ss:$8 sps:$4 sm:$0xff]  }
 0x126   : > { %2642 = vmatprep.subr.bf16.mxu1 %v7557_v23  ;;  %v7615_v23 = vld [vmem:[%s10575_s1 + $0xb20] ss:$8 sps:$4 sm:$0xff]  }
 0x128   : > { %2602 = vmatpush1.bf16.msra.mxu0 %v7552_v24  ;;  %v7620_v24 = vld [vmem:[%s10575_s1 + $0xa34] ss:$8 sps:$4 sm:$0xff]  }
 0x129   : > { %2643 = vmatpush1.bf16.msra.mxu1 %v7555_v25  ;;  %2603 = vmatprep.subr.bf16.mxu0 %v7560_v26  ;;  %v7623_v25 = vld [vmem:[%s10575_s1 + $0xb34] ss:$8 sps:$4 sm:$0xff]   ;;  %v7618_v26 = vld [vmem:[%s10575_s1 + $0xa30] ss:$8 sps:$4 sm:$0xff]  }
 0x12a   : > { %2644 = vmatprep.subr.bf16.mxu1 %v7563_v27  ;;  %v7621_v27 = vld [vmem:[%s10575_s1 + $0xb30] ss:$8 sps:$4 sm:$0xff]  }
 0x12c   : > { %2604 = vmatpush1.bf16.msra.mxu0 %v7558_v28  ;;  %v7626_v28 = vld [vmem:[%s10575_s1 + $0xa44] ss:$8 sps:$4 sm:$0xff]  }
 0x12d   : > { %2645 = vmatpush1.bf16.msra.mxu1 %v7561_v29  ;;  %2605 = vmatprep.subr.bf16.mxu0 %v7566_v30  ;;  %v7629_v29 = vld [vmem:[%s10575_s1 + $0xb44] ss:$8 sps:$4 sm:$0xff]   ;;  %v7624_v30 = vld [vmem:[%s10575_s1 + $0xa40] ss:$8 sps:$4 sm:$0xff]  }
 0x12e   : > { %2646 = vmatprep.subr.bf16.mxu1 %v7569_v31  ;;  %v7627_v31 = vld [vmem:[%s10575_s1 + $0xb40] ss:$8 sps:$4 sm:$0xff]  }
 0x130   : > { %2606 = vmatpush1.bf16.msra.mxu0 %v7564_v32  ;;  %v7632_v32 = vld [vmem:[%s10575_s1 + $0xa54] ss:$8 sps:$4 sm:$0xff]  }
 0x131   : > { %2647 = vmatpush1.bf16.msra.mxu1 %v7567_v33  ;;  %2607 = vmatprep.subr.bf16.mxu0 %v7572_v34  ;;  %v7635_v33 = vld [vmem:[%s10575_s1 + $0xb54] ss:$8 sps:$4 sm:$0xff]   ;;  %v7630_v34 = vld [vmem:[%s10575_s1 + $0xa50] ss:$8 sps:$4 sm:$0xff]  }
 0x132   : > { %2648 = vmatprep.subr.bf16.mxu1 %v7575_v35  ;;  %v7633_v35 = vld [vmem:[%s10575_s1 + $0xb50] ss:$8 sps:$4 sm:$0xff]  }
 0x134   : > { %2608 = vmatpush1.bf16.msra.mxu0 %v7570_v36  ;;  %v7638_v36 = vld [vmem:[%s10575_s1 + $0xa64] ss:$8 sps:$4 sm:$0xff]  }
 0x135   : > { %2649 = vmatpush1.bf16.msra.mxu1 %v7573_v37  ;;  %2609 = vmatprep.subr.bf16.mxu0 %v7578_v38  ;;  %v7641_v37 = vld [vmem:[%s10575_s1 + $0xb64] ss:$8 sps:$4 sm:$0xff]  }
 0x136   : > { %2650 = vmatprep.subr.bf16.mxu1 %v7581_v39 }
 0x138   : > { %2610 = vmatpush1.bf16.msra.mxu0 %v7576_v40  ;;  %v7636_v40 = vld [vmem:[%s10575_s1 + $0xa60] ss:$8 sps:$4 sm:$0xff]  }
 0x139   : > { %2651 = vmatpush1.bf16.msra.mxu1 %v7579_v41  ;;  %2611 = vmatprep.subr.bf16.mxu0 %v7584_v42  ;;  %v7639_v41 = vld [vmem:[%s10575_s1 + $0xb60] ss:$8 sps:$4 sm:$0xff]  }
 0x13a   : > { %2652 = vmatprep.subr.bf16.mxu1 %v7587_v43 }
 0x13c   : > { %2612 = vmatpush1.bf16.msra.mxu0 %v7582_v44 }
 0x13d   : > { %2653 = vmatpush1.bf16.msra.mxu1 %v7585_v45  ;;  %2613 = vmatprep.subr.bf16.mxu0 %v7590_v46 }
 0x13e   : > { %2654 = vmatprep.subr.bf16.mxu1 %v7593_v48 }
 0x140   : > { %2614 = vmatpush1.bf16.msra.mxu0 %v7588_v50 }
 0x141   : > { %2655 = vmatpush1.bf16.msra.mxu1 %v7591_v47  ;;  %2615 = vmatprep.subr.bf16.mxu0 %v7596_v49 }
 0x142   : > { %2656 = vmatprep.subr.bf16.mxu1 %v7599_v51  ;;  %v7644_v51 = vld [vmem:[%s10575_s1 + $0xa74] ss:$8 sps:$4 sm:$0xff]  }
 0x144   : > { %2616 = vmatpush1.bf16.msra.mxu0 %v7594_v52 }
 0x145   : > { %2657 = vmatpush1.bf16.msra.mxu1 %v7597_v55  ;;  %3070 = vmatprep.subr.bf16.mxu0 %v7602_v60  ;;  %v7645_v55 = vld [vmem:[%s10575_s1 + $0xb70] ss:$8 sps:$4 sm:$0xff]   ;;  %v7650_v60 = vld [vmem:[%s10575_s1 + $0xa84] ss:$8 sps:$4 sm:$0xff]  }
 0x146   : > { %3111 = vmatprep.subr.bf16.mxu1 %v7605_v61  ;;  %v7653_v61 = vld [vmem:[%s10575_s1 + $0xb84] ss:$8 sps:$4 sm:$0xff]  }
 0x147   : > { %2618 = vmatmul.mubr.bf16.vlgmr.msra.gmra.mrb[16].mxu0 %v2257_v5  ;;  %v7662_v5 = vld [vmem:[%s10575_s1 + $0xaa4] ss:$8 sps:$4 sm:$0xff]  }
 0x148   : > { %2659 = vmatmul.mubr.bf16.vlgmr.msra.gmra.mrb[16].mxu1 %v2259_v8  ;;  %3071 = vmatpush1.bf16.msra.mxu0 %v7600_v63  ;;  %v7651_v63 = vld [vmem:[%s10575_s1 + $0xb80] ss:$8 sps:$4 sm:$0xff]   ;;  %v7665_v8 = vld [vmem:[%s10575_s1 + $0xba4] ss:$8 sps:$4 sm:$0xff]  }
 0x149   : > { %3112 = vmatpush1.bf16.msra.mxu1 %v7603_v0  ;;  %3072 = vmatprep.subr.bf16.mxu0 %v7608_v10  ;;  %v7656_v0 = vld [vmem:[%s10575_s1 + $0xa94] ss:$8 sps:$4 sm:$0xff]   ;;  %v7660_v10 = vld [vmem:[%s10575_s1 + $0xaa0] ss:$8 sps:$4 sm:$0xff]  }
 0x14a   : > { %3113 = vmatprep.subr.bf16.mxu1 %v7611_v11  ;;  %3102 = vmatprep.mubr.bf16.mxu0 %v2739_v14  ;;  %v7663_v11 = vld [vmem:[%s10575_s1 + $0xba0] ss:$8 sps:$4 sm:$0xff]   ;;  %v7668_v14 = vld [vmem:[%s10575_s1 + $0xab4] ss:$8 sps:$4 sm:$0xff]  }
 0x14b   : > { %3143 = vmatprep.mubr.bf16.mxu1 %v2745_v15  ;;  %v7671_v15 = vld [vmem:[%s10575_s1 + $0xbb4] ss:$8 sps:$4 sm:$0xff]  }
 0x14c   : > { %3073 = vmatpush1.bf16.msra.mxu0 %v7606_v16  ;;  %v7666_v16 = vld [vmem:[%s10575_s1 + $0xab0] ss:$8 sps:$4 sm:$0xff]  }
 0x14d   : > { %3114 = vmatpush1.bf16.msra.mxu1 %v7609_v17  ;;  %3074 = vmatprep.subr.bf16.mxu0 %v7614_v19  ;;  %v7669_v17 = vld [vmem:[%s10575_s1 + $0xbb0] ss:$8 sps:$4 sm:$0xff]   ;;  %v7674_v19 = vld [vmem:[%s10575_s1 + $0xac4] ss:$8 sps:$4 sm:$0xff]  }
 0x14e   : > { %3115 = vmatprep.subr.bf16.mxu1 %v7617_v21  ;;  %v7677_v21 = vld [vmem:[%s10575_s1 + $0xbc4] ss:$8 sps:$4 sm:$0xff]  }
 0x150   : > { %3075 = vmatpush1.bf16.msra.mxu0 %v7612_v22  ;;  %v7672_v22 = vld [vmem:[%s10575_s1 + $0xac0] ss:$8 sps:$4 sm:$0xff]  }
 0x151   : > { %3116 = vmatpush1.bf16.msra.mxu1 %v7615_v23  ;;  %3076 = vmatprep.subr.bf16.mxu0 %v7620_v24  ;;  %v7675_v23 = vld [vmem:[%s10575_s1 + $0xbc0] ss:$8 sps:$4 sm:$0xff]   ;;  %v7680_v24 = vld [vmem:[%s10575_s1 + $0xad4] ss:$8 sps:$4 sm:$0xff]  }
 0x152   : > { %3117 = vmatprep.subr.bf16.mxu1 %v7623_v25  ;;  %v7683_v25 = vld [vmem:[%s10575_s1 + $0xbd4] ss:$8 sps:$4 sm:$0xff]  }
 0x154   : > { %3077 = vmatpush1.bf16.msra.mxu0 %v7618_v26  ;;  %v7678_v26 = vld [vmem:[%s10575_s1 + $0xad0] ss:$8 sps:$4 sm:$0xff]  }
 0x155   : > { %3118 = vmatpush1.bf16.msra.mxu1 %v7621_v27  ;;  %3078 = vmatprep.subr.bf16.mxu0 %v7626_v28  ;;  %v7681_v27 = vld [vmem:[%s10575_s1 + $0xbd0] ss:$8 sps:$4 sm:$0xff]   ;;  %v7686_v28 = vld [vmem:[%s10575_s1 + $0xae4] ss:$8 sps:$4 sm:$0xff]  }
 0x156   : > { %3119 = vmatprep.subr.bf16.mxu1 %v7629_v29  ;;  %v7689_v29 = vld [vmem:[%s10575_s1 + $0xbe4] ss:$8 sps:$4 sm:$0xff]  }
 0x158   : > { %3079 = vmatpush1.bf16.msra.mxu0 %v7624_v30  ;;  %v7684_v30 = vld [vmem:[%s10575_s1 + $0xae0] ss:$8 sps:$4 sm:$0xff]  }
 0x159   : > { %3120 = vmatpush1.bf16.msra.mxu1 %v7627_v31  ;;  %3080 = vmatprep.subr.bf16.mxu0 %v7632_v32  ;;  %v7687_v31 = vld [vmem:[%s10575_s1 + $0xbe0] ss:$8 sps:$4 sm:$0xff]   ;;  %v7692_v32 = vld [vmem:[%s10575_s1 + $0xaf4] ss:$8 sps:$4 sm:$0xff]  }
 0x15a   : > { %3121 = vmatprep.subr.bf16.mxu1 %v7635_v33  ;;  %v1182_v38 = vpop.f32.mrb[4].mxu0  ;;  %v7695_v33 = vld [vmem:[%s10575_s1 + $0xbf4] ss:$8 sps:$4 sm:$0xff]  }
 0x15b   : > { %v1223_v39 = vpop.f32.mrb[4].mxu1  ;;  %v1183_v42 = vadd.f32 %v1182_v38, %v9186_v4  ;;  %v1184_v43 = vpop.f32.mrb[5].mxu0  ;;  %v7647_v4 = vld [vmem:[%s10575_s1 + $0xb74] ss:$8 sps:$4 sm:$0xff]   ;;  %v7690_v38 = vld [vmem:[%s10575_s1 + $0xaf0] ss:$8 sps:$4 sm:$0xff]  }
 0x15c   : > { %v1225_v44 = vpop.f32.mrb[5].mxu1  ;;  %v1185_v45 = vadd.f32 %v1184_v43, %v9188_v9  ;;  %v1186_v46 = vpop.f32.mrb[6].mxu0  ;;  %3081 = vmatpush1.bf16.msra.mxu0 %v7630_v34  ;;  %v7642_v9 = vld [vmem:[%s10575_s1 + $0xa70] ss:$8 sps:$4 sm:$0xff]   ;;  %v2734_v34 = vrot.slane %v8495_v18, 2 }
 0x15d   : > { %v1227_v48 = vpop.f32.mrb[6].mxu1  ;;  %3122 = vmatpush1.bf16.msra.mxu1 %v7633_v35  ;;  %v9390_v50 = vadd.f32 %v1223_v39, %v1183_v42  ;;  %v1187_v47 = vpop.f32.mrb[7].mxu0  ;;  %3082 = vmatprep.subr.bf16.mxu0 %v7638_v36  ;;  %v2735_v35 = vrot.slane %v8477_v12, 3  ;;  %v2740_v36 = vrot.slane %v8499_v20, 2  ;;  %v7693_v39 = vld [vmem:[%s10575_s1 + $0xbf0] ss:$8 sps:$4 sm:$0xff]  }
 0x15e   : > { %v1228_v49 = vpop.f32.mrb[7].mxu1  ;;  %3123 = vmatprep.subr.bf16.mxu1 %v7641_v37  ;;  %v9398_v52 = vadd.f32 %v1225_v44, %v1185_v45  ;;  %v2741_v37 = vrot.slane %v8480_v13, 3  ;;  %v7696_v42 = vld [vmem:[%s10575_s1 + $0xc00] ss:$8 sps:$4 sm:$0xff]   ;;  %v7704_v46 = vld [vmem:[%s10575_s1 + $0xc14] ss:$8 sps:$4 sm:$0xff]  }
 0x15f   : > { %v2736_v43 = vor.u32 %v2735_v35, %v2734_v34  ;;  %v7699_v45 = vld [vmem:[%s10575_s1 + $0xd00] ss:$8 sps:$4 sm:$0xff]   ;;  %v7707_v48 = vld [vmem:[%s10575_s1 + $0xd14] ss:$8 sps:$4 sm:$0xff]   ;;  %v3220_v47 = vrot.slane %v8416_v53, 3  ;;  %v3222_v49 = vrot.slane %v8419_v54, 3 }
 0x160   : > { %3083 = vmatpush1.bf16.msra.mxu0 %v7636_v40  ;;  %v7698_v40 = vld [vmem:[%s10575_s1 + $0xc04] ss:$8 sps:$4 sm:$0xff]   ;;  %v2742_v44 = vor.u32 %v2741_v37, %v2740_v36  ;;  %v7741_v34 = vld [vmem:[%s10575_s1 + $0xd70] ss:$8 sps:$4 sm:$0xff]   ;;  %v7744_v36 = vld [vmem:[%s10575_s1 + $0xc80] ss:$8 sps:$4 sm:$0xff]  }
 0x161   : > { %3124 = vmatpush1.bf16.msra.mxu1 %v7639_v41  ;;  %3084 = vmatprep.subr.bf16.mxu0 %v7644_v51  ;;  %v7701_v41 = vld [vmem:[%s10575_s1 + $0xd04] ss:$8 sps:$4 sm:$0xff]   ;;  %v7702_v51 = vld [vmem:[%s10575_s1 + $0xc10] ss:$8 sps:$4 sm:$0xff]   ;;  %v7747_v37 = vld [vmem:[%s10575_s1 + $0xd80] ss:$8 sps:$4 sm:$0xff]  }
 0x162   : > { %3125 = vmatprep.subr.bf16.mxu1 %v7647_v4  ;;  %v7705_v4 = vld [vmem:[%s10575_s1 + $0xd10] ss:$8 sps:$4 sm:$0xff]   ;;  %v7710_v53 = vld [vmem:[%s10575_s1 + $0xc24] ss:$8 sps:$4 sm:$0xff]  }
 0x163   : > { %v7713_v54 = vld [vmem:[%s10575_s1 + $0xd24] ss:$8 sps:$4 sm:$0xff]  }
 0x164   : > { %3085 = vmatpush1.bf16.msra.mxu0 %v7642_v9  ;;  %v7708_v9 = vld [vmem:[%s10575_s1 + $0xc20] ss:$8 sps:$4 sm:$0xff]   ;;  %v7746_v35 = vld [vmem:[%s10575_s1 + $0xc84] ss:$8 sps:$4 sm:$0xff]  }
 0x165   : > { %3126 = vmatpush1.bf16.msra.mxu1 %v7645_v55  ;;  %3086 = vmatprep.subr.bf16.mxu0 %v7650_v60  ;;  %v7711_v55 = vld [vmem:[%s10575_s1 + $0xd20] ss:$8 sps:$4 sm:$0xff]   ;;  %v7716_v60 = vld [vmem:[%s10575_s1 + $0xc34] ss:$8 sps:$4 sm:$0xff]  }
 0x166   : > { %3127 = vmatprep.subr.bf16.mxu1 %v7653_v61  ;;  %v7719_v61 = vld [vmem:[%s10575_s1 + $0xd34] ss:$8 sps:$4 sm:$0xff]  }
 0x168   : > { %3087 = vmatpush1.bf16.msra.mxu0 %v7648_v62  ;;  %v7714_v62 = vld [vmem:[%s10575_s1 + $0xc30] ss:$8 sps:$4 sm:$0xff]  }
 0x169   : > { %3128 = vmatpush1.bf16.msra.mxu1 %v7651_v63  ;;  %3088 = vmatprep.subr.bf16.mxu0 %v7656_v0  ;;  %v7717_v63 = vld [vmem:[%s10575_s1 + $0xd30] ss:$8 sps:$4 sm:$0xff]   ;;  %v7722_v0 = vld [vmem:[%s10575_s1 + $0xc44] ss:$8 sps:$4 sm:$0xff]  }
 0x16a   : > { %3129 = vmatprep.subr.bf16.mxu1 %v7659_v1  ;;  %v7725_v1 = vld [vmem:[%s10575_s1 + $0xd44] ss:$8 sps:$4 sm:$0xff]  }
 0x16c   : > { %3089 = vmatpush1.bf16.msra.mxu0 %v7654_v2  ;;  %v7720_v2 = vld [vmem:[%s10575_s1 + $0xc40] ss:$8 sps:$4 sm:$0xff]  }
 0x16d   : > { %3130 = vmatpush1.bf16.msra.mxu1 %v7657_v3  ;;  %3090 = vmatprep.subr.bf16.mxu0 %v7662_v5  ;;  %v7723_v3 = vld [vmem:[%s10575_s1 + $0xd40] ss:$8 sps:$4 sm:$0xff]   ;;  %v7728_v5 = vld [vmem:[%s10575_s1 + $0xc54] ss:$8 sps:$4 sm:$0xff]  }
 0x16e   : > { %3131 = vmatprep.subr.bf16.mxu1 %v7665_v8  ;;  %v7731_v8 = vld [vmem:[%s10575_s1 + $0xd54] ss:$8 sps:$4 sm:$0xff]  }
 0x170   : > { %3091 = vmatpush1.bf16.msra.mxu0 %v7660_v10  ;;  %v7726_v10 = vld [vmem:[%s10575_s1 + $0xc50] ss:$8 sps:$4 sm:$0xff]  }
 0x171   : > { %3132 = vmatpush1.bf16.msra.mxu1 %v7663_v11  ;;  %3092 = vmatprep.subr.bf16.mxu0 %v7668_v14  ;;  %v7729_v11 = vld [vmem:[%s10575_s1 + $0xd50] ss:$8 sps:$4 sm:$0xff]   ;;  %v7734_v14 = vld [vmem:[%s10575_s1 + $0xc64] ss:$8 sps:$4 sm:$0xff]  }
 0x172   : > { %3133 = vmatprep.subr.bf16.mxu1 %v7671_v15  ;;  %v7737_v15 = vld [vmem:[%s10575_s1 + $0xd64] ss:$8 sps:$4 sm:$0xff]  }
 0x174   : > { %3093 = vmatpush1.bf16.msra.mxu0 %v7666_v16 }
 0x175   : > { %3134 = vmatpush1.bf16.msra.mxu1 %v7669_v17  ;;  %3094 = vmatprep.subr.bf16.mxu0 %v7674_v19  ;;  %v7732_v19 = vld [vmem:[%s10575_s1 + $0xc60] ss:$8 sps:$4 sm:$0xff]  }
 0x176   : > { %3135 = vmatprep.subr.bf16.mxu1 %v7677_v21  ;;  %v7735_v21 = vld [vmem:[%s10575_s1 + $0xd60] ss:$8 sps:$4 sm:$0xff]  }
 0x178   : > { %3095 = vmatpush1.bf16.msra.mxu0 %v7672_v22 }
 0x179   : > { %3136 = vmatpush1.bf16.msra.mxu1 %v7675_v23  ;;  %3096 = vmatprep.subr.bf16.mxu0 %v7680_v24 }
 0x17a   : > { %3137 = vmatprep.subr.bf16.mxu1 %v7683_v25 }
 0x17c   : > { %3097 = vmatpush1.bf16.msra.mxu0 %v7678_v26 }
 0x17d   : > { %3138 = vmatpush1.bf16.msra.mxu1 %v7681_v27  ;;  %3098 = vmatprep.subr.bf16.mxu0 %v7686_v28 }
 0x17e   : > { %3139 = vmatprep.subr.bf16.mxu1 %v7689_v29 }
 0x180   : > { %3099 = vmatpush1.bf16.msra.mxu0 %v7684_v30 }
 0x181   : > { %3140 = vmatpush1.bf16.msra.mxu1 %v7687_v31  ;;  %3100 = vmatprep.subr.bf16.mxu0 %v7692_v32  ;;  %v7740_v31 = vld [vmem:[%s10575_s1 + $0xc74] ss:$8 sps:$4 sm:$0xff]  }
 0x182   : > { %3141 = vmatprep.subr.bf16.mxu1 %v7695_v33  ;;  %v7743_v32 = vld [vmem:[%s10575_s1 + $0xd74] ss:$8 sps:$4 sm:$0xff]  }
 0x184   : > { %3101 = vmatpush1.bf16.msra.mxu0 %v7690_v38  ;;  %v7752_v38 = vld [vmem:[%s10575_s1 + $0xc94] ss:$8 sps:$4 sm:$0xff]  }
 0x185   : > { %3142 = vmatpush1.bf16.msra.mxu1 %v7693_v39  ;;  %3547 = vmatprep.subr.bf16.mxu0 %v7698_v40  ;;  %v7755_v39 = vld [vmem:[%s10575_s1 + $0xd94] ss:$8 sps:$4 sm:$0xff]   ;;  %v7750_v40 = vld [vmem:[%s10575_s1 + $0xc90] ss:$8 sps:$4 sm:$0xff]  }
 0x186   : > { %3588 = vmatprep.subr.bf16.mxu1 %v7701_v41  ;;  %v7753_v41 = vld [vmem:[%s10575_s1 + $0xd90] ss:$8 sps:$4 sm:$0xff]  }
 0x187   : > { %3103 = vmatmul.mubr.bf16.vlgmr.msra.gmra.mrb[20].mxu0 %v2736_v43  ;;  %v7761_v43 = vld [vmem:[%s10575_s1 + $0xda4] ss:$8 sps:$4 sm:$0xff]  }
 0x188   : > { %3144 = vmatmul.mubr.bf16.vlgmr.msra.gmra.mrb[20].mxu1 %v2742_v44  ;;  %3548 = vmatpush1.bf16.msra.mxu0 %v7696_v42  ;;  %v7758_v42 = vld [vmem:[%s10575_s1 + $0xca4] ss:$8 sps:$4 sm:$0xff]   ;;  %v7756_v44 = vld [vmem:[%s10575_s1 + $0xca0] ss:$8 sps:$4 sm:$0xff]  }
 0x189   : > { %3589 = vmatpush1.bf16.msra.mxu1 %v7699_v45  ;;  %3549 = vmatprep.subr.bf16.mxu0 %v7704_v46  ;;  %v7759_v45 = vld [vmem:[%s10575_s1 + $0xda0] ss:$8 sps:$4 sm:$0xff]   ;;  %v7764_v46 = vld [vmem:[%s10575_s1 + $0xcb4] ss:$8 sps:$4 sm:$0xff]  }
 0x18a   : > { %3590 = vmatprep.subr.bf16.mxu1 %v7707_v48  ;;  %3579 = vmatprep.mubr.bf16.mxu0 %v3220_v47  ;;  %v7767_v48 = vld [vmem:[%s10575_s1 + $0xdb4] ss:$8 sps:$4 sm:$0xff]   ;;  %v7762_v47 = vld [vmem:[%s10575_s1 + $0xcb0] ss:$8 sps:$4 sm:$0xff]  }
 0x18b   : > { %3620 = vmatprep.mubr.bf16.mxu1 %v3222_v49  ;;  %v7765_v49 = vld [vmem:[%s10575_s1 + $0xdb0] ss:$8 sps:$4 sm:$0xff]  }
 0x18c   : > { %3550 = vmatpush1.bf16.msra.mxu0 %v7702_v51  ;;  %v7770_v51 = vld [vmem:[%s10575_s1 + $0xcc4] ss:$8 sps:$4 sm:$0xff]  }
 0x18d   : > { %3591 = vmatpush1.bf16.msra.mxu1 %v7705_v4  ;;  %3551 = vmatprep.subr.bf16.mxu0 %v7710_v53  ;;  %v7773_v4 = vld [vmem:[%s10575_s1 + $0xdc4] ss:$8 sps:$4 sm:$0xff]   ;;  %v7768_v53 = vld [vmem:[%s10575_s1 + $0xcc0] ss:$8 sps:$4 sm:$0xff]  }
 0x18e   : > { %3592 = vmatprep.subr.bf16.mxu1 %v7713_v54  ;;  %v7771_v54 = vld [vmem:[%s10575_s1 + $0xdc0] ss:$8 sps:$4 sm:$0xff]  }
 0x190   : > { %3552 = vmatpush1.bf16.msra.mxu0 %v7708_v9  ;;  %v7776_v9 = vld [vmem:[%s10575_s1 + $0xcd4] ss:$8 sps:$4 sm:$0xff]  }
 0x191   : > { %3593 = vmatpush1.bf16.msra.mxu1 %v7711_v55  ;;  %3553 = vmatprep.subr.bf16.mxu0 %v7716_v60  ;;  %v7779_v55 = vld [vmem:[%s10575_s1 + $0xdd4] ss:$8 sps:$4 sm:$0xff]   ;;  %v7774_v60 = vld [vmem:[%s10575_s1 + $0xcd0] ss:$8 sps:$4 sm:$0xff]  }
 0x192   : > { %3594 = vmatprep.subr.bf16.mxu1 %v7719_v61  ;;  %v7777_v61 = vld [vmem:[%s10575_s1 + $0xdd0] ss:$8 sps:$4 sm:$0xff]  }
 0x194   : > { %3554 = vmatpush1.bf16.msra.mxu0 %v7714_v62  ;;  %v7782_v62 = vld [vmem:[%s10575_s1 + $0xce4] ss:$8 sps:$4 sm:$0xff]  }
 0x195   : > { %3595 = vmatpush1.bf16.msra.mxu1 %v7717_v63  ;;  %3555 = vmatprep.subr.bf16.mxu0 %v7722_v0  ;;  %v7785_v63 = vld [vmem:[%s10575_s1 + $0xde4] ss:$8 sps:$4 sm:$0xff]   ;;  %v7780_v0 = vld [vmem:[%s10575_s1 + $0xce0] ss:$8 sps:$4 sm:$0xff]  }
 0x196   : > { %3596 = vmatprep.subr.bf16.mxu1 %v7725_v1  ;;  %v7783_v1 = vld [vmem:[%s10575_s1 + $0xde0] ss:$8 sps:$4 sm:$0xff]  }
 0x198   : > { %3556 = vmatpush1.bf16.msra.mxu0 %v7720_v2  ;;  %v7788_v2 = vld [vmem:[%s10575_s1 + $0xcf4] ss:$8 sps:$4 sm:$0xff]  }
 0x199   : > { %3597 = vmatpush1.bf16.msra.mxu1 %v7723_v3  ;;  %3557 = vmatprep.subr.bf16.mxu0 %v7728_v5  ;;  %v7791_v3 = vld [vmem:[%s10575_s1 + $0xdf4] ss:$8 sps:$4 sm:$0xff]   ;;  %v7786_v5 = vld [vmem:[%s10575_s1 + $0xcf0] ss:$8 sps:$4 sm:$0xff]  }
 0x19a   : > { %3598 = vmatprep.subr.bf16.mxu1 %v7731_v8  ;;  %v1657_v16 = vpop.f32.mrb[8].mxu0  ;;  %v7789_v8 = vld [vmem:[%s10575_s1 + $0xdf0] ss:$8 sps:$4 sm:$0xff]  }
 0x19b   : > { %v1698_v17 = vpop.f32.mrb[8].mxu1  ;;  %v1659_v23 = vpop.f32.mrb[9].mxu0 }
 0x19c   : > { %v1699_v22 = vadd.f32 %v1698_v17, %v1657_v16  ;;  %v1700_v24 = vpop.f32.mrb[9].mxu1  ;;  %v1661_v26 = vpop.f32.mrb[10].mxu0  ;;  %3558 = vmatpush1.bf16.msra.mxu0 %v7726_v10  ;;  %v7794_v10 = vld [vmem:[%s10575_s1 + $0xe04] ss:$8 sps:$4 sm:$0xff]   ;;  %v3705_v16 = vrot.slane %v8431_v58, 3  ;;  %v3706_v17 = vrot.slane %v8434_v59, 4 }
 0x19d   : > { %v1701_v25 = vadd.f32 %v1700_v24, %v1659_v23  ;;  %v1702_v27 = vpop.f32.mrb[10].mxu1  ;;  %3599 = vmatpush1.bf16.msra.mxu1 %v7729_v11  ;;  %v1662_v29 = vpop.f32.mrb[11].mxu0  ;;  %3559 = vmatprep.subr.bf16.mxu0 %v7734_v14  ;;  %v7797_v11 = vld [vmem:[%s10575_s1 + $0xf04] ss:$8 sps:$4 sm:$0xff]   ;;  %v3699_v14 = vrot.slane %v8425_v56, 3 }
 0x19e   : > { %v9593_v28 = vadd.f32 %v1699_v22, %v9390_v50  ;;  %v1703_v30 = vpop.f32.mrb[11].mxu1  ;;  %3600 = vmatprep.subr.bf16.mxu1 %v7737_v15  ;;  %v7738_v50 = vld [vmem:[%s10575_s1 + $0xc70] ss:$8 sps:$4 sm:$0xff]   ;;  %v3700_v15 = vrot.slane %v8428_v57, 4  ;;  %v7792_v22 = vld [vmem:[%s10575_s1 + $0xe00] ss:$8 sps:$4 sm:$0xff]  }
 0x19f   : > { %v9602_v33 = vadd.f32 %v1701_v25, %v9398_v52  ;;  %v7749_v52 = vld [vmem:[%s10575_s1 + $0xd84] ss:$8 sps:$4 sm:$0xff]   ;;  %v7795_v56 = vld [vmem:[%s10575_s1 + $0xf00] ss:$8 sps:$4 sm:$0xff]   ;;  %v7800_v57 = vld [vmem:[%s10575_s1 + $0xe14] ss:$8 sps:$4 sm:$0xff]  }
 0x1a0   : > { %3560 = vmatpush1.bf16.msra.mxu0 %v7732_v19  ;;  %v3219_v19 = vrot.slane %v8459_v6, 3  ;;  %v7803_v58 = vld [vmem:[%s10575_s1 + $0xf14] ss:$8 sps:$4 sm:$0xff]   ;;  %v3701_v59 = vor.u32 %v3700_v15, %v3699_v14  ;;  %v3707_v6 = vor.u32 %v3706_v17, %v3705_v16  ;;  %v7801_v23 = vld [vmem:[%s10575_s1 + $0xf10] ss:$8 sps:$4 sm:$0xff]  }
 0x1a1   : > { %3601 = vmatpush1.bf16.msra.mxu1 %v7735_v21  ;;  %3561 = vmatprep.subr.bf16.mxu0 %v7740_v31  ;;  %v3221_v21 = vrot.slane %v8462_v7, 3  ;;  %v7798_v7 = vld [vmem:[%s10575_s1 + $0xe10] ss:$8 sps:$4 sm:$0xff]   ;;  %v7806_v24 = vld [vmem:[%s10575_s1 + $0xe24] ss:$8 sps:$4 sm:$0xff]  }
 0x1a2   : > { %3602 = vmatprep.subr.bf16.mxu1 %v7743_v32  ;;  %v7809_v25 = vld [vmem:[%s10575_s1 + $0xf24] ss:$8 sps:$4 sm:$0xff]   ;;  %v7804_v26 = vld [vmem:[%s10575_s1 + $0xe20] ss:$8 sps:$4 sm:$0xff]   ;;  %v7812_v29 = vld [vmem:[%s10575_s1 + $0xe34] ss:$8 sps:$4 sm:$0xff]  }
 0x1a3   : > { %v7807_v27 = vld [vmem:[%s10575_s1 + $0xf20] ss:$8 sps:$4 sm:$0xff]   ;;  %v7815_v30 = vld [vmem:[%s10575_s1 + $0xf34] ss:$8 sps:$4 sm:$0xff]   ;;  %v7810_v31 = vld [vmem:[%s10575_s1 + $0xe30] ss:$8 sps:$4 sm:$0xff]  }
 0x1a4   : > { %3562 = vmatpush1.bf16.msra.mxu0 %v7738_v50  ;;  %v7813_v32 = vld [vmem:[%s10575_s1 + $0xf30] ss:$8 sps:$4 sm:$0xff]   ;;  %v7818_v50 = vld [vmem:[%s10575_s1 + $0xe44] ss:$8 sps:$4 sm:$0xff]   ;;  %v7852_v14 = vld [vmem:[%s10575_s1 + $0xea0] ss:$8 sps:$4 sm:$0xff]  }
 0x1a5   : > { %3603 = vmatpush1.bf16.msra.mxu1 %v7741_v34  ;;  %3563 = vmatprep.subr.bf16.mxu0 %v7746_v35  ;;  %v7821_v34 = vld [vmem:[%s10575_s1 + $0xf44] ss:$8 sps:$4 sm:$0xff]   ;;  %v7816_v35 = vld [vmem:[%s10575_s1 + $0xe40] ss:$8 sps:$4 sm:$0xff]   ;;  %v7860_v16 = vld [vmem:[%s10575_s1 + $0xeb4] ss:$8 sps:$4 sm:$0xff]  }
 0x1a6   : > { %3604 = vmatprep.subr.bf16.mxu1 %v7749_v52  ;;  %v7819_v52 = vld [vmem:[%s10575_s1 + $0xf40] ss:$8 sps:$4 sm:$0xff]   ;;  %v7863_v17 = vld [vmem:[%s10575_s1 + $0xfb4] ss:$8 sps:$4 sm:$0xff]  }
 0x1a7   : > { %v7855_v15 = vld [vmem:[%s10575_s1 + $0xfa0] ss:$8 sps:$4 sm:$0xff]  }
 0x1a8   : > { %3564 = vmatpush1.bf16.msra.mxu0 %v7744_v36  ;;  %v7824_v36 = vld [vmem:[%s10575_s1 + $0xe54] ss:$8 sps:$4 sm:$0xff]  }
 0x1a9   : > { %3605 = vmatpush1.bf16.msra.mxu1 %v7747_v37  ;;  %3565 = vmatprep.subr.bf16.mxu0 %v7752_v38  ;;  %v7827_v37 = vld [vmem:[%s10575_s1 + $0xf54] ss:$8 sps:$4 sm:$0xff]   ;;  %v7822_v38 = vld [vmem:[%s10575_s1 + $0xe50] ss:$8 sps:$4 sm:$0xff]  }
 0x1aa   : > { %3606 = vmatprep.subr.bf16.mxu1 %v7755_v39  ;;  %v7825_v39 = vld [vmem:[%s10575_s1 + $0xf50] ss:$8 sps:$4 sm:$0xff]  }
 0x1ac   : > { %3566 = vmatpush1.bf16.msra.mxu0 %v7750_v40  ;;  %v7830_v40 = vld [vmem:[%s10575_s1 + $0xe64] ss:$8 sps:$4 sm:$0xff]  }
 0x1ad   : > { %3607 = vmatpush1.bf16.msra.mxu1 %v7753_v41  ;;  %3567 = vmatprep.subr.bf16.mxu0 %v7758_v42  ;;  %v7833_v41 = vld [vmem:[%s10575_s1 + $0xf64] ss:$8 sps:$4 sm:$0xff]  }
 0x1ae   : > { %3608 = vmatprep.subr.bf16.mxu1 %v7761_v43 }
 0x1b0   : > { %3568 = vmatpush1.bf16.msra.mxu0 %v7756_v44 }
 0x1b1   : > { %3609 = vmatpush1.bf16.msra.mxu1 %v7759_v45  ;;  %3569 = vmatprep.subr.bf16.mxu0 %v7764_v46 }
 0x1b2   : > { %3610 = vmatprep.subr.bf16.mxu1 %v7767_v48 }
 0x1b4   : > { %3570 = vmatpush1.bf16.msra.mxu0 %v7762_v47 }
 0x1b5   : > { %3611 = vmatpush1.bf16.msra.mxu1 %v7765_v49  ;;  %3571 = vmatprep.subr.bf16.mxu0 %v7770_v51  ;;  %v7828_v51 = vld [vmem:[%s10575_s1 + $0xe60] ss:$8 sps:$4 sm:$0xff]  }
 0x1b6   : > { %3612 = vmatprep.subr.bf16.mxu1 %v7773_v4  ;;  %v7831_v4 = vld [vmem:[%s10575_s1 + $0xf60] ss:$8 sps:$4 sm:$0xff]  }
 0x1b8   : > { %3572 = vmatpush1.bf16.msra.mxu0 %v7768_v53 }
 0x1b9   : > { %3613 = vmatpush1.bf16.msra.mxu1 %v7771_v54  ;;  %3573 = vmatprep.subr.bf16.mxu0 %v7776_v9 }
 0x1ba   : > { %3614 = vmatprep.subr.bf16.mxu1 %v7779_v55  ;;  %v7836_v55 = vld [vmem:[%s10575_s1 + $0xe74] ss:$8 sps:$4 sm:$0xff]  }
 0x1bc   : > { %3574 = vmatpush1.bf16.msra.mxu0 %v7774_v60  ;;  %v7839_v60 = vld [vmem:[%s10575_s1 + $0xf74] ss:$8 sps:$4 sm:$0xff]  }
 0x1bd   : > { %3615 = vmatpush1.bf16.msra.mxu1 %v7777_v61  ;;  %3575 = vmatprep.subr.bf16.mxu0 %v7782_v62  ;;  %v7837_v62 = vld [vmem:[%s10575_s1 + $0xf70] ss:$8 sps:$4 sm:$0xff]  }
 0x1be   : > { %3616 = vmatprep.subr.bf16.mxu1 %v7785_v63  ;;  %v7842_v63 = vld [vmem:[%s10575_s1 + $0xe84] ss:$8 sps:$4 sm:$0xff]  }
 0x1c0   : > { %3576 = vmatpush1.bf16.msra.mxu0 %v7780_v0  ;;  %v7840_v0 = vld [vmem:[%s10575_s1 + $0xe80] ss:$8 sps:$4 sm:$0xff]  }
 0x1c1   : > { %3617 = vmatpush1.bf16.msra.mxu1 %v7783_v1  ;;  %3577 = vmatprep.subr.bf16.mxu0 %v7788_v2  ;;  %v7843_v1 = vld [vmem:[%s10575_s1 + $0xf80] ss:$8 sps:$4 sm:$0xff]   ;;  %v7848_v2 = vld [vmem:[%s10575_s1 + $0xe94] ss:$8 sps:$4 sm:$0xff]  }
 0x1c2   : > { %3618 = vmatprep.subr.bf16.mxu1 %v7791_v3  ;;  %v7851_v3 = vld [vmem:[%s10575_s1 + $0xf94] ss:$8 sps:$4 sm:$0xff]  }
 0x1c4   : > { %3578 = vmatpush1.bf16.msra.mxu0 %v7786_v5  ;;  %v7846_v5 = vld [vmem:[%s10575_s1 + $0xe90] ss:$8 sps:$4 sm:$0xff]  }
 0x1c5   : > { %3619 = vmatpush1.bf16.msra.mxu1 %v7789_v8  ;;  %4032 = vmatprep.subr.bf16.mxu0 %v7794_v10  ;;  %v7849_v8 = vld [vmem:[%s10575_s1 + $0xf90] ss:$8 sps:$4 sm:$0xff]   ;;  %v7854_v10 = vld [vmem:[%s10575_s1 + $0xea4] ss:$8 sps:$4 sm:$0xff]  }
 0x1c6   : > { %4073 = vmatprep.subr.bf16.mxu1 %v7797_v11  ;;  %v7857_v11 = vld [vmem:[%s10575_s1 + $0xfa4] ss:$8 sps:$4 sm:$0xff]  }
 0x1c7   : > { %3580 = vmatmul.mubr.bf16.vlgmr.msra.gmra.mrb[24].mxu0 %v3219_v19  ;;  %v7858_v19 = vld [vmem:[%s10575_s1 + $0xeb0] ss:$8 sps:$4 sm:$0xff]  }
 0x1c8   : > { %3621 = vmatmul.mubr.bf16.vlgmr.msra.gmra.mrb[24].mxu1 %v3221_v21  ;;  %4033 = vmatpush1.bf16.msra.mxu0 %v7792_v22  ;;  %v7861_v21 = vld [vmem:[%s10575_s1 + $0xfb0] ss:$8 sps:$4 sm:$0xff]   ;;  %v7866_v22 = vld [vmem:[%s10575_s1 + $0xec4] ss:$8 sps:$4 sm:$0xff]  }
 0x1c9   : > { %4074 = vmatpush1.bf16.msra.mxu1 %v7795_v56  ;;  %4034 = vmatprep.subr.bf16.mxu0 %v7800_v57  ;;  %v7869_v56 = vld [vmem:[%s10575_s1 + $0xfc4] ss:$8 sps:$4 sm:$0xff]   ;;  %v7864_v57 = vld [vmem:[%s10575_s1 + $0xec0] ss:$8 sps:$4 sm:$0xff]  }
 0x1ca   : > { %4075 = vmatprep.subr.bf16.mxu1 %v7803_v58  ;;  %4064 = vmatprep.mubr.bf16.mxu0 %v3701_v59  ;;  %v7867_v58 = vld [vmem:[%s10575_s1 + $0xfc0] ss:$8 sps:$4 sm:$0xff]   ;;  %v7872_v59 = vld [vmem:[%s10575_s1 + $0xed4] ss:$8 sps:$4 sm:$0xff]  }
 0x1cb   : > { %4105 = vmatprep.mubr.bf16.mxu1 %v3707_v6  ;;  %v7875_v6 = vld [vmem:[%s10575_s1 + $0xfd4] ss:$8 sps:$4 sm:$0xff]  }
 0x1cc   : > { %4035 = vmatpush1.bf16.msra.mxu0 %v7798_v7  ;;  %v7870_v7 = vld [vmem:[%s10575_s1 + $0xed0] ss:$8 sps:$4 sm:$0xff]  }
 0x1cd   : > { %4076 = vmatpush1.bf16.msra.mxu1 %v7801_v23  ;;  %4036 = vmatprep.subr.bf16.mxu0 %v7806_v24  ;;  %v7873_v23 = vld [vmem:[%s10575_s1 + $0xfd0] ss:$8 sps:$4 sm:$0xff]   ;;  %v7878_v24 = vld [vmem:[%s10575_s1 + $0xee4] ss:$8 sps:$4 sm:$0xff]  }
 0x1ce   : > { %4077 = vmatprep.subr.bf16.mxu1 %v7809_v25  ;;  %v7881_v25 = vld [vmem:[%s10575_s1 + $0xfe4] ss:$8 sps:$4 sm:$0xff]  }
 0x1d0   : > { %4037 = vmatpush1.bf16.msra.mxu0 %v7804_v26  ;;  %v7876_v26 = vld [vmem:[%s10575_s1 + $0xee0] ss:$8 sps:$4 sm:$0xff]  }
 0x1d1   : > { %4078 = vmatpush1.bf16.msra.mxu1 %v7807_v27  ;;  %4038 = vmatprep.subr.bf16.mxu0 %v7812_v29  ;;  %v7879_v27 = vld [vmem:[%s10575_s1 + $0xfe0] ss:$8 sps:$4 sm:$0xff]   ;;  %v7884_v29 = vld [vmem:[%s10575_s1 + $0xef4] ss:$8 sps:$4 sm:$0xff]  }
 0x1d2   : > { %4079 = vmatprep.subr.bf16.mxu1 %v7815_v30  ;;  %v7887_v30 = vld [vmem:[%s10575_s1 + $0xff4] ss:$8 sps:$4 sm:$0xff]  }
 0x1d4   : > { %4039 = vmatpush1.bf16.msra.mxu0 %v7810_v31  ;;  %v3696_v31 = vrot.slane %v8495_v18, 3 }
 0x1d5   : > { %4080 = vmatpush1.bf16.msra.mxu1 %v7813_v32  ;;  %4040 = vmatprep.subr.bf16.mxu0 %v7818_v50  ;;  %v3697_v32 = vrot.slane %v8477_v12, 4  ;;  %v3702_v50 = vrot.slane %v8499_v20, 3  ;;  %v7890_v12 = vld [vmem:[%s10575_s1 + $0x1004] ss:$8 sps:$4 sm:$0xff]  }
 0x1d6   : > { %4081 = vmatprep.subr.bf16.mxu1 %v7821_v34  ;;  %v3703_v34 = vrot.slane %v8480_v13, 4  ;;  %v7893_v13 = vld [vmem:[%s10575_s1 + $0x1104] ss:$8 sps:$4 sm:$0xff]  }
 0x1d7   : > { %v3698_v18 = vor.u32 %v3697_v32, %v3696_v31  ;;  %v7950_v31 = vld [vmem:[%s10575_s1 + $0x10a4] ss:$8 sps:$4 sm:$0xff]  }
 0x1d8   : > { %4041 = vmatpush1.bf16.msra.mxu0 %v7816_v35  ;;  %v7882_v35 = vld [vmem:[%s10575_s1 + $0xef0] ss:$8 sps:$4 sm:$0xff]   ;;  %v3704_v20 = vor.u32 %v3703_v34, %v3702_v50  ;;  %v7953_v32 = vld [vmem:[%s10575_s1 + $0x11a4] ss:$8 sps:$4 sm:$0xff]   ;;  %v7948_v50 = vld [vmem:[%s10575_s1 + $0x10a0] ss:$8 sps:$4 sm:$0xff]  }
 0x1d9   : > { %4082 = vmatpush1.bf16.msra.mxu1 %v7819_v52  ;;  %4042 = vmatprep.subr.bf16.mxu0 %v7824_v36  ;;  %v7885_v52 = vld [vmem:[%s10575_s1 + $0xff0] ss:$8 sps:$4 sm:$0xff]   ;;  %v7888_v36 = vld [vmem:[%s10575_s1 + $0x1000] ss:$8 sps:$4 sm:$0xff]  }
 0x1da   : > { %4083 = vmatprep.subr.bf16.mxu1 %v7827_v37  ;;  %v2142_v42 = vpop.f32.mrb[12].mxu0  ;;  %v7891_v37 = vld [vmem:[%s10575_s1 + $0x1100] ss:$8 sps:$4 sm:$0xff]  }
 0x1db   : > { %v2183_v43 = vpop.f32.mrb[12].mxu1  ;;  %v2144_v45 = vpop.f32.mrb[13].mxu0  ;;  %v7951_v34 = vld [vmem:[%s10575_s1 + $0x11a0] ss:$8 sps:$4 sm:$0xff]  }
 0x1dc   : > { %v2184_v44 = vadd.f32 %v2183_v43, %v2142_v42  ;;  %v2185_v46 = vpop.f32.mrb[13].mxu1  ;;  %v2146_v47 = vpop.f32.mrb[14].mxu0  ;;  %4043 = vmatpush1.bf16.msra.mxu0 %v7822_v38  ;;  %v7896_v38 = vld [vmem:[%s10575_s1 + $0x1014] ss:$8 sps:$4 sm:$0xff]  }
 0x1dd   : > { %v2186_v48 = vadd.f32 %v2185_v46, %v2144_v45  ;;  %v2187_v49 = vpop.f32.mrb[14].mxu1  ;;  %4084 = vmatpush1.bf16.msra.mxu1 %v7825_v39  ;;  %v2147_v54 = vpop.f32.mrb[15].mxu0  ;;  %4044 = vmatprep.subr.bf16.mxu0 %v7830_v40  ;;  %v7899_v39 = vld [vmem:[%s10575_s1 + $0x1114] ss:$8 sps:$4 sm:$0xff]   ;;  %v7897_v45 = vld [vmem:[%s10575_s1 + $0x1110] ss:$8 sps:$4 sm:$0xff]  }
 0x1de   : > { %v9797_v53 = vadd.f32 %v2184_v44, %v9593_v28  ;;  %v2188_v9 = vpop.f32.mrb[15].mxu1  ;;  %4085 = vmatprep.subr.bf16.mxu1 %v7833_v41  ;;  %v7834_v28 = vld [vmem:[%s10575_s1 + $0xe70] ss:$8 sps:$4 sm:$0xff]   ;;  %v7902_v46 = vld [vmem:[%s10575_s1 + $0x1024] ss:$8 sps:$4 sm:$0xff]  }
 0x1df   : > { %v9806_v61 = vadd.f32 %v2186_v48, %v9602_v33  ;;  %v7845_v33 = vld [vmem:[%s10575_s1 + $0xf84] ss:$8 sps:$4 sm:$0xff]   ;;  %v9933_v40 = vld [vmem:[%s8390_s11 + $0x10] sm:$0xff]  ;;  %v9938_v42 = vld [vmem:[%s8390_s11 + $0x18] sm:$0xff] }
 0x1e0   : > { %4045 = vmatpush1.bf16.msra.mxu0 %v7828_v51  ;;  %v6755_v41 = vcombine.high %v9933_v40, %v9933_v40  ;;  %v6757_v43 = vcombine.high %v9938_v42, %v9938_v42  ;;  %v7894_v44 = vld [vmem:[%s10575_s1 + $0x1010] ss:$8 sps:$4 sm:$0xff]   ;;  %v7905_v48 = vld [vmem:[%s10575_s1 + $0x1124] ss:$8 sps:$4 sm:$0xff]   ;;  %v7900_v47 = vld [vmem:[%s10575_s1 + $0x1020] ss:$8 sps:$4 sm:$0xff]  }
 0x1e1   : > { %4086 = vmatpush1.bf16.msra.mxu1 %v7831_v4  ;;  %4046 = vmatprep.subr.bf16.mxu0 %v7836_v55  ;;  %v7903_v49 = vld [vmem:[%s10575_s1 + $0x1120] ss:$8 sps:$4 sm:$0xff]   ;;  %v7908_v51 = vld [vmem:[%s10575_s1 + $0x1034] ss:$8 sps:$4 sm:$0xff]   ;;  %v7906_v54 = vld [vmem:[%s10575_s1 + $0x1030] ss:$8 sps:$4 sm:$0xff]  }
 0x1e2   : > { %4087 = vmatprep.subr.bf16.mxu1 %v7839_v60  ;;  %v7911_v4 = vld [vmem:[%s10575_s1 + $0x1134] ss:$8 sps:$4 sm:$0xff]   ;;  %v7909_v9 = vld [vmem:[%s10575_s1 + $0x1130] ss:$8 sps:$4 sm:$0xff]   ;;  %v7914_v55 = vld [vmem:[%s10575_s1 + $0x1044] ss:$8 sps:$4 sm:$0xff]  }
 0x1e3   : > { %v7917_v60 = vld [vmem:[%s10575_s1 + $0x1144] ss:$8 sps:$4 sm:$0xff]  }
 0x1e4   : > { %4047 = vmatpush1.bf16.msra.mxu0 %v7834_v28  ;;  %v7912_v28 = vld [vmem:[%s10575_s1 + $0x1040] ss:$8 sps:$4 sm:$0xff]  }
 0x1e5   : > { %4088 = vmatpush1.bf16.msra.mxu1 %v7837_v62  ;;  %4048 = vmatprep.subr.bf16.mxu0 %v7842_v63  ;;  %v7915_v62 = vld [vmem:[%s10575_s1 + $0x1140] ss:$8 sps:$4 sm:$0xff]   ;;  %v7920_v63 = vld [vmem:[%s10575_s1 + $0x1054] ss:$8 sps:$4 sm:$0xff]  }
 0x1e6   : > { %4089 = vmatprep.subr.bf16.mxu1 %v7845_v33  ;;  %v7923_v33 = vld [vmem:[%s10575_s1 + $0x1154] ss:$8 sps:$4 sm:$0xff]  }
 0x1e8   : > { %4049 = vmatpush1.bf16.msra.mxu0 %v7840_v0  ;;  %v7918_v0 = vld [vmem:[%s10575_s1 + $0x1050] ss:$8 sps:$4 sm:$0xff]  }
 0x1e9   : > { %4090 = vmatpush1.bf16.msra.mxu1 %v7843_v1  ;;  %4050 = vmatprep.subr.bf16.mxu0 %v7848_v2  ;;  %v7921_v1 = vld [vmem:[%s10575_s1 + $0x1150] ss:$8 sps:$4 sm:$0xff]   ;;  %v7926_v2 = vld [vmem:[%s10575_s1 + $0x1064] ss:$8 sps:$4 sm:$0xff]  }
 0x1ea   : > { %4091 = vmatprep.subr.bf16.mxu1 %v7851_v3  ;;  %v7929_v3 = vld [vmem:[%s10575_s1 + $0x1164] ss:$8 sps:$4 sm:$0xff]  }
 0x1ec   : > { %4051 = vmatpush1.bf16.msra.mxu0 %v7846_v5 }
 0x1ed   : > { %4092 = vmatpush1.bf16.msra.mxu1 %v7849_v8  ;;  %4052 = vmatprep.subr.bf16.mxu0 %v7854_v10 }
 0x1ee   : > { %4093 = vmatprep.subr.bf16.mxu1 %v7857_v11 }
 0x1f0   : > { %4053 = vmatpush1.bf16.msra.mxu0 %v7852_v14 }
 0x1f1   : > { %4094 = vmatpush1.bf16.msra.mxu1 %v7855_v15  ;;  %4054 = vmatprep.subr.bf16.mxu0 %v7860_v16 }
 0x1f2   : > { %4095 = vmatprep.subr.bf16.mxu1 %v7863_v17 }
 0x1f4   : > { %4055 = vmatpush1.bf16.msra.mxu0 %v7858_v19  ;;  %v7924_v19 = vld [vmem:[%s10575_s1 + $0x1060] ss:$8 sps:$4 sm:$0xff]  }
 0x1f5   : > { %4096 = vmatpush1.bf16.msra.mxu1 %v7861_v21  ;;  %4056 = vmatprep.subr.bf16.mxu0 %v7866_v22  ;;  %v7927_v21 = vld [vmem:[%s10575_s1 + $0x1160] ss:$8 sps:$4 sm:$0xff]  }
 0x1f6   : > { %4097 = vmatprep.subr.bf16.mxu1 %v7869_v56 }
 0x1f8   : > { %4057 = vmatpush1.bf16.msra.mxu0 %v7864_v57 }
 0x1f9   : > { %4098 = vmatpush1.bf16.msra.mxu1 %v7867_v58  ;;  %4058 = vmatprep.subr.bf16.mxu0 %v7872_v59  ;;  %v7932_v58 = vld [vmem:[%s10575_s1 + $0x1074] ss:$8 sps:$4 sm:$0xff]  }
 0x1fa   : > { %4099 = vmatprep.subr.bf16.mxu1 %v7875_v6  ;;  %v7935_v59 = vld [vmem:[%s10575_s1 + $0x1174] ss:$8 sps:$4 sm:$0xff]  }
 0x1fc   : > { %4059 = vmatpush1.bf16.msra.mxu0 %v7870_v7  ;;  %v7933_v7 = vld [vmem:[%s10575_s1 + $0x1170] ss:$8 sps:$4 sm:$0xff]  }
 0x1fd   : > { %4100 = vmatpush1.bf16.msra.mxu1 %v7873_v23  ;;  %4060 = vmatprep.subr.bf16.mxu0 %v7878_v24  ;;  %v7938_v23 = vld [vmem:[%s10575_s1 + $0x1084] ss:$8 sps:$4 sm:$0xff]   ;;  %v7936_v24 = vld [vmem:[%s10575_s1 + $0x1080] ss:$8 sps:$4 sm:$0xff]  }
 0x1fe   : > { %4101 = vmatprep.subr.bf16.mxu1 %v7881_v25  ;;  %v7939_v25 = vld [vmem:[%s10575_s1 + $0x1180] ss:$8 sps:$4 sm:$0xff]  }
 0x200   : > { %4061 = vmatpush1.bf16.msra.mxu0 %v7876_v26  ;;  %v7944_v26 = vld [vmem:[%s10575_s1 + $0x1094] ss:$8 sps:$4 sm:$0xff]  }
 0x201   : > { %4102 = vmatpush1.bf16.msra.mxu1 %v7879_v27  ;;  %4062 = vmatprep.subr.bf16.mxu0 %v7884_v29  ;;  %v7947_v27 = vld [vmem:[%s10575_s1 + $0x1194] ss:$8 sps:$4 sm:$0xff]   ;;  %v7942_v29 = vld [vmem:[%s10575_s1 + $0x1090] ss:$8 sps:$4 sm:$0xff]  }
 0x202   : > { %4103 = vmatprep.subr.bf16.mxu1 %v7887_v30  ;;  %v7945_v30 = vld [vmem:[%s10575_s1 + $0x1190] ss:$8 sps:$4 sm:$0xff]  }
 0x204   : > { %4063 = vmatpush1.bf16.msra.mxu0 %v7882_v35  ;;  %v7956_v35 = vld [vmem:[%s10575_s1 + $0x10b4] ss:$8 sps:$4 sm:$0xff]  }
 0x205   : > { %4104 = vmatpush1.bf16.msra.mxu1 %v7885_v52  ;;  %4509 = vmatprep.subr.bf16.mxu0 %v7890_v12  ;;  %v7959_v52 = vld [vmem:[%s10575_s1 + $0x11b4] ss:$8 sps:$4 sm:$0xff]   ;;  %v7954_v12 = vld [vmem:[%s10575_s1 + $0x10b0] ss:$8 sps:$4 sm:$0xff]  }
 0x206   : > { %4550 = vmatprep.subr.bf16.mxu1 %v7893_v13  ;;  %v7957_v13 = vld [vmem:[%s10575_s1 + $0x11b0] ss:$8 sps:$4 sm:$0xff]  }
 0x207   : > { %4065 = vmatmul.mubr.bf16.vlgmr.msra.gmra.mrb[28].mxu0 %v3698_v18  ;;  %v7962_v18 = vld [vmem:[%s10575_s1 + $0x10c4] ss:$8 sps:$4 sm:$0xff]  }
 0x208   : > { %4106 = vmatmul.mubr.bf16.vlgmr.msra.gmra.mrb[28].mxu1 %v3704_v20  ;;  %4510 = vmatpush1.bf16.msra.mxu0 %v7888_v36  ;;  %v7965_v20 = vld [vmem:[%s10575_s1 + $0x11c4] ss:$8 sps:$4 sm:$0xff]   ;;  %v7960_v36 = vld [vmem:[%s10575_s1 + $0x10c0] ss:$8 sps:$4 sm:$0xff]  }
 0x209   : > { %4551 = vmatpush1.bf16.msra.mxu1 %v7891_v37  ;;  %4511 = vmatprep.subr.bf16.mxu0 %v7896_v38  ;;  %v7963_v37 = vld [vmem:[%s10575_s1 + $0x11c0] ss:$8 sps:$4 sm:$0xff]   ;;  %v7968_v38 = vld [vmem:[%s10575_s1 + $0x10d4] ss:$8 sps:$4 sm:$0xff]  }
 0x20a   : > { %4552 = vmatprep.subr.bf16.mxu1 %v7899_v39  ;;  %4541 = vmatprep.mubr.bf16.mxu0 %v6755_v41  ;;  %v7971_v39 = vld [vmem:[%s10575_s1 + $0x11d4] ss:$8 sps:$4 sm:$0xff]   ;;  %v10093_v41 = vld [vmem:[%s8390_s11 + $0x20] sm:$0x11] }
 0x20b   : > { %4582 = vmatprep.mubr.bf16.mxu1 %v6757_v43  ;;  %v10096_v43 = vld [vmem:[%s8390_s11 + $0x28] sm:$0x11] }
 0x20c   : > { %4512 = vmatpush1.bf16.msra.mxu0 %v7894_v44  ;;  %v7966_v44 = vld [vmem:[%s10575_s1 + $0x10d0] ss:$8 sps:$4 sm:$0xff]  }
 0x20d   : > { %4553 = vmatpush1.bf16.msra.mxu1 %v7897_v45  ;;  %4513 = vmatprep.subr.bf16.mxu0 %v7902_v46  ;;  %v7969_v45 = vld [vmem:[%s10575_s1 + $0x11d0] ss:$8 sps:$4 sm:$0xff]   ;;  %v7974_v46 = vld [vmem:[%s10575_s1 + $0x10e4] ss:$8 sps:$4 sm:$0xff]  }
 0x20e   : > { %4554 = vmatprep.subr.bf16.mxu1 %v7905_v48  ;;  %v7977_v48 = vld [vmem:[%s10575_s1 + $0x11e4] ss:$8 sps:$4 sm:$0xff]  }
 0x210   : > { %4514 = vmatpush1.bf16.msra.mxu0 %v7900_v47  ;;  %v10112_v47 = vcombine.high %v9933_v40, %v10093_v41 }
 0x211   : > { %4555 = vmatpush1.bf16.msra.mxu1 %v7903_v49  ;;  %4515 = vmatprep.subr.bf16.mxu0 %v7908_v51  ;;  %v10116_v49 = vcombine.high %v9938_v42, %v10096_v43  ;;  %v7972_v51 = vld [vmem:[%s10575_s1 + $0x10e0] ss:$8 sps:$4 sm:$0xff]  }
 0x212   : > { %4556 = vmatprep.subr.bf16.mxu1 %v7911_v4  ;;  %v7975_v4 = vld [vmem:[%s10575_s1 + $0x11e0] ss:$8 sps:$4 sm:$0xff]  }
 0x214   : > { %4516 = vmatpush1.bf16.msra.mxu0 %v7906_v54  ;;  %v7980_v54 = vld [vmem:[%s10575_s1 + $0x10f4] ss:$8 sps:$4 sm:$0xff]  }
 0x215   : > { %4557 = vmatpush1.bf16.msra.mxu1 %v7909_v9  ;;  %4517 = vmatprep.subr.bf16.mxu0 %v7914_v55  ;;  %v7983_v9 = vld [vmem:[%s10575_s1 + $0x11f4] ss:$8 sps:$4 sm:$0xff]   ;;  %v4678_v55 = vshll.u32 %v10112_v47, 16 }
 0x216   : > { %4558 = vmatprep.subr.bf16.mxu1 %v7917_v60  ;;  %v4692_v60 = vshll.u32 %v10116_v49, 16 }
 0x218   : > { %4518 = vmatpush1.bf16.msra.mxu0 %v7912_v28  ;;  %v7978_v28 = vld [vmem:[%s10575_s1 + $0x10f0] ss:$8 sps:$4 sm:$0xff]  }
 0x219   : > { %4559 = vmatpush1.bf16.msra.mxu1 %v7915_v62  ;;  %4519 = vmatprep.subr.bf16.mxu0 %v7920_v63  ;;  %v7981_v62 = vld [vmem:[%s10575_s1 + $0x11f0] ss:$8 sps:$4 sm:$0xff]   ;;  %v7990_v63 = vld [vmem:[%s10575_s1 + $0x1204] ss:$8 sps:$4 sm:$0xff]  }
 0x21a   : > { %4560 = vmatprep.subr.bf16.mxu1 %v7923_v33  ;;  %v2619_v5 = vpop.f32.mrb[16].mxu0  ;;  %v7993_v33 = vld [vmem:[%s10575_s1 + $0x1304] ss:$8 sps:$4 sm:$0xff]  }
 0x21b   : > { %v2660_v8 = vpop.f32.mrb[16].mxu1  ;;  %v2621_v11 = vpop.f32.mrb[17].mxu0 }
 0x21c   : > { %v2661_v10 = vadd.f32 %v2660_v8, %v2619_v5  ;;  %v2662_v14 = vpop.f32.mrb[17].mxu1  ;;  %v2623_v16 = vpop.f32.mrb[18].mxu0  ;;  %4520 = vmatpush1.bf16.msra.mxu0 %v7918_v0  ;;  %v4676_v0 = vshrl.u32 %v10112_v47, 16  ;;  %v6754_v5 = vcombine.low %v9933_v40, %v9933_v40  ;;  %v6756_v8 = vcombine.low %v9938_v42, %v9938_v42 }
 0x21d   : > { %v2663_v15 = vadd.f32 %v2662_v14, %v2621_v11  ;;  %v2664_v17 = vpop.f32.mrb[18].mxu1  ;;  %4561 = vmatpush1.bf16.msra.mxu1 %v7921_v1  ;;  %v2624_v56 = vpop.f32.mrb[19].mxu0  ;;  %4521 = vmatprep.subr.bf16.mxu0 %v7926_v2  ;;  %v4680_v1 = vrot.slane %v4678_v55, 1  ;;  %v4690_v2 = vshrl.u32 %v10116_v49, 16  ;;  %v7991_v11 = vld [vmem:[%s10575_s1 + $0x1300] ss:$8 sps:$4 sm:$0xff]  }
 0x21e   : > { %v10009_v22 = vadd.f32 %v2661_v10, %v9797_v53  ;;  %v2665_v57 = vpop.f32.mrb[19].mxu1  ;;  %4562 = vmatprep.subr.bf16.mxu1 %v7929_v3  ;;  %v7930_v53 = vld [vmem:[%s10575_s1 + $0x1070] ss:$8 sps:$4 sm:$0xff]   ;;  %v4694_v3 = vrot.slane %v4692_v60, 1  ;;  %v7988_v10 = vld [vmem:[%s10575_s1 + $0x1200] ss:$8 sps:$4 sm:$0xff]  }
 0x21f   : > { %v10018_v6 = vadd.f32 %v2663_v15, %v9806_v61  ;;  %v7941_v61 = vld [vmem:[%s10575_s1 + $0x1184] ss:$8 sps:$4 sm:$0xff]   ;;  %v7996_v14 = vld [vmem:[%s10575_s1 + $0x1214] ss:$8 sps:$4 sm:$0xff]   ;;  %v4681_v16 = vor.u32 %v4680_v1, %v4676_v0  ;;  %v8036_v55 = vld [vmem:[%s10575_s1 + $0x1280] ss:$8 sps:$4 sm:$0xff]  }
 0x220   : > { %4522 = vmatpush1.bf16.msra.mxu0 %v7924_v19  ;;  %v7999_v15 = vld [vmem:[%s10575_s1 + $0x1314] ss:$8 sps:$4 sm:$0xff]   ;;  %v4695_v17 = vor.u32 %v4694_v3, %v4690_v2  ;;  %v7994_v19 = vld [vmem:[%s10575_s1 + $0x1210] ss:$8 sps:$4 sm:$0xff]   ;;  %v8002_v56 = vld [vmem:[%s10575_s1 + $0x1224] ss:$8 sps:$4 sm:$0xff]  }
 0x221   : > { %4563 = vmatpush1.bf16.msra.mxu1 %v7927_v21  ;;  %4523 = vmatprep.subr.bf16.mxu0 %v7932_v58  ;;  %v7997_v21 = vld [vmem:[%s10575_s1 + $0x1310] ss:$8 sps:$4 sm:$0xff]   ;;  %v8005_v57 = vld [vmem:[%s10575_s1 + $0x1324] ss:$8 sps:$4 sm:$0xff]   ;;  %v8000_v58 = vld [vmem:[%s10575_s1 + $0x1220] ss:$8 sps:$4 sm:$0xff]  }
 0x222   : > { %4564 = vmatprep.subr.bf16.mxu1 %v7935_v59  ;;  %v8003_v59 = vld [vmem:[%s10575_s1 + $0x1320] ss:$8 sps:$4 sm:$0xff]   ;;  %v8050_v0 = vld [vmem:[%s10575_s1 + $0x12a4] ss:$8 sps:$4 sm:$0xff]  }
 0x223   : > { %v8039_v60 = vld [vmem:[%s10575_s1 + $0x1380] ss:$8 sps:$4 sm:$0xff]   ;;  %v8053_v1 = vld [vmem:[%s10575_s1 + $0x13a4] ss:$8 sps:$4 sm:$0xff]  }
 0x224   : > { %4524 = vmatpush1.bf16.msra.mxu0 %v7930_v53  ;;  %v8008_v53 = vld [vmem:[%s10575_s1 + $0x1234] ss:$8 sps:$4 sm:$0xff]   ;;  %v8048_v2 = vld [vmem:[%s10575_s1 + $0x12a0] ss:$8 sps:$4 sm:$0xff]  }
 0x225   : > { %4565 = vmatpush1.bf16.msra.mxu1 %v7933_v7  ;;  %4525 = vmatprep.subr.bf16.mxu0 %v7938_v23  ;;  %v8011_v7 = vld [vmem:[%s10575_s1 + $0x1334] ss:$8 sps:$4 sm:$0xff]   ;;  %v8006_v23 = vld [vmem:[%s10575_s1 + $0x1230] ss:$8 sps:$4 sm:$0xff]   ;;  %v8051_v3 = vld [vmem:[%s10575_s1 + $0x13a0] ss:$8 sps:$4 sm:$0xff]  }
 0x226   : > { %4566 = vmatprep.subr.bf16.mxu1 %v7941_v61  ;;  %v8009_v61 = vld [vmem:[%s10575_s1 + $0x1330] ss:$8 sps:$4 sm:$0xff]  }
 0x228   : > { %4526 = vmatpush1.bf16.msra.mxu0 %v7936_v24  ;;  %v8014_v24 = vld [vmem:[%s10575_s1 + $0x1244] ss:$8 sps:$4 sm:$0xff]  }
 0x229   : > { %4567 = vmatpush1.bf16.msra.mxu1 %v7939_v25  ;;  %4527 = vmatprep.subr.bf16.mxu0 %v7944_v26  ;;  %v8017_v25 = vld [vmem:[%s10575_s1 + $0x1344] ss:$8 sps:$4 sm:$0xff]   ;;  %v8012_v26 = vld [vmem:[%s10575_s1 + $0x1240] ss:$8 sps:$4 sm:$0xff]  }
 0x22a   : > { %4568 = vmatprep.subr.bf16.mxu1 %v7947_v27  ;;  %v8015_v27 = vld [vmem:[%s10575_s1 + $0x1340] ss:$8 sps:$4 sm:$0xff]  }
 0x22c   : > { %4528 = vmatpush1.bf16.msra.mxu0 %v7942_v29  ;;  %v8020_v29 = vld [vmem:[%s10575_s1 + $0x1254] ss:$8 sps:$4 sm:$0xff]  }
 0x22d   : > { %4569 = vmatpush1.bf16.msra.mxu1 %v7945_v30  ;;  %4529 = vmatprep.subr.bf16.mxu0 %v7950_v31  ;;  %v8023_v30 = vld [vmem:[%s10575_s1 + $0x1354] ss:$8 sps:$4 sm:$0xff]   ;;  %v8018_v31 = vld [vmem:[%s10575_s1 + $0x1250] ss:$8 sps:$4 sm:$0xff]  }
 0x22e   : > { %4570 = vmatprep.subr.bf16.mxu1 %v7953_v32  ;;  %v8021_v32 = vld [vmem:[%s10575_s1 + $0x1350] ss:$8 sps:$4 sm:$0xff]  }
 0x230   : > { %4530 = vmatpush1.bf16.msra.mxu0 %v7948_v50  ;;  %v8026_v50 = vld [vmem:[%s10575_s1 + $0x1264] ss:$8 sps:$4 sm:$0xff]  }
 0x231   : > { %4571 = vmatpush1.bf16.msra.mxu1 %v7951_v34  ;;  %4531 = vmatprep.subr.bf16.mxu0 %v7956_v35  ;;  %v8029_v34 = vld [vmem:[%s10575_s1 + $0x1364] ss:$8 sps:$4 sm:$0xff]  }
 0x232   : > { %4572 = vmatprep.subr.bf16.mxu1 %v7959_v52 }
 0x234   : > { %4532 = vmatpush1.bf16.msra.mxu0 %v7954_v12 }
 0x235   : > { %4573 = vmatpush1.bf16.msra.mxu1 %v7957_v13  ;;  %4533 = vmatprep.subr.bf16.mxu0 %v7962_v18 }
 0x236   : > { %4574 = vmatprep.subr.bf16.mxu1 %v7965_v20 }
 0x238   : > { %4534 = vmatpush1.bf16.msra.mxu0 %v7960_v36 }
 0x239   : > { %4575 = vmatpush1.bf16.msra.mxu1 %v7963_v37  ;;  %4535 = vmatprep.subr.bf16.mxu0 %v7968_v38  ;;  %v8024_v38 = vld [vmem:[%s10575_s1 + $0x1260] ss:$8 sps:$4 sm:$0xff]  }
 0x23a   : > { %4576 = vmatprep.subr.bf16.mxu1 %v7971_v39  ;;  %v8027_v39 = vld [vmem:[%s10575_s1 + $0x1360] ss:$8 sps:$4 sm:$0xff]  }
 0x23c   : > { %4536 = vmatpush1.bf16.msra.mxu0 %v7966_v44 }
 0x23d   : > { %4577 = vmatpush1.bf16.msra.mxu1 %v7969_v45  ;;  %4537 = vmatprep.subr.bf16.mxu0 %v7974_v46 }
 0x23e   : > { %4578 = vmatprep.subr.bf16.mxu1 %v7977_v48  ;;  %v8032_v48 = vld [vmem:[%s10575_s1 + $0x1274] ss:$8 sps:$4 sm:$0xff]  }
 0x240   : > { %4538 = vmatpush1.bf16.msra.mxu0 %v7972_v51  ;;  %v8035_v51 = vld [vmem:[%s10575_s1 + $0x1374] ss:$8 sps:$4 sm:$0xff]  }
 0x241   : > { %4579 = vmatpush1.bf16.msra.mxu1 %v7975_v4  ;;  %4539 = vmatprep.subr.bf16.mxu0 %v7980_v54  ;;  %v8033_v54 = vld [vmem:[%s10575_s1 + $0x1370] ss:$8 sps:$4 sm:$0xff]  }
 0x242   : > { %4580 = vmatprep.subr.bf16.mxu1 %v7983_v9  ;;  %v8038_v9 = vld [vmem:[%s10575_s1 + $0x1284] ss:$8 sps:$4 sm:$0xff]  }
 0x244   : > { %4540 = vmatpush1.bf16.msra.mxu0 %v7978_v28  ;;  %v8044_v28 = vld [vmem:[%s10575_s1 + $0x1294] ss:$8 sps:$4 sm:$0xff]  }
 0x245   : > { %4581 = vmatpush1.bf16.msra.mxu1 %v7981_v62  ;;  %5020 = vmatprep.subr.bf16.mxu0 %v7990_v63  ;;  %v8047_v62 = vld [vmem:[%s10575_s1 + $0x1394] ss:$8 sps:$4 sm:$0xff]   ;;  %v8042_v63 = vld [vmem:[%s10575_s1 + $0x1290] ss:$8 sps:$4 sm:$0xff]  }
 0x246   : > { %5061 = vmatprep.subr.bf16.mxu1 %v7993_v33  ;;  %v8045_v33 = vld [vmem:[%s10575_s1 + $0x1390] ss:$8 sps:$4 sm:$0xff]  }
 0x247   : > { %4542 = vmatmul.mubr.bf16.vlgmr.msra.gmra.mrb[32].mxu0 %v6754_v5  ;;  %v8056_v5 = vld [vmem:[%s10575_s1 + $0x12b4] ss:$8 sps:$4 sm:$0xff]  }
 0x248   : > { %4583 = vmatmul.mubr.bf16.vlgmr.msra.gmra.mrb[32].mxu1 %v6756_v8  ;;  %5021 = vmatpush1.bf16.msra.mxu0 %v7988_v10  ;;  %v8059_v8 = vld [vmem:[%s10575_s1 + $0x13b4] ss:$8 sps:$4 sm:$0xff]   ;;  %v8054_v10 = vld [vmem:[%s10575_s1 + $0x12b0] ss:$8 sps:$4 sm:$0xff]  }
 0x249   : > { %5062 = vmatpush1.bf16.msra.mxu1 %v7991_v11  ;;  %5022 = vmatprep.subr.bf16.mxu0 %v7996_v14  ;;  %v8057_v11 = vld [vmem:[%s10575_s1 + $0x13b0] ss:$8 sps:$4 sm:$0xff]   ;;  %v8062_v14 = vld [vmem:[%s10575_s1 + $0x12c4] ss:$8 sps:$4 sm:$0xff]  }
 0x24a   : > { %5063 = vmatprep.subr.bf16.mxu1 %v7999_v15  ;;  %5052 = vmatprep.mubr.bf16.mxu0 %v4681_v16  ;;  %v8065_v15 = vld [vmem:[%s10575_s1 + $0x13c4] ss:$8 sps:$4 sm:$0xff]   ;;  %v8060_v16 = vld [vmem:[%s10575_s1 + $0x12c0] ss:$8 sps:$4 sm:$0xff]  }
 0x24b   : > { %5093 = vmatprep.mubr.bf16.mxu1 %v4695_v17  ;;  %v8063_v17 = vld [vmem:[%s10575_s1 + $0x13c0] ss:$8 sps:$4 sm:$0xff]  }
 0x24c   : > { %5023 = vmatpush1.bf16.msra.mxu0 %v7994_v19  ;;  %v8068_v19 = vld [vmem:[%s10575_s1 + $0x12d4] ss:$8 sps:$4 sm:$0xff]  }
 0x24d   : > { %5064 = vmatpush1.bf16.msra.mxu1 %v7997_v21  ;;  %5024 = vmatprep.subr.bf16.mxu0 %v8002_v56  ;;  %v8071_v21 = vld [vmem:[%s10575_s1 + $0x13d4] ss:$8 sps:$4 sm:$0xff]   ;;  %v10314_v56 = vcombine.low %v9933_v40, %v10093_v41  ;;  %v8074_v40 = vld [vmem:[%s10575_s1 + $0x12e4] ss:$8 sps:$4 sm:$0xff]  }
 0x24e   : > { %5065 = vmatprep.subr.bf16.mxu1 %v8005_v57  ;;  %v10318_v57 = vcombine.low %v9938_v42, %v10096_v43  ;;  %v8077_v42 = vld [vmem:[%s10575_s1 + $0x13e4] ss:$8 sps:$4 sm:$0xff]  }
 0x24f   : > { %v4671_v41 = vshll.u32 %v10314_v56, 16 }
 0x250   : > { %5025 = vmatpush1.bf16.msra.mxu0 %v8000_v58  ;;  %v8066_v58 = vld [vmem:[%s10575_s1 + $0x12d0] ss:$8 sps:$4 sm:$0xff]   ;;  %v4685_v43 = vshll.u32 %v10318_v57, 16 }
 0x251   : > { %5066 = vmatpush1.bf16.msra.mxu1 %v8003_v59  ;;  %5026 = vmatprep.subr.bf16.mxu0 %v8008_v53  ;;  %v8069_v59 = vld [vmem:[%s10575_s1 + $0x13d0] ss:$8 sps:$4 sm:$0xff]   ;;  %v8072_v53 = vld [vmem:[%s10575_s1 + $0x12e0] ss:$8 sps:$4 sm:$0xff]  }
 0x252   : > { %5067 = vmatprep.subr.bf16.mxu1 %v8011_v7  ;;  %v8075_v7 = vld [vmem:[%s10575_s1 + $0x13e0] ss:$8 sps:$4 sm:$0xff]  }
 0x254   : > { %5027 = vmatpush1.bf16.msra.mxu0 %v8006_v23  ;;  %v8080_v23 = vld [vmem:[%s10575_s1 + $0x12f4] ss:$8 sps:$4 sm:$0xff]  }
 0x255   : > { %5068 = vmatpush1.bf16.msra.mxu1 %v8009_v61  ;;  %5028 = vmatprep.subr.bf16.mxu0 %v8014_v24  ;;  %v8083_v61 = vld [vmem:[%s10575_s1 + $0x13f4] ss:$8 sps:$4 sm:$0xff]   ;;  %v4669_v24 = vshrl.u32 %v10314_v56, 16 }
 0x256   : > { %5069 = vmatprep.subr.bf16.mxu1 %v8017_v25  ;;  %v4673_v25 = vrot.slane %v4671_v41, 1  ;;  %v8136_v41 = vld [vmem:[%s10575_s1 + $0x1480] ss:$8 sps:$4 sm:$0xff]  }
 0x258   : > { %5029 = vmatpush1.bf16.msra.mxu0 %v8012_v26  ;;  %v4683_v26 = vshrl.u32 %v10318_v57, 16 }
 0x259   : > { %5070 = vmatpush1.bf16.msra.mxu1 %v8015_v27  ;;  %5030 = vmatprep.subr.bf16.mxu0 %v8020_v29  ;;  %v4687_v27 = vrot.slane %v4685_v43, 1  ;;  %v8078_v29 = vld [vmem:[%s10575_s1 + $0x12f0] ss:$8 sps:$4 sm:$0xff]   ;;  %v8139_v43 = vld [vmem:[%s10575_s1 + $0x1580] ss:$8 sps:$4 sm:$0xff]  }
 0x25a   : > { %5071 = vmatprep.subr.bf16.mxu1 %v8023_v30  ;;  %v3104_v35 = vpop.f32.mrb[20].mxu0  ;;  %v8081_v30 = vld [vmem:[%s10575_s1 + $0x13f0] ss:$8 sps:$4 sm:$0xff]  }
 0x25b   : > { %v3145_v52 = vpop.f32.mrb[20].mxu1  ;;  %v3106_v13 = vpop.f32.mrb[21].mxu0 }
 0x25c   : > { %v3146_v12 = vadd.f32 %v3145_v52, %v3104_v35  ;;  %v3147_v18 = vpop.f32.mrb[21].mxu1  ;;  %v3108_v36 = vpop.f32.mrb[22].mxu0  ;;  %5031 = vmatpush1.bf16.msra.mxu0 %v8018_v31  ;;  %v8090_v31 = vld [vmem:[%s10575_s1 + $0x1404] ss:$8 sps:$4 sm:$0xff]   ;;  %v8088_v35 = vld [vmem:[%s10575_s1 + $0x1400] ss:$8 sps:$4 sm:$0xff]  }
 0x25d   : > { %v3148_v20 = vadd.f32 %v3147_v18, %v3106_v13  ;;  %v3149_v37 = vpop.f32.mrb[22].mxu1  ;;  %5072 = vmatpush1.bf16.msra.mxu1 %v8021_v32  ;;  %v3109_v45 = vpop.f32.mrb[23].mxu0  ;;  %5032 = vmatprep.subr.bf16.mxu0 %v8026_v50  ;;  %v8093_v32 = vld [vmem:[%s10575_s1 + $0x1504] ss:$8 sps:$4 sm:$0xff]   ;;  %v4674_v50 = vor.u32 %v4673_v25, %v4669_v24  ;;  %v8091_v52 = vld [vmem:[%s10575_s1 + $0x1500] ss:$8 sps:$4 sm:$0xff]  }
 0x25e   : > { %v10229_v44 = vadd.f32 %v3146_v12, %v10009_v22  ;;  %v3150_v46 = vpop.f32.mrb[23].mxu1  ;;  %5073 = vmatprep.subr.bf16.mxu1 %v8029_v34  ;;  %v8030_v22 = vld [vmem:[%s10575_s1 + $0x1270] ss:$8 sps:$4 sm:$0xff]   ;;  %v4688_v34 = vor.u32 %v4687_v27, %v4683_v26  ;;  %v8096_v12 = vld [vmem:[%s10575_s1 + $0x1414] ss:$8 sps:$4 sm:$0xff]   ;;  %v5170_v18 = vrot.slane %v10112_v47, 1 }
 0x25f   : > { %v10238_v4 = vadd.f32 %v3148_v20, %v10018_v6  ;;  %v8041_v6 = vld [vmem:[%s10575_s1 + $0x1384] ss:$8 sps:$4 sm:$0xff]   ;;  %v8099_v13 = vld [vmem:[%s10575_s1 + $0x1514] ss:$8 sps:$4 sm:$0xff]   ;;  %v5172_v20 = vrot.slane %v10116_v49, 1 }
 0x260   : > { %5033 = vmatpush1.bf16.msra.mxu0 %v8024_v38  ;;  %v8094_v36 = vld [vmem:[%s10575_s1 + $0x1410] ss:$8 sps:$4 sm:$0xff]   ;;  %v8102_v47 = vld [vmem:[%s10575_s1 + $0x1424] ss:$8 sps:$4 sm:$0xff]   ;;  %v8100_v38 = vld [vmem:[%s10575_s1 + $0x1420] ss:$8 sps:$4 sm:$0xff]  }
 0x261   : > { %5074 = vmatpush1.bf16.msra.mxu1 %v8027_v39  ;;  %5034 = vmatprep.subr.bf16.mxu0 %v8032_v48  ;;  %v8097_v37 = vld [vmem:[%s10575_s1 + $0x1510] ss:$8 sps:$4 sm:$0xff]   ;;  %v8105_v49 = vld [vmem:[%s10575_s1 + $0x1524] ss:$8 sps:$4 sm:$0xff]   ;;  %v8103_v39 = vld [vmem:[%s10575_s1 + $0x1520] ss:$8 sps:$4 sm:$0xff]  }
 0x262   : > { %5075 = vmatprep.subr.bf16.mxu1 %v8035_v51  ;;  %v8108_v45 = vld [vmem:[%s10575_s1 + $0x1434] ss:$8 sps:$4 sm:$0xff]   ;;  %v8106_v48 = vld [vmem:[%s10575_s1 + $0x1430] ss:$8 sps:$4 sm:$0xff]   ;;  %v8150_v24 = vld [vmem:[%s10575_s1 + $0x14a4] ss:$8 sps:$4 sm:$0xff]  }
 0x263   : > { %v8111_v46 = vld [vmem:[%s10575_s1 + $0x1534] ss:$8 sps:$4 sm:$0xff]   ;;  %v8109_v51 = vld [vmem:[%s10575_s1 + $0x1530] ss:$8 sps:$4 sm:$0xff]   ;;  %v8153_v25 = vld [vmem:[%s10575_s1 + $0x15a4] ss:$8 sps:$4 sm:$0xff]  }
 0x264   : > { %5035 = vmatpush1.bf16.msra.mxu0 %v8030_v22  ;;  %v8114_v22 = vld [vmem:[%s10575_s1 + $0x1444] ss:$8 sps:$4 sm:$0xff]   ;;  %v8148_v26 = vld [vmem:[%s10575_s1 + $0x14a0] ss:$8 sps:$4 sm:$0xff]  }
 0x265   : > { %5076 = vmatpush1.bf16.msra.mxu1 %v8033_v54  ;;  %5036 = vmatprep.subr.bf16.mxu0 %v8038_v9  ;;  %v8117_v54 = vld [vmem:[%s10575_s1 + $0x1544] ss:$8 sps:$4 sm:$0xff]   ;;  %v8112_v9 = vld [vmem:[%s10575_s1 + $0x1440] ss:$8 sps:$4 sm:$0xff]  }
 0x266   : > { %5077 = vmatprep.subr.bf16.mxu1 %v8041_v6  ;;  %v8115_v6 = vld [vmem:[%s10575_s1 + $0x1540] ss:$8 sps:$4 sm:$0xff]  }
 0x267   : > { %v8151_v27 = vld [vmem:[%s10575_s1 + $0x15a0] ss:$8 sps:$4 sm:$0xff]  }
 0x268   : > { %5037 = vmatpush1.bf16.msra.mxu0 %v8036_v55  ;;  %v8120_v55 = vld [vmem:[%s10575_s1 + $0x1454] ss:$8 sps:$4 sm:$0xff]  }
 0x269   : > { %5078 = vmatpush1.bf16.msra.mxu1 %v8039_v60  ;;  %5038 = vmatprep.subr.bf16.mxu0 %v8044_v28  ;;  %v8123_v60 = vld [vmem:[%s10575_s1 + $0x1554] ss:$8 sps:$4 sm:$0xff]   ;;  %v8118_v28 = vld [vmem:[%s10575_s1 + $0x1450] ss:$8 sps:$4 sm:$0xff]  }
 0x26a   : > { %5079 = vmatprep.subr.bf16.mxu1 %v8047_v62  ;;  %v8121_v62 = vld [vmem:[%s10575_s1 + $0x1550] ss:$8 sps:$4 sm:$0xff]  }
 0x26c   : > { %5039 = vmatpush1.bf16.msra.mxu0 %v8042_v63  ;;  %v8126_v63 = vld [vmem:[%s10575_s1 + $0x1464] ss:$8 sps:$4 sm:$0xff]  }
 0x26d   : > { %5080 = vmatpush1.bf16.msra.mxu1 %v8045_v33  ;;  %5040 = vmatprep.subr.bf16.mxu0 %v8050_v0  ;;  %v8129_v33 = vld [vmem:[%s10575_s1 + $0x1564] ss:$8 sps:$4 sm:$0xff]  }
 0x26e   : > { %5081 = vmatprep.subr.bf16.mxu1 %v8053_v1 }
 0x270   : > { %5041 = vmatpush1.bf16.msra.mxu0 %v8048_v2 }
 0x271   : > { %5082 = vmatpush1.bf16.msra.mxu1 %v8051_v3  ;;  %5042 = vmatprep.subr.bf16.mxu0 %v8056_v5 }
 0x272   : > { %5083 = vmatprep.subr.bf16.mxu1 %v8059_v8 }
 0x274   : > { %5043 = vmatpush1.bf16.msra.mxu0 %v8054_v10 }
 0x275   : > { %5084 = vmatpush1.bf16.msra.mxu1 %v8057_v11  ;;  %5044 = vmatprep.subr.bf16.mxu0 %v8062_v14  ;;  %v8124_v14 = vld [vmem:[%s10575_s1 + $0x1460] ss:$8 sps:$4 sm:$0xff]  }
 0x276   : > { %5085 = vmatprep.subr.bf16.mxu1 %v8065_v15  ;;  %v8127_v15 = vld [vmem:[%s10575_s1 + $0x1560] ss:$8 sps:$4 sm:$0xff]  }
 0x278   : > { %5045 = vmatpush1.bf16.msra.mxu0 %v8060_v16 }
 0x279   : > { %5086 = vmatpush1.bf16.msra.mxu1 %v8063_v17  ;;  %5046 = vmatprep.subr.bf16.mxu0 %v8068_v19 }
 0x27a   : > { %5087 = vmatprep.subr.bf16.mxu1 %v8071_v21  ;;  %v8132_v21 = vld [vmem:[%s10575_s1 + $0x1474] ss:$8 sps:$4 sm:$0xff]  }
 0x27c   : > { %5047 = vmatpush1.bf16.msra.mxu0 %v8066_v58  ;;  %v8135_v58 = vld [vmem:[%s10575_s1 + $0x1574] ss:$8 sps:$4 sm:$0xff]  }
 0x27d   : > { %5088 = vmatpush1.bf16.msra.mxu1 %v8069_v59  ;;  %5048 = vmatprep.subr.bf16.mxu0 %v8074_v40  ;;  %v8133_v40 = vld [vmem:[%s10575_s1 + $0x1570] ss:$8 sps:$4 sm:$0xff]  }
 0x27e   : > { %5089 = vmatprep.subr.bf16.mxu1 %v8077_v42  ;;  %v8138_v42 = vld [vmem:[%s10575_s1 + $0x1484] ss:$8 sps:$4 sm:$0xff]  }
 0x280   : > { %5049 = vmatpush1.bf16.msra.mxu0 %v8072_v53  ;;  %v8144_v53 = vld [vmem:[%s10575_s1 + $0x1494] ss:$8 sps:$4 sm:$0xff]  }
 0x281   : > { %5090 = vmatpush1.bf16.msra.mxu1 %v8075_v7  ;;  %5050 = vmatprep.subr.bf16.mxu0 %v8080_v23  ;;  %v8147_v7 = vld [vmem:[%s10575_s1 + $0x1594] ss:$8 sps:$4 sm:$0xff]   ;;  %v8142_v23 = vld [vmem:[%s10575_s1 + $0x1490] ss:$8 sps:$4 sm:$0xff]  }
 0x282   : > { %5091 = vmatprep.subr.bf16.mxu1 %v8083_v61  ;;  %v8145_v61 = vld [vmem:[%s10575_s1 + $0x1590] ss:$8 sps:$4 sm:$0xff]  }
 0x284   : > { %5051 = vmatpush1.bf16.msra.mxu0 %v8078_v29  ;;  %v8156_v29 = vld [vmem:[%s10575_s1 + $0x14b4] ss:$8 sps:$4 sm:$0xff]  }
 0x285   : > { %5092 = vmatpush1.bf16.msra.mxu1 %v8081_v30  ;;  %5497 = vmatprep.subr.bf16.mxu0 %v8090_v31  ;;  %v8159_v30 = vld [vmem:[%s10575_s1 + $0x15b4] ss:$8 sps:$4 sm:$0xff]   ;;  %v8154_v31 = vld [vmem:[%s10575_s1 + $0x14b0] ss:$8 sps:$4 sm:$0xff]  }
 0x286   : > { %5538 = vmatprep.subr.bf16.mxu1 %v8093_v32  ;;  %v8157_v32 = vld [vmem:[%s10575_s1 + $0x15b0] ss:$8 sps:$4 sm:$0xff]  }
 0x287   : > { %5053 = vmatmul.mubr.bf16.vlgmr.msra.gmra.mrb[36].mxu0 %v4674_v50  ;;  %v8162_v50 = vld [vmem:[%s10575_s1 + $0x14c4] ss:$8 sps:$4 sm:$0xff]  }
 0x288   : > { %5094 = vmatmul.mubr.bf16.vlgmr.msra.gmra.mrb[36].mxu1 %v4688_v34  ;;  %5498 = vmatpush1.bf16.msra.mxu0 %v8088_v35  ;;  %v8165_v34 = vld [vmem:[%s10575_s1 + $0x15c4] ss:$8 sps:$4 sm:$0xff]   ;;  %v8160_v35 = vld [vmem:[%s10575_s1 + $0x14c0] ss:$8 sps:$4 sm:$0xff]  }
 0x289   : > { %5539 = vmatpush1.bf16.msra.mxu1 %v8091_v52  ;;  %5499 = vmatprep.subr.bf16.mxu0 %v8096_v12  ;;  %v8163_v52 = vld [vmem:[%s10575_s1 + $0x15c0] ss:$8 sps:$4 sm:$0xff]   ;;  %v8168_v12 = vld [vmem:[%s10575_s1 + $0x14d4] ss:$8 sps:$4 sm:$0xff]  }
 0x28a   : > { %5540 = vmatprep.subr.bf16.mxu1 %v8099_v13  ;;  %5529 = vmatprep.mubr.bf16.mxu0 %v5170_v18  ;;  %v8171_v13 = vld [vmem:[%s10575_s1 + $0x15d4] ss:$8 sps:$4 sm:$0xff]   ;;  %v8166_v18 = vld [vmem:[%s10575_s1 + $0x14d0] ss:$8 sps:$4 sm:$0xff]  }
 0x28b   : > { %5570 = vmatprep.mubr.bf16.mxu1 %v5172_v20  ;;  %v8169_v20 = vld [vmem:[%s10575_s1 + $0x15d0] ss:$8 sps:$4 sm:$0xff]  }
 0x28c   : > { %5500 = vmatpush1.bf16.msra.mxu0 %v8094_v36  ;;  %v8174_v36 = vld [vmem:[%s10575_s1 + $0x14e4] ss:$8 sps:$4 sm:$0xff]  }
 0x28d   : > { %5541 = vmatpush1.bf16.msra.mxu1 %v8097_v37  ;;  %5501 = vmatprep.subr.bf16.mxu0 %v8102_v47  ;;  %v8177_v37 = vld [vmem:[%s10575_s1 + $0x15e4] ss:$8 sps:$4 sm:$0xff]   ;;  %v8172_v47 = vld [vmem:[%s10575_s1 + $0x14e0] ss:$8 sps:$4 sm:$0xff]  }
 0x28e   : > { %5542 = vmatprep.subr.bf16.mxu1 %v8105_v49  ;;  %v8175_v49 = vld [vmem:[%s10575_s1 + $0x15e0] ss:$8 sps:$4 sm:$0xff]  }
 0x290   : > { %5502 = vmatpush1.bf16.msra.mxu0 %v8100_v38  ;;  %v8180_v38 = vld [vmem:[%s10575_s1 + $0x14f4] ss:$8 sps:$4 sm:$0xff]  }
 0x291   : > { %5543 = vmatpush1.bf16.msra.mxu1 %v8103_v39  ;;  %5503 = vmatprep.subr.bf16.mxu0 %v8108_v45  ;;  %v8183_v39 = vld [vmem:[%s10575_s1 + $0x15f4] ss:$8 sps:$4 sm:$0xff]   ;;  %v8178_v45 = vld [vmem:[%s10575_s1 + $0x14f0] ss:$8 sps:$4 sm:$0xff]  }
 0x292   : > { %5544 = vmatprep.subr.bf16.mxu1 %v8111_v46  ;;  %v8181_v46 = vld [vmem:[%s10575_s1 + $0x15f0] ss:$8 sps:$4 sm:$0xff]  }
 0x294   : > { %5504 = vmatpush1.bf16.msra.mxu0 %v8106_v48  ;;  %v5169_v48 = vrot.slane %v10314_v56, 1 }
 0x295   : > { %5545 = vmatpush1.bf16.msra.mxu1 %v8109_v51  ;;  %5505 = vmatprep.subr.bf16.mxu0 %v8114_v22  ;;  %v5171_v51 = vrot.slane %v10318_v57, 1 }
 0x296   : > { %5546 = vmatprep.subr.bf16.mxu1 %v8117_v54 }
 0x298   : > { %5506 = vmatpush1.bf16.msra.mxu0 %v8112_v9 }
 0x299   : > { %5547 = vmatpush1.bf16.msra.mxu1 %v8115_v6  ;;  %5507 = vmatprep.subr.bf16.mxu0 %v8120_v55 }
 0x29a   : > { %5548 = vmatprep.subr.bf16.mxu1 %v8123_v60  ;;  %v3581_v0 = vpop.f32.mrb[24].mxu0 }
 0x29b   : > { %v3622_v1 = vpop.f32.mrb[24].mxu1  ;;  %v3583_v3 = vpop.f32.mrb[25].mxu0 }
 0x29c   : > { %v3623_v2 = vadd.f32 %v3622_v1, %v3581_v0  ;;  %v3624_v5 = vpop.f32.mrb[25].mxu1  ;;  %v3585_v10 = vpop.f32.mrb[26].mxu0  ;;  %5508 = vmatpush1.bf16.msra.mxu0 %v8118_v28 }
 0x29d   : > { %v3625_v8 = vadd.f32 %v3624_v5, %v3583_v3  ;;  %v3626_v11 = vpop.f32.mrb[26].mxu1  ;;  %5549 = vmatpush1.bf16.msra.mxu1 %v8121_v62  ;;  %v3586_v17 = vpop.f32.mrb[27].mxu0  ;;  %5509 = vmatprep.subr.bf16.mxu0 %v8126_v63 }
 0x29e   : > { %v10441_v16 = vadd.f32 %v3623_v2, %v10229_v44  ;;  %v3627_v19 = vpop.f32.mrb[27].mxu1  ;;  %5550 = vmatprep.subr.bf16.mxu1 %v8129_v33  ;;  %v8130_v44 = vld [vmem:[%s10575_s1 + $0x1470] ss:$8 sps:$4 sm:$0xff]  }
 0x29f   : > { %v10450_v59 = vadd.f32 %v3625_v8, %v10238_v4  ;;  %v8141_v4 = vld [vmem:[%s10575_s1 + $0x1584] ss:$8 sps:$4 sm:$0xff]  }
 0x2a0   : > { %5510 = vmatpush1.bf16.msra.mxu0 %v8124_v14 }
 0x2a1   : > { %5551 = vmatpush1.bf16.msra.mxu1 %v8127_v15  ;;  %5511 = vmatprep.subr.bf16.mxu0 %v8132_v21 }
 0x2a2   : > { %5552 = vmatprep.subr.bf16.mxu1 %v8135_v58 }
 0x2a4   : > { %5512 = vmatpush1.bf16.msra.mxu0 %v8130_v44 }
 0x2a5   : > { %5553 = vmatpush1.bf16.msra.mxu1 %v8133_v40  ;;  %5513 = vmatprep.subr.bf16.mxu0 %v8138_v42 }
 0x2a6   : > { %5554 = vmatprep.subr.bf16.mxu1 %v8141_v4 }
 0x2a8   : > { %5514 = vmatpush1.bf16.msra.mxu0 %v8136_v41 }
 0x2a9   : > { %5555 = vmatpush1.bf16.msra.mxu1 %v8139_v43  ;;  %5515 = vmatprep.subr.bf16.mxu0 %v8144_v53 }
 0x2aa   : > { %5556 = vmatprep.subr.bf16.mxu1 %v8147_v7 }
 0x2ac   : > { %5516 = vmatpush1.bf16.msra.mxu0 %v8142_v23  ;;  %v5583_v23 = vlaneseq }
 0x2ad   : > { %5557 = vmatpush1.bf16.msra.mxu1 %v8145_v61  ;;  %5517 = vmatprep.subr.bf16.mxu0 %v8150_v24 }
 0x2ae   : > { %5558 = vmatprep.subr.bf16.mxu1 %v8153_v25  ;;  %v5584_v61 = vshrl.u32 %v5583_v23, 7  ;;  %v5581_v25 = vld [vmem:[%s10576_s2] sm:$0x3] }
 0x2b0   : > { %5518 = vmatpush1.bf16.msra.mxu0 %v8148_v26  ;;  %v5585_v24 = vsub.s32 0, %v5584_v61  ;;  %v5589_v26 = vsub.s32 1, %v5584_v61 }
 0x2b1   : > { %5559 = vmatpush1.bf16.msra.mxu1 %v8151_v27  ;;  %5519 = vmatprep.subr.bf16.mxu0 %v8156_v29 }
 0x2b2   : > { %5560 = vmatprep.subr.bf16.mxu1 %v8159_v30 }
 0x2b4   : > { %5520 = vmatpush1.bf16.msra.mxu0 %v8154_v31  ;;  %v5586_v31 = vrot.slane %v5581_v25, %v5585_v24 }
 0x2b5   : > { %5561 = vmatpush1.bf16.msra.mxu1 %v8157_v32  ;;  %5521 = vmatprep.subr.bf16.mxu0 %v8162_v50 }
 0x2b6   : > { %5562 = vmatprep.subr.bf16.mxu1 %v8165_v34 }
 0x2b8   : > { %5522 = vmatpush1.bf16.msra.mxu0 %v8160_v35  ;;  %v5590_v35 = vrot.slane %v5581_v25, %v5589_v26 }
 0x2b9   : > { %5563 = vmatpush1.bf16.msra.mxu1 %v8163_v52  ;;  %5523 = vmatprep.subr.bf16.mxu0 %v8168_v12 }
 0x2ba   : > { %5564 = vmatprep.subr.bf16.mxu1 %v8171_v13 }
 0x2bc   : > { %5524 = vmatpush1.bf16.msra.mxu0 %v8166_v18 }
 0x2bd   : > { %5565 = vmatpush1.bf16.msra.mxu1 %v8169_v20  ;;  %5525 = vmatprep.subr.bf16.mxu0 %v8174_v36 }
 0x2be   : > { %5566 = vmatprep.subr.bf16.mxu1 %v8177_v37 }
 0x2c0   : > { %5526 = vmatpush1.bf16.msra.mxu0 %v8172_v47 }
 0x2c1   : > { %5567 = vmatpush1.bf16.msra.mxu1 %v8175_v49  ;;  %5527 = vmatprep.subr.bf16.mxu0 %v8180_v38 }
 0x2c2   : > { %5568 = vmatprep.subr.bf16.mxu1 %v8183_v39 }
 0x2c4   : > { %5528 = vmatpush1.bf16.msra.mxu0 %v8178_v45 }
 0x2c5   : > { %5569 = vmatpush1.bf16.msra.mxu1 %v8181_v46 }
 0x2c7   : > { %5530 = vmatmul.mubr.bf16.vlgmr.msra.gmra.mrb[40].mxu0 %v5169_v48 }
 0x2c8   : > { %5571 = vmatmul.mubr.bf16.vlgmr.msra.gmra.mrb[40].mxu1 %v5171_v51 }
 0x2da   : > { %v4066_v22 = vpop.f32.mrb[28].mxu0 }
 0x2db   : > { %v4107_v54 = vpop.f32.mrb[28].mxu1  ;;  %v4068_v6 = vpop.f32.mrb[29].mxu0 }
 0x2dc   : > { %v4108_v9 = vadd.f32 %v4107_v54, %v4066_v22  ;;  %v4109_v55 = vpop.f32.mrb[29].mxu1  ;;  %v4070_v28 = vpop.f32.mrb[30].mxu0 }
 0x2dd   : > { %v4110_v60 = vadd.f32 %v4109_v55, %v4068_v6  ;;  %v4111_v62 = vpop.f32.mrb[30].mxu1  ;;  %v4071_v33 = vpop.f32.mrb[31].mxu0 }
 0x2de   : > { %v4114_v63 = vadd.f32 %v4108_v9, %v10441_v16  ;;  %v4112_v0 = vpop.f32.mrb[31].mxu1 }
 0x2df   : > { %v4115_v56 = vadd.f32 %v4110_v60, %v10450_v59 }
 0x31a   : > { %v4543_v1 = vpop.f32.mrb[32].mxu0 }
 0x31b   : > { %v4584_v57 = vpop.f32.mrb[32].mxu1  ;;  %v4545_v3 = vpop.f32.mrb[33].mxu0 }
 0x31c   : > { %v4585_v2 = vadd.f32 %v4584_v57, %v4543_v1  ;;  %v4586_v5 = vpop.f32.mrb[33].mxu1  ;;  %v4547_v10 = vpop.f32.mrb[34].mxu0 }
 0x31d   : > { %v4587_v8 = vadd.f32 %v4586_v5, %v4545_v3  ;;  %v4588_v11 = vpop.f32.mrb[34].mxu1  ;;  %v4548_v15 = vpop.f32.mrb[35].mxu0 }
 0x31e   : > { %v4591_v14 = vadd.f32 %v4585_v2, %v4114_v63  ;;  %v4589_v17 = vpop.f32.mrb[35].mxu1 }
 0x31f   : > { %v4592_v19 = vadd.f32 %v4587_v8, %v4115_v56 }
 0x35a   : > { %v5054_v21 = vpop.f32.mrb[36].mxu0 }
 0x35b   : > { %v5095_v58 = vpop.f32.mrb[36].mxu1  ;;  %v5056_v16 = vpop.f32.mrb[37].mxu0 }
 0x35c   : > { %v5096_v44 = vadd.f32 %v5095_v58, %v5054_v21  ;;  %v5097_v40 = vpop.f32.mrb[37].mxu1  ;;  %v5058_v4 = vpop.f32.mrb[38].mxu0 }
 0x35d   : > { %v5098_v42 = vadd.f32 %v5097_v40, %v5056_v16  ;;  %v5099_v59 = vpop.f32.mrb[38].mxu1  ;;  %v5059_v43 = vpop.f32.mrb[39].mxu0 }
 0x35e   : > { %v5102_v41 = vadd.f32 %v5096_v44, %v4591_v14  ;;  %v5100_v53 = vpop.f32.mrb[39].mxu1 }
 0x35f   : > { %v5103_v7 = vadd.f32 %v5098_v42, %v4592_v19 }
 0x39a   : > { %v5531_v27 = vpop.f32.mrb[40].mxu0 }
 0x39b   : > { %v5572_v29 = vpop.f32.mrb[40].mxu1  ;;  %v5533_v32 = vpop.f32.mrb[41].mxu0 }
 0x39c   : > { %v5573_v30 = vadd.f32 %v5572_v29, %v5531_v27  ;;  %v5574_v50 = vpop.f32.mrb[41].mxu1  ;;  %v5535_v52 = vpop.f32.mrb[42].mxu0 }
 0x39d   : > { %v5575_v34 = vadd.f32 %v5574_v50, %v5533_v32  ;;  %v5576_v12 = vpop.f32.mrb[42].mxu1  ;;  %v5536_v18 = vpop.f32.mrb[43].mxu0 }
 0x39e   : > { %v5579_v13 = vadd.f32 %v5573_v30, %v5102_v41  ;;  %v5577_v20 = vpop.f32.mrb[43].mxu1 }
 0x39f   : > { %v5580_v36 = vadd.f32 %v5575_v34, %v5103_v7 }
 0x3a0   : > { %v5593_v37 = vadd.f32 %v5586_v31, %v5579_v13 }
 0x3a1   : > { %v5594_v47 = vadd.f32 %v5590_v35, %v5580_v36 }
 0x3a3   : > { %v7086_v49 = vpack.c.bf16 %v5594_v47, %v5593_v37 }
 0x3a5   : > { %5603 = vst [vmem:[%s233_s4] sm:$0xff] %v7086_v49 }
 0x3a6 PF: > { %s13_s14 = sadd.s32 1, %s8208_s14   ;;  %s10578_s12 = smov %s8204_s13 }
 0x3a7   : > { %p10_p5 = scmp.ge.s32.totalorder %s13_s14, 4   ;;  %s10579_s13 = smov %s10581_s15 }
 0x3a9   :  { %12 = sbr.rel (!%p10_p5) target bundleno = 2 (0x2), region = 78 }

</bundles_post_ra>
